<compile_context>
chip_gen: v5e
topology: v5e:2x2
jax: 0.10.0
libtpu: 0.0.40
codegen_flags: <defaults>
</compile_context>

<pallas_src>
from functools import partial

import jax
import jax.numpy as jnp
import numpy as np
from jax import lax
from jax.experimental import pallas as pl
from jax.experimental.pallas import tpu as pltpu

C_PAD = 128                                    # padded channel count
_BRANCHES = ("ctr", "offset", "size")          # fused channel-block order
_TAPS = tuple((dy, dx) for dy in (-1, 0, 1) for dx in (-1, 0, 1))
_CENTER_TAP = 4                                # index of (0, 0) in _TAPS


# -----------------------------------------------------------------------------
# Fused Pallas kernel
# -----------------------------------------------------------------------------
def _ostrack_head_kernel(x_ref,
                         w1_ref, b1_ref, w2_ref, b2_ref,
                         w3_ref, b3_ref, w4_ref, b4_ref,
                         w5t_ref, b5t_ref,
                         masks_ref, ref_ref,
                         out_ref, *, tap_offsets):
    """Fully fused OSTrack conv head (single invocation, everything in VMEM).

    x_ref     : (C_PAD, M)        transposed, channel-padded input features
    wk_ref    : (9, C_PAD, C_PAD) per-tap transposed conv weights, BN folded,
                                  three branches fused along the channel axis
    bk_ref    : (C_PAD, 1)        fused conv bias + BN shift
    w5t_ref   : (8, C_PAD)        fused transposed 1x1 heads
                                  rows = [score, off_x, off_y, size_w, size_h, 0,0,0]
    b5t_ref   : (8, 1)
    masks_ref : (9, M)            per-tap border-validity masks (f32 0/1)
    ref_ref   : (2, M)            anchor-free reference points (cx row, cy row)
    out_ref   : (8, M)            rows = [score, x1, y1, x2, y2, 0, 0, 0]
    """
    C, M = x_ref.shape
    h = x_ref[...]                                              # (C_PAD, M)

    # Hoisted loop-invariants: one (1, M) border-mask row per tap.
    mask_rows = [masks_ref[t:t + 1, :] for t in range(9)]

    # Four conv3x3 + BN + ReLU stages (branch-fused along the channel axis).
    for w_ref, b_ref in ((w1_ref, b1_ref), (w2_ref, b2_ref),
                         (w3_ref, b3_ref), (w4_ref, b4_ref)):
        # Centre tap: no shift, no mask -> initializes the f32 accumulator.
        acc = jnp.dot(w_ref[_CENTER_TAP], h,
                      preferred_element_type=jnp.float32)       # (C_PAD, M)
        for t, off in enumerate(tap_offsets):
            if t == _CENTER_TAP:
                continue
            # out[:, m] needs in[:, m + off]; jnp.roll/pltpu.roll semantics:
            # roll(x, s)[m] = x[(m - s) % M]  ->  s = (-off) % M.
            shifted = h if off == 0 else pltpu.roll(h, (-off) % M, 1)
            acc = acc + jnp.dot(w_ref[t], shifted * mask_rows[t],
                                preferred_element_type=jnp.float32)
        h = jnp.maximum(acc + b_ref[...], 0.0)                  # bias + ReLU

    # Fused 1x1 heads (score | offset | size) + bbox epilogue (kept in f32).
    head = jnp.dot(w5t_ref[...], h,
                   preferred_element_type=jnp.float32) + b5t_ref[...]  # (8, M)
    score = head[0:1, :]
    sz = 1.0 / (1.0 + jnp.exp(-head[3:5, :]))                   # sigmoid (EUP)
    ctr = ref_ref[...] + head[1:3, :]                           # (cx, cy)
    out_ref[...] = jnp.concatenate(
        [score, ctr - 0.5 * sz, ctr + 0.5 * sz,
         jnp.zeros((3, M), jnp.float32)], axis=0)               # lane-dense slab


# -----------------------------------------------------------------------------
# Wrapper: single pallas_call (no grid -- everything is VMEM resident)
# -----------------------------------------------------------------------------
@partial(jax.jit, static_argnums=(2,))
def ostrack_conv_head_forward(x, fused, map_size):
    """x: (B, H*W, Cin) -> {'score_map': (B, H, W), 'boxes': (B, H, W, 4)}."""
    stage_w, stage_b, w5t, b5t, ref_hw_t = fused
    B, hw, cin = x.shape
    W, H = map_size
    assert hw == H * W
    M = B * H * W

    # Channel-padded, transposed input slab (C_PAD sublanes x M lanes).
    xf = x.astype(jnp.float32).reshape(M, cin)
    x_t = jnp.zeros((C_PAD, M), jnp.float32).at[:cin, :].set(xf.T)

    # Anchor-free reference points tiled over the batch (constant under jit).
    ref_t = jnp.tile(ref_hw_t, (1, B))                          # (2, M)

    # Per-tap border masks, flattened (b, y, x)-major, tiled over the batch.
    ys = jnp.arange(H)[:, None]
    xs = jnp.arange(W)[None, :]
    mask_list = []
    for dy, dx in _TAPS:
        valid = ((ys + dy >= 0) & (ys + dy < H) &
                 (xs + dx >= 0) & (xs + dx < W)).astype(jnp.float32)  # (H, W)
        mask_list.append(jnp.tile(valid.reshape(1, H * W), (1, B)))
    masks = jnp.concatenate(mask_list, axis=0)                  # (9, M)

    tap_offsets = tuple(dy * W + dx for dy, dx in _TAPS)

    flops = 2 * M * C_PAD * C_PAD * 9 * 4 + 2 * M * C_PAD * 8
    bytes_accessed = 4 * (x_t.size + sum(int(w.size) for w in stage_w)
                          + sum(int(b.size) for b in stage_b)
                          + int(w5t.size) + int(b5t.size)
                          + int(masks.size) + int(ref_t.size) + 8 * M)

    out_t = pl.pallas_call(
        partial(_ostrack_head_kernel, tap_offsets=tap_offsets),
        out_shape=jax.ShapeDtypeStruct((8, M), jnp.float32),
        cost_estimate=pl.CostEstimate(flops=flops, transcendentals=2 * M,
                                      bytes_accessed=bytes_accessed),
        compiler_params=pltpu.CompilerParams(
            vmem_limit_bytes=32 * 1024 * 1024),   # ample; ~3 MiB actually used
    )(x_t, stage_w[0], stage_b[0], stage_w[1], stage_b[1],
      stage_w[2], stage_b[2], stage_w[3], stage_b[3],
      w5t, b5t, masks, ref_t)

    # Tiny layout plumbing back to the PyTorch output shapes (outside kernel).
    score = out_t[0].reshape(B, H, W)
    boxes = jnp.transpose(out_t[1:5].reshape(4, B, H, W), (1, 2, 3, 0))
    return {"score_map": score, "boxes": boxes}


# -----------------------------------------------------------------------------
# Parameter construction (deterministic, synthetic) + host-side fusion
# -----------------------------------------------------------------------------
def make_params(key, inplanes, channel, map_size):
    W, H = map_size
    dims = [(inplanes, channel), (channel, channel // 2),
            (channel // 2, channel // 4), (channel // 4, channel // 8)]
    head_out = {"ctr": 1, "offset": 2, "size": 2}
    eps = 1e-5
    params = {}
    for branch in _BRANCHES:
        blocks = []
        for (cin, cout) in dims:
            key, k1, k2, k3, k4, k5, k6 = jax.random.split(key, 7)
            fan_in, fan_out = cin * 9, cout * 9
            bound = (6.0 / (fan_in + fan_out)) ** 0.5
            w = jax.random.uniform(k1, (3, 3, cin, cout), jnp.float32, -bound, bound)
            conv_b = jax.random.uniform(k2, (cout,), jnp.float32, -0.1, 0.1)
            gamma = 1.0 + 0.05 * jax.random.normal(k3, (cout,), jnp.float32)
            beta = 0.05 * jax.random.normal(k4, (cout,), jnp.float32)
            mean = 0.05 * jax.random.normal(k5, (cout,), jnp.float32)
            var = 1.0 + 0.1 * jax.random.uniform(k6, (cout,), jnp.float32)
            # Fold BatchNorm (inference form) into conv weight / bias.
            scale = gamma / jnp.sqrt(var + eps)
            blocks.append({"w_hwio": w * scale,
                           "b": ((conv_b - mean) * scale + beta).reshape(1, cout)})
        key, k1, k2 = jax.random.split(key, 3)
        cin, cout = channel // 8, head_out[branch]
        bound = (6.0 / (cin + cout)) ** 0.5
        hw_ = jax.random.uniform(k1, (cin, cout), jnp.float32, -bound, bound)
        hb = jax.random.uniform(k2, (1, cout), jnp.float32, -0.1, 0.1)
        params[branch] = {"blocks": blocks, "head_w": hw_, "head_b": hb}

    # TODO(synk): get_anchor_free_reference_points source not provided; use the
    # standard normalized cell-centre convention ((x+0.5)/W, (y+0.5)/H).
    xs = (jnp.arange(W, dtype=jnp.float32) + 0.5) / W
    ys = (jnp.arange(H, dtype=jnp.float32) + 0.5) / H
    gx, gy = jnp.meshgrid(xs, ys)                               # (H, W) each
    params["bbox_offset"] = jnp.stack([gx, gy], axis=-1)        # (H, W, 2)
    return params


def fuse_params(params, inplanes, channel, map_size):
    """Branch-fused, 128-padded, transposed per-tap weights for the kernel."""
    cins = (inplanes, channel, channel // 2, channel // 4)
    couts = (channel, channel // 2, channel // 4, channel // 8)
    # Layout-consistency guards (review: branch ordering must survive fusion).
    for k in range(1, 4):
        assert cins[k] == couts[k - 1], "branch channel chain broken"
    assert couts[3] == channel // 8
    assert inplanes <= C_PAD and 3 * channel <= C_PAD, "raise C_PAD"

    stage_w, stage_b = [], []
    for k in range(4):
        cin, cout = cins[k], couts[k]
        wt = np.zeros((9, C_PAD, C_PAD), np.float32)     # (tap, out_ch, in_ch)
        bt = np.zeros((C_PAD, 1), np.float32)
        for i, br in enumerate(_BRANCHES):
            blk = params[br]["blocks"][k]
            w = np.asarray(blk["w_hwio"])                # (3, 3, cin, cout)
            b = np.asarray(blk["b"]).reshape(cout)
            in_off = 0 if k == 0 else i * cin            # stage 1 input shared
            out_off = i * cout
            for t, (dy, dx) in enumerate(_TAPS):
                wt[t, out_off:out_off + cout, in_off:in_off + cin] = \
                    w[dy + 1, dx + 1].T
            bt[out_off:out_off + cout, 0] = b
        stage_w.append(jnp.asarray(wt))
        stage_b.append(jnp.asarray(bt))

    # Fused transposed 1x1 heads: rows [score, off_x, off_y, size_w, size_h,0,0,0]
    c8 = channel // 8
    w5t = np.zeros((8, C_PAD), np.float32)
    b5t = np.zeros((8, 1), np.float32)
    w5t[0, 0:c8] = np.asarray(params["ctr"]["head_w"])[:, 0]
    w5t[1:3, c8:2 * c8] = np.asarray(params["offset"]["head_w"]).T
    w5t[3:5, 2 * c8:3 * c8] = np.asarray(params["size"]["head_w"]).T
    b5t[0, 0] = np.asarray(params["ctr"]["head_b"])[0, 0]
    b5t[1:3, 0] = np.asarray(params["offset"]["head_b"])[0]
    b5t[3:5, 0] = np.asarray(params["size"]["head_b"])[0]

    W, H = map_size
    ref_hw_t = jnp.asarray(params["bbox_offset"]).reshape(H * W, 2).T  # (2, HW)
    return (stage_w, stage_b, jnp.asarray(w5t), jnp.asarray(b5t), ref_hw_t)


# -----------------------------------------------------------------------------
# Pure-JAX reference (per-branch lax.conv), for validation
# -----------------------------------------------------------------------------
def reference_forward(x, params, map_size):
    B = x.shape[0]
    W, H = map_size
    feat = x.reshape(B, H, W, -1).astype(jnp.float32)
    feats = {}
    for branch in _BRANCHES:
        h = feat
        for blk in params[branch]["blocks"]:
            h = lax.conv_general_dilated(
                h, blk["w_hwio"], (1, 1), "SAME",
                dimension_numbers=("NHWC", "HWIO", "NHWC"))
            h = jnp.maximum(h + blk["b"].reshape(1, 1, 1, -1), 0.0)
        feats[branch] = h
    score = (jnp.einsum("bhwc,co->bhwo", feats["ctr"], params["ctr"]["head_w"])
             + params["ctr"]["head_b"])[..., 0]
    off = (jnp.einsum("bhwc,co->bhwo", feats["offset"], params["offset"]["head_w"])
           + params["offset"]["head_b"])
    sz = jax.nn.sigmoid(
        jnp.einsum("bhwc,co->bhwo", feats["size"], params["size"]["head_w"])
        + params["size"]["head_b"])
    ctr = params["bbox_offset"][None] + off
    boxes = jnp.concatenate([ctr - 0.5 * sz, ctr + 0.5 * sz], axis=-1)
    return {"score_map": score, "boxes": boxes}


# -----------------------------------------------------------------------------
if __name__ == "__main__":
    B, inplanes, channel = 2, 32, 32
    map_size = (8, 8)                    # (W, H), like the PyTorch module
    W, H = map_size

    key = jax.random.PRNGKey(0)
    key, kx, kp = jax.random.split(key, 3)
    x = jax.random.normal(kx, (B, H * W, inplanes), jnp.float32)
    params = make_params(kp, inplanes, channel, map_size)
    fused = fuse_params(params, inplanes, channel, map_size)

    out = ostrack_conv_head_forward(x, fused, map_size)
    out = jax.block_until_ready(out)

    assert out["score_map"].shape == (B, H, W)
    assert out["boxes"].shape == (B, H, W, 4)

    ref = reference_forward(x, params, map_size)
    np.testing.assert_allclose(np.asarray(out["score_map"]),
                               np.asarray(ref["score_map"]), rtol=1e-3, atol=1e-3)
    np.testing.assert_allclose(np.asarray(out["boxes"]),
                               np.asarray(ref["boxes"]), rtol=1e-3, atol=1e-3)
    print("KERNEL_OK")
</pallas_src>

<mosaic_0001>
module attributes {stable_mosaic.version = 11 : i64} {
  func.func @_ostrack_head_kernel(%arg0: memref<128x128xf32, #tpu.memory_space<vmem>>, %arg1: memref<9x128x128xf32, #tpu.memory_space<vmem>>, %arg2: memref<128x1xf32, #tpu.memory_space<vmem>>, %arg3: memref<9x128x128xf32, #tpu.memory_space<vmem>>, %arg4: memref<128x1xf32, #tpu.memory_space<vmem>>, %arg5: memref<9x128x128xf32, #tpu.memory_space<vmem>>, %arg6: memref<128x1xf32, #tpu.memory_space<vmem>>, %arg7: memref<9x128x128xf32, #tpu.memory_space<vmem>>, %arg8: memref<128x1xf32, #tpu.memory_space<vmem>>, %arg9: memref<8x128xf32, #tpu.memory_space<vmem>>, %arg10: memref<8x1xf32, #tpu.memory_space<vmem>>, %arg11: memref<9x128xf32, #tpu.memory_space<vmem>>, %arg12: memref<2x128xf32, #tpu.memory_space<vmem>>, %arg13: memref<8x128xf32, #tpu.memory_space<vmem>>) attributes {dimension_semantics = [], scalar_prefetch = 0 : i64, scratch_operands = 0 : i64, tpu.core_type = #tpu.core_type<tc>} {
    %c0 = arith.constant 0 : index
    %c0_0 = arith.constant 0 : index
    %0 = vector.load %arg0[%c0, %c0_0] : memref<128x128xf32, #tpu.memory_space<vmem>>, vector<128x128xf32>
    %c0_1 = arith.constant 0 : index
    %c0_2 = arith.constant 0 : index
    %1 = vector.load %arg11[%c0_1, %c0_2] : memref<9x128xf32, #tpu.memory_space<vmem>>, vector<1x128xf32>
    %c1 = arith.constant 1 : index
    %c0_3 = arith.constant 0 : index
    %2 = vector.load %arg11[%c1, %c0_3] : memref<9x128xf32, #tpu.memory_space<vmem>>, vector<1x128xf32>
    %c2 = arith.constant 2 : index
    %c0_4 = arith.constant 0 : index
    %3 = vector.load %arg11[%c2, %c0_4] : memref<9x128xf32, #tpu.memory_space<vmem>>, vector<1x128xf32>
    %c3 = arith.constant 3 : index
    %c0_5 = arith.constant 0 : index
    %4 = vector.load %arg11[%c3, %c0_5] : memref<9x128xf32, #tpu.memory_space<vmem>>, vector<1x128xf32>
    %c5 = arith.constant 5 : index
    %c0_6 = arith.constant 0 : index
    %5 = vector.load %arg11[%c5, %c0_6] : memref<9x128xf32, #tpu.memory_space<vmem>>, vector<1x128xf32>
    %c6 = arith.constant 6 : index
    %c0_7 = arith.constant 0 : index
    %6 = vector.load %arg11[%c6, %c0_7] : memref<9x128xf32, #tpu.memory_space<vmem>>, vector<1x128xf32>
    %c7 = arith.constant 7 : index
    %c0_8 = arith.constant 0 : index
    %7 = vector.load %arg11[%c7, %c0_8] : memref<9x128xf32, #tpu.memory_space<vmem>>, vector<1x128xf32>
    %c8 = arith.constant 8 : index
    %c0_9 = arith.constant 0 : index
    %8 = vector.load %arg11[%c8, %c0_9] : memref<9x128xf32, #tpu.memory_space<vmem>>, vector<1x128xf32>
    %c4 = arith.constant 4 : index
    %c0_10 = arith.constant 0 : index
    %c0_11 = arith.constant 0 : index
    %9 = vector.load %arg1[%c4, %c0_10, %c0_11] : memref<9x128x128xf32, #tpu.memory_space<vmem>>, vector<1x128x128xf32>
    %10 = vector.shape_cast %9 : vector<1x128x128xf32> to vector<128x128xf32>
    %cst = arith.constant dense<0.000000e+00> : vector<128x128xf32>
    %11 = tpu.matmul %10, %0, %cst {dimension_numbers = #tpu.dot_dimension_numbers<[1], [0], [0], [1], [0, 0, 1, 1], [], []>} : vector<128x128xf32>, vector<128x128xf32>, vector<128x128xf32> -> vector<128x128xf32>
    %c9_i32 = arith.constant 9 : i32
    %12 = tpu.dynamic_rotate %0 by %c9_i32 dim 1 : vector<128x128xf32>, i32 -> vector<128x128xf32>
    %c0_12 = arith.constant 0 : index
    %c0_13 = arith.constant 0 : index
    %c0_14 = arith.constant 0 : index
    %13 = vector.load %arg1[%c0_12, %c0_13, %c0_14] : memref<9x128x128xf32, #tpu.memory_space<vmem>>, vector<1x128x128xf32>
    %14 = vector.shape_cast %13 : vector<1x128x128xf32> to vector<128x128xf32>
    %15 = vector.broadcast %1 : vector<1x128xf32> to vector<128x128xf32>
    %16 = arith.mulf %12, %15 : vector<128x128xf32>
    %cst_15 = arith.constant dense<0.000000e+00> : vector<128x128xf32>
    %17 = tpu.matmul %14, %16, %cst_15 {dimension_numbers = #tpu.dot_dimension_numbers<[1], [0], [0], [1], [0, 0, 1, 1], [], []>} : vector<128x128xf32>, vector<128x128xf32>, vector<128x128xf32> -> vector<128x128xf32>
    %18 = arith.addf %11, %17 : vector<128x128xf32>
    %c8_i32 = arith.constant 8 : i32
    %19 = tpu.dynamic_rotate %0 by %c8_i32 dim 1 : vector<128x128xf32>, i32 -> vector<128x128xf32>
    %c1_16 = arith.constant 1 : index
    %c0_17 = arith.constant 0 : index
    %c0_18 = arith.constant 0 : index
    %20 = vector.load %arg1[%c1_16, %c0_17, %c0_18] : memref<9x128x128xf32, #tpu.memory_space<vmem>>, vector<1x128x128xf32>
    %21 = vector.shape_cast %20 : vector<1x128x128xf32> to vector<128x128xf32>
    %22 = vector.broadcast %2 : vector<1x128xf32> to vector<128x128xf32>
    %23 = arith.mulf %19, %22 : vector<128x128xf32>
    %cst_19 = arith.constant dense<0.000000e+00> : vector<128x128xf32>
    %24 = tpu.matmul %21, %23, %cst_19 {dimension_numbers = #tpu.dot_dimension_numbers<[1], [0], [0], [1], [0, 0, 1, 1], [], []>} : vector<128x128xf32>, vector<128x128xf32>, vector<128x128xf32> -> vector<128x128xf32>
    %25 = arith.addf %18, %24 : vector<128x128xf32>
    %c7_i32 = arith.constant 7 : i32
    %26 = tpu.dynamic_rotate %0 by %c7_i32 dim 1 : vector<128x128xf32>, i32 -> vector<128x128xf32>
    %c2_20 = arith.constant 2 : index
    %c0_21 = arith.constant 0 : index
    %c0_22 = arith.constant 0 : index
    %27 = vector.load %arg1[%c2_20, %c0_21, %c0_22] : memref<9x128x128xf32, #tpu.memory_space<vmem>>, vector<1x128x128xf32>
    %28 = vector.shape_cast %27 : vector<1x128x128xf32> to vector<128x128xf32>
    %29 = vector.broadcast %3 : vector<1x128xf32> to vector<128x128xf32>
    %30 = arith.mulf %26, %29 : vector<128x128xf32>
    %cst_23 = arith.constant dense<0.000000e+00> : vector<128x128xf32>
    %31 = tpu.matmul %28, %30, %cst_23 {dimension_numbers = #tpu.dot_dimension_numbers<[1], [0], [0], [1], [0, 0, 1, 1], [], []>} : vector<128x128xf32>, vector<128x128xf32>, vector<128x128xf32> -> vector<128x128xf32>
    %32 = arith.addf %25, %31 : vector<128x128xf32>
    %c1_i32 = arith.constant 1 : i32
    %33 = tpu.dynamic_rotate %0 by %c1_i32 dim 1 : vector<128x128xf32>, i32 -> vector<128x128xf32>
    %c3_24 = arith.constant 3 : index
    %c0_25 = arith.constant 0 : index
    %c0_26 = arith.constant 0 : index
    %34 = vector.load %arg1[%c3_24, %c0_25, %c0_26] : memref<9x128x128xf32, #tpu.memory_space<vmem>>, vector<1x128x128xf32>
    %35 = vector.shape_cast %34 : vector<1x128x128xf32> to vector<128x128xf32>
    %36 = vector.broadcast %4 : vector<1x128xf32> to vector<128x128xf32>
    %37 = arith.mulf %33, %36 : vector<128x128xf32>
    %cst_27 = arith.constant dense<0.000000e+00> : vector<128x128xf32>
    %38 = tpu.matmul %35, %37, %cst_27 {dimension_numbers = #tpu.dot_dimension_numbers<[1], [0], [0], [1], [0, 0, 1, 1], [], []>} : vector<128x128xf32>, vector<128x128xf32>, vector<128x128xf32> -> vector<128x128xf32>
    %39 = arith.addf %32, %38 : vector<128x128xf32>
    %c127_i32 = arith.constant 127 : i32
    %40 = tpu.dynamic_rotate %0 by %c127_i32 dim 1 : vector<128x128xf32>, i32 -> vector<128x128xf32>
    %c5_28 = arith.constant 5 : index
    %c0_29 = arith.constant 0 : index
    %c0_30 = arith.constant 0 : index
    %41 = vector.load %arg1[%c5_28, %c0_29, %c0_30] : memref<9x128x128xf32, #tpu.memory_space<vmem>>, vector<1x128x128xf32>
    %42 = vector.shape_cast %41 : vector<1x128x128xf32> to vector<128x128xf32>
    %43 = vector.broadcast %5 : vector<1x128xf32> to vector<128x128xf32>
    %44 = arith.mulf %40, %43 : vector<128x128xf32>
    %cst_31 = arith.constant dense<0.000000e+00> : vector<128x128xf32>
    %45 = tpu.matmul %42, %44, %cst_31 {dimension_numbers = #tpu.dot_dimension_numbers<[1], [0], [0], [1], [0, 0, 1, 1], [], []>} : vector<128x128xf32>, vector<128x128xf32>, vector<128x128xf32> -> vector<128x128xf32>
    %46 = arith.addf %39, %45 : vector<128x128xf32>
    %c121_i32 = arith.constant 121 : i32
    %47 = tpu.dynamic_rotate %0 by %c121_i32 dim 1 : vector<128x128xf32>, i32 -> vector<128x128xf32>
    %c6_32 = arith.constant 6 : index
    %c0_33 = arith.constant 0 : index
    %c0_34 = arith.constant 0 : index
    %48 = vector.load %arg1[%c6_32, %c0_33, %c0_34] : memref<9x128x128xf32, #tpu.memory_space<vmem>>, vector<1x128x128xf32>
    %49 = vector.shape_cast %48 : vector<1x128x128xf32> to vector<128x128xf32>
    %50 = vector.broadcast %6 : vector<1x128xf32> to vector<128x128xf32>
    %51 = arith.mulf %47, %50 : vector<128x128xf32>
    %cst_35 = arith.constant dense<0.000000e+00> : vector<128x128xf32>
    %52 = tpu.matmul %49, %51, %cst_35 {dimension_numbers = #tpu.dot_dimension_numbers<[1], [0], [0], [1], [0, 0, 1, 1], [], []>} : vector<128x128xf32>, vector<128x128xf32>, vector<128x128xf32> -> vector<128x128xf32>
    %53 = arith.addf %46, %52 : vector<128x128xf32>
    %c120_i32 = arith.constant 120 : i32
    %54 = tpu.dynamic_rotate %0 by %c120_i32 dim 1 : vector<128x128xf32>, i32 -> vector<128x128xf32>
    %c7_36 = arith.constant 7 : index
    %c0_37 = arith.constant 0 : index
    %c0_38 = arith.constant 0 : index
    %55 = vector.load %arg1[%c7_36, %c0_37, %c0_38] : memref<9x128x128xf32, #tpu.memory_space<vmem>>, vector<1x128x128xf32>
    %56 = vector.shape_cast %55 : vector<1x128x128xf32> to vector<128x128xf32>
    %57 = vector.broadcast %7 : vector<1x128xf32> to vector<128x128xf32>
    %58 = arith.mulf %54, %57 : vector<128x128xf32>
    %cst_39 = arith.constant dense<0.000000e+00> : vector<128x128xf32>
    %59 = tpu.matmul %56, %58, %cst_39 {dimension_numbers = #tpu.dot_dimension_numbers<[1], [0], [0], [1], [0, 0, 1, 1], [], []>} : vector<128x128xf32>, vector<128x128xf32>, vector<128x128xf32> -> vector<128x128xf32>
    %60 = arith.addf %53, %59 : vector<128x128xf32>
    %c119_i32 = arith.constant 119 : i32
    %61 = tpu.dynamic_rotate %0 by %c119_i32 dim 1 : vector<128x128xf32>, i32 -> vector<128x128xf32>
    %c8_40 = arith.constant 8 : index
    %c0_41 = arith.constant 0 : index
    %c0_42 = arith.constant 0 : index
    %62 = vector.load %arg1[%c8_40, %c0_41, %c0_42] : memref<9x128x128xf32, #tpu.memory_space<vmem>>, vector<1x128x128xf32>
    %63 = vector.shape_cast %62 : vector<1x128x128xf32> to vector<128x128xf32>
    %64 = vector.broadcast %8 : vector<1x128xf32> to vector<128x128xf32>
    %65 = arith.mulf %61, %64 : vector<128x128xf32>
    %cst_43 = arith.constant dense<0.000000e+00> : vector<128x128xf32>
    %66 = tpu.matmul %63, %65, %cst_43 {dimension_numbers = #tpu.dot_dimension_numbers<[1], [0], [0], [1], [0, 0, 1, 1], [], []>} : vector<128x128xf32>, vector<128x128xf32>, vector<128x128xf32> -> vector<128x128xf32>
    %67 = arith.addf %60, %66 : vector<128x128xf32>
    %c0_44 = arith.constant 0 : index
    %c0_45 = arith.constant 0 : index
    %68 = vector.load %arg2[%c0_44, %c0_45] : memref<128x1xf32, #tpu.memory_space<vmem>>, vector<128x1xf32>
    %69 = vector.broadcast %68 : vector<128x1xf32> to vector<128x128xf32>
    %70 = arith.addf %67, %69 : vector<128x128xf32>
    %cst_46 = arith.constant 0.000000e+00 : f32
    %71 = vector.broadcast %cst_46 : f32 to vector<128x128xf32>
    %72 = arith.maximumf %70, %71 : vector<128x128xf32>
    %c4_47 = arith.constant 4 : index
    %c0_48 = arith.constant 0 : index
    %c0_49 = arith.constant 0 : index
    %73 = vector.load %arg3[%c4_47, %c0_48, %c0_49] : memref<9x128x128xf32, #tpu.memory_space<vmem>>, vector<1x128x128xf32>
    %74 = vector.shape_cast %73 : vector<1x128x128xf32> to vector<128x128xf32>
    %cst_50 = arith.constant dense<0.000000e+00> : vector<128x128xf32>
    %75 = tpu.matmul %74, %72, %cst_50 {dimension_numbers = #tpu.dot_dimension_numbers<[1], [0], [0], [1], [0, 0, 1, 1], [], []>} : vector<128x128xf32>, vector<128x128xf32>, vector<128x128xf32> -> vector<128x128xf32>
    %c9_i32_51 = arith.constant 9 : i32
    %76 = tpu.dynamic_rotate %72 by %c9_i32_51 dim 1 : vector<128x128xf32>, i32 -> vector<128x128xf32>
    %c0_52 = arith.constant 0 : index
    %c0_53 = arith.constant 0 : index
    %c0_54 = arith.constant 0 : index
    %77 = vector.load %arg3[%c0_52, %c0_53, %c0_54] : memref<9x128x128xf32, #tpu.memory_space<vmem>>, vector<1x128x128xf32>
    %78 = vector.shape_cast %77 : vector<1x128x128xf32> to vector<128x128xf32>
    %79 = vector.broadcast %1 : vector<1x128xf32> to vector<128x128xf32>
    %80 = arith.mulf %76, %79 : vector<128x128xf32>
    %cst_55 = arith.constant dense<0.000000e+00> : vector<128x128xf32>
    %81 = tpu.matmul %78, %80, %cst_55 {dimension_numbers = #tpu.dot_dimension_numbers<[1], [0], [0], [1], [0, 0, 1, 1], [], []>} : vector<128x128xf32>, vector<128x128xf32>, vector<128x128xf32> -> vector<128x128xf32>
    %82 = arith.addf %75, %81 : vector<128x128xf32>
    %c8_i32_56 = arith.constant 8 : i32
    %83 = tpu.dynamic_rotate %72 by %c8_i32_56 dim 1 : vector<128x128xf32>, i32 -> vector<128x128xf32>
    %c1_57 = arith.constant 1 : index
    %c0_58 = arith.constant 0 : index
    %c0_59 = arith.constant 0 : index
    %84 = vector.load %arg3[%c1_57, %c0_58, %c0_59] : memref<9x128x128xf32, #tpu.memory_space<vmem>>, vector<1x128x128xf32>
    %85 = vector.shape_cast %84 : vector<1x128x128xf32> to vector<128x128xf32>
    %86 = vector.broadcast %2 : vector<1x128xf32> to vector<128x128xf32>
    %87 = arith.mulf %83, %86 : vector<128x128xf32>
    %cst_60 = arith.constant dense<0.000000e+00> : vector<128x128xf32>
    %88 = tpu.matmul %85, %87, %cst_60 {dimension_numbers = #tpu.dot_dimension_numbers<[1], [0], [0], [1], [0, 0, 1, 1], [], []>} : vector<128x128xf32>, vector<128x128xf32>, vector<128x128xf32> -> vector<128x128xf32>
    %89 = arith.addf %82, %88 : vector<128x128xf32>
    %c7_i32_61 = arith.constant 7 : i32
    %90 = tpu.dynamic_rotate %72 by %c7_i32_61 dim 1 : vector<128x128xf32>, i32 -> vector<128x128xf32>
    %c2_62 = arith.constant 2 : index
    %c0_63 = arith.constant 0 : index
    %c0_64 = arith.constant 0 : index
    %91 = vector.load %arg3[%c2_62, %c0_63, %c0_64] : memref<9x128x128xf32, #tpu.memory_space<vmem>>, vector<1x128x128xf32>
    %92 = vector.shape_cast %91 : vector<1x128x128xf32> to vector<128x128xf32>
    %93 = vector.broadcast %3 : vector<1x128xf32> to vector<128x128xf32>
    %94 = arith.mulf %90, %93 : vector<128x128xf32>
    %cst_65 = arith.constant dense<0.000000e+00> : vector<128x128xf32>
    %95 = tpu.matmul %92, %94, %cst_65 {dimension_numbers = #tpu.dot_dimension_numbers<[1], [0], [0], [1], [0, 0, 1, 1], [], []>} : vector<128x128xf32>, vector<128x128xf32>, vector<128x128xf32> -> vector<128x128xf32>
    %96 = arith.addf %89, %95 : vector<128x128xf32>
    %c1_i32_66 = arith.constant 1 : i32
    %97 = tpu.dynamic_rotate %72 by %c1_i32_66 dim 1 : vector<128x128xf32>, i32 -> vector<128x128xf32>
    %c3_67 = arith.constant 3 : index
    %c0_68 = arith.constant 0 : index
    %c0_69 = arith.constant 0 : index
    %98 = vector.load %arg3[%c3_67, %c0_68, %c0_69] : memref<9x128x128xf32, #tpu.memory_space<vmem>>, vector<1x128x128xf32>
    %99 = vector.shape_cast %98 : vector<1x128x128xf32> to vector<128x128xf32>
    %100 = vector.broadcast %4 : vector<1x128xf32> to vector<128x128xf32>
    %101 = arith.mulf %97, %100 : vector<128x128xf32>
    %cst_70 = arith.constant dense<0.000000e+00> : vector<128x128xf32>
    %102 = tpu.matmul %99, %101, %cst_70 {dimension_numbers = #tpu.dot_dimension_numbers<[1], [0], [0], [1], [0, 0, 1, 1], [], []>} : vector<128x128xf32>, vector<128x128xf32>, vector<128x128xf32> -> vector<128x128xf32>
    %103 = arith.addf %96, %102 : vector<128x128xf32>
    %c127_i32_71 = arith.constant 127 : i32
    %104 = tpu.dynamic_rotate %72 by %c127_i32_71 dim 1 : vector<128x128xf32>, i32 -> vector<128x128xf32>
    %c5_72 = arith.constant 5 : index
    %c0_73 = arith.constant 0 : index
    %c0_74 = arith.constant 0 : index
    %105 = vector.load %arg3[%c5_72, %c0_73, %c0_74] : memref<9x128x128xf32, #tpu.memory_space<vmem>>, vector<1x128x128xf32>
    %106 = vector.shape_cast %105 : vector<1x128x128xf32> to vector<128x128xf32>
    %107 = vector.broadcast %5 : vector<1x128xf32> to vector<128x128xf32>
    %108 = arith.mulf %104, %107 : vector<128x128xf32>
    %cst_75 = arith.constant dense<0.000000e+00> : vector<128x128xf32>
    %109 = tpu.matmul %106, %108, %cst_75 {dimension_numbers = #tpu.dot_dimension_numbers<[1], [0], [0], [1], [0, 0, 1, 1], [], []>} : vector<128x128xf32>, vector<128x128xf32>, vector<128x128xf32> -> vector<128x128xf32>
    %110 = arith.addf %103, %109 : vector<128x128xf32>
    %c121_i32_76 = arith.constant 121 : i32
    %111 = tpu.dynamic_rotate %72 by %c121_i32_76 dim 1 : vector<128x128xf32>, i32 -> vector<128x128xf32>
    %c6_77 = arith.constant 6 : index
    %c0_78 = arith.constant 0 : index
    %c0_79 = arith.constant 0 : index
    %112 = vector.load %arg3[%c6_77, %c0_78, %c0_79] : memref<9x128x128xf32, #tpu.memory_space<vmem>>, vector<1x128x128xf32>
    %113 = vector.shape_cast %112 : vector<1x128x128xf32> to vector<128x128xf32>
    %114 = vector.broadcast %6 : vector<1x128xf32> to vector<128x128xf32>
    %115 = arith.mulf %111, %114 : vector<128x128xf32>
    %cst_80 = arith.constant dense<0.000000e+00> : vector<128x128xf32>
    %116 = tpu.matmul %113, %115, %cst_80 {dimension_numbers = #tpu.dot_dimension_numbers<[1], [0], [0], [1], [0, 0, 1, 1], [], []>} : vector<128x128xf32>, vector<128x128xf32>, vector<128x128xf32> -> vector<128x128xf32>
    %117 = arith.addf %110, %116 : vector<128x128xf32>
    %c120_i32_81 = arith.constant 120 : i32
    %118 = tpu.dynamic_rotate %72 by %c120_i32_81 dim 1 : vector<128x128xf32>, i32 -> vector<128x128xf32>
    %c7_82 = arith.constant 7 : index
    %c0_83 = arith.constant 0 : index
    %c0_84 = arith.constant 0 : index
    %119 = vector.load %arg3[%c7_82, %c0_83, %c0_84] : memref<9x128x128xf32, #tpu.memory_space<vmem>>, vector<1x128x128xf32>
    %120 = vector.shape_cast %119 : vector<1x128x128xf32> to vector<128x128xf32>
    %121 = vector.broadcast %7 : vector<1x128xf32> to vector<128x128xf32>
    %122 = arith.mulf %118, %121 : vector<128x128xf32>
    %cst_85 = arith.constant dense<0.000000e+00> : vector<128x128xf32>
    %123 = tpu.matmul %120, %122, %cst_85 {dimension_numbers = #tpu.dot_dimension_numbers<[1], [0], [0], [1], [0, 0, 1, 1], [], []>} : vector<128x128xf32>, vector<128x128xf32>, vector<128x128xf32> -> vector<128x128xf32>
    %124 = arith.addf %117, %123 : vector<128x128xf32>
    %c119_i32_86 = arith.constant 119 : i32
    %125 = tpu.dynamic_rotate %72 by %c119_i32_86 dim 1 : vector<128x128xf32>, i32 -> vector<128x128xf32>
    %c8_87 = arith.constant 8 : index
    %c0_88 = arith.constant 0 : index
    %c0_89 = arith.constant 0 : index
    %126 = vector.load %arg3[%c8_87, %c0_88, %c0_89] : memref<9x128x128xf32, #tpu.memory_space<vmem>>, vector<1x128x128xf32>
    %127 = vector.shape_cast %126 : vector<1x128x128xf32> to vector<128x128xf32>
    %128 = vector.broadcast %8 : vector<1x128xf32> to vector<128x128xf32>
    %129 = arith.mulf %125, %128 : vector<128x128xf32>
    %cst_90 = arith.constant dense<0.000000e+00> : vector<128x128xf32>
    %130 = tpu.matmul %127, %129, %cst_90 {dimension_numbers = #tpu.dot_dimension_numbers<[1], [0], [0], [1], [0, 0, 1, 1], [], []>} : vector<128x128xf32>, vector<128x128xf32>, vector<128x128xf32> -> vector<128x128xf32>
    %131 = arith.addf %124, %130 : vector<128x128xf32>
    %c0_91 = arith.constant 0 : index
    %c0_92 = arith.constant 0 : index
    %132 = vector.load %arg4[%c0_91, %c0_92] : memref<128x1xf32, #tpu.memory_space<vmem>>, vector<128x1xf32>
    %133 = vector.broadcast %132 : vector<128x1xf32> to vector<128x128xf32>
    %134 = arith.addf %131, %133 : vector<128x128xf32>
    %cst_93 = arith.constant 0.000000e+00 : f32
    %135 = vector.broadcast %cst_93 : f32 to vector<128x128xf32>
    %136 = arith.maximumf %134, %135 : vector<128x128xf32>
    %c4_94 = arith.constant 4 : index
    %c0_95 = arith.constant 0 : index
    %c0_96 = arith.constant 0 : index
    %137 = vector.load %arg5[%c4_94, %c0_95, %c0_96] : memref<9x128x128xf32, #tpu.memory_space<vmem>>, vector<1x128x128xf32>
    %138 = vector.shape_cast %137 : vector<1x128x128xf32> to vector<128x128xf32>
    %cst_97 = arith.constant dense<0.000000e+00> : vector<128x128xf32>
    %139 = tpu.matmul %138, %136, %cst_97 {dimension_numbers = #tpu.dot_dimension_numbers<[1], [0], [0], [1], [0, 0, 1, 1], [], []>} : vector<128x128xf32>, vector<128x128xf32>, vector<128x128xf32> -> vector<128x128xf32>
    %c9_i32_98 = arith.constant 9 : i32
    %140 = tpu.dynamic_rotate %136 by %c9_i32_98 dim 1 : vector<128x128xf32>, i32 -> vector<128x128xf32>
    %c0_99 = arith.constant 0 : index
    %c0_100 = arith.constant 0 : index
    %c0_101 = arith.constant 0 : index
    %141 = vector.load %arg5[%c0_99, %c0_100, %c0_101] : memref<9x128x128xf32, #tpu.memory_space<vmem>>, vector<1x128x128xf32>
    %142 = vector.shape_cast %141 : vector<1x128x128xf32> to vector<128x128xf32>
    %143 = vector.broadcast %1 : vector<1x128xf32> to vector<128x128xf32>
    %144 = arith.mulf %140, %143 : vector<128x128xf32>
    %cst_102 = arith.constant dense<0.000000e+00> : vector<128x128xf32>
    %145 = tpu.matmul %142, %144, %cst_102 {dimension_numbers = #tpu.dot_dimension_numbers<[1], [0], [0], [1], [0, 0, 1, 1], [], []>} : vector<128x128xf32>, vector<128x128xf32>, vector<128x128xf32> -> vector<128x128xf32>
    %146 = arith.addf %139, %145 : vector<128x128xf32>
    %c8_i32_103 = arith.constant 8 : i32
    %147 = tpu.dynamic_rotate %136 by %c8_i32_103 dim 1 : vector<128x128xf32>, i32 -> vector<128x128xf32>
    %c1_104 = arith.constant 1 : index
    %c0_105 = arith.constant 0 : index
    %c0_106 = arith.constant 0 : index
    %148 = vector.load %arg5[%c1_104, %c0_105, %c0_106] : memref<9x128x128xf32, #tpu.memory_space<vmem>>, vector<1x128x128xf32>
    %149 = vector.shape_cast %148 : vector<1x128x128xf32> to vector<128x128xf32>
    %150 = vector.broadcast %2 : vector<1x128xf32> to vector<128x128xf32>
    %151 = arith.mulf %147, %150 : vector<128x128xf32>
    %cst_107 = arith.constant dense<0.000000e+00> : vector<128x128xf32>
    %152 = tpu.matmul %149, %151, %cst_107 {dimension_numbers = #tpu.dot_dimension_numbers<[1], [0], [0], [1], [0, 0, 1, 1], [], []>} : vector<128x128xf32>, vector<128x128xf32>, vector<128x128xf32> -> vector<128x128xf32>
    %153 = arith.addf %146, %152 : vector<128x128xf32>
    %c7_i32_108 = arith.constant 7 : i32
    %154 = tpu.dynamic_rotate %136 by %c7_i32_108 dim 1 : vector<128x128xf32>, i32 -> vector<128x128xf32>
    %c2_109 = arith.constant 2 : index
    %c0_110 = arith.constant 0 : index
    %c0_111 = arith.constant 0 : index
    %155 = vector.load %arg5[%c2_109, %c0_110, %c0_111] : memref<9x128x128xf32, #tpu.memory_space<vmem>>, vector<1x128x128xf32>
    %156 = vector.shape_cast %155 : vector<1x128x128xf32> to vector<128x128xf32>
    %157 = vector.broadcast %3 : vector<1x128xf32> to vector<128x128xf32>
    %158 = arith.mulf %154, %157 : vector<128x128xf32>
    %cst_112 = arith.constant dense<0.000000e+00> : vector<128x128xf32>
    %159 = tpu.matmul %156, %158, %cst_112 {dimension_numbers = #tpu.dot_dimension_numbers<[1], [0], [0], [1], [0, 0, 1, 1], [], []>} : vector<128x128xf32>, vector<128x128xf32>, vector<128x128xf32> -> vector<128x128xf32>
    %160 = arith.addf %153, %159 : vector<128x128xf32>
    %c1_i32_113 = arith.constant 1 : i32
    %161 = tpu.dynamic_rotate %136 by %c1_i32_113 dim 1 : vector<128x128xf32>, i32 -> vector<128x128xf32>
    %c3_114 = arith.constant 3 : index
    %c0_115 = arith.constant 0 : index
    %c0_116 = arith.constant 0 : index
    %162 = vector.load %arg5[%c3_114, %c0_115, %c0_116] : memref<9x128x128xf32, #tpu.memory_space<vmem>>, vector<1x128x128xf32>
    %163 = vector.shape_cast %162 : vector<1x128x128xf32> to vector<128x128xf32>
    %164 = vector.broadcast %4 : vector<1x128xf32> to vector<128x128xf32>
    %165 = arith.mulf %161, %164 : vector<128x128xf32>
    %cst_117 = arith.constant dense<0.000000e+00> : vector<128x128xf32>
    %166 = tpu.matmul %163, %165, %cst_117 {dimension_numbers = #tpu.dot_dimension_numbers<[1], [0], [0], [1], [0, 0, 1, 1], [], []>} : vector<128x128xf32>, vector<128x128xf32>, vector<128x128xf32> -> vector<128x128xf32>
    %167 = arith.addf %160, %166 : vector<128x128xf32>
    %c127_i32_118 = arith.constant 127 : i32
    %168 = tpu.dynamic_rotate %136 by %c127_i32_118 dim 1 : vector<128x128xf32>, i32 -> vector<128x128xf32>
    %c5_119 = arith.constant 5 : index
    %c0_120 = arith.constant 0 : index
    %c0_121 = arith.constant 0 : index
    %169 = vector.load %arg5[%c5_119, %c0_120, %c0_121] : memref<9x128x128xf32, #tpu.memory_space<vmem>>, vector<1x128x128xf32>
    %170 = vector.shape_cast %169 : vector<1x128x128xf32> to vector<128x128xf32>
    %171 = vector.broadcast %5 : vector<1x128xf32> to vector<128x128xf32>
    %172 = arith.mulf %168, %171 : vector<128x128xf32>
    %cst_122 = arith.constant dense<0.000000e+00> : vector<128x128xf32>
    %173 = tpu.matmul %170, %172, %cst_122 {dimension_numbers = #tpu.dot_dimension_numbers<[1], [0], [0], [1], [0, 0, 1, 1], [], []>} : vector<128x128xf32>, vector<128x128xf32>, vector<128x128xf32> -> vector<128x128xf32>
    %174 = arith.addf %167, %173 : vector<128x128xf32>
    %c121_i32_123 = arith.constant 121 : i32
    %175 = tpu.dynamic_rotate %136 by %c121_i32_123 dim 1 : vector<128x128xf32>, i32 -> vector<128x128xf32>
    %c6_124 = arith.constant 6 : index
    %c0_125 = arith.constant 0 : index
    %c0_126 = arith.constant 0 : index
    %176 = vector.load %arg5[%c6_124, %c0_125, %c0_126] : memref<9x128x128xf32, #tpu.memory_space<vmem>>, vector<1x128x128xf32>
    %177 = vector.shape_cast %176 : vector<1x128x128xf32> to vector<128x128xf32>
    %178 = vector.broadcast %6 : vector<1x128xf32> to vector<128x128xf32>
    %179 = arith.mulf %175, %178 : vector<128x128xf32>
    %cst_127 = arith.constant dense<0.000000e+00> : vector<128x128xf32>
    %180 = tpu.matmul %177, %179, %cst_127 {dimension_numbers = #tpu.dot_dimension_numbers<[1], [0], [0], [1], [0, 0, 1, 1], [], []>} : vector<128x128xf32>, vector<128x128xf32>, vector<128x128xf32> -> vector<128x128xf32>
    %181 = arith.addf %174, %180 : vector<128x128xf32>
    %c120_i32_128 = arith.constant 120 : i32
    %182 = tpu.dynamic_rotate %136 by %c120_i32_128 dim 1 : vector<128x128xf32>, i32 -> vector<128x128xf32>
    %c7_129 = arith.constant 7 : index
    %c0_130 = arith.constant 0 : index
    %c0_131 = arith.constant 0 : index
    %183 = vector.load %arg5[%c7_129, %c0_130, %c0_131] : memref<9x128x128xf32, #tpu.memory_space<vmem>>, vector<1x128x128xf32>
    %184 = vector.shape_cast %183 : vector<1x128x128xf32> to vector<128x128xf32>
    %185 = vector.broadcast %7 : vector<1x128xf32> to vector<128x128xf32>
    %186 = arith.mulf %182, %185 : vector<128x128xf32>
    %cst_132 = arith.constant dense<0.000000e+00> : vector<128x128xf32>
    %187 = tpu.matmul %184, %186, %cst_132 {dimension_numbers = #tpu.dot_dimension_numbers<[1], [0], [0], [1], [0, 0, 1, 1], [], []>} : vector<128x128xf32>, vector<128x128xf32>, vector<128x128xf32> -> vector<128x128xf32>
    %188 = arith.addf %181, %187 : vector<128x128xf32>
    %c119_i32_133 = arith.constant 119 : i32
    %189 = tpu.dynamic_rotate %136 by %c119_i32_133 dim 1 : vector<128x128xf32>, i32 -> vector<128x128xf32>
    %c8_134 = arith.constant 8 : index
    %c0_135 = arith.constant 0 : index
    %c0_136 = arith.constant 0 : index
    %190 = vector.load %arg5[%c8_134, %c0_135, %c0_136] : memref<9x128x128xf32, #tpu.memory_space<vmem>>, vector<1x128x128xf32>
    %191 = vector.shape_cast %190 : vector<1x128x128xf32> to vector<128x128xf32>
    %192 = vector.broadcast %8 : vector<1x128xf32> to vector<128x128xf32>
    %193 = arith.mulf %189, %192 : vector<128x128xf32>
    %cst_137 = arith.constant dense<0.000000e+00> : vector<128x128xf32>
    %194 = tpu.matmul %191, %193, %cst_137 {dimension_numbers = #tpu.dot_dimension_numbers<[1], [0], [0], [1], [0, 0, 1, 1], [], []>} : vector<128x128xf32>, vector<128x128xf32>, vector<128x128xf32> -> vector<128x128xf32>
    %195 = arith.addf %188, %194 : vector<128x128xf32>
    %c0_138 = arith.constant 0 : index
    %c0_139 = arith.constant 0 : index
    %196 = vector.load %arg6[%c0_138, %c0_139] : memref<128x1xf32, #tpu.memory_space<vmem>>, vector<128x1xf32>
    %197 = vector.broadcast %196 : vector<128x1xf32> to vector<128x128xf32>
    %198 = arith.addf %195, %197 : vector<128x128xf32>
    %cst_140 = arith.constant 0.000000e+00 : f32
    %199 = vector.broadcast %cst_140 : f32 to vector<128x128xf32>
    %200 = arith.maximumf %198, %199 : vector<128x128xf32>
    %c4_141 = arith.constant 4 : index
    %c0_142 = arith.constant 0 : index
    %c0_143 = arith.constant 0 : index
    %201 = vector.load %arg7[%c4_141, %c0_142, %c0_143] : memref<9x128x128xf32, #tpu.memory_space<vmem>>, vector<1x128x128xf32>
    %202 = vector.shape_cast %201 : vector<1x128x128xf32> to vector<128x128xf32>
    %cst_144 = arith.constant dense<0.000000e+00> : vector<128x128xf32>
    %203 = tpu.matmul %202, %200, %cst_144 {dimension_numbers = #tpu.dot_dimension_numbers<[1], [0], [0], [1], [0, 0, 1, 1], [], []>} : vector<128x128xf32>, vector<128x128xf32>, vector<128x128xf32> -> vector<128x128xf32>
    %c9_i32_145 = arith.constant 9 : i32
    %204 = tpu.dynamic_rotate %200 by %c9_i32_145 dim 1 : vector<128x128xf32>, i32 -> vector<128x128xf32>
    %c0_146 = arith.constant 0 : index
    %c0_147 = arith.constant 0 : index
    %c0_148 = arith.constant 0 : index
    %205 = vector.load %arg7[%c0_146, %c0_147, %c0_148] : memref<9x128x128xf32, #tpu.memory_space<vmem>>, vector<1x128x128xf32>
    %206 = vector.shape_cast %205 : vector<1x128x128xf32> to vector<128x128xf32>
    %207 = vector.broadcast %1 : vector<1x128xf32> to vector<128x128xf32>
    %208 = arith.mulf %204, %207 : vector<128x128xf32>
    %cst_149 = arith.constant dense<0.000000e+00> : vector<128x128xf32>
    %209 = tpu.matmul %206, %208, %cst_149 {dimension_numbers = #tpu.dot_dimension_numbers<[1], [0], [0], [1], [0, 0, 1, 1], [], []>} : vector<128x128xf32>, vector<128x128xf32>, vector<128x128xf32> -> vector<128x128xf32>
    %210 = arith.addf %203, %209 : vector<128x128xf32>
    %c8_i32_150 = arith.constant 8 : i32
    %211 = tpu.dynamic_rotate %200 by %c8_i32_150 dim 1 : vector<128x128xf32>, i32 -> vector<128x128xf32>
    %c1_151 = arith.constant 1 : index
    %c0_152 = arith.constant 0 : index
    %c0_153 = arith.constant 0 : index
    %212 = vector.load %arg7[%c1_151, %c0_152, %c0_153] : memref<9x128x128xf32, #tpu.memory_space<vmem>>, vector<1x128x128xf32>
    %213 = vector.shape_cast %212 : vector<1x128x128xf32> to vector<128x128xf32>
    %214 = vector.broadcast %2 : vector<1x128xf32> to vector<128x128xf32>
    %215 = arith.mulf %211, %214 : vector<128x128xf32>
    %cst_154 = arith.constant dense<0.000000e+00> : vector<128x128xf32>
    %216 = tpu.matmul %213, %215, %cst_154 {dimension_numbers = #tpu.dot_dimension_numbers<[1], [0], [0], [1], [0, 0, 1, 1], [], []>} : vector<128x128xf32>, vector<128x128xf32>, vector<128x128xf32> -> vector<128x128xf32>
    %217 = arith.addf %210, %216 : vector<128x128xf32>
    %c7_i32_155 = arith.constant 7 : i32
    %218 = tpu.dynamic_rotate %200 by %c7_i32_155 dim 1 : vector<128x128xf32>, i32 -> vector<128x128xf32>
    %c2_156 = arith.constant 2 : index
    %c0_157 = arith.constant 0 : index
    %c0_158 = arith.constant 0 : index
    %219 = vector.load %arg7[%c2_156, %c0_157, %c0_158] : memref<9x128x128xf32, #tpu.memory_space<vmem>>, vector<1x128x128xf32>
    %220 = vector.shape_cast %219 : vector<1x128x128xf32> to vector<128x128xf32>
    %221 = vector.broadcast %3 : vector<1x128xf32> to vector<128x128xf32>
    %222 = arith.mulf %218, %221 : vector<128x128xf32>
    %cst_159 = arith.constant dense<0.000000e+00> : vector<128x128xf32>
    %223 = tpu.matmul %220, %222, %cst_159 {dimension_numbers = #tpu.dot_dimension_numbers<[1], [0], [0], [1], [0, 0, 1, 1], [], []>} : vector<128x128xf32>, vector<128x128xf32>, vector<128x128xf32> -> vector<128x128xf32>
    %224 = arith.addf %217, %223 : vector<128x128xf32>
    %c1_i32_160 = arith.constant 1 : i32
    %225 = tpu.dynamic_rotate %200 by %c1_i32_160 dim 1 : vector<128x128xf32>, i32 -> vector<128x128xf32>
    %c3_161 = arith.constant 3 : index
    %c0_162 = arith.constant 0 : index
    %c0_163 = arith.constant 0 : index
    %226 = vector.load %arg7[%c3_161, %c0_162, %c0_163] : memref<9x128x128xf32, #tpu.memory_space<vmem>>, vector<1x128x128xf32>
    %227 = vector.shape_cast %226 : vector<1x128x128xf32> to vector<128x128xf32>
    %228 = vector.broadcast %4 : vector<1x128xf32> to vector<128x128xf32>
    %229 = arith.mulf %225, %228 : vector<128x128xf32>
    %cst_164 = arith.constant dense<0.000000e+00> : vector<128x128xf32>
    %230 = tpu.matmul %227, %229, %cst_164 {dimension_numbers = #tpu.dot_dimension_numbers<[1], [0], [0], [1], [0, 0, 1, 1], [], []>} : vector<128x128xf32>, vector<128x128xf32>, vector<128x128xf32> -> vector<128x128xf32>
    %231 = arith.addf %224, %230 : vector<128x128xf32>
    %c127_i32_165 = arith.constant 127 : i32
    %232 = tpu.dynamic_rotate %200 by %c127_i32_165 dim 1 : vector<128x128xf32>, i32 -> vector<128x128xf32>
    %c5_166 = arith.constant 5 : index
    %c0_167 = arith.constant 0 : index
    %c0_168 = arith.constant 0 : index
    %233 = vector.load %arg7[%c5_166, %c0_167, %c0_168] : memref<9x128x128xf32, #tpu.memory_space<vmem>>, vector<1x128x128xf32>
    %234 = vector.shape_cast %233 : vector<1x128x128xf32> to vector<128x128xf32>
    %235 = vector.broadcast %5 : vector<1x128xf32> to vector<128x128xf32>
    %236 = arith.mulf %232, %235 : vector<128x128xf32>
    %cst_169 = arith.constant dense<0.000000e+00> : vector<128x128xf32>
    %237 = tpu.matmul %234, %236, %cst_169 {dimension_numbers = #tpu.dot_dimension_numbers<[1], [0], [0], [1], [0, 0, 1, 1], [], []>} : vector<128x128xf32>, vector<128x128xf32>, vector<128x128xf32> -> vector<128x128xf32>
    %238 = arith.addf %231, %237 : vector<128x128xf32>
    %c121_i32_170 = arith.constant 121 : i32
    %239 = tpu.dynamic_rotate %200 by %c121_i32_170 dim 1 : vector<128x128xf32>, i32 -> vector<128x128xf32>
    %c6_171 = arith.constant 6 : index
    %c0_172 = arith.constant 0 : index
    %c0_173 = arith.constant 0 : index
    %240 = vector.load %arg7[%c6_171, %c0_172, %c0_173] : memref<9x128x128xf32, #tpu.memory_space<vmem>>, vector<1x128x128xf32>
    %241 = vector.shape_cast %240 : vector<1x128x128xf32> to vector<128x128xf32>
    %242 = vector.broadcast %6 : vector<1x128xf32> to vector<128x128xf32>
    %243 = arith.mulf %239, %242 : vector<128x128xf32>
    %cst_174 = arith.constant dense<0.000000e+00> : vector<128x128xf32>
    %244 = tpu.matmul %241, %243, %cst_174 {dimension_numbers = #tpu.dot_dimension_numbers<[1], [0], [0], [1], [0, 0, 1, 1], [], []>} : vector<128x128xf32>, vector<128x128xf32>, vector<128x128xf32> -> vector<128x128xf32>
    %245 = arith.addf %238, %244 : vector<128x128xf32>
    %c120_i32_175 = arith.constant 120 : i32
    %246 = tpu.dynamic_rotate %200 by %c120_i32_175 dim 1 : vector<128x128xf32>, i32 -> vector<128x128xf32>
    %c7_176 = arith.constant 7 : index
    %c0_177 = arith.constant 0 : index
    %c0_178 = arith.constant 0 : index
    %247 = vector.load %arg7[%c7_176, %c0_177, %c0_178] : memref<9x128x128xf32, #tpu.memory_space<vmem>>, vector<1x128x128xf32>
    %248 = vector.shape_cast %247 : vector<1x128x128xf32> to vector<128x128xf32>
    %249 = vector.broadcast %7 : vector<1x128xf32> to vector<128x128xf32>
    %250 = arith.mulf %246, %249 : vector<128x128xf32>
    %cst_179 = arith.constant dense<0.000000e+00> : vector<128x128xf32>
    %251 = tpu.matmul %248, %250, %cst_179 {dimension_numbers = #tpu.dot_dimension_numbers<[1], [0], [0], [1], [0, 0, 1, 1], [], []>} : vector<128x128xf32>, vector<128x128xf32>, vector<128x128xf32> -> vector<128x128xf32>
    %252 = arith.addf %245, %251 : vector<128x128xf32>
    %c119_i32_180 = arith.constant 119 : i32
    %253 = tpu.dynamic_rotate %200 by %c119_i32_180 dim 1 : vector<128x128xf32>, i32 -> vector<128x128xf32>
    %c8_181 = arith.constant 8 : index
    %c0_182 = arith.constant 0 : index
    %c0_183 = arith.constant 0 : index
    %254 = vector.load %arg7[%c8_181, %c0_182, %c0_183] : memref<9x128x128xf32, #tpu.memory_space<vmem>>, vector<1x128x128xf32>
    %255 = vector.shape_cast %254 : vector<1x128x128xf32> to vector<128x128xf32>
    %256 = vector.broadcast %8 : vector<1x128xf32> to vector<128x128xf32>
    %257 = arith.mulf %253, %256 : vector<128x128xf32>
    %cst_184 = arith.constant dense<0.000000e+00> : vector<128x128xf32>
    %258 = tpu.matmul %255, %257, %cst_184 {dimension_numbers = #tpu.dot_dimension_numbers<[1], [0], [0], [1], [0, 0, 1, 1], [], []>} : vector<128x128xf32>, vector<128x128xf32>, vector<128x128xf32> -> vector<128x128xf32>
    %259 = arith.addf %252, %258 : vector<128x128xf32>
    %c0_185 = arith.constant 0 : index
    %c0_186 = arith.constant 0 : index
    %260 = vector.load %arg8[%c0_185, %c0_186] : memref<128x1xf32, #tpu.memory_space<vmem>>, vector<128x1xf32>
    %261 = vector.broadcast %260 : vector<128x1xf32> to vector<128x128xf32>
    %262 = arith.addf %259, %261 : vector<128x128xf32>
    %cst_187 = arith.constant 0.000000e+00 : f32
    %263 = vector.broadcast %cst_187 : f32 to vector<128x128xf32>
    %264 = arith.maximumf %262, %263 : vector<128x128xf32>
    %c0_188 = arith.constant 0 : index
    %c0_189 = arith.constant 0 : index
    %265 = vector.load %arg9[%c0_188, %c0_189] : memref<8x128xf32, #tpu.memory_space<vmem>>, vector<8x128xf32>
    %cst_190 = arith.constant dense<0.000000e+00> : vector<8x128xf32>
    %266 = tpu.matmul %265, %264, %cst_190 {dimension_numbers = #tpu.dot_dimension_numbers<[1], [0], [0], [1], [0, 0, 1, 1], [], []>} : vector<8x128xf32>, vector<128x128xf32>, vector<8x128xf32> -> vector<8x128xf32>
    %c0_191 = arith.constant 0 : index
    %c0_192 = arith.constant 0 : index
    %267 = vector.load %arg10[%c0_191, %c0_192] : memref<8x1xf32, #tpu.memory_space<vmem>>, vector<8x1xf32>
    %268 = vector.broadcast %267 : vector<8x1xf32> to vector<8x128xf32>
    %269 = arith.addf %266, %268 : vector<8x128xf32>
    %270 = vector.extract_strided_slice %269 {offsets = [0, 0], sizes = [1, 128], strides = [1, 1]} : vector<8x128xf32> to vector<1x128xf32>
    %271 = vector.extract_strided_slice %269 {offsets = [3, 0], sizes = [2, 128], strides = [1, 1]} : vector<8x128xf32> to vector<2x128xf32>
    %cst_193 = arith.constant 0.000000e+00 : f32
    %272 = vector.broadcast %cst_193 : f32 to vector<2x128xf32>
    %273 = arith.subf %272, %271 : vector<2x128xf32>
    %274 = math.exp %273 : vector<2x128xf32>
    %cst_194 = arith.constant 1.000000e+00 : f32
    %275 = vector.broadcast %cst_194 : f32 to vector<2x128xf32>
    %276 = arith.addf %275, %274 : vector<2x128xf32>
    %cst_195 = arith.constant 1.000000e+00 : f32
    %277 = vector.broadcast %cst_195 : f32 to vector<2x128xf32>
    %278 = arith.divf %277, %276 : vector<2x128xf32>
    %c0_196 = arith.constant 0 : index
    %c0_197 = arith.constant 0 : index
    %279 = vector.load %arg12[%c0_196, %c0_197] : memref<2x128xf32, #tpu.memory_space<vmem>>, vector<2x128xf32>
    %280 = vector.extract_strided_slice %269 {offsets = [1, 0], sizes = [2, 128], strides = [1, 1]} : vector<8x128xf32> to vector<2x128xf32>
    %281 = arith.addf %279, %280 : vector<2x128xf32>
    %cst_198 = arith.constant 5.000000e-01 : f32
    %282 = vector.broadcast %cst_198 : f32 to vector<2x128xf32>
    %283 = arith.mulf %282, %278 : vector<2x128xf32>
    %284 = arith.subf %281, %283 : vector<2x128xf32>
    %cst_199 = arith.constant 5.000000e-01 : f32
    %285 = vector.broadcast %cst_199 : f32 to vector<2x128xf32>
    %286 = arith.mulf %285, %278 : vector<2x128xf32>
    %287 = arith.addf %281, %286 : vector<2x128xf32>
    %cst_200 = arith.constant 0.000000e+00 : f32
    %288 = vector.broadcast %cst_200 : f32 to vector<3x128xf32>
    %289 = tpu.concatenate %270, %284, %287, %288 in 0 : vector<1x128xf32>, vector<2x128xf32>, vector<2x128xf32>, vector<3x128xf32> -> vector<8x128xf32>
    %c0_201 = arith.constant 0 : index
    %c0_202 = arith.constant 0 : index
    %290 = vector.load %arg13[%c0_201, %c0_202] : memref<8x128xf32, #tpu.memory_space<vmem>>, vector<8x128xf32>
    tpu.vector_store %arg13[%c0_201, %c0_202], %289 {strides = array<i32>} : memref<8x128xf32, #tpu.memory_space<vmem>>, vector<8x128xf32>,
    return
  }
}

</mosaic_0001>

<bundles_post_ra>
// kernel: tile.45
= control target key start
LH: loop header
LB: loop body
LE: loop exit
PB: predicated region body
PF: predicated region fallthrough
CT: control target
= control target key end

     0   :  { %s10_s10 = smov 3  ;;  %vm12_vm0 = vcmask 523264   ;;  %s29_s11 = smov 64   ;;  %vm19_vm1 = vcmask 1048064   ;;  %s49_s0 = inlined_call_operand.vmem [shape: f32[2,2,64], index: 0, kind: input, shape index: {}]   ;;  %s50_s1 = inlined_call_operand.vmem [shape: f32[2,128], index: 1, kind: output, shape index: {}]  }
   0x1   :  { %v27_v0 = vld [vmem:[%s49_s0 + $0x2] sm:$0x3]  ;;  %v8_v1 = vld [vmem:[%s49_s0] sm:$0x3]  ;;  %s15_s0 = smov 3 }
   0x2   :  { %7 = vst [vmem:[#allocation1 + $0x8] sm:$0x3] %v27_v0 }
   0x3   :  { %9 = vst [vmem:[#allocation1] sm:$0x3] %v8_v1 }
   0xa   :  { %v16_v2 = vld [vmem:[#allocation1 + $0x1] ss:$8 sm:%s15_s0]   ;;  %v11_v3 = vld [vmem:[#allocation1] ss:$8 sm:%s10_s10]  }
   0xb   :  { %17 = vrot.lane.b32.xlu0 %v16_v2, %s29_s11  ;;  %13 = vst.msk [vmem:[#allocation0] sm:$0x3] %vm12_vm0, %v11_v3  }
  0x7d   :  { %v18_v4 = vpop.permute.xlu0 %17  }
  0x7e   :  { %20 = vst.msk [vmem:[#allocation0] sm:$0x3] %vm19_vm1, %v18_v4  }
  0x85   :  { %v23_v5 = vld [vmem:[#allocation0] sm:$0x3] }
  0x86   :  { %26 = vst [vmem:[%s50_s1] sm:$0x3] %v23_v5 }

// kernel: squeeze.1
= control target key start
LH: loop header
LB: loop body
LE: loop exit
PB: predicated region body
PF: predicated region fallthrough
CT: control target
= control target key end

     0   :  { %s202_s0 = inlined_call_operand.vmem [shape: f32[128], index: 0, kind: input, shape index: {}]   ;;  %s203_s1 = inlined_call_operand.hbm [shape: f32[2,8,8], index: 1, kind: output, shape index: {}]  }
   0x1   :  { %v5_v0 = vld [vmem:[%s202_s0] sm:$0x1] }
   0x2   :  { %2 = vsyncpa [#allocation1], 0  ;;  %6 = vst [vmem:[#allocation2] sm:$0x1] %v5_v0  ;;  %s154_s0 = smov 104   ;;  %s155_s8 = smov 120  }
   0x3   :  { %s156_s9 = smov 88   ;;  %s157_s10 = smov 96   ;;  %vm8_vm0 = vcmask 64512  }
   0x4   :  { %s158_s11 = smov 112   ;;  %s159_s12 = smov 80  }
   0x5   :  { %s160_s13 = smov 64   ;;  %s161_s14 = smov 72  }
   0x6   :  { %s162_s15 = smov 56   ;;  %s163_s16 = smov 40  }
   0x7   :  { %s164_s17 = smov 48   ;;  %s165_s18 = smov 32  }
   0x8   :  { %s166_s19 = smov 16   ;;  %s167_s20 = smov 24  }
   0x9   :  { %v22_v1 = vld [vmem:[#allocation2] sm:$0x1]   ;;  %s168_s21 = smov 8   ;;  %s169_s22 = smov [#allocation0]  }
   0xa   :  { %v10_v2 = vld [vmem:[#allocation2] sm:$0x1]   ;;  %23 = vrot.lane.b32.xlu1 %v22_v1, %s154_s0  ;;  %s103_s23 = sshll.u32 %s169_s22, 4  ;;  %s105_s1 = sshll.u32 %s203_s1, 4  ;;  %s104_s23 = int_to_ptr.vmem [resolvable:$true] %s103_s23  ;;  %s106_s1 = int_to_ptr.hbm [resolvable:$true] %s105_s1 }
   0xb   :  { %11 = vrot.lane.b32.xlu0 %v10_v2, %s155_s8  ;;  %v34_v3 = vld [vmem:[#allocation2] sm:$0x1]  }
   0xc   :  { %35 = vrot.lane.b32.xlu2 %v34_v3, %s156_s9  ;;  %v28_v4 = vld [vmem:[#allocation2] sm:$0x1]  }
   0xd   :  { %v16_v5 = vld [vmem:[#allocation2] sm:$0x1]  }
   0xe   :  { %v40_v6 = vld [vmem:[#allocation2] sm:$0x1]  }
   0xf   :  { %v52_v7 = vld [vmem:[#allocation2] sm:$0x1]  }
  0x10   :  { %v46_v8 = vld [vmem:[#allocation2] sm:$0x1]  }
  0x11   :  { %v58_v9 = vld [vmem:[#allocation2] sm:$0x1]  }
  0x12   :  { %29 = vrot.lane.b32.xlu1 %v28_v4, %s157_s10  ;;  %v70_v10 = vld [vmem:[#allocation2] sm:$0x1]  }
  0x13   :  { %17 = vrot.lane.b32.xlu0 %v16_v5, %s158_s11  ;;  %v64_v11 = vld [vmem:[#allocation2] sm:$0x1]  }
  0x14   :  { %41 = vrot.lane.b32.xlu2 %v40_v6, %s159_s12  ;;  %v76_v12 = vld [vmem:[#allocation2] sm:$0x1]  }
  0x15   :  { %v88_v13 = vld [vmem:[#allocation2] sm:$0x1]  }
  0x16   :  { %v82_v14 = vld [vmem:[#allocation2] sm:$0x1]  }
  0x17   :  { %v94_v15 = vld [vmem:[#allocation2] sm:$0x1]  }
  0x18   :  { %v7_v21 = vld [vmem:[#allocation2] sm:$0x1]  }
  0x19   :  { %9 = vst.msk [vmem:[#allocation0] sm:$0x1] %vm8_vm0, %v7_v21  }
  0x1a   :  { %53 = vrot.lane.b32.xlu1 %v52_v7, %s160_s13 }
  0x1b   :  { %47 = vrot.lane.b32.xlu0 %v46_v8, %s161_s14 }
  0x1c   :  { %59 = vrot.lane.b32.xlu2 %v58_v9, %s162_s15 }
  0x22   :  { %71 = vrot.lane.b32.xlu1 %v70_v10, %s163_s16 }
  0x23   :  { %65 = vrot.lane.b32.xlu0 %v64_v11, %s164_s17 }
  0x24   :  { %77 = vrot.lane.b32.xlu2 %v76_v12, %s165_s18 }
  0x2a   :  { %89 = vrot.lane.b32.xlu1 %v88_v13, %s166_s19 }
  0x2b   :  { %83 = vrot.lane.b32.xlu0 %v82_v14, %s167_s20 }
  0x2c   :  { %95 = vrot.lane.b32.xlu2 %v94_v15, %s168_s21 }
  0x66   :  { %v36_v16 = vpop.permute.xlu2 %35  }
  0x67   :  { %39 = vst.msk [vmem:[#allocation0 + $0x5] sm:$0x1] %vm8_vm0, %v36_v16  }
  0x6e   :  { %v42_v17 = vpop.permute.xlu2 %41  }
  0x6f   :  { %45 = vst.msk [vmem:[#allocation0 + $0x6] sm:$0x1] %vm8_vm0, %v42_v17  }
  0x76   :  { %v60_v18 = vpop.permute.xlu2 %59  }
  0x77   :  { %63 = vst.msk [vmem:[#allocation0 + $0x9] sm:$0x1] %vm8_vm0, %v60_v18  }
  0x7c   :  { %v24_v19 = vpop.permute.xlu1 %23  }
  0x7d   :  { %v12_v20 = vpop.permute.xlu0 %11   ;;  %27 = vst.msk [vmem:[#allocation0 + $0x3] sm:$0x1] %vm8_vm0, %v24_v19  }
  0x7e   :  { %15 = vst.msk [vmem:[#allocation0 + $0x1] sm:$0x1] %vm8_vm0, %v12_v20   ;;  %v78_v22 = vpop.permute.xlu2 %77  }
  0x7f   :  { %81 = vst.msk [vmem:[#allocation0 + $0xc] sm:$0x1] %vm8_vm0, %v78_v22  }
  0x84   :  { %v30_v23 = vpop.permute.xlu1 %29  }
  0x85   :  { %v18_v24 = vpop.permute.xlu0 %17   ;;  %33 = vst.msk [vmem:[#allocation0 + $0x4] sm:$0x1] %vm8_vm0, %v30_v23  }
  0x86   :  { %21 = vst.msk [vmem:[#allocation0 + $0x2] sm:$0x1] %vm8_vm0, %v18_v24   ;;  %v96_v25 = vpop.permute.xlu2 %95  }
  0x87   :  { %99 = vst.msk [vmem:[#allocation0 + $0xf] sm:$0x1] %vm8_vm0, %v96_v25  }
  0x8c   :  { %v54_v26 = vpop.permute.xlu1 %53  }
  0x8d   :  { %v48_v27 = vpop.permute.xlu0 %47   ;;  %57 = vst.msk [vmem:[#allocation0 + $0x8] sm:$0x1] %vm8_vm0, %v54_v26  }
  0x8e   :  { %51 = vst.msk [vmem:[#allocation0 + $0x7] sm:$0x1] %vm8_vm0, %v48_v27  }
  0x94   :  { %v72_v28 = vpop.permute.xlu1 %71  }
  0x95   :  { %v66_v29 = vpop.permute.xlu0 %65   ;;  %75 = vst.msk [vmem:[#allocation0 + $0xb] sm:$0x1] %vm8_vm0, %v72_v28  }
  0x96   :  { %69 = vst.msk [vmem:[#allocation0 + $0xa] sm:$0x1] %vm8_vm0, %v66_v29  }
  0x9c   :  { %v90_v30 = vpop.permute.xlu1 %89  }
  0x9d   :  { %v84_v31 = vpop.permute.xlu0 %83   ;;  %93 = vst.msk [vmem:[#allocation0 + $0xe] sm:$0x1] %vm8_vm0, %v90_v30  }
  0x9e   :  { %87 = vst.msk [vmem:[#allocation0 + $0xd] sm:$0x1] %vm8_vm0, %v84_v31  }
  0x9f   :  { %108 = dma.vmem_to_hbm [thread:$0]  %s104_s23, 256, %s106_s1, [#allocation1]  }
  0xa0   :  { %152 = dma.done.wait [#allocation1], 256  }
  0xa1   :  { %153 = vsyncadd [#allocation1], 4294967040 }
  0xa2   :  { %111 = vsyncpa [#allocation1], 1 }

// kernel: ostrack_conv_head_forward.1
= control target key start
LH: loop header
LB: loop body
LE: loop exit
PB: predicated region body
PF: predicated region fallthrough
CT: control target
= control target key end

     0   :  { %18 = vsyncpa [#allocation3], 0  ;;  %s10402_s0 = inlined_call_operand.vmem [shape: f32[128,128], index: 0, kind: input, shape index: {}]   ;;  %s10403_s1 = inlined_call_operand.vmem [shape: f32[9,128,128], index: 1, kind: input, shape index: {}]   ;;  %s10404_s2 = inlined_call_operand.vmem [shape: f32[128,1], index: 2, kind: input, shape index: {}]   ;;  %s10405_s3 = inlined_call_operand.hbm [shape: f32[9,128,128], index: 3, kind: input, shape index: {}]   ;;  %s10406_s4 = inlined_call_operand.vmem [shape: f32[128,1], index: 4, kind: input, shape index: {}]   ;;  %s10407_s5 = inlined_call_operand.hbm [shape: f32[9,128,128], index: 5, kind: input, shape index: {}]   ;;  %s10408_s6 = inlined_call_operand.vmem [shape: f32[128,1], index: 6, kind: input, shape index: {}]   ;;  %s10409_s7 = inlined_call_operand.hbm [shape: f32[9,128,128], index: 7, kind: input, shape index: {}]   ;;  %s10410_s8 = inlined_call_operand.vmem [shape: f32[128,1], index: 8, kind: input, shape index: {}]   ;;  %s10411_s9 = inlined_call_operand.vmem [shape: f32[8,128], index: 9, kind: input, shape index: {}]   ;;  %s10412_s10 = inlined_call_operand.vmem [shape: f32[8,1], index: 10, kind: input, shape index: {}]   ;;  %s10413_s11 = inlined_call_operand.vmem [shape: f32[9,128], index: 11, kind: input, shape index: {}]   ;;  %s10414_s12 = inlined_call_operand.vmem [shape: f32[2,128], index: 12, kind: input, shape index: {}]   ;;  %s10415_s13 = inlined_call_operand.vmem [shape: f32[8,128], index: 13, kind: output, shape index: {}]  }
   0x1   :  { %19 = vsyncpa [#allocation5], 0  ;;  %s45_s27 = sshll.u32 %s10407_s5, 4  ;;  %s5899_s28 = smov [#allocation4]   ;;  %s46_s27 = int_to_ptr.hbm [resolvable:$true] %s45_s27 }
   0x2   :  { %s47_s29 = sshll.u32 %s5899_s28, 4  ;;  %s30_s15 = sshll.u32 %s10405_s3, 4  ;;  %s48_s29 = int_to_ptr.vmem [resolvable:$true] %s47_s29  ;;  %s31_s15 = int_to_ptr.hbm [resolvable:$true] %s30_s15 }
   0x3   :  { %s5900_s16 = smov 128   ;;  %s5901_s17 = smov 8  }
   0x4   :  { %53 = dma.hbm_to_vmem [thread:$0]  %s46_s27, 18432, %s48_s29, [#allocation5], %s5900_s16, %s5900_s16, %s5901_s17  }
   0x5   :  { %s5902_s18 = smov [#allocation2]   ;;  %s60_s22 = sshll.u32 %s10409_s7, 4  ;;  %s61_s22 = int_to_ptr.hbm [resolvable:$true] %s60_s22 }
   0x6   :  { %s32_s19 = sshll.u32 %s5902_s18, 4  ;;  %s5903_s5 = smov [#allocation6]   ;;  %s33_s19 = int_to_ptr.vmem [resolvable:$true] %s32_s19 }
   0x7   :  { %38 = dma.hbm_to_vmem [thread:$0]  %s31_s15, 18432, %s33_s19, [#allocation3], %s5900_s16, %s5900_s16, %s5901_s17  }
   0x8   :  { %s62_s23 = sshll.u32 %s5903_s5, 4  ;;  %s63_s23 = int_to_ptr.vmem [resolvable:$true] %s62_s23 }
   0x9   :  { %68 = dma.hbm_to_vmem [thread:$0]  %s61_s22, 18432, %s63_s23, [#allocation5], %s5900_s16, %s5900_s16, %s5901_s17  }
   0xa   :  { %5895 = dma.done.wait [#allocation3], 18432  }
   0xb   :  { %5896 = vsyncadd [#allocation3], 4294948864 }
   0xc   :  { %5897 = dma.done.wait [#allocation5], 36864  }
   0xd   :  { %5898 = vsyncadd [#allocation5], 4294930432  ;;  %v5997_v0 = vld [vmem:[%s10402_s0 + $0x78] sm:$0xff]  ;;  %v6002_v1 = vld [vmem:[%s10402_s0 + $0x68] sm:$0xff]  ;;  %s5904_s26 = smov 9   ;;  %s5906_s21 = smov 1  }
   0xe   :  { %162 = vrot.lane.b32.xlu0 %v5997_v0, %s5904_s26  ;;  %158 = vrot.lane.b32.xlu1 %v6002_v1, %s5904_s26  ;;  %v6012_v2 = vld [vmem:[%s10402_s0 + $0x70] sm:$0xff]  ;;  %v6017_v3 = vld [vmem:[%s10402_s0 + $0x58] sm:$0xff]  ;;  %s5907_s15 = smov 121   ;;  %s5908_s22 = smov 120   ;;  %vm5630_vm4 = vcmask 1040384   ;;  %vm5632_vm5 = vcmask 1042432  }
   0xf   :  { %262 = vmatpush.msra.mxu1 %v5997_v0  ;;  %v6022_v4 = vld [vmem:[%s10402_s0 + $0x60] sm:$0xff]  ;;  %154 = vrot.lane.b32.xlu2 %v6017_v3, %s5904_s26  ;;  %v6036_v5 = vld [vmem:[%s10402_s0 + $0x50] sm:$0xff]  ;;  %v6045_v6 = vld [vmem:[%s10402_s0 + $0x48] sm:$0xff]  ;;  %s5909_s5 = smov 127   ;;  %s5910_s7 = smov 119   ;;  %vm5634_vm6 = vcmask 1044480  }
  0x10   :  { %v6050_v7 = vld [vmem:[%s10402_s0 + $0x40] sm:$0xff]  ;;  %v6061_v8 = vld [vmem:[%s10402_s0 + $0x38] sm:$0xff]  ;;  %v6067_v9 = vld [vmem:[%s10402_s0 + $0x30] sm:$0xff] }
  0x11   :  { %263 = vmatpush.msra.mxu1 %v6012_v2  ;;  %v6075_v10 = vld [vmem:[%s10402_s0 + $0x28] sm:$0xff]  ;;  %v6081_v11 = vld [vmem:[%s10402_s0 + $0x20] sm:$0xff]  ;;  %v6091_v12 = vld [vmem:[%s10402_s0 + $0x18] sm:$0xff] }
  0x12   :  { %v6097_v13 = vld [vmem:[%s10402_s0 + $0x10] sm:$0xff]  ;;  %v6105_v14 = vld [vmem:[%s10402_s0 + $0x8] sm:$0xff]  ;;  %v6111_v15 = vld [vmem:[%s10402_s0] sm:$0xff]  ;;  %s5905_s0 = smov 7  }
  0x13   :  { %264 = vmatpush.msra.mxu1 %v6002_v1  ;;  %v6177_v19 = vld [vmem:[%s10413_s11] ss:$0 sm:$0xff]  ;;  %v6227_v50 = vld [vmem:[%s10413_s11 + $0x1] ss:$0 sm:$0xff]  ;;  %v6244_v58 = vld [vmem:[%s10413_s11 + $0x2] ss:$0 sm:$0xff] }
  0x14   :  { %v164_v54 = vld [vmem:[%s10403_s1] sm:$0xff]  ;;  %v165_v62 = vld [vmem:[%s10403_s1 + $0x8] sm:$0xff] }
  0x15   :  { %265 = vmatpush.msra.mxu1 %v6022_v4 }
  0x16   :  { %160 = vrot.lane.b32.xlu0 %v6012_v2, %s5904_s26  ;;  %156 = vrot.lane.b32.xlu1 %v6022_v4, %s5904_s26 }
  0x17   :  { %266 = vmatpush.msra.mxu1 %v6017_v3  ;;  %152 = vrot.lane.b32.xlu2 %v6036_v5, %s5904_s26 }
  0x19   :  { %267 = vmatpush.msra.mxu1 %v6036_v5 }
  0x1b   :  { %268 = vmatpush.msra.mxu1 %v6045_v6 }
  0x1d   :  { %269 = vmatpush.msra.mxu1 %v6050_v7 }
  0x1e   :  { %150 = vrot.lane.b32.xlu0 %v6045_v6, %s5904_s26  ;;  %148 = vrot.lane.b32.xlu1 %v6050_v7, %s5904_s26 }
  0x1f   :  { %270 = vmatpush.msra.mxu1 %v6061_v8  ;;  %146 = vrot.lane.b32.xlu2 %v6061_v8, %s5904_s26 }
  0x21   :  { %271 = vmatpush.msra.mxu1 %v6067_v9 }
  0x23   :  { %272 = vmatpush.msra.mxu1 %v6075_v10 }
  0x25   :  { %273 = vmatpush.msra.mxu1 %v6081_v11 }
  0x26   :  { %144 = vrot.lane.b32.xlu0 %v6067_v9, %s5904_s26  ;;  %142 = vrot.lane.b32.xlu1 %v6075_v10, %s5904_s26 }
  0x27   :  { %274 = vmatpush.msra.mxu1 %v6091_v12  ;;  %140 = vrot.lane.b32.xlu2 %v6081_v11, %s5904_s26 }
  0x29   :  { %275 = vmatpush.msra.mxu1 %v6097_v13 }
  0x2b   :  { %276 = vmatpush.msra.mxu1 %v6105_v14 }
  0x2d   :  { %277 = vmatpush.msra.mxu1 %v6111_v15 }
  0x2e   :  { %138 = vrot.lane.b32.xlu0 %v6091_v12, %s5904_s26  ;;  %136 = vrot.lane.b32.xlu1 %v6097_v13, %s5904_s26 }
  0x2f   :  { %134 = vrot.lane.b32.xlu2 %v6105_v14, %s5904_s26 }
  0x36   :  { %357 = vrot.lane.b32.xlu1 %v5997_v0, %s5901_s17  ;;  %132 = vrot.lane.b32.xlu0 %v6111_v15, %s5904_s26 }
  0x37   :  { %355 = vrot.lane.b32.xlu2 %v6012_v2, %s5901_s17 }
  0x3e   :  { %353 = vrot.lane.b32.xlu1 %v6002_v1, %s5901_s17  ;;  %504 = vrot.lane.b32.xlu0 %v5997_v0, %s5905_s0 }
  0x3f   :  { %502 = vrot.lane.b32.xlu2 %v6012_v2, %s5905_s0 }
  0x46   :  { %500 = vrot.lane.b32.xlu1 %v6002_v1, %s5905_s0  ;;  %351 = vrot.lane.b32.xlu0 %v6022_v4, %s5901_s17 }
  0x47   :  { %349 = vrot.lane.b32.xlu2 %v6017_v3, %s5901_s17 }
  0x4e   :  { %347 = vrot.lane.b32.xlu1 %v6036_v5, %s5901_s17  ;;  %498 = vrot.lane.b32.xlu0 %v6022_v4, %s5905_s0 }
  0x4f   :  { %496 = vrot.lane.b32.xlu2 %v6017_v3, %s5905_s0 }
  0x56   :  { %345 = vrot.lane.b32.xlu1 %v6045_v6, %s5901_s17  ;;  %651 = vrot.lane.b32.xlu0 %v5997_v0, %s5906_s21 }
  0x57   :  { %494 = vrot.lane.b32.xlu2 %v6036_v5, %s5905_s0 }
  0x5e   :  { %343 = vrot.lane.b32.xlu1 %v6050_v7, %s5901_s17  ;;  %649 = vrot.lane.b32.xlu0 %v6012_v2, %s5906_s21 }
  0x5f   :  { %492 = vrot.lane.b32.xlu2 %v6045_v6, %s5905_s0 }
  0x66   :  { %341 = vrot.lane.b32.xlu1 %v6061_v8, %s5901_s17  ;;  %647 = vrot.lane.b32.xlu0 %v6002_v1, %s5906_s21 }
  0x67   :  { %490 = vrot.lane.b32.xlu2 %v6050_v7, %s5905_s0 }
  0x69   :  { %v155_v16 = vpop.permute.xlu2 %154 }
  0x6a   :  { %v192_v30 = vmul.f32 %v6177_v19, %v155_v16 }
  0x6e   :  { %339 = vrot.lane.b32.xlu1 %v6067_v9, %s5901_s17  ;;  %645 = vrot.lane.b32.xlu0 %v6022_v4, %s5906_s21 }
  0x6f   :  { %488 = vrot.lane.b32.xlu2 %v6061_v8, %s5905_s0 }
  0x71   :  { %v153_v17 = vpop.permute.xlu2 %152 }
  0x72   :  { %v191_v33 = vmul.f32 %v6177_v19, %v153_v17 }
  0x76   :  { %337 = vrot.lane.b32.xlu1 %v6075_v10, %s5901_s17  ;;  %643 = vrot.lane.b32.xlu0 %v6017_v3, %s5906_s21 }
  0x77   :  { %486 = vrot.lane.b32.xlu2 %v6067_v9, %s5905_s0 }
  0x79   :  { %v147_v18 = vpop.permute.xlu2 %146 }
  0x7a   :  { %v188_v37 = vmul.f32 %v6177_v19, %v147_v18  ;;  %v5643_v18 = vld [vmem:[%s10403_s1 + $0x200] sm:$0xff] }
  0x7b   :  { %278 = vmatmul.f32.vlgmr.msra.gmra.mxu1 %v5643_v18 }
  0x7e   :  { %335 = vrot.lane.b32.xlu1 %v6081_v11, %s5901_s17  ;;  %641 = vrot.lane.b32.xlu0 %v6036_v5, %s5906_s21 }
  0x7f   :  { %484 = vrot.lane.b32.xlu2 %v6075_v10, %s5905_s0 }
  0x80   :  { %v163_v20 = vpop.permute.xlu0 %162  ;;  %v159_v21 = vpop.permute.xlu1 %158 }
  0x81   :  { %v196_v22 = vmul.f32 %v6177_v19, %v163_v20  ;;  %v141_v23 = vpop.permute.xlu2 %140  ;;  %v194_v27 = vmul.f32 %v6177_v19, %v159_v21 }
  0x82   :  { %v185_v42 = vmul.f32 %v6177_v19, %v141_v23 }
  0x83   :  { %197 = vmatpush.msra.mxu0 %v196_v22  ;;  %v166_v22 = vld [vmem:[%s10403_s1 + $0x10] sm:$0xff] }
  0x86   :  { %333 = vrot.lane.b32.xlu1 %v6091_v12, %s5901_s17  ;;  %639 = vrot.lane.b32.xlu0 %v6045_v6, %s5906_s21 }
  0x87   :  { %482 = vrot.lane.b32.xlu2 %v6081_v11, %s5905_s0 }
  0x88   :  { %v161_v24 = vpop.permute.xlu0 %160  ;;  %v157_v25 = vpop.permute.xlu1 %156 }
  0x89   :  { %v195_v26 = vmul.f32 %v6177_v19, %v161_v24  ;;  %v135_v28 = vpop.permute.xlu2 %134  ;;  %v193_v29 = vmul.f32 %v6177_v19, %v157_v25 }
  0x8a   :  { %v182_v48 = vmul.f32 %v6177_v19, %v135_v28 }
  0x8b   :  { %198 = vmatpush.msra.mxu0 %v195_v26  ;;  %v5644_v26 = vld [vmem:[%s10403_s1 + $0x208] sm:$0xff] }
  0x8c   :  { %281 = vmatmul.f32.gmra.mxu1 %v5644_v26 }
  0x8d   :  { %199 = vmatpush.msra.mxu0 %v194_v27 }
  0x8e   :  { %331 = vrot.lane.b32.xlu1 %v6097_v13, %s5901_s17  ;;  %637 = vrot.lane.b32.xlu0 %v6050_v7, %s5906_s21 }
  0x8f   :  { %200 = vmatpush.msra.mxu0 %v193_v29  ;;  %480 = vrot.lane.b32.xlu2 %v6091_v12, %s5905_s0 }
  0x90   :  { %v151_v31 = vpop.permute.xlu0 %150  ;;  %v149_v32 = vpop.permute.xlu1 %148 }
  0x91   :  { %201 = vmatpush.msra.mxu0 %v192_v30  ;;  %v190_v34 = vmul.f32 %v6177_v19, %v151_v31  ;;  %v356_v35 = vpop.permute.xlu2 %355  ;;  %v189_v36 = vmul.f32 %v6177_v19, %v149_v32  ;;  %v167_v30 = vld [vmem:[%s10403_s1 + $0x18] sm:$0xff] }
  0x92   :  { %v391_v56 = vmul.f32 %v6227_v50, %v356_v35  ;;  %v6292_v35 = vld [vmem:[%s10413_s11 + $0x3] ss:$0 sm:$0xff] }
  0x93   :  { %202 = vmatpush.msra.mxu0 %v191_v33 }
  0x95   :  { %203 = vmatpush.msra.mxu0 %v190_v34 }
  0x96   :  { %329 = vrot.lane.b32.xlu1 %v6105_v14, %s5901_s17  ;;  %635 = vrot.lane.b32.xlu0 %v6061_v8, %s5906_s21 }
  0x97   :  { %204 = vmatpush.msra.mxu0 %v189_v36  ;;  %478 = vrot.lane.b32.xlu2 %v6097_v13, %s5905_s0 }
  0x98   :  { %v145_v38 = vpop.permute.xlu0 %144  ;;  %v143_v39 = vpop.permute.xlu1 %142 }
  0x99   :  { %205 = vmatpush.msra.mxu0 %v188_v37  ;;  %v187_v40 = vmul.f32 %v6177_v19, %v145_v38  ;;  %v186_v41 = vmul.f32 %v6177_v19, %v143_v39  ;;  %v503_v43 = vpop.permute.xlu2 %502  ;;  %v5645_v37 = vld [vmem:[%s10403_s1 + $0x210] sm:$0xff] }
  0x9a   :  { %v538_v16 = vmul.f32 %v6244_v58, %v503_v43  ;;  %284 = vmatmul.f32.gmra.mxu1 %v5645_v37 }
  0x9b   :  { %206 = vmatpush.msra.mxu0 %v187_v40 }
  0x9d   :  { %207 = vmatpush.msra.mxu0 %v186_v41 }
  0x9e   :  { %327 = vrot.lane.b32.xlu1 %v6111_v15, %s5901_s17  ;;  %633 = vrot.lane.b32.xlu0 %v6067_v9, %s5906_s21 }
  0x9f   :  { %208 = vmatpush.msra.mxu0 %v185_v42  ;;  %476 = vrot.lane.b32.xlu2 %v6105_v14, %s5905_s0  ;;  %v168_v42 = vld [vmem:[%s10403_s1 + $0x20] sm:$0xff] }
  0xa0   :  { %v139_v44 = vpop.permute.xlu0 %138  ;;  %v137_v45 = vpop.permute.xlu1 %136 }
  0xa1   :  { %v184_v46 = vmul.f32 %v6177_v19, %v139_v44  ;;  %v183_v47 = vmul.f32 %v6177_v19, %v137_v45  ;;  %v350_v49 = vpop.permute.xlu2 %349 }
  0xa2   :  { %v388_v24 = vmul.f32 %v6227_v50, %v350_v49 }
  0xa3   :  { %209 = vmatpush.msra.mxu0 %v184_v46  ;;  %v5646_v46 = vld [vmem:[%s10403_s1 + $0x218] sm:$0xff] }
  0xa4   :  { %287 = vmatmul.f32.gmra.mxu1 %v5646_v46  ;;  %v5652_v46 = vld [vmem:[%s10403_s1 + $0x248] sm:$0xff] }
  0xa5   :  { %210 = vmatpush.msra.mxu0 %v183_v47 }
  0xa6   :  { %474 = vrot.lane.b32.xlu1 %v6111_v15, %s5905_s0  ;;  %631 = vrot.lane.b32.xlu0 %v6075_v10, %s5906_s21 }
  0xa7   :  { %211 = vmatpush.msra.mxu0 %v182_v48  ;;  %629 = vrot.lane.b32.xlu2 %v6081_v11, %s5906_s21 }
  0xa8   :  { %v358_v51 = vpop.permute.xlu1 %357  ;;  %v133_v52 = vpop.permute.xlu0 %132 }
  0xa9   :  { %v181_v53 = vmul.f32 %v6177_v19, %v133_v52  ;;  %v392_v55 = vmul.f32 %v6227_v50, %v358_v51  ;;  %v497_v57 = vpop.permute.xlu2 %496  ;;  %v169_v51 = vld [vmem:[%s10403_s1 + $0x28] sm:$0xff] }
  0xaa   :  { %v535_v32 = vmul.f32 %v6244_v58, %v497_v57 }
  0xab   :  { %212 = vmatpush.msra.mxu0 %v181_v53  ;;  %393 = vmatpush.msra.mxu2 %v392_v55  ;;  %v5647_v55 = vld [vmem:[%s10403_s1 + $0x220] sm:$0xff] }
  0xac   :  { %213 = vmatmul.f32.vlgmr.msra.gmra.mxu0 %v164_v54  ;;  %290 = vmatmul.f32.gmra.mxu1 %v5647_v55 }
  0xad   :  { %394 = vmatpush.msra.mxu2 %v391_v56 }
  0xae   :  { %627 = vrot.lane.b32.xlu0 %v6091_v12, %s5906_s21  ;;  %625 = vrot.lane.b32.xlu1 %v6097_v13, %s5906_s21 }
  0xaf   :  { %623 = vrot.lane.b32.xlu2 %v6105_v14, %s5906_s21 }
  0xb0   :  { %v354_v59 = vpop.permute.xlu1 %353  ;;  %v505_v60 = vpop.permute.xlu0 %504 }
  0xb1   :  { %v539_v61 = vmul.f32 %v6244_v58, %v505_v60  ;;  %v390_v63 = vmul.f32 %v6227_v50, %v354_v59  ;;  %v495_v17 = vpop.permute.xlu2 %494  ;;  %v170_v60 = vld [vmem:[%s10403_s1 + $0x30] sm:$0xff] }
  0xb2   :  { %v534_v33 = vmul.f32 %v6244_v58, %v495_v17 }
  0xb3   :  { %540 = vmatpush.msra.mxu3 %v539_v61  ;;  %395 = vmatpush.msra.mxu2 %v390_v63 }
  0xb4   :  { %216 = vmatmul.f32.gmra.mxu0 %v165_v62 }
  0xb5   :  { %541 = vmatpush.msra.mxu3 %v538_v16  ;;  %v5648_v16 = vld [vmem:[%s10403_s1 + $0x228] sm:$0xff] }
  0xb6   :  { %621 = vrot.lane.b32.xlu0 %v6111_v15, %s5906_s21  ;;  %945 = vrot.lane.b32.xlu1 %v5997_v0, %s5907_s15 }
  0xb7   :  { %943 = vrot.lane.b32.xlu2 %v6012_v2, %s5907_s15  ;;  %293 = vmatmul.f32.gmra.mxu1 %v5648_v16 }
  0xb8   :  { %v501_v19 = vpop.permute.xlu1 %500  ;;  %v352_v20 = vpop.permute.xlu0 %351 }
  0xb9   :  { %v389_v21 = vmul.f32 %v6227_v50, %v352_v20  ;;  %v537_v23 = vmul.f32 %v6244_v58, %v501_v19  ;;  %v493_v25 = vpop.permute.xlu2 %492  ;;  %v171_v20 = vld [vmem:[%s10403_s1 + $0x38] sm:$0xff] }
  0xba   :  { %v533_v36 = vmul.f32 %v6244_v58, %v493_v25 }
  0xbb   :  { %396 = vmatpush.msra.mxu2 %v389_v21  ;;  %542 = vmatpush.msra.mxu3 %v537_v23  ;;  %v5649_v23 = vld [vmem:[%s10403_s1 + $0x230] sm:$0xff] }
  0xbc   :  { %219 = vmatmul.f32.gmra.mxu0 %v166_v22 }
  0xbd   :  { %397 = vmatpush.msra.mxu2 %v388_v24 }
  0xbe   :  { %1092 = vrot.lane.b32.xlu0 %v5997_v0, %s5908_s22  ;;  %798 = vrot.lane.b32.xlu1 %v5997_v0, %s5909_s5 }
  0xbf   :  { %941 = vrot.lane.b32.xlu2 %v6002_v1, %s5907_s15  ;;  %296 = vmatmul.f32.gmra.mxu1 %v5649_v23  ;;  %v178_v23 = vld [vmem:[%s10403_s1 + $0x70] sm:$0xff] }
  0xc0   :  { %v348_v27 = vpop.permute.xlu1 %347  ;;  %v499_v28 = vpop.permute.xlu0 %498 }
  0xc1   :  { %v536_v29 = vmul.f32 %v6244_v58, %v499_v28  ;;  %v387_v31 = vmul.f32 %v6227_v50, %v348_v27  ;;  %v491_v34 = vpop.permute.xlu2 %490  ;;  %v172_v27 = vld [vmem:[%s10403_s1 + $0x40] sm:$0xff] }
  0xc2   :  { %v532_v40 = vmul.f32 %v6244_v58, %v491_v34  ;;  %v173_v34 = vld [vmem:[%s10403_s1 + $0x48] sm:$0xff] }
  0xc3   :  { %543 = vmatpush.msra.mxu3 %v536_v29  ;;  %398 = vmatpush.msra.mxu2 %v387_v31  ;;  %v5650_v31 = vld [vmem:[%s10403_s1 + $0x238] sm:$0xff] }
  0xc4   :  { %222 = vmatmul.f32.gmra.mxu0 %v167_v30 }
  0xc5   :  { %544 = vmatpush.msra.mxu3 %v535_v32 }
  0xc6   :  { %1090 = vrot.lane.b32.xlu0 %v6012_v2, %s5908_s22  ;;  %796 = vrot.lane.b32.xlu1 %v6012_v2, %s5909_s5 }
  0xc7   :  { %545 = vmatpush.msra.mxu3 %v534_v33  ;;  %939 = vrot.lane.b32.xlu2 %v6022_v4, %s5907_s15 }
  0xc8   :  { %v346_v38 = vpop.permute.xlu1 %345  ;;  %v652_v39 = vpop.permute.xlu0 %651  ;;  %299 = vmatmul.f32.gmra.mxu1 %v5650_v31  ;;  %v5661_v31 = vld [vmem:[%s10403_s1 + $0x90] sm:$0xff] }
  0xc9   :  { %v686_v41 = vmul.f32 %v6292_v35, %v652_v39  ;;  %v386_v43 = vmul.f32 %v6227_v50, %v346_v38  ;;  %546 = vmatpush.msra.mxu3 %v533_v36  ;;  %v489_v44 = vpop.permute.xlu2 %488  ;;  %v5651_v39 = vld [vmem:[%s10403_s1 + $0x240] sm:$0xff] }
  0xca   :  { %v531_v45 = vmul.f32 %v6244_v58, %v489_v44 }
  0xcb   :  { %687 = vmatpush.msrb.mxu0 %v686_v41  ;;  %399 = vmatpush.msra.mxu2 %v386_v43  ;;  %v174_v43 = vld [vmem:[%s10403_s1 + $0x50] sm:$0xff] }
  0xcc   :  { %225 = vmatmul.f32.gmra.mxu0 %v168_v42  ;;  %547 = vmatpush.msra.mxu3 %v532_v40 }
  0xce   :  { %1088 = vrot.lane.b32.xlu0 %v6002_v1, %s5908_s22  ;;  %794 = vrot.lane.b32.xlu1 %v6002_v1, %s5909_s5 }
  0xcf   :  { %548 = vmatpush.msra.mxu3 %v531_v45  ;;  %937 = vrot.lane.b32.xlu2 %v6017_v3, %s5907_s15 }
  0xd0   :  { %v344_v47 = vpop.permute.xlu1 %343  ;;  %v650_v48 = vpop.permute.xlu0 %649  ;;  %302 = vmatmul.f32.gmra.mxu1 %v5651_v39 }
  0xd1   :  { %v685_v49 = vmul.f32 %v6292_v35, %v650_v48  ;;  %v385_v52 = vmul.f32 %v6227_v50, %v344_v47  ;;  %v487_v53 = vpop.permute.xlu2 %486 }
  0xd2   :  { %v530_v54 = vmul.f32 %v6244_v58, %v487_v53  ;;  %v5653_v53 = vld [vmem:[%s10403_s1 + $0x250] sm:$0xff] }
  0xd3   :  { %688 = vmatpush.msrb.mxu0 %v685_v49  ;;  %400 = vmatpush.msra.mxu2 %v385_v52 }
  0xd4   :  { %228 = vmatmul.f32.gmra.mxu0 %v169_v51  ;;  %549 = vmatpush.msra.mxu3 %v530_v54  ;;  %v175_v51 = vld [vmem:[%s10403_s1 + $0x58] sm:$0xff] }
  0xd6   :  { %1086 = vrot.lane.b32.xlu0 %v6022_v4, %s5908_s22  ;;  %792 = vrot.lane.b32.xlu1 %v6022_v4, %s5909_s5 }
  0xd7   :  { %935 = vrot.lane.b32.xlu2 %v6036_v5, %s5907_s15 }
  0xd8   :  { %v342_v56 = vpop.permute.xlu1 %341  ;;  %v648_v57 = vpop.permute.xlu0 %647  ;;  %305 = vmatmul.f32.gmra.mxu1 %v5652_v46  ;;  %v6520_v46 = vld [vmem:[%s10413_s11 + $0x7] ss:$0 sm:$0xff] }
  0xd9   :  { %v684_v59 = vmul.f32 %v6292_v35, %v648_v57  ;;  %v384_v61 = vmul.f32 %v6227_v50, %v342_v56  ;;  %v485_v62 = vpop.permute.xlu2 %484  ;;  %v176_v57 = vld [vmem:[%s10403_s1 + $0x60] sm:$0xff] }
  0xda   :  { %v529_v63 = vmul.f32 %v6244_v58, %v485_v62 }
  0xdb   :  { %689 = vmatpush.msrb.mxu0 %v684_v59  ;;  %401 = vmatpush.msra.mxu2 %v384_v61  ;;  %v5654_v61 = vld [vmem:[%s10403_s1 + $0x258] sm:$0xff] }
  0xdc   :  { %231 = vmatmul.f32.gmra.mxu0 %v170_v60  ;;  %550 = vmatpush.msra.mxu3 %v529_v63 }
  0xde   :  { %1084 = vrot.lane.b32.xlu0 %v6017_v3, %s5908_s22  ;;  %1239 = vrot.lane.b32.xlu1 %v5997_v0, %s5910_s7 }
  0xdf   :  { %790 = vrot.lane.b32.xlu2 %v6017_v3, %s5909_s5 }
  0xe0   :  { %v340_v17 = vpop.permute.xlu1 %339  ;;  %v646_v18 = vpop.permute.xlu0 %645  ;;  %308 = vmatmul.f32.gmra.mxu1 %v5653_v53  ;;  %v5663_v53 = vld [vmem:[%s10403_s1 + $0xa0] sm:$0xff] }
  0xe1   :  { %v683_v19 = vmul.f32 %v6292_v35, %v646_v18  ;;  %v383_v21 = vmul.f32 %v6227_v50, %v340_v17  ;;  %v483_v22 = vpop.permute.xlu2 %482  ;;  %v177_v17 = vld [vmem:[%s10403_s1 + $0x68] sm:$0xff]  ;;  %v5659_v18 = vld [vmem:[%s10403_s1 + $0x80] sm:$0xff] }
  0xe2   :  { %v528_v0 = vmul.f32 %v6244_v58, %v483_v22 }
  0xe3   :  { %690 = vmatpush.msrb.mxu0 %v683_v19  ;;  %402 = vmatpush.msra.mxu2 %v383_v21 }
  0xe4   :  { %234 = vmatmul.f32.gmra.mxu0 %v171_v20  ;;  %551 = vmatpush.msra.mxu3 %v528_v0 }
  0xe6   :  { %933 = vrot.lane.b32.xlu0 %v6045_v6, %s5907_s15  ;;  %1082 = vrot.lane.b32.xlu1 %v6036_v5, %s5908_s22 }
  0xe7   :  { %1237 = vrot.lane.b32.xlu2 %v6012_v2, %s5910_s7 }
  0xe8   :  { %v338_v24 = vpop.permute.xlu1 %337  ;;  %v644_v25 = vpop.permute.xlu0 %643  ;;  %311 = vmatmul.f32.gmra.mxu1 %v5654_v61 }
  0xe9   :  { %v682_v26 = vmul.f32 %v6292_v35, %v644_v25  ;;  %v382_v28 = vmul.f32 %v6227_v50, %v338_v24  ;;  %v481_v29 = vpop.permute.xlu2 %480  ;;  %v5675_v25 = vld [vmem:[%s10403_s1 + $0x100] sm:$0xff] }
  0xea   :  { %v527_v30 = vmul.f32 %v6244_v58, %v481_v29 }
  0xeb   :  { %691 = vmatpush.msrb.mxu0 %v682_v26  ;;  %403 = vmatpush.msra.mxu2 %v382_v28  ;;  %v5656_v26 = vld [vmem:[%s10403_s1 + $0x268] sm:$0xff] }
  0xec   :  { %237 = vmatmul.f32.gmra.mxu0 %v172_v27  ;;  %552 = vmatpush.msra.mxu3 %v527_v30  ;;  %v179_v30 = vld [vmem:[%s10403_s1 + $0x78] sm:$0xff] }
  0xee   :  { %788 = vrot.lane.b32.xlu0 %v6036_v5, %s5909_s5  ;;  %931 = vrot.lane.b32.xlu1 %v6050_v7, %s5907_s15 }
  0xef   :  { %1080 = vrot.lane.b32.xlu2 %v6045_v6, %s5908_s22 }
  0xf0   :  { %v336_v32 = vpop.permute.xlu1 %335  ;;  %v642_v2 = vpop.permute.xlu0 %641 }
  0xf1   :  { %v681_v33 = vmul.f32 %v6292_v35, %v642_v2  ;;  %v381_v36 = vmul.f32 %v6227_v50, %v336_v32  ;;  %v479_v37 = vpop.permute.xlu2 %478 }
  0xf2   :  { %v526_v38 = vmul.f32 %v6244_v58, %v479_v37 }
  0xf3   :  { %692 = vmatpush.msrb.mxu0 %v681_v33  ;;  %404 = vmatpush.msra.mxu2 %v381_v36  ;;  %v5657_v36 = vld [vmem:[%s10403_s1 + $0x270] sm:$0xff] }
  0xf4   :  { %240 = vmatmul.f32.gmra.mxu0 %v173_v34  ;;  %553 = vmatpush.msra.mxu3 %v526_v38  ;;  %v6491_v34 = vld [vmem:[%s10413_s11 + $0x6] ss:$0 sm:$0xff] }
  0xf6   :  { %1235 = vrot.lane.b32.xlu0 %v6002_v1, %s5910_s7  ;;  %786 = vrot.lane.b32.xlu1 %v6045_v6, %s5909_s5 }
  0xf7   :  { %929 = vrot.lane.b32.xlu2 %v6061_v8, %s5907_s15 }
  0xf8   :  { %v334_v40 = vpop.permute.xlu1 %333  ;;  %v640_v41 = vpop.permute.xlu0 %639 }
  0xf9   :  { %v680_v42 = vmul.f32 %v6292_v35, %v640_v41  ;;  %v380_v44 = vmul.f32 %v6227_v50, %v334_v40  ;;  %v477_v1 = vpop.permute.xlu2 %476  ;;  %v5662_v41 = vld [vmem:[%s10403_s1 + $0x98] sm:$0xff] }
  0xfa   :  { %v525_v45 = vmul.f32 %v6244_v58, %v477_v1  ;;  %v5677_v1 = vld [vmem:[%s10403_s1 + $0x110] sm:$0xff] }
  0xfb   :  { %693 = vmatpush.msrb.mxu0 %v680_v42  ;;  %405 = vmatpush.msra.mxu2 %v380_v44  ;;  %v5691_v42 = vld [vmem:[%s10403_s1 + $0x180] sm:$0xff] }
  0xfc   :  { %243 = vmatmul.f32.gmra.mxu0 %v174_v43  ;;  %554 = vmatpush.msra.mxu3 %v525_v45 }
  0xfe   :  { %1078 = vrot.lane.b32.xlu0 %v6050_v7, %s5908_s22  ;;  %1233 = vrot.lane.b32.xlu1 %v6022_v4, %s5910_s7 }
  0xff   :  { %784 = vrot.lane.b32.xlu2 %v6050_v7, %s5909_s5 }
 0x100   :  { %v332_v47 = vpop.permute.xlu1 %331  ;;  %v638_v48 = vpop.permute.xlu0 %637 }
 0x101   :  { %v679_v49 = vmul.f32 %v6292_v35, %v638_v48  ;;  %v379_v52 = vmul.f32 %v6227_v50, %v332_v47  ;;  %v630_v4 = vpop.permute.xlu2 %629  ;;  %v5658_v48 = vld [vmem:[%s10403_s1 + $0x278] sm:$0xff] }
 0x102   :  { %v675_v24 = vmul.f32 %v6292_v35, %v630_v4 }
 0x103   :  { %694 = vmatpush.msrb.mxu0 %v679_v49  ;;  %406 = vmatpush.msra.mxu2 %v379_v52 }
 0x104   :  { %246 = vmatmul.f32.gmra.mxu0 %v175_v51 }
 0x106   :  { %927 = vrot.lane.b32.xlu0 %v6067_v9, %s5907_s15  ;;  %1076 = vrot.lane.b32.xlu1 %v6061_v8, %s5908_s22 }
 0x107   :  { %1231 = vrot.lane.b32.xlu2 %v6017_v3, %s5910_s7 }
 0x108   :  { %v330_v54 = vpop.permute.xlu1 %329  ;;  %v636_v55 = vpop.permute.xlu0 %635 }
 0x109   :  { %v678_v56 = vmul.f32 %v6292_v35, %v636_v55  ;;  %v378_v59 = vmul.f32 %v6227_v50, %v330_v54  ;;  %v624_v60 = vpop.permute.xlu2 %623  ;;  %v5692_v54 = vld [vmem:[%s10403_s1 + $0x188] sm:$0xff] }
 0x10a   :  { %v672_v2 = vmul.f32 %v6292_v35, %v624_v60 }
 0x10b   :  { %695 = vmatpush.msrb.mxu0 %v678_v56  ;;  %407 = vmatpush.msra.mxu2 %v378_v59 }
 0x10c   :  { %249 = vmatmul.f32.gmra.mxu0 %v176_v57  ;;  %v5678_v57 = vld [vmem:[%s10403_s1 + $0x118] sm:$0xff] }
 0x10e   :  { %782 = vrot.lane.b32.xlu0 %v6061_v8, %s5909_s5  ;;  %925 = vrot.lane.b32.xlu1 %v6075_v10, %s5907_s15 }
 0x10f   :  { %1074 = vrot.lane.b32.xlu2 %v6067_v9, %s5908_s22 }
 0x110   :  { %v328_v62 = vpop.permute.xlu1 %327  ;;  %v634_v63 = vpop.permute.xlu0 %633 }
 0x111   :  { %v377_v16 = vmul.f32 %v6227_v50, %v328_v62  ;;  %v677_v3 = vmul.f32 %v6292_v35, %v634_v63  ;;  %v944_v19 = vpop.permute.xlu2 %943  ;;  %v5655_v50 = vld [vmem:[%s10403_s1 + $0x260] sm:$0xff] }
 0x112   :  { %314 = vmatmul.f32.gmra.mxu1 %v5655_v50  ;;  %v979_v44 = vmul.f32 %v6491_v34, %v944_v19 }
 0x113   :  { %408 = vmatpush.msra.mxu2 %v377_v16  ;;  %696 = vmatpush.msrb.mxu0 %v677_v3  ;;  %v5664_v3 = vld [vmem:[%s10403_s1 + $0xa8] sm:$0xff] }
 0x114   :  { %252 = vmatmul.f32.gmra.mxu0 %v177_v17  ;;  %409 = vmatmul.f32.vlgmr.msra.gmra.mxu2 %v5659_v18  ;;  %v5693_v17 = vld [vmem:[%s10403_s1 + $0x190] sm:$0xff]  ;;  %v5679_v18 = vld [vmem:[%s10403_s1 + $0x120] sm:$0xff] }
 0x116   :  { %1229 = vrot.lane.b32.xlu0 %v6036_v5, %s5910_s7  ;;  %780 = vrot.lane.b32.xlu1 %v6067_v9, %s5909_s5  ;;  %v5660_v5 = vld [vmem:[%s10403_s1 + $0x88] sm:$0xff] }
 0x117   :  { %923 = vrot.lane.b32.xlu2 %v6081_v11, %s5907_s15 }
 0x118   :  { %v475_v20 = vpop.permute.xlu1 %474  ;;  %v632_v21 = vpop.permute.xlu0 %631 }
 0x119   :  { %v524_v22 = vmul.f32 %v6244_v58, %v475_v20  ;;  %v676_v0 = vmul.f32 %v6292_v35, %v632_v21  ;;  %v942_v58 = vpop.permute.xlu2 %941 }
 0x11a   :  { %317 = vmatmul.f32.gmra.mxu1 %v5656_v26 }
 0x11b   :  { %555 = vmatpush.msra.mxu3 %v524_v22  ;;  %697 = vmatpush.msrb.mxu0 %v676_v0  ;;  %v5665_v0 = vld [vmem:[%s10403_s1 + $0xb0] sm:$0xff] }
 0x11c   :  { %255 = vmatmul.f32.gmra.mxu0 %v178_v23  ;;  %412 = vmatmul.f32.gmra.mxu2 %v5660_v5  ;;  %v5694_v23 = vld [vmem:[%s10403_s1 + $0x198] sm:$0xff] }
 0x11d   :  { %556 = vmatmul.f32.vlgmr.msra.gmra.mxu3 %v5675_v25  ;;  %698 = vmatpush.msrb.mxu0 %v675_v24 }
 0x11e   :  { %1072 = vrot.lane.b32.xlu0 %v6075_v10, %s5908_s22  ;;  %1227 = vrot.lane.b32.xlu1 %v6045_v6, %s5910_s7  ;;  %v5676_v6 = vld [vmem:[%s10403_s1 + $0x108] sm:$0xff] }
 0x11f   :  { %778 = vrot.lane.b32.xlu2 %v6075_v10, %s5909_s5 }
 0x120   :  { %v628_v27 = vpop.permute.xlu0 %627  ;;  %v626_v28 = vpop.permute.xlu1 %625 }
 0x121   :  { %v674_v29 = vmul.f32 %v6292_v35, %v628_v27  ;;  %v673_v32 = vmul.f32 %v6292_v35, %v626_v28  ;;  %v940_v33 = vpop.permute.xlu2 %939  ;;  %v5666_v28 = vld [vmem:[%s10403_s1 + $0xb8] sm:$0xff] }
 0x122   :  { %320 = vmatmul.f32.gmra.mxu1 %v5657_v36  ;;  %v977_v47 = vmul.f32 %v6491_v34, %v940_v33 }
 0x123   :  { %699 = vmatpush.msrb.mxu0 %v674_v29  ;;  %v5695_v29 = vld [vmem:[%s10403_s1 + $0x1a0] sm:$0xff] }
 0x124   :  { %258 = vmatmul.f32.gmra.mxu0 %v179_v30  ;;  %415 = vmatmul.f32.gmra.mxu2 %v5661_v31 }
 0x125   :  { %559 = vmatmul.f32.gmra.mxu3 %v5676_v6  ;;  %700 = vmatpush.msrb.mxu0 %v673_v32  ;;  %v5681_v32 = vld [vmem:[%s10403_s1 + $0x130] sm:$0xff] }
 0x126   :  { %921 = vrot.lane.b32.xlu0 %v6091_v12, %s5907_s15  ;;  %1070 = vrot.lane.b32.xlu1 %v6081_v11, %s5908_s22 }
 0x127   :  { %701 = vmatpush.msrb.mxu0 %v672_v2  ;;  %1225 = vrot.lane.b32.xlu2 %v6050_v7, %s5910_s7  ;;  %v6525_v7 = vld [vmem:[%s10413_s11 + $0x5] ss:$0 sm:$0xff]  ;;  %v6613_v2 = vld [vmem:[%s10413_s11 + $0x8] ss:$0 sm:$0xff] }
 0x128   :  { %v622_v37 = vpop.permute.xlu0 %621  ;;  %v946_v38 = vpop.permute.xlu1 %945 }
 0x129   :  { %v6500_v39 = vpop.f32.mrf.mxu0  ;;  %v671_v40 = vmul.f32 %v6292_v35, %v622_v37  ;;  %v980_v43 = vmul.f32 %v6491_v34, %v946_v38  ;;  %v978_v35 = vmul.f32 %v6491_v34, %v942_v58  ;;  %v938_v45 = vpop.permute.xlu2 %937 }
 0x12a   :  { %323 = vmatmul.f32.gmra.mxu1 %v5658_v48  ;;  %v976_v56 = vmul.f32 %v6491_v34, %v938_v45  ;;  %v5697_v48 = vld [vmem:[%s10403_s1 + $0x1b0] sm:$0xff] }
 0x12b   :  { %702 = vmatpush.msrb.mxu0 %v671_v40  ;;  %981 = vmatpush.msrb.mxu2 %v980_v43  ;;  %v5667_v40 = vld [vmem:[%s10403_s1 + $0xc0] sm:$0xff]  ;;  %v5682_v43 = vld [vmem:[%s10403_s1 + $0x138] sm:$0xff] }
 0x12c   :  { %418 = vmatmul.f32.gmra.mxu2 %v5662_v41  ;;  %703 = vmatmul.f32.vlgmr.msrb.gmra.mxu0 %v5691_v42  ;;  %v5696_v41 = vld [vmem:[%s10403_s1 + $0x1a8] sm:$0xff] }
 0x12d   :  { %562 = vmatmul.f32.gmra.mxu3 %v5677_v1  ;;  %982 = vmatpush.msrb.mxu2 %v979_v44 }
 0x12e   :  { %776 = vrot.lane.b32.xlu0 %v6081_v11, %s5909_s5  ;;  %919 = vrot.lane.b32.xlu1 %v6097_v13, %s5907_s15 }
 0x12f   :  { %983 = vmatpush.msrb.mxu2 %v978_v35  ;;  %1068 = vrot.lane.b32.xlu2 %v6091_v12, %s5908_s22 }
 0x130   :  { %v1093_v49 = vpop.permute.xlu0 %1092  ;;  %v799_v51 = vpop.permute.xlu1 %798 }
 0x131   :  { %v6535_v52 = vpop.f32.mrf.mxu0  ;;  %v1127_v4 = vmul.f32 %v6520_v46, %v1093_v49  ;;  %v833_v55 = vmul.f32 %v6525_v7, %v799_v51  ;;  %984 = vmatpush.msrb.mxu2 %v977_v47  ;;  %v936_v59 = vpop.permute.xlu2 %935  ;;  %v5668_v47 = vld [vmem:[%s10403_s1 + $0xc8] sm:$0xff] }
 0x132   :  { %v975_v60 = vmul.f32 %v6491_v34, %v936_v59 }
 0x133   :  { %1128 = vmatpush.msrb.mxu3 %v1127_v4  ;;  %834 = vmatpush.msrb.mxu1 %v833_v55 }
 0x134   :  { %421 = vmatmul.f32.gmra.mxu2 %v5663_v53  ;;  %706 = vmatmul.f32.gmra.mxu0 %v5692_v54 }
 0x135   :  { %565 = vmatmul.f32.gmra.mxu3 %v5678_v57  ;;  %985 = vmatpush.msrb.mxu2 %v976_v56  ;;  %v5669_v56 = vld [vmem:[%s10403_s1 + $0xd0] sm:$0xff]  ;;  %v5698_v57 = vld [vmem:[%s10403_s1 + $0x1b8] sm:$0xff] }
 0x136   :  { %1223 = vrot.lane.b32.xlu0 %v6061_v8, %s5910_s7  ;;  %774 = vrot.lane.b32.xlu1 %v6091_v12, %s5909_s5 }
 0x137   :  { %986 = vmatpush.msrb.mxu2 %v975_v60  ;;  %917 = vrot.lane.b32.xlu2 %v6105_v14, %s5907_s15 }
 0x138   :  { %v1091_v61 = vpop.permute.xlu0 %1090  ;;  %v797_v62 = vpop.permute.xlu1 %796 }
 0x139   :  { %v6556_v63 = vpop.f32.mrf.mxu0  ;;  %v1126_v16 = vmul.f32 %v6520_v46, %v1091_v61  ;;  %v832_v8 = vmul.f32 %v6525_v7, %v797_v62  ;;  %v791_v19 = vpop.permute.xlu2 %790 }
 0x13a   :  { %v829_v31 = vmul.f32 %v6525_v7, %v791_v19 }
 0x13b   :  { %1129 = vmatpush.msrb.mxu3 %v1126_v16  ;;  %835 = vmatpush.msrb.mxu1 %v832_v8  ;;  %v5699_v8 = vld [vmem:[%s10403_s1 + $0x1c0] sm:$0xff] }
 0x13c   :  { %424 = vmatmul.f32.gmra.mxu2 %v5664_v3  ;;  %709 = vmatmul.f32.gmra.mxu0 %v5693_v17  ;;  %v5670_v17 = vld [vmem:[%s10403_s1 + $0xd8] sm:$0xff] }
 0x13d   :  { %568 = vmatmul.f32.gmra.mxu3 %v5679_v18 }
 0x13e   :  { %1066 = vrot.lane.b32.xlu0 %v6097_v13, %s5908_s22  ;;  %1221 = vrot.lane.b32.xlu1 %v6067_v9, %s5910_s7  ;;  %v5680_v9 = vld [vmem:[%s10403_s1 + $0x128] sm:$0xff] }
 0x13f   :  { %772 = vrot.lane.b32.xlu2 %v6097_v13, %s5909_s5 }
 0x140   :  { %v1089_v50 = vpop.permute.xlu0 %1088  ;;  %v795_v20 = vpop.permute.xlu1 %794 }
 0x141   :  { %v6575_v21 = vpop.f32.mrf.mxu0  ;;  %v1125_v22 = vmul.f32 %v6520_v46, %v1089_v50  ;;  %v831_v5 = vmul.f32 %v6525_v7, %v795_v20  ;;  %v1238_v24 = vpop.permute.xlu2 %1237  ;;  %v5685_v50 = vld [vmem:[%s10403_s1 + $0x150] sm:$0xff] }
 0x142   :  { %v1273_v42 = vmul.f32 %v6613_v2, %v1238_v24  ;;  %v5671_v24 = vld [vmem:[%s10403_s1 + $0xe0] sm:$0xff] }
 0x143   :  { %1130 = vmatpush.msrb.mxu3 %v1125_v22  ;;  %836 = vmatpush.msrb.mxu1 %v831_v5 }
 0x144   :  { %427 = vmatmul.f32.gmra.mxu2 %v5665_v0  ;;  %712 = vmatmul.f32.gmra.mxu0 %v5694_v23 }
 0x145   :  { %571 = vmatmul.f32.gmra.mxu3 %v5680_v9 }
 0x146   :  { %915 = vrot.lane.b32.xlu0 %v6111_v15, %s5907_s15  ;;  %1064 = vrot.lane.b32.xlu1 %v6105_v14, %s5908_s22 }
 0x147   :  { %1219 = vrot.lane.b32.xlu2 %v6075_v10, %s5910_s7 }
 0x148   :  { %v1087_v25 = vpop.permute.xlu0 %1086  ;;  %v793_v58 = vpop.permute.xlu1 %792 }
 0x149   :  { %v6594_v26 = vpop.f32.mrf.mxu0  ;;  %v1124_v27 = vmul.f32 %v6520_v46, %v1087_v25  ;;  %v830_v30 = vmul.f32 %v6525_v7, %v793_v58  ;;  %v1081_v6 = vpop.permute.xlu2 %1080  ;;  %v5700_v25 = vld [vmem:[%s10403_s1 + $0x1c8] sm:$0xff] }
 0x14a   :  { %v1121_v51 = vmul.f32 %v6520_v46, %v1081_v6  ;;  %v5672_v6 = vld [vmem:[%s10403_s1 + $0xe8] sm:$0xff] }
 0x14b   :  { %1131 = vmatpush.msrb.mxu3 %v1124_v27  ;;  %837 = vmatpush.msrb.mxu1 %v830_v30  ;;  %v5686_v27 = vld [vmem:[%s10403_s1 + $0x158] sm:$0xff] }
 0x14c   :  { %430 = vmatmul.f32.gmra.mxu2 %v5666_v28  ;;  %715 = vmatmul.f32.gmra.mxu0 %v5695_v29 }
 0x14d   :  { %574 = vmatmul.f32.gmra.mxu3 %v5681_v32  ;;  %838 = vmatpush.msrb.mxu1 %v829_v31 }
 0x14e   :  { %770 = vrot.lane.b32.xlu0 %v6105_v14, %s5909_s5  ;;  %1062 = vrot.lane.b32.xlu1 %v6111_v15, %s5908_s22 }
 0x14f   :  { %1217 = vrot.lane.b32.xlu2 %v6081_v11, %s5910_s7 }
 0x150   :  { %v1085_v10 = vpop.permute.xlu0 %1084  ;;  %v1240_v33 = vpop.permute.xlu1 %1239 }
 0x151   :  { %v6619_v36 = vpop.f32.mrf.mxu0  ;;  %v1274_v37 = vmul.f32 %v6613_v2, %v1240_v33  ;;  %v1123_v38 = vmul.f32 %v6520_v46, %v1085_v10  ;;  %v930_v44 = vpop.permute.xlu2 %929  ;;  %v5701_v10 = vld [vmem:[%s10403_s1 + $0x1d0] sm:$0xff] }
 0x152   :  { %v972_v59 = vmul.f32 %v6491_v34, %v930_v44  ;;  %v5673_v44 = vld [vmem:[%s10403_s1 + $0xf0] sm:$0xff] }
 0x153   :  { %1132 = vmatpush.msrb.mxu3 %v1123_v38  ;;  %1275 = vmatpush.msra.mxu0 %v1274_v37  ;;  %v5687_v37 = vld [vmem:[%s10403_s1 + $0x160] sm:$0xff] }
 0x154   :  { %433 = vmatmul.f32.gmra.mxu2 %v5667_v40  ;;  %718 = vmatmul.f32.gmra.mxu0 %v5696_v41 }
 0x155   :  { %577 = vmatmul.f32.gmra.mxu3 %v5682_v43  ;;  %1276 = vmatpush.msra.mxu0 %v1273_v42 }
 0x156   :  { %768 = vrot.lane.b32.xlu0 %v6111_v15, %s5909_s5  ;;  %1215 = vrot.lane.b32.xlu1 %v6091_v12, %s5910_s7  ;;  %v5683_v12 = vld [vmem:[%s10403_s1 + $0x140] sm:$0xff] }
 0x157   :  { %1213 = vrot.lane.b32.xlu2 %v6097_v13, %s5910_s7 }
 0x158   :  { %v934_v1 = vpop.permute.xlu0 %933  ;;  %v1083_v35 = vpop.permute.xlu1 %1082 }
 0x159   :  { %v6639_v11 = vpop.f32.mrf.mxu0  ;;  %v974_v45 = vmul.f32 %v6491_v34, %v934_v1  ;;  %v1122_v49 = vmul.f32 %v6520_v46, %v1083_v35  ;;  %v785_v4 = vpop.permute.xlu2 %784  ;;  %v5702_v1 = vld [vmem:[%s10403_s1 + $0x1d8] sm:$0xff] }
 0x15a   :  { %v826_v19 = vmul.f32 %v6525_v7, %v785_v4 }
 0x15b   :  { %987 = vmatpush.msrb.mxu2 %v974_v45  ;;  %1133 = vmatpush.msrb.mxu3 %v1122_v49 }
 0x15c   :  { %436 = vmatmul.f32.gmra.mxu2 %v5668_v47  ;;  %721 = vmatmul.f32.gmra.mxu0 %v5697_v48  ;;  %v5688_v47 = vld [vmem:[%s10403_s1 + $0x168] sm:$0xff] }
 0x15d   :  { %580 = vmatmul.f32.gmra.mxu3 %v5683_v12 }
 0x15e   :  { %1211 = vrot.lane.b32.xlu0 %v6105_v14, %s5910_s7  ;;  %1209 = vrot.lane.b32.xlu1 %v6111_v15, %s5910_s7  ;;  %v5684_v15 = vld [vmem:[%s10403_s1 + $0x148] sm:$0xff] }
 0x15f   :  { %1134 = vmatpush.msrb.mxu3 %v1121_v51 }
 0x160   :  { %v789_v13 = vpop.permute.xlu0 %788  ;;  %v932_v53 = vpop.permute.xlu1 %931 }
 0x161   :  { %v6659_v54 = vpop.f32.mrf.mxu0  ;;  %v828_v55 = vmul.f32 %v6525_v7, %v789_v13  ;;  %v973_v14 = vmul.f32 %v6491_v34, %v932_v53  ;;  %v1232_v60 = vpop.permute.xlu2 %1231  ;;  %v5674_v13 = vld [vmem:[%s10403_s1 + $0xf8] sm:$0xff]  ;;  %v5703_v53 = vld [vmem:[%s10403_s1 + $0x1e0] sm:$0xff] }
 0x162   :  { %v1270_v58 = vmul.f32 %v6613_v2, %v1232_v60 }
 0x163   :  { %839 = vmatpush.msrb.mxu1 %v828_v55  ;;  %988 = vmatpush.msrb.mxu2 %v973_v14 }
 0x164   :  { %439 = vmatmul.f32.gmra.mxu2 %v5669_v56  ;;  %724 = vmatmul.f32.gmra.mxu0 %v5698_v57  ;;  %v5689_v57 = vld [vmem:[%s10403_s1 + $0x170] sm:$0xff] }
 0x165   :  { %583 = vmatmul.f32.gmra.mxu3 %v5684_v15  ;;  %989 = vmatpush.msrb.mxu2 %v972_v59 }
 0x168   :  { %v1236_v61 = vpop.permute.xlu0 %1235  ;;  %v787_v62 = vpop.permute.xlu1 %786 }
 0x169   :  { %v1272_v16 = vmul.f32 %v6613_v2, %v1236_v61  ;;  %v6674_v3 = vpop.f32.mrf.mxu0  ;;  %v827_v18 = vmul.f32 %v6525_v7, %v787_v62  ;;  %v1075_v20 = vpop.permute.xlu2 %1074 }
 0x16a   :  { %v1118_v38 = vmul.f32 %v6520_v46, %v1075_v20 }
 0x16b   :  { %1277 = vmatpush.msra.mxu0 %v1272_v16  ;;  %840 = vmatpush.msrb.mxu1 %v827_v18  ;;  %v5704_v16 = vld [vmem:[%s10403_s1 + $0x1e8] sm:$0xff] }
 0x16c   :  { %442 = vmatmul.f32.gmra.mxu2 %v5670_v17  ;;  %727 = vmatmul.f32.gmra.mxu0 %v5699_v8  ;;  %v5690_v8 = vld [vmem:[%s10403_s1 + $0x178] sm:$0xff] }
 0x16d   :  { %586 = vmatmul.f32.gmra.mxu3 %v5685_v50  ;;  %841 = vmatpush.msrb.mxu1 %v826_v19 }
 0x170   :  { %v1079_v22 = vpop.permute.xlu0 %1078  ;;  %v1234_v0 = vpop.permute.xlu1 %1233 }
 0x171   :  { %v6687_v23 = vpop.f32.mrf.mxu0  ;;  %v1271_v5 = vmul.f32 %v6613_v2, %v1234_v0  ;;  %v1120_v9 = vmul.f32 %v6520_v46, %v1079_v22  ;;  %v924_v28 = vpop.permute.xlu2 %923  ;;  %v5705_v0 = vld [vmem:[%s10403_s1 + $0x1f0] sm:$0xff] }
 0x172   :  { %v969_v45 = vmul.f32 %v6491_v34, %v924_v28 }
 0x173   :  { %1135 = vmatpush.msrb.mxu3 %v1120_v9  ;;  %1278 = vmatpush.msra.mxu0 %v1271_v5 }
 0x174   :  { %445 = vmatmul.f32.gmra.mxu2 %v5671_v24  ;;  %730 = vmatmul.f32.gmra.mxu0 %v5700_v25 }
 0x175   :  { %589 = vmatmul.f32.gmra.mxu3 %v5686_v27  ;;  %1279 = vmatpush.msra.mxu0 %v1270_v58 }
 0x178   :  { %v928_v29 = vpop.permute.xlu0 %927  ;;  %v1077_v30 = vpop.permute.xlu1 %1076 }
 0x179   :  { %v6701_v31 = vpop.f32.mrf.mxu0  ;;  %v971_v32 = vmul.f32 %v6491_v34, %v928_v29  ;;  %v1119_v33 = vmul.f32 %v6520_v46, %v1077_v30  ;;  %v779_v40 = vpop.permute.xlu2 %778  ;;  %v5706_v30 = vld [vmem:[%s10403_s1 + $0x1f8] sm:$0xff] }
 0x17a   :  { %10416 = vst [vmem:[#allocation9_spill] sm:$0xff] %v6701_v31  ;;  %v823_v56 = vmul.f32 %v6525_v7, %v779_v40 }
 0x17b   :  { %990 = vmatpush.msrb.mxu2 %v971_v32  ;;  %1136 = vmatpush.msrb.mxu3 %v1119_v33  ;;  %v5911_v33 = vmov 0  }
 0x17c   :  { %448 = vmatmul.f32.gmra.mxu2 %v5672_v6  ;;  %733 = vmatmul.f32.gmra.mxu0 %v5701_v10  ;;  %v1370_v10 = vld [vmem:[%s10404_s2 + $0x70] sm:$0xff] }
 0x17d   :  { %592 = vmatmul.f32.gmra.mxu3 %v5687_v37  ;;  %5785 = vset.pattern.permute.xlu0 %v5911_v33 }
 0x17e   :  { %1137 = vmatpush.msrb.mxu3 %v1118_v38  ;;  %1444 = vperm.xlu0 %5785, %v1370_v10   ;;  %v6773_v38 = vpop.f32.mrf.mxu1  ;;  %v1364_v10 = vld [vmem:[%s10404_s2 + $0x40] sm:$0xff] }
 0x17f   :  { %5786 = vset.pattern.permute.xlu1 %v5911_v33  ;;  %5784 = vset.pattern.permute.xlu2 %v5911_v33  ;;  %v1356_v33 = vld [vmem:[%s10404_s2] sm:$0xff] }
 0x180   :  { %v783_v41 = vpop.permute.xlu0 %782  ;;  %v926_v42 = vpop.permute.xlu1 %925 }
 0x181   :  { %v825_v43 = vmul.f32 %v6525_v7, %v783_v41  ;;  %v970_v35 = vmul.f32 %v6491_v34, %v926_v42  ;;  %v6727_v48 = vpop.f32.mrf.mxu0  ;;  %v1226_v49 = vpop.permute.xlu2 %1225 }
 0x182   :  { %10417 = vst [vmem:[#allocation10_spill] sm:$0xff] %v6727_v48  ;;  %v1267_v17 = vmul.f32 %v6613_v2, %v1226_v49  ;;  %v5750_v48 = vld [vmem:[%s10403_s1 + $0x3d8] sm:$0xff] }
 0x183   :  { %842 = vmatpush.msrb.mxu1 %v825_v43  ;;  %991 = vmatpush.msrb.mxu2 %v970_v35 }
 0x184   :  { %451 = vmatmul.f32.gmra.mxu2 %v5673_v44  ;;  %736 = vmatmul.f32.gmra.mxu0 %v5702_v1 }
 0x185   :  { %595 = vmatmul.f32.gmra.mxu3 %v5688_v47  ;;  %992 = vmatpush.msrb.mxu2 %v969_v45  ;;  %v1365_v45 = vld [vmem:[%s10404_s2 + $0x48] sm:$0xff] }
 0x186   :  { %1419 = vperm.xlu0 %5785, %v1365_v45  }
 0x188   :  { %v1230_v12 = vpop.permute.xlu0 %1229  ;;  %v781_v51 = vpop.permute.xlu1 %780 }
 0x189   :  { %v1269_v4 = vmul.f32 %v6613_v2, %v1230_v12  ;;  %v824_v55 = vmul.f32 %v6525_v7, %v781_v51  ;;  %v1069_v14 = vpop.permute.xlu2 %1068  ;;  %v6741_v59 = vpop.f32.mrf.mxu0 }
 0x18a   :  { %10418 = vst [vmem:[#allocation11_spill] sm:$0xff] %v6741_v59  ;;  %v1115_v9 = vmul.f32 %v6520_v46, %v1069_v14 }
 0x18b   :  { %1280 = vmatpush.msra.mxu0 %v1269_v4  ;;  %843 = vmatpush.msrb.mxu1 %v824_v55 }
 0x18c   :  { %454 = vmatmul.f32.gmra.mxu2 %v5674_v13  ;;  %739 = vmatmul.f32.gmra.mxu0 %v5703_v53  ;;  %v6788_v13 = vpop.f32.mrf.mxu1 }
 0x18d   :  { %598 = vmatmul.f32.gmra.mxu3 %v5689_v57  ;;  %844 = vmatpush.msrb.mxu1 %v823_v56  ;;  %v1369_v56 = vld [vmem:[%s10404_s2 + $0x68] sm:$0xff]  ;;  %v1362_v57 = vld [vmem:[%s10404_s2 + $0x30] sm:$0xff] }
 0x18e   :  { %1439 = vperm.xlu1 %5786, %v1369_v56   ;;  %1404 = vperm.xlu0 %5785, %v1362_v57  }
 0x190   :  { %v1073_v15 = vpop.permute.xlu0 %1072  ;;  %v1228_v60 = vpop.permute.xlu1 %1227 }
 0x191   :  { %v1268_v61 = vmul.f32 %v6613_v2, %v1228_v60  ;;  %v1117_v62 = vmul.f32 %v6520_v46, %v1073_v15  ;;  %v918_v18 = vpop.permute.xlu2 %917  ;;  %v6752_v19 = vpop.f32.mrf.mxu0 }
 0x192   :  { %10419 = vst [vmem:[#allocation12_spill] sm:$0xff] %v6752_v19  ;;  %v966_v6 = vmul.f32 %v6491_v34, %v918_v18 }
 0x193   :  { %1138 = vmatpush.msrb.mxu3 %v1117_v62  ;;  %1281 = vmatpush.msra.mxu0 %v1268_v61 }
 0x194   :  { %742 = vmatmul.f32.gmra.mxu0 %v5704_v16 }
 0x195   :  { %601 = vmatmul.f32.gmra.mxu3 %v5690_v8  ;;  %1282 = vmatpush.msra.mxu0 %v1267_v17  ;;  %v5723_v8 = vld [vmem:[%s10403_s1 + $0x300] sm:$0xff] }
 0x197   :  { %v6760_v25 = vpop.f32.mrf.mxu2 }
 0x198   :  { %v922_v50 = vpop.permute.xlu0 %921  ;;  %v1071_v20 = vpop.permute.xlu1 %1070 }
 0x199   :  { %v968_v22 = vmul.f32 %v6491_v34, %v922_v50  ;;  %v1116_v5 = vmul.f32 %v6520_v46, %v1071_v20  ;;  %v773_v24 = vpop.permute.xlu2 %772  ;;  %v6762_v27 = vpop.f32.mrf.mxu0  ;;  %v1371_v50 = vld [vmem:[%s10404_s2 + $0x78] sm:$0xff] }
 0x19a   :  { %10420 = vst [vmem:[#allocation13_spill] sm:$0xff] %v6762_v27  ;;  %v820_v35 = vmul.f32 %v6525_v7, %v773_v24  ;;  %v1367_v20 = vld [vmem:[%s10404_s2 + $0x58] sm:$0xff]  ;;  %1449 = vperm.xlu2 %5784, %v1371_v50   ;;  %v5749_v27 = vld [vmem:[%s10403_s1 + $0x3d0] sm:$0xff] }
 0x19b   :  { %993 = vmatpush.msrb.mxu2 %v968_v22  ;;  %1139 = vmatpush.msrb.mxu3 %v1116_v5  ;;  %v6819_v22 = vpop.f32.mrf.mxu1  ;;  %v1363_v50 = vld [vmem:[%s10404_s2 + $0x38] sm:$0xff] }
 0x19c   :  { %745 = vmatmul.f32.gmra.mxu0 %v5705_v0  ;;  %1429 = vperm.xlu1 %5786, %v1367_v20  }
 0x19d   :  { %1140 = vmatpush.msrb.mxu3 %v1115_v9 }
 0x19f   :  { %v6775_v41 = vpop.f32.mrf.mxu2 }
 0x1a0   :  { %v777_v58 = vpop.permute.xlu0 %776  ;;  %v920_v28 = vpop.permute.xlu1 %919 }
 0x1a1   :  { %v822_v29 = vmul.f32 %v6525_v7, %v777_v58  ;;  %v967_v32 = vmul.f32 %v6491_v34, %v920_v28  ;;  %v1220_v37 = vpop.permute.xlu2 %1219  ;;  %v6778_v44 = vpop.f32.mrf.mxu3 }
 0x1a2   :  { %v6785_v47 = vpop.f32.mrf.mxu0  ;;  %v1264_v55 = vmul.f32 %v6613_v2, %v1220_v37 }
 0x1a3   :  { %845 = vmatpush.msrb.mxu1 %v822_v29  ;;  %994 = vmatpush.msrb.mxu2 %v967_v32  ;;  %10421 = vst [vmem:[#allocation14_spill] sm:$0xff] %v6785_v47  ;;  %v5724_v29 = vld [vmem:[%s10403_s1 + $0x308] sm:$0xff]  ;;  %v5739_v32 = vld [vmem:[%s10403_s1 + $0x380] sm:$0xff] }
 0x1a4   :  { %748 = vmatmul.f32.gmra.mxu0 %v5706_v30  ;;  %1414 = vperm.xlu1 %5786, %v1364_v10   ;;  %v5716_v47 = vld [vmem:[%s10403_s1 + $0x2c8] sm:$0xff] }
 0x1a5   :  { %995 = vmatpush.msrb.mxu2 %v966_v6  ;;  %v1368_v6 = vld [vmem:[%s10404_s2 + $0x60] sm:$0xff] }
 0x1a6   :  { %1434 = vperm.xlu2 %5784, %v1368_v6   ;;  %v5727_v6 = vld [vmem:[%s10403_s1 + $0x320] sm:$0xff] }
 0x1a7   :  { %v6798_v14 = vpop.f32.mrf.mxu2 }
 0x1a8   :  { %v1224_v40 = vpop.permute.xlu0 %1223  ;;  %v775_v43 = vpop.permute.xlu1 %774 }
 0x1a9   :  { %v1266_v42 = vmul.f32 %v6613_v2, %v1224_v40  ;;  %v821_v1 = vmul.f32 %v6525_v7, %v775_v43  ;;  %v1218_v4 = vpop.permute.xlu2 %1217  ;;  %v6800_v15 = vpop.f32.mrf.mxu3 }
 0x1aa   :  { %v1263_v60 = vmul.f32 %v6613_v2, %v1218_v4  ;;  %v6803_v61 = vpop.f32.mrf.mxu0  ;;  %v5740_v4 = vld [vmem:[%s10403_s1 + $0x388] sm:$0xff] }
 0x1ab   :  { %1283 = vmatpush.msra.mxu0 %v1266_v42  ;;  %846 = vmatpush.msrb.mxu1 %v821_v1 }
 0x1ad   :  { %847 = vmatpush.msrb.mxu1 %v820_v35 }
 0x1af   :  { %v6821_v0 = vpop.f32.mrf.mxu2 }
 0x1b0   :  { %v1067_v49 = vpop.permute.xlu0 %1066  ;;  %v1222_v12 = vpop.permute.xlu1 %1221 }
 0x1b1   :  { %v1114_v51 = vmul.f32 %v6520_v46, %v1067_v49  ;;  %v1265_v53 = vmul.f32 %v6613_v2, %v1222_v12  ;;  %v6823_v5 = vpop.f32.mrf.mxu3  ;;  %v1214_v40 = vpop.permute.xlu2 %1213  ;;  %v5707_v49 = vld [vmem:[%s10403_s1 + $0x280] sm:$0xff] }
 0x1b2   :  { %v6825_v9 = vpop.f32.mrf.mxu0 }
 0x1b3   :  { %1141 = vmatpush.msrb.mxu3 %v1114_v51  ;;  %1284 = vmatpush.msra.mxu0 %v1265_v53  ;;  %v1261_v51 = vmul.f32 %v6613_v2, %v1214_v40  ;;  %v5725_v53 = vld [vmem:[%s10403_s1 + $0x310] sm:$0xff] }
 0x1b5   :  { %1285 = vmatpush.msra.mxu0 %v1264_v55  ;;  %v1361_v55 = vld [vmem:[%s10404_s2 + $0x28] sm:$0xff] }
 0x1b6   :  { %1399 = vperm.xlu1 %5786, %v1361_v55  }
 0x1b7   :  { %1286 = vmatpush.msra.mxu0 %v1263_v60  ;;  %v6846_v37 = vpop.f32.mrf.mxu2 }
 0x1b8   :  { %v916_v62 = vpop.permute.xlu0 %915  ;;  %v1065_v16 = vpop.permute.xlu1 %1064 }
 0x1b9   :  { %v965_v17 = vmul.f32 %v6491_v34, %v916_v62  ;;  %v1113_v18 = vmul.f32 %v6520_v46, %v1065_v16  ;;  %v1359_v34 = vld [vmem:[%s10404_s2 + $0x18] sm:$0xff]  ;;  %v6848_v42 = vpop.f32.mrf.mxu3  ;;  %v5708_v62 = vld [vmem:[%s10403_s1 + $0x288] sm:$0xff] }
 0x1ba   :  { %1389 = vperm.xlu0 %5785, %v1359_v34   ;;  %v6850_v1 = vpop.f32.mrf.mxu0 }
 0x1bb   :  { %996 = vmatpush.msrb.mxu2 %v965_v17  ;;  %1142 = vmatpush.msrb.mxu3 %v1113_v18  ;;  %v5741_v18 = vld [vmem:[%s10403_s1 + $0x390] sm:$0xff] }
 0x1bc   :  { %997 = vmatmul.f32.vlgmr.msrb.gmra.mxu2 %v5723_v8 }
 0x1bf   :  { %v6885_v20 = vpop.f32.mrf.mxu2 }
 0x1c0   :  { %v771_v24 = vpop.permute.xlu0 %770  ;;  %v1063_v58 = vpop.permute.xlu1 %1062 }
 0x1c1   :  { %v819_v28 = vmul.f32 %v6525_v7, %v771_v24  ;;  %v1112_v30 = vmul.f32 %v6520_v46, %v1063_v58  ;;  %v6844_v46 = vpop.f32.mrf.mxu1  ;;  %v6876_v17 = vpop.f32.mrf.mxu3  ;;  %v5755_v24 = vld [vmem:[%s10403_s1 + $0x400] sm:$0xff]  ;;  %v1358_v58 = vld [vmem:[%s10404_s2 + $0x10] sm:$0xff] }
 0x1c2   :  { %1374 = vperm.xlu0 %5785, %v1356_v33   ;;  %v6887_v34 = vpop.f32.mrf.mxu0  ;;  %1384 = vperm.xlu1 %5786, %v1358_v58   ;;  %v5745_v58 = vld [vmem:[%s10403_s1 + $0x3b0] sm:$0xff] }
 0x1c3   :  { %848 = vmatpush.msrb.mxu1 %v819_v28  ;;  %1143 = vmatpush.msrb.mxu3 %v1112_v30  ;;  %v5709_v28 = vld [vmem:[%s10403_s1 + $0x290] sm:$0xff]  ;;  %v1360_v30 = vld [vmem:[%s10404_s2 + $0x20] sm:$0xff] }
 0x1c4   :  { %1000 = vmatmul.f32.gmra.mxu2 %v5724_v29  ;;  %1144 = vmatmul.f32.vlgmr.msrb.gmra.mxu3 %v5739_v32  ;;  %v5742_v29 = vld [vmem:[%s10403_s1 + $0x398] sm:$0xff]  ;;  %v5756_v32 = vld [vmem:[%s10403_s1 + $0x408] sm:$0xff] }
 0x1c7   :  { %v6917_v40 = vpop.f32.mrf.mxu2 }
 0x1c8   :  { %v769_v43 = vpop.permute.xlu0 %768  ;;  %v1216_v35 = vpop.permute.xlu1 %1215 }
 0x1c9   :  { %v818_v45 = vmul.f32 %v6525_v7, %v769_v43  ;;  %v1262_v12 = vmul.f32 %v6613_v2, %v1216_v35  ;;  %v1366_v7 = vld [vmem:[%s10404_s2 + $0x50] sm:$0xff]  ;;  %v6874_v16 = vpop.f32.mrf.mxu1  ;;  %v6915_v33 = vpop.f32.mrf.mxu3  ;;  %v5710_v35 = vld [vmem:[%s10403_s1 + $0x298] sm:$0xff] }
 0x1ca   :  { %1424 = vperm.xlu2 %5784, %v1366_v7   ;;  %v6919_v43 = vpop.f32.mrf.mxu0 }
 0x1cb   :  { %849 = vmatpush.msrb.mxu1 %v818_v45  ;;  %1287 = vmatpush.msra.mxu0 %v1262_v12  ;;  %v5743_v45 = vld [vmem:[%s10403_s1 + $0x3a0] sm:$0xff]  ;;  %v5757_v12 = vld [vmem:[%s10403_s1 + $0x410] sm:$0xff] }
 0x1cc   :  { %850 = vmatmul.f32.vlgmr.msrb.gmra.mxu1 %v5707_v49  ;;  %1147 = vmatmul.f32.gmra.mxu3 %v5740_v4  ;;  %v1357_v49 = vld [vmem:[%s10404_s2 + $0x8] sm:$0xff] }
 0x1cd   :  { %1003 = vmatmul.f32.gmra.mxu2 %v5725_v53  ;;  %1288 = vmatpush.msra.mxu0 %v1261_v51  ;;  %v5728_v51 = vld [vmem:[%s10403_s1 + $0x328] sm:$0xff] }
 0x1cf   :  { %v6940_v7 = vpop.f32.mrf.mxu2 }
 0x1d0   :  { %v1212_v56 = vpop.permute.xlu0 %1211  ;;  %v1210_v60 = vpop.permute.xlu1 %1209 }
 0x1d1   :  { %v1260_v57 = vmul.f32 %v6613_v2, %v1212_v56  ;;  %v1259_v8 = vmul.f32 %v6613_v2, %v1210_v60  ;;  %v5726_v2 = vld [vmem:[%s10403_s1 + $0x318] sm:$0xff]  ;;  %v6913_v10 = vpop.f32.mrf.mxu1  ;;  %v6938_v53 = vpop.f32.mrf.mxu3  ;;  %v5711_v56 = vld [vmem:[%s10403_s1 + $0x2a0] sm:$0xff] }
 0x1d2   :  { %1409 = vperm.xlu2 %5784, %v1363_v50   ;;  %v6942_v55 = vpop.f32.mrf.mxu0  ;;  %v5758_v60 = vld [vmem:[%s10403_s1 + $0x418] sm:$0xff] }
 0x1d3   :  { %1289 = vmatpush.msra.mxu0 %v1260_v57  ;;  %v5744_v57 = vld [vmem:[%s10403_s1 + $0x3a8] sm:$0xff] }
 0x1d4   :  { %853 = vmatmul.f32.gmra.mxu1 %v5708_v62  ;;  %1150 = vmatmul.f32.gmra.mxu3 %v5741_v18  ;;  %v5729_v62 = vld [vmem:[%s10403_s1 + $0x330] sm:$0xff] }
 0x1d5   :  { %1290 = vmatpush.msra.mxu0 %v1259_v8  ;;  %1006 = vmatmul.f32.gmra.mxu2 %v5726_v2  ;;  %v5712_v2 = vld [vmem:[%s10403_s1 + $0x2a8] sm:$0xff] }
 0x1d6   :  { %1291 = vmatmul.f32.vlgmr.msra.gmra.mxu0 %v5755_v24 }
 0x1d7   :  { %v6960_v50 = vpop.f32.mrf.mxu2 }
 0x1d9   :  { %v6936_v4 = vpop.f32.mrf.mxu1  ;;  %v6958_v18 = vpop.f32.mrf.mxu3 }
 0x1da   :  { %1394 = vperm.xlu2 %5784, %v1360_v30   ;;  %v6962_v24 = vpop.f32.mrf.mxu0  ;;  %v5713_v30 = vld [vmem:[%s10403_s1 + $0x2b0] sm:$0xff] }
 0x1dc   :  { %856 = vmatmul.f32.gmra.mxu1 %v5709_v28  ;;  %1153 = vmatmul.f32.gmra.mxu3 %v5742_v29  ;;  %v5759_v28 = vld [vmem:[%s10403_s1 + $0x420] sm:$0xff]  ;;  %v5730_v29 = vld [vmem:[%s10403_s1 + $0x338] sm:$0xff] }
 0x1dd   :  { %1009 = vmatmul.f32.gmra.mxu2 %v5727_v6 }
 0x1de   :  { %1294 = vmatmul.f32.gmra.mxu0 %v5756_v32 }
 0x1e1   :  { %v6956_v8 = vpop.f32.mrf.mxu1  ;;  %v6981_v6 = vpop.f32.mrf.mxu3 }
 0x1e2   :  { %1379 = vperm.xlu2 %5784, %v1357_v49   ;;  %v6988_v49 = vpop.f32.mrf.mxu0 }
 0x1e4   :  { %859 = vmatmul.f32.gmra.mxu1 %v5710_v35  ;;  %1156 = vmatmul.f32.gmra.mxu3 %v5743_v45  ;;  %v5746_v35 = vld [vmem:[%s10403_s1 + $0x3b8] sm:$0xff]  ;;  %v6986_v45 = vpop.f32.mrf.mxu2 }
 0x1e5   :  { %1012 = vmatmul.f32.gmra.mxu2 %v5728_v51  ;;  %v5731_v51 = vld [vmem:[%s10403_s1 + $0x340] sm:$0xff] }
 0x1e6   :  { %1297 = vmatmul.f32.gmra.mxu0 %v5757_v12  ;;  %v5760_v12 = vld [vmem:[%s10403_s1 + $0x428] sm:$0xff] }
 0x1e9   :  { %v6979_v32 = vpop.f32.mrf.mxu1 }
 0x1ec   :  { %862 = vmatmul.f32.gmra.mxu1 %v5711_v56  ;;  %1159 = vmatmul.f32.gmra.mxu3 %v5744_v57  ;;  %v5714_v56 = vld [vmem:[%s10403_s1 + $0x2b8] sm:$0xff]  ;;  %v5747_v57 = vld [vmem:[%s10403_s1 + $0x3c0] sm:$0xff] }
 0x1ed   :  { %1015 = vmatmul.f32.gmra.mxu2 %v5729_v62  ;;  %v5732_v62 = vld [vmem:[%s10403_s1 + $0x348] sm:$0xff] }
 0x1ee   :  { %1300 = vmatmul.f32.gmra.mxu0 %v5758_v60  ;;  %v5761_v60 = vld [vmem:[%s10403_s1 + $0x430] sm:$0xff] }
 0x1f4   :  { %865 = vmatmul.f32.gmra.mxu1 %v5712_v2  ;;  %1162 = vmatmul.f32.gmra.mxu3 %v5745_v58  ;;  %v7008_v2 = vpop.f32.mrf.mxu1  ;;  %v7010_v58 = vpop.f32.mrf.mxu3 }
 0x1f5   :  { %1018 = vmatmul.f32.gmra.mxu2 %v5730_v29  ;;  %v7014_v29 = vpop.f32.mrf.mxu0 }
 0x1f6   :  { %1303 = vmatmul.f32.gmra.mxu0 %v5759_v28  ;;  %v7012_v28 = vpop.f32.mrf.mxu2 }
 0x1f7   :  { %10422 = vst [vmem:[#allocation15_spill] sm:$0xff] %v7012_v28 }
 0x1fc   :  { %868 = vmatmul.f32.gmra.mxu1 %v5713_v30  ;;  %1165 = vmatmul.f32.gmra.mxu3 %v5746_v35  ;;  %v5715_v30 = vld [vmem:[%s10403_s1 + $0x2c0] sm:$0xff]  ;;  %v5748_v35 = vld [vmem:[%s10403_s1 + $0x3c8] sm:$0xff] }
 0x1fd   :  { %1021 = vmatmul.f32.gmra.mxu2 %v5731_v51  ;;  %v5733_v51 = vld [vmem:[%s10403_s1 + $0x350] sm:$0xff] }
 0x1fe   :  { %1306 = vmatmul.f32.gmra.mxu0 %v5760_v12  ;;  %v5762_v12 = vld [vmem:[%s10403_s1 + $0x438] sm:$0xff] }
 0x204   :  { %871 = vmatmul.f32.gmra.mxu1 %v5714_v56  ;;  %1168 = vmatmul.f32.gmra.mxu3 %v5747_v57  ;;  %v7028_v56 = vpop.f32.mrf.mxu1  ;;  %v7030_v57 = vpop.f32.mrf.mxu3 }
 0x205   :  { %1024 = vmatmul.f32.gmra.mxu2 %v5732_v62  ;;  %10423 = vst [vmem:[#allocation16_spill] sm:$0xff] %v7028_v56  ;;  %v7034_v62 = vpop.f32.mrf.mxu0 }
 0x206   :  { %1309 = vmatmul.f32.gmra.mxu0 %v5761_v60  ;;  %10424 = vst [vmem:[#allocation17_spill] sm:$0xff] %v7030_v57  ;;  %v7032_v60 = vpop.f32.mrf.mxu2 }
 0x207   :  { %10425 = vst [vmem:[#allocation18_spill] sm:$0xff] %v7032_v60  ;;  %v5717_v60 = vld [vmem:[%s10403_s1 + $0x2d0] sm:$0xff] }
 0x208   :  { %10426 = vst [vmem:[#allocation19_spill] sm:$0xff] %v7034_v62 }
 0x20c   :  { %874 = vmatmul.f32.gmra.mxu1 %v5715_v30  ;;  %1171 = vmatmul.f32.gmra.mxu3 %v5748_v35  ;;  %v5763_v30 = vld [vmem:[%s10403_s1 + $0x440] sm:$0xff]  ;;  %v5734_v35 = vld [vmem:[%s10403_s1 + $0x358] sm:$0xff] }
 0x20d   :  { %1027 = vmatmul.f32.gmra.mxu2 %v5733_v51  ;;  %v7050_v51 = vpop.f32.mrf.mxu3  ;;  %v7054_v59 = vpop.f32.mrf.mxu0 }
 0x20e   :  { %1312 = vmatmul.f32.gmra.mxu0 %v5762_v12  ;;  %v7048_v12 = vpop.f32.mrf.mxu1  ;;  %10428 = vst [vmem:[#allocation21_spill] sm:$0xff] %v7050_v51  ;;  %v7052_v19 = vpop.f32.mrf.mxu2  ;;  %v5751_v51 = vld [vmem:[%s10403_s1 + $0x3e0] sm:$0xff] }
 0x20f   :  { %10427 = vst [vmem:[#allocation20_spill] sm:$0xff] %v7048_v12 }
 0x210   :  { %10429 = vst [vmem:[#allocation22_spill] sm:$0xff] %v7052_v19 }
 0x211   :  { %10430 = vst [vmem:[#allocation23_spill] sm:$0xff] %v7054_v59 }
 0x214   :  { %877 = vmatmul.f32.gmra.mxu1 %v5716_v47  ;;  %1174 = vmatmul.f32.gmra.mxu3 %v5749_v27  ;;  %v5764_v27 = vld [vmem:[%s10403_s1 + $0x448] sm:$0xff]  ;;  %v5735_v47 = vld [vmem:[%s10403_s1 + $0x360] sm:$0xff] }
 0x215   :  { %1030 = vmatmul.f32.gmra.mxu2 %v5734_v35  ;;  %v7073_v19 = vpop.f32.mrf.mxu3  ;;  %v7080_v59 = vpop.f32.mrf.mxu0 }
 0x216   :  { %1315 = vmatmul.f32.gmra.mxu0 %v5763_v30  ;;  %v5718_v30 = vld [vmem:[%s10403_s1 + $0x2d8] sm:$0xff]  ;;  %v7071_v35 = vpop.f32.mrf.mxu1  ;;  %10432 = vst [vmem:[#allocation25_spill] sm:$0xff] %v7073_v19  ;;  %v7078_v12 = vpop.f32.mrf.mxu2 }
 0x217   :  { %10431 = vst [vmem:[#allocation24_spill] sm:$0xff] %v7071_v35  ;;  %v5766_v19 = vld [vmem:[%s10403_s1 + $0x458] sm:$0xff]  ;;  %v7099_v35 = vpop.permute.xlu0 %1444 }
 0x218   :  { %10433 = vst [vmem:[#allocation26_spill] sm:$0xff] %v7078_v12  ;;  %v5752_v12 = vld [vmem:[%s10403_s1 + $0x3e8] sm:$0xff] }
 0x219   :  { %10434 = vst [vmem:[#allocation27_spill] sm:$0xff] %v7080_v59  ;;  %v5753_v59 = vld [vmem:[%s10403_s1 + $0x3f0] sm:$0xff] }
 0x21a   :  { %10436 = vst [vmem:[#allocation29_spill] sm:$0xff] %v7099_v35  ;;  %v5720_v35 = vld [vmem:[%s10403_s1 + $0x2e8] sm:$0xff] }
 0x21c   :  { %880 = vmatmul.f32.gmra.mxu1 %v5717_v60  ;;  %1177 = vmatmul.f32.gmra.mxu3 %v5750_v48  ;;  %v5765_v48 = vld [vmem:[%s10403_s1 + $0x450] sm:$0xff]  ;;  %v5736_v60 = vld [vmem:[%s10403_s1 + $0x368] sm:$0xff] }
 0x21d   :  { %1033 = vmatmul.f32.gmra.mxu2 %v5735_v47  ;;  %v7091_v47 = vpop.permute.xlu2 %1449 }
 0x21e   :  { %1318 = vmatmul.f32.gmra.mxu0 %v5764_v27  ;;  %v5719_v27 = vld [vmem:[%s10403_s1 + $0x2e0] sm:$0xff]  ;;  %10435 = vst [vmem:[#allocation28_spill] sm:$0xff] %v7091_v47  ;;  %v7110_v47 = vpop.f32.mrf.mxu0 }
 0x21f   :  { %10440 = vst [vmem:[#allocation33_spill] sm:$0xff] %v7110_v47 }
 0x224   :  { %883 = vmatmul.f32.gmra.mxu1 %v5718_v30  ;;  %1180 = vmatmul.f32.gmra.mxu3 %v5751_v51  ;;  %v5737_v51 = vld [vmem:[%s10403_s1 + $0x370] sm:$0xff]  ;;  %v7104_v30 = vpop.f32.mrf.mxu1 }
 0x225   :  { %1036 = vmatmul.f32.gmra.mxu2 %v5736_v60  ;;  %10437 = vst [vmem:[#allocation30_spill] sm:$0xff] %v7104_v30  ;;  %v7108_v60 = vpop.f32.mrf.mxu2 }
 0x226   :  { %1321 = vmatmul.f32.gmra.mxu0 %v5765_v48  ;;  %v7106_v48 = vpop.f32.mrf.mxu3  ;;  %10439 = vst [vmem:[#allocation32_spill] sm:$0xff] %v7108_v60  ;;  %v7134_v47 = vpop.f32.mrf.mxu0 }
 0x227   :  { %10438 = vst [vmem:[#allocation31_spill] sm:$0xff] %v7106_v48  ;;  %v5767_v48 = vld [vmem:[%s10403_s1 + $0x460] sm:$0xff] }
 0x228   :  { %10446 = vst [vmem:[#allocation39_spill] sm:$0xff] %v7134_v47 }
 0x22c   :  { %886 = vmatmul.f32.gmra.mxu1 %v5719_v27  ;;  %1183 = vmatmul.f32.gmra.mxu3 %v5752_v12  ;;  %v7121_v27 = vpop.permute.xlu2 %1434  ;;  %v5738_v12 = vld [vmem:[%s10403_s1 + $0x378] sm:$0xff] }
 0x22d   :  { %1039 = vmatmul.f32.gmra.mxu2 %v5737_v51  ;;  %10441 = vst [vmem:[#allocation34_spill] sm:$0xff] %v7121_v27  ;;  %v7128_v51 = vpop.f32.mrf.mxu1  ;;  %v7132_v30 = vpop.f32.mrf.mxu2  ;;  %v5721_v27 = vld [vmem:[%s10403_s1 + $0x2f0] sm:$0xff] }
 0x22e   :  { %1324 = vmatmul.f32.gmra.mxu0 %v5766_v19  ;;  %v7126_v19 = vpop.permute.xlu0 %1419  ;;  %10443 = vst [vmem:[#allocation36_spill] sm:$0xff] %v7128_v51  ;;  %v7130_v60 = vpop.f32.mrf.mxu3 }
 0x22f   :  { %10442 = vst [vmem:[#allocation35_spill] sm:$0xff] %v7126_v19  ;;  %v7155_v19 = vpop.f32.mrf.mxu0 }
 0x230   :  { %10444 = vst [vmem:[#allocation37_spill] sm:$0xff] %v7130_v60  ;;  %v5768_v60 = vld [vmem:[%s10403_s1 + $0x468] sm:$0xff] }
 0x231   :  { %10445 = vst [vmem:[#allocation38_spill] sm:$0xff] %v7132_v30 }
 0x232   :  { %10451 = vst [vmem:[#allocation44_spill] sm:$0xff] %v7155_v19 }
 0x234   :  { %889 = vmatmul.f32.gmra.mxu1 %v5720_v35  ;;  %1186 = vmatmul.f32.gmra.mxu3 %v5753_v59  ;;  %v5754_v59 = vld [vmem:[%s10403_s1 + $0x3f8] sm:$0xff]  ;;  %v7142_v35 = vpop.permute.xlu1 %1439 }
 0x235   :  { %1042 = vmatmul.f32.gmra.mxu2 %v5738_v12  ;;  %10447 = vst [vmem:[#allocation40_spill] sm:$0xff] %v7142_v35  ;;  %v7153_v47 = vpop.f32.mrf.mxu1  ;;  %v5722_v35 = vld [vmem:[%s10403_s1 + $0x2f8] sm:$0xff] }
 0x236   :  { %1327 = vmatmul.f32.gmra.mxu0 %v5767_v48  ;;  %v7147_v48 = vpop.permute.xlu2 %1424  ;;  %v7149_v12 = vpop.permute.xlu0 %1404  ;;  %10450 = vst [vmem:[#allocation43_spill] sm:$0xff] %v7153_v47 }
 0x237   :  { %10448 = vst [vmem:[#allocation41_spill] sm:$0xff] %v7147_v48  ;;  %v7151_v51 = vpop.f32.mrf.mxu3 }
 0x238   :  { %10449 = vst [vmem:[#allocation42_spill] sm:$0xff] %v7151_v51 }
 0x23c   :  { %892 = vmatmul.f32.gmra.mxu1 %v5721_v27  ;;  %1189 = vmatmul.f32.gmra.mxu3 %v5754_v59  ;;  %v280_v27 = vadd.f32 %v6773_v38, %v6500_v39  ;;  %v7166_v48 = vpop.permute.xlu1 %1429  ;;  %v283_v38 = vadd.f32 %v6788_v13, %v6535_v52 }
 0x23d   :  { %10452 = vst [vmem:[#allocation45_spill] sm:$0xff] %v7166_v48 }
 0x23e   :  { %1330 = vmatmul.f32.gmra.mxu0 %v5768_v60  ;;  %v5769_v60 = vld [vmem:[%s10403_s1 + $0x470] sm:$0xff]  ;;  %v458_v59 = vadd.f32 %v6760_v25, %v280_v27  ;;  %v7169_v47 = vpop.permute.xlu2 %1409  ;;  %v7172_v39 = vpop.permute.xlu0 %1389 }
 0x23f   :  { %v998_v30 = vpop.f32.mrf.mxu2  ;;  %10453 = vst [vmem:[#allocation46_spill] sm:$0xff] %v7169_v47  ;;  %v7176_v25 = vpop.f32.mrf.mxu0 }
 0x240   :  { %v605_v51 = vadd.f32 %v6778_v44, %v458_v59  ;;  %10454 = vst [vmem:[#allocation47_spill] sm:$0xff] %v7176_v25  ;;  %v5770_v44 = vld [vmem:[%s10403_s1 + $0x478] sm:$0xff] }
 0x242   :  { %v752_v57 = vadd.f32 %v6803_v61, %v605_v51 }
 0x244   :  { %895 = vmatmul.f32.gmra.mxu1 %v5722_v35  ;;  %v459_v35 = vadd.f32 %v6775_v41, %v283_v38  ;;  %v7183_v61 = vpop.permute.xlu1 %1414 }
 0x245   :  { %10455 = vst [vmem:[#allocation48_spill] sm:$0xff] %v7183_v61 }
 0x246   :  { %1333 = vmatmul.f32.gmra.mxu0 %v5769_v60  ;;  %v606_v27 = vadd.f32 %v6800_v15, %v459_v35  ;;  %v7186_v13 = vpop.permute.xlu2 %1394  ;;  %v1375_v41 = vpop.permute.xlu0 %1374 }
 0x247   :  { %v1001_v19 = vpop.f32.mrf.mxu2  ;;  %v1145_v28 = vpop.f32.mrf.mxu3 }
 0x248   :  { %v753_v51 = vadd.f32 %v6825_v9, %v606_v27 }
 0x249   :  { %v851_v56 = vpop.f32.mrf.mxu1 }
 0x24a   :  { %v899_v31 = vadd.f32 %v851_v56, %v752_v57  ;;  %v286_v56 = vadd.f32 %v6819_v22, %v6556_v63  ;;  %v289_v22 = vadd.f32 %v6844_v46, %v6575_v21 }
 0x24c   :  { %v1046_v60 = vadd.f32 %v998_v30, %v899_v31  ;;  %v460_v15 = vadd.f32 %v6798_v14, %v286_v56  ;;  %v7195_v27 = vpop.permute.xlu1 %1399 }
 0x24e   :  { %1336 = vmatmul.f32.gmra.mxu0 %v5770_v44  ;;  %v1193_v57 = vadd.f32 %v1145_v28, %v1046_v60  ;;  %v607_v30 = vadd.f32 %v6823_v5, %v460_v15  ;;  %v1380_v5 = vpop.permute.xlu2 %1379 }
 0x24f   :  { %v1148_v59 = vpop.f32.mrf.mxu3 }
 0x250   :  { %v1004_v48 = vpop.f32.mrf.mxu2  ;;  %v754_v9 = vadd.f32 %v6850_v1, %v607_v30 }
 0x251   :  { %v854_v52 = vpop.f32.mrf.mxu1 }
 0x252   :  { %v900_v25 = vadd.f32 %v854_v52, %v753_v51 }
 0x253   :  { %v1292_v62 = vpop.f32.mrf.mxu0 }
 0x254   :  { %v1340_v31 = vadd.f32 %v1292_v62, %v1193_v57  ;;  %v1047_v38 = vadd.f32 %v1001_v19, %v900_v25  ;;  %v461_v62 = vadd.f32 %v6821_v0, %v289_v22  ;;  %v1385_v15 = vpop.permute.xlu1 %1384 }
 0x256   :  { %v1452_v44 = vadd.f32 %v1375_v41, %v1340_v31  ;;  %v1194_v28 = vadd.f32 %v1148_v59, %v1047_v38  ;;  %v608_v19 = vadd.f32 %v6848_v42, %v461_v62 }
 0x257   :  { %v1151_v61 = vpop.f32.mrf.mxu3 }
 0x258   :  { %v7193_v35 = vmax.f32 %v1452_v44, 0.0  ;;  %v1007_v63 = vpop.f32.mrf.mxu2  ;;  %v755_v52 = vadd.f32 %v6887_v34, %v608_v19  ;;  %v298_v19 = vadd.f32 %v6936_v4, %v6639_v11 }
 0x259   :  { %v857_v47 = vpop.f32.mrf.mxu1 }
 0x25a   :  { %v901_v60 = vadd.f32 %v857_v47, %v754_v9  ;;  %1501 = vrot.lane.b32.xlu1 %v7193_v35, %s5904_s26  ;;  %v292_v47 = vadd.f32 %v6874_v16, %v6594_v26 }
 0x25b   :  { %v1295_v14 = vpop.f32.mrf.mxu0 }
 0x25c   :  { %v1341_v1 = vadd.f32 %v1295_v14, %v1194_v28  ;;  %v1048_v25 = vadd.f32 %v1004_v48, %v901_v60  ;;  %v462_v42 = vadd.f32 %v6846_v37, %v292_v47 }
 0x25e   :  { %v1453_v51 = vadd.f32 %v1380_v5, %v1341_v1  ;;  %v1195_v59 = vadd.f32 %v1151_v61, %v1048_v25  ;;  %v609_v34 = vadd.f32 %v6876_v17, %v462_v42  ;;  %v295_v61 = vadd.f32 %v6913_v10, %v6619_v36 }
 0x25f   :  { %v1154_v57 = vpop.f32.mrf.mxu3 }
 0x260   :  { %v7204_v56 = vmax.f32 %v1453_v51, 0.0  ;;  %v1010_v46 = vpop.f32.mrf.mxu2  ;;  %v756_v38 = vadd.f32 %v6919_v43, %v609_v34  ;;  %v463_v17 = vadd.f32 %v6885_v20, %v295_v61 }
 0x261   :  { %v860_v21 = vpop.f32.mrf.mxu1 }
 0x262   :  { %v902_v41 = vadd.f32 %v860_v21, %v755_v52  ;;  %1503 = vrot.lane.b32.xlu0 %v7204_v56, %s5904_s26  ;;  %v610_v60 = vadd.f32 %v6915_v33, %v463_v17  ;;  %v464_v33 = vadd.f32 %v6917_v40, %v298_v19  ;;  %v10458_v19 = vld [vmem:[#allocation9_spill] sm:$0xff] }
 0x263   :  { %v1298_v0 = vpop.f32.mrf.mxu0 }
 0x264   :  { %v1342_v48 = vadd.f32 %v1298_v0, %v1195_v59  ;;  %v1049_v31 = vadd.f32 %v1007_v63, %v902_v41  ;;  %v757_v5 = vadd.f32 %v6942_v55, %v610_v60  ;;  %v301_v59 = vadd.f32 %v6956_v8, %v6659_v54 }
 0x266   :  { %v1454_v30 = vadd.f32 %v1385_v15, %v1342_v48  ;;  %v1196_v22 = vadd.f32 %v1154_v57, %v1049_v31 }
 0x267   :  { %v1157_v9 = vpop.f32.mrf.mxu3 }
 0x268   :  { %v7213_v44 = vmax.f32 %v1454_v30, 0.0  ;;  %v1013_v16 = vpop.f32.mrf.mxu2  ;;  %v304_v30 = vadd.f32 %v6979_v32, %v6674_v3 }
 0x269   :  { %v863_v26 = vpop.f32.mrf.mxu1 }
 0x26a   :  { %v903_v28 = vadd.f32 %v863_v26, %v756_v38  ;;  %1505 = vrot.lane.b32.xlu2 %v7213_v44, %s5904_s26 }
 0x26b   :  { %v1301_v37 = vpop.f32.mrf.mxu0 }
 0x26c   :  { %v1343_v63 = vadd.f32 %v1301_v37, %v1196_v22  ;;  %v1050_v43 = vadd.f32 %v1010_v46, %v903_v28  ;;  %v307_v37 = vadd.f32 %v7008_v2, %v6687_v23 }
 0x26e   :  { %v1455_v14 = vadd.f32 %v7172_v39, %v1343_v63  ;;  %v1197_v25 = vadd.f32 %v1157_v9, %v1050_v43  ;;  %v611_v39 = vadd.f32 %v6938_v53, %v464_v33  ;;  %v465_v53 = vadd.f32 %v6940_v7, %v301_v59  ;;  %v10456_v43 = vld [vmem:[#allocation46_spill] sm:$0xff] }
 0x26f   :  { %v1160_v1 = vpop.f32.mrf.mxu3 }
 0x270   :  { %v7223_v62 = vmax.f32 %v1455_v14, 0.0  ;;  %v1016_v10 = vpop.f32.mrf.mxu2  ;;  %v758_v21 = vadd.f32 %v6962_v24, %v611_v39 }
 0x271   :  { %v866_v36 = vpop.f32.mrf.mxu1 }
 0x272   :  { %v904_v51 = vadd.f32 %v866_v36, %v757_v5  ;;  %1507 = vrot.lane.b32.xlu1 %v7223_v62, %s5904_s26  ;;  %v10457_v5 = vld [vmem:[#allocation19_spill] sm:$0xff] }
 0x273   :  { %v1304_v20 = vpop.f32.mrf.mxu0 }
 0x274   :  { %v1344_v52 = vadd.f32 %v1304_v20, %v1197_v25  ;;  %v1051_v55 = vadd.f32 %v1013_v16, %v904_v51  ;;  %v10459_v25 = vld [vmem:[#allocation16_spill] sm:$0xff] }
 0x275   :  { %v310_v51 = vadd.f32 %v10459_v25, %v10458_v19 }
 0x276   :  { %v1456_v57 = vadd.f32 %v7186_v13, %v1344_v52  ;;  %v1198_v41 = vadd.f32 %v1160_v1, %v1051_v55  ;;  %v612_v13 = vadd.f32 %v6958_v18, %v465_v53  ;;  %v466_v18 = vadd.f32 %v6960_v50, %v304_v30  ;;  %v10461_v55 = vld [vmem:[#allocation17_spill] sm:$0xff]  ;;  %v10464_v53 = vld [vmem:[#allocation10_spill] sm:$0xff] }
 0x277   :  { %v1163_v47 = vpop.f32.mrf.mxu3 }
 0x278   :  { %v7233_v46 = vmax.f32 %v1456_v57, 0.0  ;;  %v1019_v4 = vpop.f32.mrf.mxu2  ;;  %v759_v48 = vadd.f32 %v6988_v49, %v612_v13 }
 0x279   :  { %v869_v11 = vpop.f32.mrf.mxu1 }
 0x27a   :  { %v905_v0 = vadd.f32 %v869_v11, %v758_v21  ;;  %1509 = vrot.lane.b32.xlu0 %v7233_v46, %s5904_s26 }
 0x27b   :  { %v1307_v40 = vpop.f32.mrf.mxu0 }
 0x27c   :  { %v1345_v15 = vadd.f32 %v1307_v40, %v1198_v41  ;;  %v1052_v24 = vadd.f32 %v1016_v10, %v905_v0 }
 0x27e   :  { %v1457_v42 = vadd.f32 %v7195_v27, %v1345_v15  ;;  %v1199_v38 = vadd.f32 %v1163_v47, %v1052_v24  ;;  %v613_v27 = vadd.f32 %v6981_v6, %v466_v18  ;;  %v467_v6 = vadd.f32 %v6986_v45, %v307_v37  ;;  %v10462_v47 = vld [vmem:[#allocation48_spill] sm:$0xff]  ;;  %v10468_v18 = vld [vmem:[#allocation35_spill] sm:$0xff] }
 0x27f   :  { %v1166_v31 = vpop.f32.mrf.mxu3  ;;  %v10465_v15 = vld [vmem:[#allocation20_spill] sm:$0xff] }
 0x280   :  { %v7243_v34 = vmax.f32 %v1457_v42, 0.0  ;;  %v1022_v8 = vpop.f32.mrf.mxu2  ;;  %v760_v61 = vadd.f32 %v7014_v29, %v613_v27  ;;  %v313_v13 = vadd.f32 %v10465_v15, %v10464_v53  ;;  %v10469_v27 = vld [vmem:[#allocation27_spill] sm:$0xff] }
 0x281   :  { %v872_v54 = vpop.f32.mrf.mxu1  ;;  %v10481_v53 = vld [vmem:[#allocation39_spill] sm:$0xff] }
 0x282   :  { %v906_v9 = vadd.f32 %v872_v54, %v759_v48  ;;  %1511 = vrot.lane.b32.xlu2 %v7243_v34, %s5904_s26  ;;  %v10466_v54 = vld [vmem:[#allocation18_spill] sm:$0xff] }
 0x283   :  { %v1310_v7 = vpop.f32.mrf.mxu0 }
 0x284   :  { %v1346_v26 = vadd.f32 %v1310_v7, %v1199_v38  ;;  %v1053_v49 = vadd.f32 %v1019_v4, %v906_v9  ;;  %v10463_v4 = vld [vmem:[#allocation23_spill] sm:$0xff]  ;;  %v10467_v38 = vld [vmem:[#allocation21_spill] sm:$0xff] }
 0x286   :  { %v1458_v16 = vadd.f32 %v7149_v12, %v1346_v26  ;;  %v1200_v17 = vadd.f32 %v1166_v31, %v1053_v49  ;;  %v614_v12 = vadd.f32 %v7010_v58, %v467_v6  ;;  %v10460_v58 = vld [vmem:[#allocation15_spill] sm:$0xff]  ;;  %v10472_v6 = vld [vmem:[#allocation22_spill] sm:$0xff] }
 0x287   :  { %v1169_v28 = vpop.f32.mrf.mxu3  ;;  %v468_v52 = vadd.f32 %v10460_v58, %v310_v51 }
 0x288   :  { %v7253_v22 = vmax.f32 %v1458_v16, 0.0  ;;  %v1025_v32 = vpop.f32.mrf.mxu2  ;;  %v761_v1 = vadd.f32 %v10457_v5, %v614_v12 }
 0x289   :  { %v875_v3 = vpop.f32.mrf.mxu1  ;;  %v615_v57 = vadd.f32 %v10461_v55, %v468_v52  ;;  %v10478_v55 = vld [vmem:[#allocation26_spill] sm:$0xff] }
 0x28a   :  { %v907_v63 = vadd.f32 %v875_v3, %v760_v61  ;;  %1513 = vrot.lane.b32.xlu1 %v7253_v22, %s5904_s26  ;;  %v10470_v3 = vld [vmem:[#allocation11_spill] sm:$0xff] }
 0x28b   :  { %v1313_v50 = vpop.f32.mrf.mxu0  ;;  %v762_v59 = vadd.f32 %v10463_v4, %v615_v57 }
 0x28c   :  { %v1347_v60 = vadd.f32 %v1313_v50, %v1200_v17  ;;  %v1054_v29 = vadd.f32 %v1022_v8, %v907_v63  ;;  %v469_v8 = vadd.f32 %v10466_v54, %v313_v13 }
 0x28e   :  { %v1459_v14 = vadd.f32 %v10456_v43, %v1347_v60  ;;  %v1201_v20 = vadd.f32 %v1169_v28, %v1054_v29  ;;  %v616_v9 = vadd.f32 %v10467_v38, %v469_v8  ;;  %v10473_v43 = vld [vmem:[#allocation25_spill] sm:$0xff] }
 0x28f   :  { %v1172_v10 = vpop.f32.mrf.mxu3 }
 0x290   :  { %v7263_v36 = vmax.f32 %v1459_v14, 0.0  ;;  %v1028_v2 = vpop.f32.mrf.mxu2  ;;  %v763_v49 = vadd.f32 %v10469_v27, %v616_v9  ;;  %v10484_v9 = vld [vmem:[#allocation32_spill] sm:$0xff] }
 0x291   :  { %v878_v23 = vpop.f32.mrf.mxu1 }
 0x292   :  { %v908_v33 = vadd.f32 %v878_v23, %v761_v1  ;;  %1515 = vrot.lane.b32.xlu0 %v7263_v36, %s5904_s26  ;;  %v10474_v1 = vld [vmem:[#allocation41_spill] sm:$0xff] }
 0x293   :  { %v1316_v45 = vpop.f32.mrf.mxu0  ;;  %v10475_v23 = vld [vmem:[#allocation33_spill] sm:$0xff] }
 0x294   :  { %v1348_v39 = vadd.f32 %v1316_v45, %v1201_v20  ;;  %v1055_v21 = vadd.f32 %v1025_v32, %v908_v33  ;;  %v10471_v32 = vld [vmem:[#allocation24_spill] sm:$0xff]  ;;  %v10477_v33 = vld [vmem:[#allocation30_spill] sm:$0xff] }
 0x295   :  { %v316_v37 = vadd.f32 %v10471_v32, %v10470_v3  ;;  %v10476_v20 = vld [vmem:[#allocation12_spill] sm:$0xff] }
 0x296   :  { %v1460_v11 = vadd.f32 %v10462_v47, %v1348_v39  ;;  %v1202_v24 = vadd.f32 %v1172_v10, %v1055_v21  ;;  %v319_v45 = vadd.f32 %v10477_v33, %v10476_v20  ;;  %v10479_v47 = vld [vmem:[#allocation31_spill] sm:$0xff]  ;;  %v10487_v3 = vld [vmem:[#allocation44_spill] sm:$0xff] }
 0x297   :  { %v1175_v0 = vpop.f32.mrf.mxu3  ;;  %v470_v60 = vadd.f32 %v10472_v6, %v316_v37  ;;  %v10489_v6 = vld [vmem:[#allocation43_spill] sm:$0xff] }
 0x298   :  { %v7273_v41 = vmax.f32 %v1460_v11, 0.0  ;;  %v1031_v31 = vpop.f32.mrf.mxu2  ;;  %v471_v57 = vadd.f32 %v10478_v55, %v319_v45  ;;  %v10493_v33 = vld [vmem:[#allocation47_spill] sm:$0xff] }
 0x299   :  { %v881_v40 = vpop.f32.mrf.mxu1  ;;  %v617_v14 = vadd.f32 %v10473_v43, %v470_v60 }
 0x29a   :  { %v909_v42 = vadd.f32 %v881_v40, %v762_v59  ;;  %1517 = vrot.lane.b32.xlu2 %v7273_v41, %s5904_s26  ;;  %v618_v11 = vadd.f32 %v10479_v47, %v471_v57  ;;  %v10480_v59 = vld [vmem:[#allocation45_spill] sm:$0xff] }
 0x29b   :  { %v1319_v48 = vpop.f32.mrf.mxu0 }
 0x29c   :  { %v1349_v30 = vadd.f32 %v1319_v48, %v1202_v24  ;;  %v1056_v7 = vadd.f32 %v1028_v2, %v909_v42  ;;  %v764_v2 = vadd.f32 %v10475_v23, %v617_v14  ;;  %v765_v15 = vadd.f32 %v10481_v53, %v618_v11  ;;  %v10482_v42 = vld [vmem:[#allocation13_spill] sm:$0xff]  ;;  %v10483_v48 = vld [vmem:[#allocation36_spill] sm:$0xff]  ;;  %v10490_v14 = vld [vmem:[#allocation38_spill] sm:$0xff] }
 0x29d   :  { %v10491_v23 = vld [vmem:[#allocation42_spill] sm:$0xff] }
 0x29e   :  { %v1461_v26 = vadd.f32 %v10468_v18, %v1349_v30  ;;  %v1203_v17 = vadd.f32 %v1175_v0, %v1056_v7 }
 0x29f   :  { %v1178_v61 = vpop.f32.mrf.mxu3 }
 0x2a0   :  { %v7283_v16 = vmax.f32 %v1461_v26, 0.0  ;;  %v1034_v29 = vpop.f32.mrf.mxu2  ;;  %v10485_v26 = vld [vmem:[#allocation37_spill] sm:$0xff] }
 0x2a1   :  { %v884_v28 = vpop.f32.mrf.mxu1 }
 0x2a2   :  { %v910_v63 = vadd.f32 %v884_v28, %v763_v49  ;;  %1519 = vrot.lane.b32.xlu1 %v7283_v16, %s5904_s26 }
 0x2a3   :  { %v1322_v50 = vpop.f32.mrf.mxu0 }
 0x2a4   :  { %v1350_v12 = vadd.f32 %v1322_v50, %v1203_v17  ;;  %v1057_v5 = vadd.f32 %v1031_v31, %v910_v63  ;;  %v322_v31 = vadd.f32 %v10483_v48, %v10482_v42  ;;  %v10488_v50 = vld [vmem:[#allocation14_spill] sm:$0xff]  ;;  %v10495_v42 = vld [vmem:[#allocation28_spill] sm:$0xff] }
 0x2a5   :  { %v325_v60 = vadd.f32 %v10489_v6, %v10488_v50 }
 0x2a6   :  { %v1462_v10 = vadd.f32 %v10474_v1, %v1350_v12  ;;  %v1204_v58 = vadd.f32 %v1178_v61, %v1057_v5  ;;  %v472_v7 = vadd.f32 %v10484_v9, %v322_v31  ;;  %v10486_v61 = vld [vmem:[#allocation34_spill] sm:$0xff] }
 0x2a7   :  { %v1181_v51 = vpop.f32.mrf.mxu3  ;;  %v473_v5 = vadd.f32 %v10490_v14, %v325_v60 }
 0x2a8   :  { %v7293_v19 = vmax.f32 %v1462_v10, 0.0  ;;  %v1037_v40 = vpop.f32.mrf.mxu2  ;;  %v619_v27 = vadd.f32 %v10485_v26, %v472_v7 }
 0x2a9   :  { %v887_v25 = vpop.f32.mrf.mxu1 }
 0x2aa   :  { %v911_v52 = vadd.f32 %v887_v25, %v764_v2  ;;  %1715 = vrot.lane.b32.xlu2 %v7293_v19, %s5901_s17  ;;  %1521 = vrot.lane.b32.xlu0 %v7293_v19, %s5904_s26  ;;  %v766_v32 = vadd.f32 %v10487_v3, %v619_v27  ;;  %v620_v2 = vadd.f32 %v10491_v23, %v473_v5 }
 0x2ab   :  { %v1325_v39 = vpop.f32.mrf.mxu0 }
 0x2ac   :  { %v1351_v21 = vadd.f32 %v1325_v39, %v1204_v58  ;;  %v1058_v4 = vadd.f32 %v1034_v29, %v911_v52  ;;  %v767_v45 = vadd.f32 %v10493_v33, %v620_v2  ;;  %v5799_v2 = vld [vmem:[%s10413_s11] ss:$0 sm:$0xff] }
 0x2ae   :  { %v1463_v0 = vadd.f32 %v10480_v59, %v1351_v21  ;;  %v1205_v54 = vadd.f32 %v1181_v51, %v1058_v4  ;;  %v10492_v51 = vld [vmem:[#allocation40_spill] sm:$0xff]  ;;  %v10494_v4 = vld [vmem:[#allocation29_spill] sm:$0xff] }
 0x2af   :  { %v1184_v38 = vpop.f32.mrf.mxu3 }
 0x2b0   :  { %v7305_v13 = vmax.f32 %v1463_v0, 0.0  ;;  %v1040_v63 = vpop.f32.mrf.mxu2 }
 0x2b1   :  { %v890_v24 = vpop.f32.mrf.mxu1 }
 0x2b2   :  { %v912_v8 = vadd.f32 %v890_v24, %v765_v15  ;;  %1523 = vrot.lane.b32.xlu2 %v7305_v13, %s5904_s26  ;;  %1717 = vrot.lane.b32.xlu0 %v7305_v13, %s5901_s17 }
 0x2b3   :  { %v1328_v30 = vpop.f32.mrf.mxu0 }
 0x2b4   :  { %v1352_v18 = vadd.f32 %v1328_v30, %v1205_v54  ;;  %v1059_v49 = vadd.f32 %v1037_v40, %v912_v8 }
 0x2b6   :  { %v1464_v28 = vadd.f32 %v10486_v61, %v1352_v18  ;;  %v1206_v12 = vadd.f32 %v1184_v38, %v1059_v49 }
 0x2b7   :  { %v1187_v10 = vpop.f32.mrf.mxu3 }
 0x2b8   :  { %v7317_v37 = vmax.f32 %v1464_v28, 0.0  ;;  %v1043_v57 = vpop.f32.mrf.mxu2 }
 0x2b9   :  { %v893_v17 = vpop.f32.mrf.mxu1 }
 0x2ba   :  { %v913_v29 = vadd.f32 %v893_v17, %v766_v32  ;;  %1719 = vrot.lane.b32.xlu2 %v7317_v37, %s5901_s17  ;;  %1525 = vrot.lane.b32.xlu1 %v7317_v37, %s5904_s26 }
 0x2bb   :  { %v1331_v43 = vpop.f32.mrf.mxu0 }
 0x2bc   :  { %v1353_v1 = vadd.f32 %v1331_v43, %v1206_v12  ;;  %v1060_v25 = vadd.f32 %v1040_v63, %v913_v29 }
 0x2be   :  { %v1465_v20 = vadd.f32 %v10492_v51, %v1353_v1  ;;  %v1207_v39 = vadd.f32 %v1187_v10, %v1060_v25  ;;  %v1485_v1 = vld [vmem:[#allocation2 + $0x200] sm:$0xff] }
 0x2bf   :  { %v1190_v0 = vpop.f32.mrf.mxu3 }
 0x2c0   :  { %v7329_v58 = vmax.f32 %v1465_v20, 0.0 }
 0x2c1   :  { %v896_v52 = vpop.f32.mrf.mxu1 }
 0x2c2   :  { %v914_v55 = vadd.f32 %v896_v52, %v767_v45  ;;  %1527 = vrot.lane.b32.xlu0 %v7329_v58, %s5904_s26  ;;  %1721 = vrot.lane.b32.xlu1 %v7329_v58, %s5901_s17  ;;  %v1486_v52 = vld [vmem:[#allocation2 + $0x208] sm:$0xff] }
 0x2c3   :  { %v1334_v21 = vpop.f32.mrf.mxu0 }
 0x2c4   :  { %v1354_v47 = vadd.f32 %v1334_v21, %v1207_v39  ;;  %v1061_v11 = vadd.f32 %v1043_v57, %v914_v55  ;;  %v7384_v54 = vpop.permute.xlu2 %1505 }
 0x2c6   :  { %v1466_v59 = vadd.f32 %v10494_v4, %v1354_v47  ;;  %v1208_v53 = vadd.f32 %v1190_v0, %v1061_v11 }
 0x2c8   :  { %v7336_v40 = vmax.f32 %v1466_v59, 0.0  ;;  %v1487_v59 = vld [vmem:[#allocation2 + $0x210] sm:$0xff] }
 0x2ca   :  { %1529 = vrot.lane.b32.xlu2 %v7336_v40, %s5904_s26  ;;  %1867 = vrot.lane.b32.xlu0 %v7329_v58, %s5905_s0 }
 0x2cb   :  { %v1337_v15 = vpop.f32.mrf.mxu0 }
 0x2cc   :  { %v1355_v24 = vadd.f32 %v1337_v15, %v1208_v53  ;;  %v7423_v26 = vpop.permute.xlu1 %1501 }
 0x2ce   :  { %v1467_v48 = vadd.f32 %v10495_v42, %v1355_v24 }
 0x2d0   :  { %v7343_v31 = vmax.f32 %v1467_v48, 0.0 }
 0x2d2   :  { %1630 = vmatpush.msra.mxu2 %v7343_v31  ;;  %1713 = vrot.lane.b32.xlu2 %v7283_v16, %s5901_s17 }
 0x2d3   :  { %1723 = vrot.lane.b32.xlu0 %v7336_v40, %s5901_s17  ;;  %1531 = vrot.lane.b32.xlu1 %v7343_v31, %s5904_s26 }
 0x2d4   :  { %1631 = vmatpush.msra.mxu2 %v7336_v40  ;;  %v7411_v9 = vpop.permute.xlu0 %1503 }
 0x2d6   :  { %1632 = vmatpush.msra.mxu2 %v7329_v58 }
 0x2d8   :  { %1633 = vmatpush.msra.mxu2 %v7317_v37 }
 0x2da   :  { %1634 = vmatpush.msra.mxu2 %v7305_v13  ;;  %1711 = vrot.lane.b32.xlu2 %v7273_v41, %s5901_s17 }
 0x2db   :  { %1869 = vrot.lane.b32.xlu0 %v7336_v40, %s5905_s0  ;;  %2015 = vrot.lane.b32.xlu1 %v7336_v40, %s5906_s21 }
 0x2dc   :  { %1635 = vmatpush.msra.mxu2 %v7293_v19  ;;  %v7393_v8 = vpop.permute.xlu2 %1511 }
 0x2dd   :  { %v1554_v42 = vmul.f32 %v5799_v2, %v7393_v8 }
 0x2de   :  { %1636 = vmatpush.msra.mxu2 %v7283_v16 }
 0x2e0   :  { %1637 = vmatpush.msra.mxu2 %v7273_v41 }
 0x2e2   :  { %1638 = vmatpush.msra.mxu2 %v7263_v36  ;;  %1709 = vrot.lane.b32.xlu2 %v7263_v36, %s5901_s17 }
 0x2e3   :  { %1865 = vrot.lane.b32.xlu0 %v7317_v37, %s5905_s0  ;;  %2013 = vrot.lane.b32.xlu1 %v7329_v58, %s5906_s21 }
 0x2e4   :  { %1639 = vmatpush.msra.mxu2 %v7253_v22  ;;  %v7433_v49 = vpop.permute.xlu1 %1507 }
 0x2e5   :  { %v1552_v8 = vmul.f32 %v5799_v2, %v7433_v49 }
 0x2e6   :  { %1640 = vmatpush.msra.mxu2 %v7243_v34 }
 0x2e8   :  { %1641 = vmatpush.msra.mxu2 %v7233_v46 }
 0x2ea   :  { %1642 = vmatpush.msra.mxu2 %v7223_v62  ;;  %1707 = vrot.lane.b32.xlu2 %v7253_v22, %s5901_s17 }
 0x2eb   :  { %1863 = vrot.lane.b32.xlu0 %v7305_v13, %s5905_s0  ;;  %2011 = vrot.lane.b32.xlu1 %v7317_v37, %s5906_s21 }
 0x2ec   :  { %1643 = vmatpush.msra.mxu2 %v7213_v44  ;;  %v7419_v7 = vpop.permute.xlu0 %1509 }
 0x2ed   :  { %v1553_v48 = vmul.f32 %v5799_v2, %v7419_v7  ;;  %v1549_v7 = vmul.f32 %v5799_v2, %v7423_v26 }
 0x2ee   :  { %1644 = vmatpush.msra.mxu2 %v7204_v56 }
 0x2f0   :  { %1645 = vmatpush.msra.mxu2 %v7193_v35 }
 0x2f1   :  { %1646 = vmatmul.f32.vlgmr.msra.gmra.mxu2 %v1485_v1  ;;  %v1490_v1 = vld [vmem:[#allocation2 + $0x228] sm:$0xff] }
 0x2f2   :  { %1705 = vrot.lane.b32.xlu2 %v7243_v34, %s5901_s17 }
 0x2f3   :  { %1861 = vrot.lane.b32.xlu0 %v7293_v19, %s5905_s0  ;;  %2009 = vrot.lane.b32.xlu1 %v7305_v13, %s5906_s21 }
 0x2f4   :  { %v7401_v30 = vpop.permute.xlu2 %1517 }
 0x2f5   :  { %v1557_v11 = vmul.f32 %v5799_v2, %v7401_v30 }
 0x2f9   :  { %1649 = vmatmul.f32.gmra.mxu2 %v1486_v52 }
 0x2fa   :  { %1703 = vrot.lane.b32.xlu2 %v7233_v46, %s5901_s17 }
 0x2fb   :  { %1859 = vrot.lane.b32.xlu0 %v7283_v16, %s5905_s0  ;;  %2007 = vrot.lane.b32.xlu1 %v7293_v19, %s5906_s21 }
 0x2fc   :  { %v7443_v3 = vpop.permute.xlu1 %1513 }
 0x2fd   :  { %v1555_v24 = vmul.f32 %v5799_v2, %v7443_v3  ;;  %v1551_v3 = vmul.f32 %v5799_v2, %v7384_v54  ;;  %v1489_v54 = vld [vmem:[#allocation2 + $0x220] sm:$0xff] }
 0x301   :  { %1652 = vmatmul.f32.gmra.mxu2 %v1487_v59  ;;  %v1493_v59 = vld [vmem:[#allocation2 + $0x240] sm:$0xff] }
 0x302   :  { %1701 = vrot.lane.b32.xlu2 %v7223_v62, %s5901_s17 }
 0x303   :  { %1857 = vrot.lane.b32.xlu0 %v7273_v41, %s5905_s0  ;;  %2005 = vrot.lane.b32.xlu1 %v7283_v16, %s5906_s21 }
 0x304   :  { %v7409_v38 = vpop.permute.xlu2 %1715  ;;  %v7429_v27 = vpop.permute.xlu0 %1515 }
 0x305   :  { %v1556_v15 = vmul.f32 %v5799_v2, %v7429_v27 }
 0x30a   :  { %1699 = vrot.lane.b32.xlu2 %v7213_v44, %s5901_s17 }
 0x30b   :  { %1855 = vrot.lane.b32.xlu0 %v7263_v36, %s5905_s0  ;;  %2003 = vrot.lane.b32.xlu1 %v7273_v41, %s5906_s21 }
 0x30c   :  { %v1524_v18 = vpop.permute.xlu2 %1523 }
 0x30d   :  { %v1560_v57 = vmul.f32 %v5799_v2, %v1524_v18  ;;  %v1488_v18 = vld [vmem:[#allocation2 + $0x218] sm:$0xff] }
 0x30e   :  { %1655 = vmatmul.f32.gmra.mxu2 %v1488_v18  ;;  %v1494_v18 = vld [vmem:[#allocation2 + $0x248] sm:$0xff] }
 0x312   :  { %1697 = vrot.lane.b32.xlu2 %v7204_v56, %s5901_s17 }
 0x313   :  { %1853 = vrot.lane.b32.xlu0 %v7253_v22, %s5905_s0  ;;  %2001 = vrot.lane.b32.xlu1 %v7263_v36, %s5906_s21 }
 0x314   :  { %v7439_v61 = vpop.permute.xlu2 %1719  ;;  %v1520_v17 = vpop.permute.xlu1 %1519 }
 0x315   :  { %v1558_v47 = vmul.f32 %v5799_v2, %v1520_v17  ;;  %v1533_v17 = vld [vmem:[#allocation2] sm:$0xff] }
 0x316   :  { %1658 = vmatmul.f32.gmra.mxu2 %v1489_v54 }
 0x31a   :  { %1695 = vrot.lane.b32.xlu2 %v7193_v35, %s5901_s17 }
 0x31b   :  { %1851 = vrot.lane.b32.xlu0 %v7243_v34, %s5905_s0  ;;  %1999 = vrot.lane.b32.xlu1 %v7253_v22, %s5906_s21 }
 0x31c   :  { %v1522_v28 = vpop.permute.xlu0 %1521 }
 0x31d   :  { %v1559_v21 = vmul.f32 %v5799_v2, %v1522_v28 }
 0x31e   :  { %1661 = vmatmul.f32.gmra.mxu2 %v1490_v1  ;;  %v1540_v1 = vld [vmem:[#allocation2 + $0x38] sm:$0xff] }
 0x322   :  { %1847 = vrot.lane.b32.xlu2 %v7223_v62, %s5905_s0 }
 0x323   :  { %1849 = vrot.lane.b32.xlu0 %v7233_v46, %s5905_s0  ;;  %1997 = vrot.lane.b32.xlu1 %v7243_v34, %s5906_s21 }
 0x324   :  { %v1530_v32 = vpop.permute.xlu2 %1529  ;;  %v7455_v63 = vpop.permute.xlu0 %1717 }
 0x325   :  { %v1563_v51 = vmul.f32 %v5799_v2, %v1530_v32  ;;  %v1550_v32 = vmul.f32 %v5799_v2, %v7411_v9 }
 0x32a   :  { %1993 = vrot.lane.b32.xlu2 %v7223_v62, %s5906_s21 }
 0x32b   :  { %1995 = vrot.lane.b32.xlu0 %v7233_v46, %s5906_s21  ;;  %1845 = vrot.lane.b32.xlu1 %v7213_v44, %s5905_s0 }
 0x32c   :  { %v7457_v50 = vpop.permute.xlu2 %1713  ;;  %v1526_v6 = vpop.permute.xlu1 %1525 }
 0x32d   :  { %v1561_v33 = vmul.f32 %v5799_v2, %v1526_v6 }
 0x332   :  { %1841 = vrot.lane.b32.xlu2 %v7193_v35, %s5905_s0 }
 0x333   :  { %1843 = vrot.lane.b32.xlu0 %v7204_v56, %s5905_s0  ;;  %1991 = vrot.lane.b32.xlu1 %v7213_v44, %s5906_s21 }
 0x334   :  { %v7465_v60 = vpop.permute.xlu2 %1711  ;;  %v1528_v12 = vpop.permute.xlu0 %1527 }
 0x335   :  { %v7477_v14 = vpop.permute.xlu1 %1721  ;;  %v1562_v20 = vmul.f32 %v5799_v2, %v1528_v12  ;;  %v1534_v12 = vld [vmem:[#allocation2 + $0x8] sm:$0xff] }
 0x33a   :  { %2159 = vrot.lane.b32.xlu2 %v7329_v58, %s5909_s5 }
 0x33b   :  { %1989 = vrot.lane.b32.xlu0 %v7204_v56, %s5906_s21  ;;  %1987 = vrot.lane.b32.xlu1 %v7193_v35, %s5906_s21 }
 0x33c   :  { %v7473_v29 = vpop.permute.xlu2 %1709  ;;  %v7475_v43 = vpop.permute.xlu0 %1867 }
 0x342   :  { %1725 = vrot.lane.b32.xlu2 %v7343_v31, %s5901_s17 }
 0x343   :  { %2161 = vrot.lane.b32.xlu0 %v7336_v40, %s5909_s5  ;;  %2157 = vrot.lane.b32.xlu1 %v7317_v37, %s5909_s5 }
 0x344   :  { %v7485_v5 = vpop.permute.xlu2 %1707 }
 0x345   :  { %v7487_v10 = vpop.permute.xlu0 %1723  ;;  %v1532_v23 = vpop.permute.xlu1 %1531 }
 0x346   :  { %v1564_v25 = vmul.f32 %v5799_v2, %v1532_v23 }
 0x348   :  { %1565 = vmatpush.msra.mxu1 %v1564_v25 }
 0x34a   :  { %1566 = vmatpush.msra.mxu1 %v1563_v51  ;;  %2305 = vrot.lane.b32.xlu2 %v7329_v58, %s5907_s15  ;;  %v1535_v51 = vld [vmem:[#allocation2 + $0x10] sm:$0xff] }
 0x34b   :  { %2307 = vrot.lane.b32.xlu0 %v7336_v40, %s5907_s15  ;;  %1871 = vrot.lane.b32.xlu1 %v7343_v31, %s5905_s0 }
 0x34c   :  { %1567 = vmatpush.msra.mxu1 %v1562_v20  ;;  %v7498_v45 = vpop.permute.xlu2 %1705  ;;  %v1491_v20 = vld [vmem:[#allocation2 + $0x230] sm:$0xff] }
 0x34d   :  { %v7500_v39 = vpop.permute.xlu0 %1869  ;;  %v7502_v55 = vpop.permute.xlu1 %2015  ;;  %1664 = vmatmul.f32.gmra.mxu2 %v1491_v20 }
 0x34e   :  { %1568 = vmatpush.msra.mxu1 %v1561_v33 }
 0x350   :  { %1569 = vmatpush.msra.mxu1 %v1560_v57  ;;  %v1536_v57 = vld [vmem:[#allocation2 + $0x18] sm:$0xff] }
 0x352   :  { %1570 = vmatpush.msra.mxu1 %v1559_v21  ;;  %2153 = vrot.lane.b32.xlu2 %v7293_v19, %s5909_s5  ;;  %v1492_v21 = vld [vmem:[#allocation2 + $0x238] sm:$0xff] }
 0x353   :  { %2155 = vrot.lane.b32.xlu0 %v7305_v13, %s5909_s5  ;;  %2017 = vrot.lane.b32.xlu1 %v7343_v31, %s5906_s21 }
 0x354   :  { %1571 = vmatpush.msra.mxu1 %v1558_v47  ;;  %v7511_v4 = vpop.permute.xlu2 %1703 }
 0x355   :  { %v7513_v0 = vpop.permute.xlu0 %1865  ;;  %v7515_v53 = vpop.permute.xlu1 %2013  ;;  %1667 = vmatmul.f32.gmra.mxu2 %v1492_v21 }
 0x356   :  { %1572 = vmatpush.msra.mxu1 %v1557_v11 }
 0x358   :  { %1573 = vmatpush.msra.mxu1 %v1556_v15 }
 0x35a   :  { %1574 = vmatpush.msra.mxu1 %v1555_v24  ;;  %2151 = vrot.lane.b32.xlu2 %v7283_v16, %s5909_s5 }
 0x35b   :  { %2301 = vrot.lane.b32.xlu0 %v7305_v13, %s5907_s15  ;;  %2303 = vrot.lane.b32.xlu1 %v7317_v37, %s5907_s15 }
 0x35c   :  { %1575 = vmatpush.msra.mxu1 %v1554_v42  ;;  %v7527_v30 = vpop.permute.xlu2 %1701 }
 0x35d   :  { %v7529_v27 = vpop.permute.xlu0 %1863  ;;  %v7531_v28 = vpop.permute.xlu1 %2011  ;;  %1670 = vmatmul.f32.gmra.mxu2 %v1493_v59 }
 0x35e   :  { %1576 = vmatpush.msra.mxu1 %v1553_v48  ;;  %v1538_v48 = vld [vmem:[#allocation2 + $0x28] sm:$0xff] }
 0x360   :  { %1577 = vmatpush.msra.mxu1 %v1552_v8 }
 0x362   :  { %1578 = vmatpush.msra.mxu1 %v1551_v3  ;;  %2451 = vrot.lane.b32.xlu2 %v7329_v58, %s5908_s22 }
 0x363   :  { %2299 = vrot.lane.b32.xlu0 %v7293_v19, %s5907_s15  ;;  %2453 = vrot.lane.b32.xlu1 %v7336_v40, %s5908_s22 }
 0x364   :  { %1579 = vmatpush.msra.mxu1 %v1550_v32  ;;  %v7543_v49 = vpop.permute.xlu2 %1699 }
 0x365   :  { %v7545_v6 = vpop.permute.xlu0 %1861  ;;  %v7547_v9 = vpop.permute.xlu1 %2009  ;;  %1673 = vmatmul.f32.gmra.mxu2 %v1494_v18  ;;  %v1497_v18 = vld [vmem:[#allocation2 + $0x260] sm:$0xff] }
 0x366   :  { %1580 = vmatpush.msra.mxu1 %v1549_v7  ;;  %v1539_v7 = vld [vmem:[#allocation2 + $0x30] sm:$0xff] }
 0x367   :  { %1581 = vmatmul.f32.vlgmr.msra.gmra.mxu1 %v1533_v17  ;;  %v1495_v17 = vld [vmem:[#allocation2 + $0x250] sm:$0xff] }
 0x36a   :  { %2295 = vrot.lane.b32.xlu2 %v7273_v41, %s5907_s15 }
 0x36b   :  { %2149 = vrot.lane.b32.xlu0 %v7273_v41, %s5909_s5  ;;  %2297 = vrot.lane.b32.xlu1 %v7283_v16, %s5907_s15 }
 0x36c   :  { %v7555_v26 = vpop.permute.xlu2 %1697 }
 0x36d   :  { %v7557_v23 = vpop.permute.xlu0 %1859  ;;  %v7559_v2 = vpop.permute.xlu1 %2007  ;;  %1676 = vmatmul.f32.gmra.mxu2 %v1495_v17 }
 0x36f   :  { %1584 = vmatmul.f32.gmra.mxu1 %v1534_v12 }
 0x372   :  { %2145 = vrot.lane.b32.xlu2 %v7253_v22, %s5909_s5 }
 0x373   :  { %2599 = vrot.lane.b32.xlu0 %v7336_v40, %s5910_s7  ;;  %2147 = vrot.lane.b32.xlu1 %v7263_v36, %s5909_s5 }
 0x374   :  { %v7567_v25 = vpop.permute.xlu2 %1695 }
 0x375   :  { %v7569_v33 = vpop.permute.xlu0 %1857  ;;  %v7571_v52 = vpop.permute.xlu1 %2005 }
 0x377   :  { %1587 = vmatmul.f32.gmra.mxu1 %v1535_v51  ;;  %v1496_v51 = vld [vmem:[#allocation2 + $0x258] sm:$0xff] }
 0x378   :  { %1679 = vmatmul.f32.gmra.mxu2 %v1496_v51 }
 0x37a   :  { %2595 = vrot.lane.b32.xlu2 %v7317_v37, %s5910_s7 }
 0x37b   :  { %2449 = vrot.lane.b32.xlu0 %v7317_v37, %s5908_s22  ;;  %2597 = vrot.lane.b32.xlu1 %v7329_v58, %s5910_s7  ;;  %v1537_v58 = vld [vmem:[#allocation2 + $0x20] sm:$0xff] }
 0x37c   :  { %v7579_v40 = vpop.permute.xlu2 %1847 }
 0x37d   :  { %v7581_v47 = vpop.permute.xlu0 %1855  ;;  %v7583_v11 = vpop.permute.xlu1 %2003 }
 0x37f   :  { %1590 = vmatmul.f32.gmra.mxu1 %v1536_v57  ;;  %v7632_v57 = vld [vmem:[%s10413_s11 + $0x1] ss:$0 sm:$0xff] }
 0x380   :  { %v1756_v59 = vmul.f32 %v7632_v57, %v7439_v61  ;;  %1682 = vmatmul.f32.gmra.mxu2 %v1497_v18  ;;  %v1755_v17 = vmul.f32 %v7632_v57, %v7455_v63  ;;  %v1753_v61 = vmul.f32 %v7632_v57, %v7457_v50  ;;  %v1752_v63 = vmul.f32 %v7632_v57, %v7465_v60  ;;  %v1499_v18 = vld [vmem:[#allocation2 + $0x270] sm:$0xff] }
 0x381   :  { %v1749_v60 = vmul.f32 %v7632_v57, %v7498_v45 }
 0x382   :  { %2445 = vrot.lane.b32.xlu2 %v7293_v19, %s5908_s22 }
 0x383   :  { %2293 = vrot.lane.b32.xlu0 %v7263_v36, %s5907_s15  ;;  %2447 = vrot.lane.b32.xlu1 %v7305_v13, %s5908_s22 }
 0x384   :  { %v7591_v37 = vpop.permute.xlu2 %1993 }
 0x385   :  { %v7593_v15 = vpop.permute.xlu0 %1853  ;;  %v7595_v24 = vpop.permute.xlu1 %2001 }
 0x387   :  { %1593 = vmatmul.f32.gmra.mxu1 %v1537_v58 }
 0x38a   :  { %2289 = vrot.lane.b32.xlu2 %v7243_v34, %s5907_s15 }
 0x38b   :  { %2143 = vrot.lane.b32.xlu0 %v7243_v34, %s5909_s5  ;;  %2291 = vrot.lane.b32.xlu1 %v7253_v22, %s5907_s15 }
 0x38c   :  { %v7603_v42 = vpop.permute.xlu2 %1841 }
 0x38d   :  { %v7605_v8 = vpop.permute.xlu0 %1851  ;;  %v7607_v3 = vpop.permute.xlu1 %1999 }
 0x38f   :  { %1596 = vmatmul.f32.gmra.mxu1 %v1538_v48  ;;  %v1541_v48 = vld [vmem:[#allocation2 + $0x40] sm:$0xff] }
 0x392   :  { %2139 = vrot.lane.b32.xlu2 %v7223_v62, %s5909_s5 }
 0x393   :  { %2593 = vrot.lane.b32.xlu0 %v7305_v13, %s5910_s7  ;;  %2141 = vrot.lane.b32.xlu1 %v7233_v46, %s5909_s5 }
 0x394   :  { %v7615_v32 = vpop.permute.xlu2 %2159 }
 0x395   :  { %v7617_v54 = vpop.permute.xlu0 %1849  ;;  %v7619_v12 = vpop.permute.xlu1 %1997 }
 0x397   :  { %1599 = vmatmul.f32.gmra.mxu1 %v1539_v7 }
 0x39a   :  { %2589 = vrot.lane.b32.xlu2 %v7283_v16, %s5910_s7 }
 0x39b   :  { %2443 = vrot.lane.b32.xlu0 %v7283_v16, %s5908_s22  ;;  %2591 = vrot.lane.b32.xlu1 %v7293_v19, %s5910_s7  ;;  %v1758_v16 = vmul.f32 %v7632_v57, %v7487_v10  ;;  %v1757_v19 = vmul.f32 %v7632_v57, %v7477_v14 }
 0x39c   :  { %v1726_v13 = vpop.permute.xlu2 %1725 }
 0x39d   :  { %v7627_v20 = vpop.permute.xlu0 %1995  ;;  %v1759_v21 = vmul.f32 %v7632_v57, %v1726_v13  ;;  %v7635_v58 = vpop.permute.xlu1 %1845  ;;  %v1754_v13 = vmul.f32 %v7632_v57, %v7409_v38  ;;  %v1542_v38 = vld [vmem:[#allocation2 + $0x48] sm:$0xff] }
 0x39f   :  { %1602 = vmatmul.f32.gmra.mxu1 %v1540_v1  ;;  %1760 = vmatpush.msra.mxu3 %v1759_v21  ;;  %v1498_v21 = vld [vmem:[#allocation2 + $0x268] sm:$0xff] }
 0x3a0   :  { %1685 = vmatmul.f32.gmra.mxu2 %v1498_v21 }
 0x3a1   :  { %1761 = vmatpush.msra.mxu3 %v1758_v16  ;;  %v1751_v16 = vmul.f32 %v7632_v57, %v7473_v29  ;;  %v1748_v29 = vmul.f32 %v7632_v57, %v7511_v4  ;;  %v1745_v4 = vmul.f32 %v7632_v57, %v7555_v26 }
 0x3a2   :  { %2439 = vrot.lane.b32.xlu2 %v7263_v36, %s5908_s22 }
 0x3a3   :  { %2287 = vrot.lane.b32.xlu0 %v7233_v46, %s5907_s15  ;;  %2441 = vrot.lane.b32.xlu1 %v7273_v41, %s5908_s22 }
 0x3a4   :  { %1762 = vmatpush.msra.mxu3 %v1757_v19  ;;  %v7649_v10 = vpop.permute.xlu2 %2305  ;;  %v1750_v19 = vmul.f32 %v7632_v57, %v7485_v5  ;;  %v1543_v5 = vld [vmem:[#allocation2 + $0x50] sm:$0xff] }
 0x3a5   :  { %v7651_v7 = vpop.permute.xlu0 %1843  ;;  %v7653_v14 = vpop.permute.xlu1 %1991 }
 0x3a6   :  { %1763 = vmatpush.msra.mxu3 %v1756_v59 }
 0x3a7   :  { %1605 = vmatmul.f32.gmra.mxu1 %v1541_v48 }
 0x3a8   :  { %1764 = vmatpush.msra.mxu3 %v1755_v17  ;;  %v1747_v17 = vmul.f32 %v7632_v57, %v7527_v30  ;;  %1688 = vmatmul.f32.gmra.mxu2 %v1499_v18  ;;  %v1744_v30 = vmul.f32 %v7632_v57, %v7567_v25  ;;  %v7740_v18 = vld [vmem:[%s10413_s11 + $0x3] ss:$0 sm:$0xff] }
 0x3aa   :  { %1765 = vmatpush.msra.mxu3 %v1754_v13  ;;  %2163 = vrot.lane.b32.xlu2 %v7343_v31, %s5909_s5 }
 0x3ab   :  { %2137 = vrot.lane.b32.xlu0 %v7213_v44, %s5909_s5  ;;  %2285 = vrot.lane.b32.xlu1 %v7223_v62, %s5907_s15 }
 0x3ac   :  { %1766 = vmatpush.msra.mxu3 %v1753_v61  ;;  %v7669_v1 = vpop.permute.xlu2 %2153  ;;  %v1728_v61 = vld [vmem:[#allocation2 + $0x80] sm:$0xff] }
 0x3ad   :  { %v7671_v51 = vpop.permute.xlu0 %1989  ;;  %v7673_v50 = vpop.permute.xlu1 %1987 }
 0x3ae   :  { %1767 = vmatpush.msra.mxu3 %v1752_v63 }
 0x3af   :  { %1608 = vmatmul.f32.gmra.mxu1 %v1542_v38  ;;  %v7716_v38 = vld [vmem:[%s10413_s11 + $0x2] ss:$0 sm:$0xff] }
 0x3b0   :  { %1768 = vmatpush.msra.mxu3 %v1751_v16  ;;  %v1904_v25 = vmul.f32 %v7716_v38, %v7500_v39  ;;  %v1902_v16 = vmul.f32 %v7716_v38, %v7513_v0  ;;  %v2050_v0 = vmul.f32 %v7740_v18, %v7502_v55  ;;  %v1898_v55 = vmul.f32 %v7716_v38, %v7569_v33 }
 0x3b1   :  { %v1896_v33 = vmul.f32 %v7716_v38, %v7593_v15 }
 0x3b2   :  { %1769 = vmatpush.msra.mxu3 %v1750_v19  ;;  %2601 = vrot.lane.b32.xlu2 %v7343_v31, %s5910_s7  ;;  %v1545_v19 = vld [vmem:[#allocation2 + $0x60] sm:$0xff] }
 0x3b3   :  { %2587 = vrot.lane.b32.xlu0 %v7273_v41, %s5910_s7  ;;  %2309 = vrot.lane.b32.xlu1 %v7343_v31, %s5907_s15  ;;  %v1746_v41 = vmul.f32 %v7632_v57, %v7543_v49  ;;  %v1544_v49 = vld [vmem:[#allocation2 + $0x58] sm:$0xff]  ;;  %v1903_v57 = vmul.f32 %v7716_v38, %v7475_v43 }
 0x3b4   :  { %1770 = vmatpush.msra.mxu3 %v1749_v60  ;;  %v7689_v59 = vpop.permute.xlu2 %2151  ;;  %v1729_v60 = vld [vmem:[#allocation2 + $0x88] sm:$0xff] }
 0x3b5   :  { %v7691_v48 = vpop.permute.xlu0 %2161  ;;  %v7693_v45 = vpop.permute.xlu1 %2157 }
 0x3b6   :  { %1771 = vmatpush.msra.mxu3 %v1748_v29 }
 0x3b7   :  { %1611 = vmatmul.f32.gmra.mxu1 %v1543_v5  ;;  %v1901_v5 = vmul.f32 %v7716_v38, %v7529_v27  ;;  %v1899_v27 = vmul.f32 %v7716_v38, %v7557_v23  ;;  %v1730_v23 = vld [vmem:[#allocation2 + $0x90] sm:$0xff] }
 0x3b8   :  { %1772 = vmatpush.msra.mxu3 %v1747_v17 }
 0x3ba   :  { %1773 = vmatpush.msra.mxu3 %v1746_v41  ;;  %2283 = vrot.lane.b32.xlu2 %v7213_v44, %s5907_s15  ;;  %v1900_v41 = vmul.f32 %v7716_v38, %v7545_v6 }
 0x3bb   :  { %2437 = vrot.lane.b32.xlu0 %v7253_v22, %s5908_s22  ;;  %2455 = vrot.lane.b32.xlu1 %v7343_v31, %s5908_s22  ;;  %v1500_v31 = vld [vmem:[#allocation2 + $0x278] sm:$0xff] }
 0x3bc   :  { %1774 = vmatpush.msra.mxu3 %v1745_v4  ;;  %v7709_v13 = vpop.permute.xlu2 %2451  ;;  %1691 = vmatmul.f32.gmra.mxu2 %v1500_v31  ;;  %v2049_v4 = vmul.f32 %v7740_v18, %v7515_v53  ;;  %v1731_v31 = vld [vmem:[#allocation2 + $0x98] sm:$0xff] }
 0x3bd   :  { %v7711_v63 = vpop.permute.xlu0 %2307  ;;  %v1872_v26 = vpop.permute.xlu1 %1871 }
 0x3be   :  { %v1905_v21 = vmul.f32 %v7716_v38, %v1872_v26  ;;  %1775 = vmatpush.msra.mxu3 %v1744_v30  ;;  %v2048_v30 = vmul.f32 %v7740_v18, %v7531_v28  ;;  %v2046_v28 = vmul.f32 %v7740_v18, %v7559_v2  ;;  %v2045_v26 = vmul.f32 %v7740_v18, %v7571_v52 }
 0x3bf   :  { %1614 = vmatmul.f32.gmra.mxu1 %v1544_v49  ;;  %1776 = vmatmul.f32.vlgmr.msra.gmra.mxu3 %v1728_v61  ;;  %v1546_v61 = vld [vmem:[#allocation2 + $0x68] sm:$0xff]  ;;  %v2044_v2 = vmul.f32 %v7740_v18, %v7583_v11  ;;  %v1894_v52 = vmul.f32 %v7716_v38, %v7617_v54  ;;  %v2042_v11 = vmul.f32 %v7740_v18, %v7607_v3 }
 0x3c0   :  { %1906 = vmatpush.msrb.mxu0 %v1905_v21  ;;  %v1547_v21 = vld [vmem:[#allocation2 + $0x70] sm:$0xff]  ;;  %v1892_v54 = vmul.f32 %v7716_v38, %v7635_v58  ;;  %v1890_v3 = vmul.f32 %v7716_v38, %v7603_v42  ;;  %v2038_v42 = vmul.f32 %v7740_v18, %v7653_v14 }
 0x3c2   :  { %1907 = vmatpush.msrb.mxu0 %v1904_v25  ;;  %2133 = vrot.lane.b32.xlu2 %v7193_v35, %s5909_s5  ;;  %v1893_v25 = vmul.f32 %v7716_v38, %v7579_v40  ;;  %v2041_v40 = vmul.f32 %v7740_v18, %v7619_v12  ;;  %v1732_v12 = vld [vmem:[#allocation2 + $0xa0] sm:$0xff] }
 0x3c3   :  { %2281 = vrot.lane.b32.xlu0 %v7204_v56, %s5907_s15  ;;  %2135 = vrot.lane.b32.xlu1 %v7204_v56, %s5909_s5 }
 0x3c4   :  { %1908 = vmatpush.msrb.mxu0 %v1903_v57  ;;  %v7731_v39 = vpop.permute.xlu2 %2295  ;;  %v1891_v57 = vmul.f32 %v7716_v38, %v7651_v7 }
 0x3c5   :  { %v7733_v29 = vpop.permute.xlu0 %2155  ;;  %v2018_v43 = vpop.permute.xlu1 %2017 }
 0x3c6   :  { %v2051_v17 = vmul.f32 %v7740_v18, %v2018_v43  ;;  %1909 = vmatpush.msrb.mxu0 %v1902_v16  ;;  %v1548_v16 = vld [vmem:[#allocation2 + $0x78] sm:$0xff] }
 0x3c7   :  { %1617 = vmatmul.f32.gmra.mxu1 %v1545_v19  ;;  %1779 = vmatmul.f32.gmra.mxu3 %v1729_v60  ;;  %v1874_v19 = vld [vmem:[#allocation2 + $0x100] sm:$0xff]  ;;  %v2039_v60 = vmul.f32 %v7740_v18, %v7591_v37 }
 0x3c8   :  { %1910 = vmatpush.msrb.mxu0 %v1901_v5  ;;  %2052 = vmatpush.msrb.mxu1 %v2051_v17  ;;  %v1733_v5 = vld [vmem:[#allocation2 + $0xa8] sm:$0xff] }
 0x3c9   :  { %v1875_v17 = vld [vmem:[#allocation2 + $0x108] sm:$0xff] }
 0x3ca   :  { %1911 = vmatpush.msrb.mxu0 %v1900_v41  ;;  %2053 = vmatpush.msrb.mxu1 %v2050_v0  ;;  %v2020_v0 = vld [vmem:[#allocation2 + $0x180] sm:$0xff] }
 0x3cb   :  { %2279 = vrot.lane.b32.xlu0 %v7193_v35, %s5907_s15  ;;  %2583 = vrot.lane.b32.xlu2 %v7253_v22, %s5910_s7  ;;  %v1897_v22 = vmul.f32 %v7716_v38, %v7581_v47  ;;  %v1895_v47 = vmul.f32 %v7716_v38, %v7605_v8  ;;  %v2037_v38 = vmul.f32 %v7740_v18, %v7671_v51 }
 0x3cc   :  { %2585 = vrot.lane.b32.xlu1 %v7263_v36, %s5910_s7  ;;  %1912 = vmatpush.msrb.mxu0 %v1899_v27  ;;  %v7759_v6 = vpop.permute.xlu2 %2145  ;;  %v2047_v36 = vmul.f32 %v7740_v18, %v7547_v9  ;;  %v2036_v51 = vmul.f32 %v7740_v18, %v7673_v50  ;;  %v1734_v27 = vld [vmem:[#allocation2 + $0xb0] sm:$0xff] }
 0x3cd   :  { %2054 = vmatpush.msrb.mxu1 %v2049_v4  ;;  %v7763_v53 = vpop.permute.xlu0 %2301  ;;  %v7765_v49 = vpop.permute.xlu1 %2303  ;;  %v1876_v4 = vld [vmem:[#allocation2 + $0x110] sm:$0xff] }
 0x3ce   :  { %1913 = vmatpush.msrb.mxu0 %v1898_v55  ;;  %v2021_v55 = vld [vmem:[#allocation2 + $0x188] sm:$0xff] }
 0x3cf   :  { %2055 = vmatpush.msrb.mxu1 %v2048_v30  ;;  %1782 = vmatmul.f32.gmra.mxu3 %v1730_v23  ;;  %v2729_v23 = vld [vmem:[%s10406_s4 + $0x60] sm:$0xff] }
 0x3d0   :  { %1620 = vmatmul.f32.gmra.mxu1 %v1546_v61  ;;  %1914 = vmatpush.msrb.mxu0 %v1897_v22 }
 0x3d1   :  { %2056 = vmatpush.msrb.mxu1 %v2047_v36 }
 0x3d2   :  { %1915 = vmatpush.msrb.mxu0 %v1896_v33  ;;  %v1735_v33 = vld [vmem:[#allocation2 + $0xb8] sm:$0xff] }
 0x3d3   :  { %2057 = vmatpush.msrb.mxu1 %v2046_v28  ;;  %2431 = vrot.lane.b32.xlu0 %v7223_v62, %s5908_s22  ;;  %v1877_v28 = vld [vmem:[#allocation2 + $0x118] sm:$0xff] }
 0x3d4   :  { %2581 = vrot.lane.b32.xlu2 %v7243_v34, %s5910_s7  ;;  %2435 = vrot.lane.b32.xlu1 %v7243_v34, %s5908_s22  ;;  %v7785_v9 = vpop.permute.xlu2 %2595  ;;  %v2043_v34 = vmul.f32 %v7740_v18, %v7595_v24 }
 0x3d5   :  { %1916 = vmatpush.msrb.mxu0 %v1895_v47  ;;  %2058 = vmatpush.msrb.mxu1 %v2045_v26  ;;  %v7791_v15 = vpop.permute.xlu0 %2299  ;;  %v7793_v8 = vpop.permute.xlu1 %2453  ;;  %v2022_v26 = vld [vmem:[#allocation2 + $0x190] sm:$0xff]  ;;  %v2726_v47 = vld [vmem:[%s10406_s4 + $0x48] sm:$0xff] }
 0x3d7   :  { %1917 = vmatpush.msrb.mxu0 %v1894_v52  ;;  %2059 = vmatpush.msrb.mxu1 %v2044_v2  ;;  %v2727_v2 = vld [vmem:[%s10406_s4 + $0x50] sm:$0xff] }
 0x3d8   :  { %1623 = vmatmul.f32.gmra.mxu1 %v1547_v21  ;;  %1785 = vmatmul.f32.gmra.mxu3 %v1731_v31 }
 0x3d9   :  { %1918 = vmatpush.msrb.mxu0 %v1893_v25  ;;  %2060 = vmatpush.msrb.mxu1 %v2043_v34  ;;  %v1736_v34 = vld [vmem:[#allocation2 + $0xc0] sm:$0xff] }
 0x3db   :  { %1919 = vmatpush.msrb.mxu0 %v1892_v54  ;;  %2061 = vmatpush.msrb.mxu1 %v2042_v11  ;;  %v1878_v11 = vld [vmem:[#allocation2 + $0x120] sm:$0xff]  ;;  %v2023_v54 = vld [vmem:[#allocation2 + $0x198] sm:$0xff] }
 0x3dc   :  { %2577 = vrot.lane.b32.xlu0 %v7223_v62, %s5910_s7  ;;  %2429 = vrot.lane.b32.xlu2 %v7213_v44, %s5908_s22  ;;  %v7811_v24 = vpop.permute.xlu2 %2445  ;;  %v2040_v62 = vmul.f32 %v7740_v18, %v7627_v20 }
 0x3dd   :  { %2433 = vrot.lane.b32.xlu1 %v7233_v46, %s5908_s22  ;;  %1920 = vmatpush.msrb.mxu0 %v1891_v57  ;;  %v7817_v58 = vpop.permute.xlu0 %2149  ;;  %v7819_v7 = vpop.permute.xlu1 %2297  ;;  %v2723_v57 = vld [vmem:[%s10406_s4 + $0x30] sm:$0xff] }
 0x3de   :  { %2062 = vmatpush.msrb.mxu1 %v2041_v40  ;;  %v2724_v40 = vld [vmem:[%s10406_s4 + $0x38] sm:$0xff] }
 0x3df   :  { %1921 = vmatpush.msrb.mxu0 %v1890_v3  ;;  %v2728_v3 = vld [vmem:[%s10406_s4 + $0x58] sm:$0xff] }
 0x3e0   :  { %2063 = vmatpush.msrb.mxu1 %v2040_v62  ;;  %1788 = vmatmul.f32.gmra.mxu3 %v1732_v12 }
 0x3e1   :  { %1626 = vmatmul.f32.gmra.mxu1 %v1548_v16  ;;  %1922 = vmatmul.f32.vlgmr.msrb.gmra.mxu0 %v1874_v19  ;;  %v7907_v19 = vld [vmem:[%s10413_s11 + $0x5] ss:$0 sm:$0xff] }
 0x3e2   :  { %2064 = vmatpush.msrb.mxu1 %v2039_v60 }
 0x3e4   :  { %2065 = vmatpush.msrb.mxu1 %v2038_v42  ;;  %2425 = vrot.lane.b32.xlu0 %v7193_v35, %s5908_s22  ;;  %v7831_v20 = vpop.f32.mrf.mxu1  ;;  %v7833_v43 = vpop.permute.xlu2 %2289 }
 0x3e5   :  { %2575 = vrot.lane.b32.xlu2 %v7213_v44, %s5910_s7  ;;  %2579 = vrot.lane.b32.xlu1 %v7233_v46, %s5910_s7  ;;  %v7839_v37 = vpop.permute.xlu0 %2599  ;;  %v7841_v14 = vpop.permute.xlu1 %2147  ;;  %v2732_v44 = vld [vmem:[%s10406_s4 + $0x78] sm:$0xff] }
 0x3e6   :  { %2066 = vmatpush.msrb.mxu1 %v2037_v38  ;;  %v1737_v38 = vld [vmem:[#allocation2 + $0xc8] sm:$0xff] }
 0x3e8   :  { %2067 = vmatpush.msrb.mxu1 %v2036_v51  ;;  %1791 = vmatmul.f32.gmra.mxu3 %v1733_v5  ;;  %v1879_v5 = vld [vmem:[#allocation2 + $0x128] sm:$0xff]  ;;  %v2024_v51 = vld [vmem:[#allocation2 + $0x1a0] sm:$0xff] }
 0x3e9   :  { %1925 = vmatmul.f32.gmra.mxu0 %v1875_v17  ;;  %2068 = vmatmul.f32.vlgmr.msrb.gmra.mxu1 %v2020_v0  ;;  %v2196_v17 = vmul.f32 %v7907_v19, %v7691_v48  ;;  %v2720_v0 = vld [vmem:[%s10406_s4 + $0x18] sm:$0xff]  ;;  %v2194_v48 = vmul.f32 %v7907_v19, %v7693_v45  ;;  %v2193_v45 = vmul.f32 %v7907_v19, %v7733_v29 }
 0x3ea   :  { %v2191_v29 = vmul.f32 %v7907_v19, %v7689_v59 }
 0x3ec   :  { %2810 = vperm.xlu0 %5785, %v2732_v44   ;;  %v7848_v46 = vpop.f32.mrf.mxu1  ;;  %v7850_v41 = vpop.permute.xlu2 %2139  ;;  %v2195_v44 = vmul.f32 %v7907_v19, %v7615_v32 }
 0x3ed   :  { %2571 = vrot.lane.b32.xlu2 %v7193_v35, %s5910_s7  ;;  %2427 = vrot.lane.b32.xlu1 %v7204_v56, %s5908_s22  ;;  %v7856_v50 = vpop.permute.xlu0 %2449  ;;  %v7858_v18 = vpop.permute.xlu1 %2597  ;;  %v2730_v35 = vld [vmem:[%s10406_s4 + $0x68] sm:$0xff] }
 0x3f0   :  { %1794 = vmatmul.f32.gmra.mxu3 %v1734_v27  ;;  %v2721_v27 = vld [vmem:[%s10406_s4 + $0x20] sm:$0xff] }
 0x3f1   :  { %1928 = vmatmul.f32.gmra.mxu0 %v1876_v4  ;;  %2071 = vmatmul.f32.gmra.mxu1 %v2021_v55  ;;  %v2725_v4 = vld [vmem:[%s10406_s4 + $0x40] sm:$0xff] }
 0x3f4   :  { %2795 = vperm.xlu0 %5785, %v2729_v23   ;;  %v7866_v30 = vpop.f32.mrf.mxu1  ;;  %v7868_v61 = vpop.permute.xlu2 %2589 }
 0x3f5   :  { %2800 = vperm.xlu2 %5784, %v2730_v35   ;;  %2573 = vrot.lane.b32.xlu1 %v7204_v56, %s5910_s7  ;;  %v7872_v22 = vpop.permute.xlu0 %2293  ;;  %v7874_v36 = vpop.permute.xlu1 %2447  ;;  %v2731_v56 = vld [vmem:[%s10406_s4 + $0x70] sm:$0xff]  ;;  %v7934_v35 = vld [vmem:[%s10413_s11 + $0x8] ss:$0 sm:$0xff] }
 0x3f8   :  { %1797 = vmatmul.f32.gmra.mxu3 %v1735_v33 }
 0x3f9   :  { %1931 = vmatmul.f32.gmra.mxu0 %v1877_v28  ;;  %2074 = vmatmul.f32.gmra.mxu1 %v2022_v26  ;;  %v1738_v26 = vld [vmem:[#allocation2 + $0xd0] sm:$0xff] }
 0x3fc   :  { %2780 = vperm.xlu0 %5785, %v2726_v47   ;;  %v7885_v52 = vpop.f32.mrf.mxu1  ;;  %v7887_v21 = vpop.permute.xlu2 %2439  ;;  %v1880_v47 = vld [vmem:[#allocation2 + $0x130] sm:$0xff] }
 0x3fd   :  { %2785 = vperm.xlu2 %5784, %v2727_v2   ;;  %2805 = vperm.xlu1 %5786, %v2731_v56   ;;  %v7889_v31 = vpop.permute.xlu0 %2143  ;;  %v7891_v25 = vpop.permute.xlu1 %2291  ;;  %v2025_v2 = vld [vmem:[#allocation2 + $0x1a8] sm:$0xff]  ;;  %v2192_v56 = vmul.f32 %v7907_v19, %v7669_v1 }
 0x3fe   :  { %v2718_v1 = vld [vmem:[%s10406_s4 + $0x8] sm:$0xff] }
 0x400   :  { %1800 = vmatmul.f32.gmra.mxu3 %v1736_v34  ;;  %v2634_v34 = vmul.f32 %v7934_v35, %v7839_v37  ;;  %v2722_v37 = vld [vmem:[%s10406_s4 + $0x28] sm:$0xff] }
 0x401   :  { %1934 = vmatmul.f32.gmra.mxu0 %v1878_v11  ;;  %2077 = vmatmul.f32.gmra.mxu1 %v2023_v54  ;;  %v2717_v11 = vld [vmem:[%s10406_s4] sm:$0xff]  ;;  %v2190_v54 = vmul.f32 %v7907_v19, %v7817_v58  ;;  %v1881_v58 = vld [vmem:[#allocation2 + $0x138] sm:$0xff] }
 0x404   :  { %2765 = vperm.xlu0 %5785, %v2723_v57   ;;  %v7902_v12 = vpop.f32.mrf.mxu1  ;;  %v2164_v62 = vpop.permute.xlu2 %2163  ;;  %v2633_v57 = vmul.f32 %v7934_v35, %v7858_v18  ;;  %v2189_v18 = vmul.f32 %v7907_v19, %v7841_v14  ;;  %v2629_v14 = vmul.f32 %v7934_v35, %v7868_v61  ;;  %v2185_v61 = vmul.f32 %v7907_v19, %v7850_v41 }
 0x405   :  { %2770 = vperm.xlu2 %5784, %v2724_v40   ;;  %2790 = vperm.xlu1 %5786, %v2728_v3   ;;  %v2594_v16 = vpop.permute.xlu0 %2593  ;;  %v2197_v60 = vmul.f32 %v7907_v19, %v2164_v62  ;;  %v7910_v42 = vpop.permute.xlu1 %2141  ;;  %v1739_v62 = vld [vmem:[#allocation2 + $0xd8] sm:$0xff] }
 0x406   :  { %v7993_v41 = vpop.f32.mrf.mxu2 }
 0x407   :  { %2198 = vmatpush.msrb.mxu2 %v2197_v60  ;;  %v2632_v60 = vmul.f32 %v7934_v35, %v7785_v9  ;;  %v2719_v9 = vld [vmem:[%s10406_s4 + $0x10] sm:$0xff] }
 0x408   :  { %1803 = vmatmul.f32.gmra.mxu3 %v1737_v38  ;;  %v2026_v38 = vld [vmem:[#allocation2 + $0x1b0] sm:$0xff] }
 0x409   :  { %1937 = vmatmul.f32.gmra.mxu0 %v1879_v5  ;;  %2080 = vmatmul.f32.gmra.mxu1 %v2024_v51  ;;  %v2631_v5 = vmul.f32 %v7934_v35, %v2594_v16  ;;  %v2188_v51 = vmul.f32 %v7907_v19, %v7759_v6  ;;  %v2187_v16 = vmul.f32 %v7907_v19, %v7889_v31 }
 0x40a   :  { %2199 = vmatpush.msrb.mxu2 %v2196_v17 }
 0x40c   :  { %2750 = vperm.xlu0 %5785, %v2720_v0   ;;  %v7927_v55 = vpop.f32.mrf.mxu1  ;;  %2200 = vmatpush.msrb.mxu2 %v2195_v44  ;;  %v2602_v23 = vpop.permute.xlu2 %2601 }
 0x40d   :  { %2755 = vperm.xlu2 %5784, %v2721_v27   ;;  %2775 = vperm.xlu1 %5786, %v2725_v4   ;;  %v7929_v32 = vpop.permute.xlu0 %2443  ;;  %v2635_v33 = vmul.f32 %v7934_v35, %v2602_v23  ;;  %v2592_v28 = vpop.permute.xlu1 %2591  ;;  %v1740_v27 = vld [vmem:[#allocation2 + $0xe0] sm:$0xff]  ;;  %v2186_v4 = vmul.f32 %v7907_v19, %v7910_v42  ;;  %v2027_v23 = vld [vmem:[#allocation2 + $0x1b8] sm:$0xff] }
 0x40e   :  { %2201 = vmatpush.msrb.mxu2 %v2194_v48  ;;  %v2630_v17 = vmul.f32 %v7934_v35, %v2592_v28  ;;  %v1882_v48 = vld [vmem:[#allocation2 + $0x140] sm:$0xff] }
 0x40f   :  { %2636 = vmatpush.msra.mxu1 %v2635_v33 }
 0x410   :  { %1806 = vmatmul.f32.gmra.mxu3 %v1738_v26  ;;  %2202 = vmatpush.msrb.mxu2 %v2193_v45  ;;  %v1741_v26 = vld [vmem:[#allocation2 + $0xe8] sm:$0xff] }
 0x411   :  { %1940 = vmatmul.f32.gmra.mxu0 %v1880_v47  ;;  %2083 = vmatmul.f32.gmra.mxu1 %v2025_v2  ;;  %v1883_v2 = vld [vmem:[#allocation2 + $0x148] sm:$0xff] }
 0x412   :  { %2203 = vmatpush.msrb.mxu2 %v2192_v56  ;;  %2637 = vmatpush.msra.mxu1 %v2634_v34  ;;  %v2028_v56 = vld [vmem:[#allocation2 + $0x1c0] sm:$0xff] }
 0x413   :  { %v7998_v34 = vld [vmem:[%s10413_s11 + $0x6] ss:$0 sm:$0xff] }
 0x414   :  { %2735 = vperm.xlu0 %5785, %v2717_v11   ;;  %v7958_v40 = vpop.f32.mrf.mxu1  ;;  %2204 = vmatpush.msrb.mxu2 %v2191_v29  ;;  %v7988_v33 = vpop.permute.xlu2 %2283  ;;  %v2342_v29 = vmul.f32 %v7998_v34, %v7711_v63  ;;  %v8014_v63 = vld [vmem:[%s10413_s11 + $0x7] ss:$0 sm:$0xff] }
 0x415   :  { %2740 = vperm.xlu2 %5784, %v2718_v1   ;;  %2760 = vperm.xlu1 %5786, %v2722_v37   ;;  %v7960_v59 = vpop.permute.xlu0 %2287  ;;  %v7962_v3 = vpop.permute.xlu1 %2441  ;;  %v2341_v1 = vmul.f32 %v7998_v34, %v7649_v10 }
 0x416   :  { %2638 = vmatpush.msra.mxu1 %v2633_v57  ;;  %2205 = vmatpush.msrb.mxu2 %v2190_v54  ;;  %v2340_v57 = vmul.f32 %v7998_v34, %v7765_v49  ;;  %v2338_v49 = vmul.f32 %v7998_v34, %v7791_v15 }
 0x418   :  { %2639 = vmatpush.msra.mxu1 %v2632_v60  ;;  %1809 = vmatmul.f32.gmra.mxu3 %v1739_v62 }
 0x419   :  { %1943 = vmatmul.f32.gmra.mxu0 %v1881_v58  ;;  %2086 = vmatmul.f32.gmra.mxu1 %v2026_v38  ;;  %v1742_v58 = vld [vmem:[#allocation2 + $0xf0] sm:$0xff] }
 0x41a   :  { %2206 = vmatpush.msrb.mxu2 %v2189_v18  ;;  %2640 = vmatpush.msra.mxu1 %v2631_v5  ;;  %v1884_v38 = vld [vmem:[#allocation2 + $0x150] sm:$0xff]  ;;  %v2029_v18 = vld [vmem:[#allocation2 + $0x1c8] sm:$0xff]  ;;  %v2339_v5 = vmul.f32 %v7998_v34, %v7763_v53  ;;  %v2487_v53 = vmul.f32 %v8014_v63, %v7709_v13  ;;  %v2335_v13 = vmul.f32 %v7998_v34, %v7872_v22 }
 0x41b   :  { %v2484_v22 = vmul.f32 %v8014_v63, %v7811_v24 }
 0x41c   :  { %2207 = vmatpush.msrb.mxu2 %v2188_v51  ;;  %2641 = vmatpush.msra.mxu1 %v2630_v17  ;;  %v7979_v0 = vpop.f32.mrf.mxu1  ;;  %v2134_v54 = vpop.permute.xlu2 %2133  ;;  %v2488_v17 = vmul.f32 %v8014_v63, %v7793_v8  ;;  %v2486_v8 = vmul.f32 %v8014_v63, %v7856_v50  ;;  %v2334_v50 = vmul.f32 %v7998_v34, %v7891_v25 }
 0x41d   :  { %2745 = vperm.xlu1 %5786, %v2719_v9   ;;  %v2138_v6 = vpop.permute.xlu0 %2137  ;;  %v7981_v44 = vpop.permute.xlu1 %2285  ;;  %v2337_v9 = vmul.f32 %v7998_v34, %v7819_v7 }
 0x41e   :  { %2208 = vmatpush.msrb.mxu2 %v2187_v16  ;;  %2642 = vmatpush.msra.mxu1 %v2629_v14  ;;  %v2184_v31 = vmul.f32 %v7907_v19, %v2138_v6  ;;  %v8019_v51 = vpop.f32.mrf.mxu2  ;;  %v2336_v16 = vmul.f32 %v7998_v34, %v7731_v39  ;;  %v1743_v6 = vld [vmem:[#allocation2 + $0xf8] sm:$0xff]  ;;  %v2485_v39 = vmul.f32 %v8014_v63, %v7874_v36 }
 0x41f   :  { %v2333_v36 = vmul.f32 %v7998_v34, %v7833_v43  ;;  %v1886_v43 = vld [vmem:[#allocation2 + $0x160] sm:$0xff] }
 0x420   :  { %2209 = vmatpush.msrb.mxu2 %v2186_v4  ;;  %1812 = vmatmul.f32.gmra.mxu3 %v1740_v27  ;;  %v1885_v4 = vld [vmem:[#allocation2 + $0x158] sm:$0xff] }
 0x421   :  { %1946 = vmatmul.f32.gmra.mxu0 %v1882_v48  ;;  %2089 = vmatmul.f32.gmra.mxu1 %v2027_v23  ;;  %v2030_v48 = vld [vmem:[#allocation2 + $0x1d0] sm:$0xff] }
 0x422   :  { %2210 = vmatpush.msrb.mxu2 %v2185_v61 }
 0x424   :  { %2211 = vmatpush.msrb.mxu2 %v2184_v31  ;;  %v7990_v28 = vpop.f32.mrf.mxu1  ;;  %v2182_v31 = vmul.f32 %v7907_v19, %v2134_v54  ;;  %v2167_v54 = vld [vmem:[#allocation2 + $0x288] sm:$0xff] }
 0x425   :  { %v2588_v42 = vpop.permute.xlu0 %2587  ;;  %v2310_v47 = vpop.permute.xlu1 %2309 }
 0x426   :  { %v2628_v45 = vmul.f32 %v7934_v35, %v2588_v42  ;;  %v2343_v11 = vmul.f32 %v7998_v34, %v2310_v47  ;;  %v2584_v27 = vpop.permute.xlu2 %2583  ;;  %v8040_v61 = vpop.f32.mrf.mxu2  ;;  %v2166_v42 = vld [vmem:[#allocation2 + $0x280] sm:$0xff]  ;;  %v2031_v47 = vld [vmem:[#allocation2 + $0x1d8] sm:$0xff] }
 0x428   :  { %1815 = vmatmul.f32.gmra.mxu3 %v1741_v26  ;;  %2643 = vmatpush.msra.mxu1 %v2628_v45  ;;  %v2483_v45 = vmul.f32 %v8014_v63, %v7929_v32  ;;  %v2481_v32 = vmul.f32 %v8014_v63, %v7887_v21 }
 0x429   :  { %1949 = vmatmul.f32.gmra.mxu0 %v1883_v2  ;;  %2092 = vmatmul.f32.gmra.mxu1 %v2028_v56  ;;  %v2482_v2 = vmul.f32 %v8014_v63, %v7962_v3  ;;  %v2331_v56 = vmul.f32 %v7998_v34, %v7981_v44  ;;  %v2330_v3 = vmul.f32 %v7998_v34, %v7988_v33 }
 0x42a   :  { %2344 = vmatpush.msrb.mxu3 %v2343_v11 }
 0x42c   :  { %2345 = vmatpush.msrb.mxu3 %v2342_v29  ;;  %v8005_v37 = vpop.f32.mrf.mxu1 }
 0x42d   :  { %10496 = vst [vmem:[#allocation46_spill] sm:$0xff] %v8005_v37  ;;  %v8009_v62 = vpop.permute.xlu0 %2437  ;;  %v2456_v60 = vpop.permute.xlu1 %2455  ;;  %v2619_v37 = vld [vmem:[#allocation2 + $0x478] sm:$0xff] }
 0x42e   :  { %2346 = vmatpush.msrb.mxu3 %v2341_v1  ;;  %v2489_v10 = vmul.f32 %v8014_v63, %v2456_v60  ;;  %v2582_v11 = vpop.permute.xlu2 %2581  ;;  %v2480_v44 = vmul.f32 %v8014_v63, %v8009_v62  ;;  %v8071_v21 = vpop.f32.mrf.mxu2 }
 0x42f   :  { %v2625_v60 = vmul.f32 %v7934_v35, %v2582_v11 }
 0x430   :  { %2347 = vmatpush.msrb.mxu3 %v2340_v57  ;;  %2490 = vmatpush.msra.mxu0 %v2489_v10  ;;  %v2032_v10 = vld [vmem:[#allocation2 + $0x1e0] sm:$0xff] }
 0x431   :  { %1818 = vmatmul.f32.gmra.mxu3 %v1742_v58  ;;  %1952 = vmatmul.f32.gmra.mxu0 %v1884_v38 }
 0x432   :  { %2095 = vmatmul.f32.gmra.mxu1 %v2029_v18  ;;  %2348 = vmatpush.msrb.mxu3 %v2339_v5  ;;  %v2312_v18 = vld [vmem:[#allocation2 + $0x300] sm:$0xff]  ;;  %v1887_v5 = vld [vmem:[#allocation2 + $0x168] sm:$0xff] }
 0x433   :  { %2491 = vmatpush.msra.mxu0 %v2488_v17  ;;  %v2168_v17 = vld [vmem:[#allocation2 + $0x290] sm:$0xff] }
 0x434   :  { %2349 = vmatpush.msrb.mxu3 %v2338_v49  ;;  %v8027_v14 = vpop.f32.mrf.mxu1 }
 0x435   :  { %10497 = vst [vmem:[#allocation19_spill] sm:$0xff] %v8027_v14  ;;  %v2136_v15 = vpop.permute.xlu1 %2135  ;;  %2492 = vmatpush.msra.mxu0 %v2487_v53  ;;  %v2282_v23 = vpop.permute.xlu0 %2281 }
 0x436   :  { %2350 = vmatpush.msrb.mxu3 %v2337_v9  ;;  %v2183_v7 = vmul.f32 %v7907_v19, %v2136_v15  ;;  %v2332_v19 = vmul.f32 %v7998_v34, %v7960_v59  ;;  %v2626_v59 = vmul.f32 %v7934_v35, %v2584_v27  ;;  %v2329_v58 = vmul.f32 %v7998_v34, %v2282_v23  ;;  %v2033_v15 = vld [vmem:[#allocation2 + $0x1e8] sm:$0xff] }
 0x437   :  { %2493 = vmatpush.msra.mxu0 %v2486_v8  ;;  %v2430_v8 = vpop.permute.xlu2 %2429 }
 0x438   :  { %2351 = vmatpush.msrb.mxu3 %v2336_v16  ;;  %2212 = vmatpush.msrb.mxu2 %v2183_v7  ;;  %v1888_v7 = vld [vmem:[#allocation2 + $0x170] sm:$0xff] }
 0x439   :  { %1821 = vmatmul.f32.gmra.mxu3 %v1743_v6  ;;  %1955 = vmatmul.f32.gmra.mxu0 %v1885_v4  ;;  %v2313_v6 = vld [vmem:[#allocation2 + $0x308] sm:$0xff] }
 0x43a   :  { %2098 = vmatmul.f32.gmra.mxu1 %v2030_v48  ;;  %2352 = vmatpush.msrb.mxu3 %v2335_v13  ;;  %v2169_v48 = vld [vmem:[#allocation2 + $0x298] sm:$0xff] }
 0x43b   :  { %2494 = vmatpush.msra.mxu0 %v2485_v39  ;;  %2213 = vmatpush.msrb.mxu2 %v2182_v31  ;;  %v2476_v39 = vmul.f32 %v8014_v63, %v2430_v8  ;;  %v2604_v8 = vld [vmem:[#allocation2 + $0x400] sm:$0xff] }
 0x43c   :  { %v8047_v26 = vpop.f32.mrf.mxu1  ;;  %2353 = vmatpush.msrb.mxu3 %v2334_v50  ;;  %2214 = vmatmul.f32.vlgmr.msrb.gmra.mxu2 %v2166_v42  ;;  %v2034_v42 = vld [vmem:[#allocation2 + $0x1f0] sm:$0xff] }
 0x43d   :  { %10498 = vst [vmem:[#allocation9_spill] sm:$0xff] %v8047_v26  ;;  %2495 = vmatpush.msra.mxu0 %v2484_v22  ;;  %v2280_v29 = vpop.permute.xlu0 %2279  ;;  %v2314_v22 = vld [vmem:[#allocation2 + $0x310] sm:$0xff] }
 0x43e   :  { %v2586_v25 = vpop.permute.xlu1 %2585  ;;  %2354 = vmatpush.msrb.mxu3 %v2333_v36  ;;  %v2328_v38 = vmul.f32 %v7998_v34, %v2280_v29  ;;  %v8081_v34 = vpop.f32.mrf.mxu2 }
 0x43f   :  { %v2627_v24 = vmul.f32 %v7934_v35, %v2586_v25  ;;  %2496 = vmatpush.msra.mxu0 %v2483_v45  ;;  %v1889_v45 = vld [vmem:[#allocation2 + $0x178] sm:$0xff] }
 0x440   :  { %2355 = vmatpush.msrb.mxu3 %v2332_v19  ;;  %v2576_v19 = vpop.permute.xlu2 %2575 }
 0x441   :  { %2644 = vmatpush.msra.mxu1 %v2627_v24  ;;  %2497 = vmatpush.msra.mxu0 %v2482_v2  ;;  %v2170_v2 = vld [vmem:[#allocation2 + $0x2a0] sm:$0xff] }
 0x442   :  { %2101 = vmatmul.f32.gmra.mxu1 %v2031_v47  ;;  %v8063_v1 = vpop.f32.mrf.mxu3  ;;  %1958 = vmatmul.f32.gmra.mxu0 %v1886_v43  ;;  %v2622_v43 = vmul.f32 %v7934_v35, %v2576_v19 }
 0x443   :  { %2356 = vmatpush.msrb.mxu3 %v2331_v56  ;;  %2498 = vmatpush.msra.mxu0 %v2481_v32  ;;  %v2035_v32 = vld [vmem:[#allocation2 + $0x1f8] sm:$0xff] }
 0x444   :  { %2645 = vmatpush.msra.mxu1 %v2626_v59  ;;  %v8069_v57 = vpop.f32.mrf.mxu1  ;;  %2217 = vmatmul.f32.gmra.mxu2 %v2167_v54  ;;  %v2315_v59 = vld [vmem:[#allocation2 + $0x318] sm:$0xff] }
 0x445   :  { %10499 = vst [vmem:[#allocation16_spill] sm:$0xff] %v8069_v57  ;;  %2357 = vmatpush.msrb.mxu3 %v2330_v3  ;;  %2499 = vmatpush.msra.mxu0 %v2480_v44  ;;  %v2432_v9 = vpop.permute.xlu0 %2431 }
 0x446   :  { %v2436_v33 = vpop.permute.xlu1 %2435  ;;  %2646 = vmatpush.msra.mxu1 %v2625_v60  ;;  %v2477_v23 = vmul.f32 %v8014_v63, %v2432_v9  ;;  %v8091_v25 = vpop.f32.mrf.mxu2 }
 0x447   :  { %2358 = vmatpush.msrb.mxu3 %v2329_v58  ;;  %v2479_v62 = vmul.f32 %v8014_v63, %v2436_v33  ;;  %v2171_v33 = vld [vmem:[#allocation2 + $0x2a8] sm:$0xff] }
 0x449   :  { %2359 = vmatpush.msrb.mxu3 %v2328_v38  ;;  %2500 = vmatpush.msra.mxu0 %v2479_v62  ;;  %v2458_v38 = vld [vmem:[#allocation2 + $0x380] sm:$0xff] }
 0x44a   :  { %2104 = vmatmul.f32.gmra.mxu1 %v2032_v10  ;;  %2360 = vmatmul.f32.vlgmr.msrb.gmra.mxu3 %v2312_v18  ;;  %v8077_v49 = vpop.f32.mrf.mxu3  ;;  %v2316_v18 = vld [vmem:[#allocation2 + $0x320] sm:$0xff] }
 0x44b   :  { %1961 = vmatmul.f32.gmra.mxu0 %v1887_v5  ;;  %v2572_v5 = vpop.permute.xlu2 %2571 }
 0x44c   :  { %2220 = vmatmul.f32.gmra.mxu2 %v2168_v17 }
 0x44d   :  { %v8079_v53 = vpop.f32.mrf.mxu1 }
 0x44e   :  { %10500 = vst [vmem:[#allocation15_spill] sm:$0xff] %v8079_v53  ;;  %v2578_v50 = vpop.permute.xlu0 %2577  ;;  %v8102_v44 = vpop.f32.mrf.mxu2 }
 0x44f   :  { %v2434_v16 = vpop.permute.xlu1 %2433  ;;  %v2623_v24 = vmul.f32 %v7934_v35, %v2578_v50  ;;  %v2460_v50 = vld [vmem:[#allocation2 + $0x390] sm:$0xff] }
 0x450   :  { %v2478_v27 = vmul.f32 %v8014_v63, %v2434_v16 }
 0x452   :  { %2107 = vmatmul.f32.gmra.mxu1 %v2033_v15  ;;  %2363 = vmatmul.f32.gmra.mxu3 %v2313_v6  ;;  %v8084_v4 = vpop.f32.mrf.mxu3  ;;  %v2172_v15 = vld [vmem:[#allocation2 + $0x2b0] sm:$0xff]  ;;  %v2459_v6 = vld [vmem:[#allocation2 + $0x388] sm:$0xff] }
 0x453   :  { %1964 = vmatmul.f32.gmra.mxu0 %v1888_v7 }
 0x454   :  { %2501 = vmatpush.msra.mxu0 %v2478_v27  ;;  %2223 = vmatmul.f32.gmra.mxu2 %v2169_v48 }
 0x455   :  { %v8087_v13 = vpop.f32.mrf.mxu1 }
 0x456   :  { %10501 = vst [vmem:[#allocation17_spill] sm:$0xff] %v8087_v13  ;;  %2502 = vmatpush.msra.mxu0 %v2477_v23  ;;  %v2426_v29 = vpop.permute.xlu0 %2425  ;;  %v8115_v27 = vpop.f32.mrf.mxu2  ;;  %v2317_v23 = vld [vmem:[#allocation2 + $0x328] sm:$0xff]  ;;  %v2611_v13 = vld [vmem:[#allocation2 + $0x438] sm:$0xff] }
 0x457   :  { %v2580_v31 = vpop.permute.xlu1 %2579  ;;  %v2474_v60 = vmul.f32 %v8014_v63, %v2426_v29  ;;  %v2319_v29 = vld [vmem:[#allocation2 + $0x338] sm:$0xff] }
 0x458   :  { %2503 = vmatpush.msra.mxu0 %v2476_v39  ;;  %v2624_v36 = vmul.f32 %v7934_v35, %v2580_v31  ;;  %v2605_v31 = vld [vmem:[#allocation2 + $0x408] sm:$0xff] }
 0x45a   :  { %2110 = vmatmul.f32.gmra.mxu1 %v2034_v42  ;;  %2366 = vmatmul.f32.gmra.mxu3 %v2314_v22 }
 0x45b   :  { %1967 = vmatmul.f32.gmra.mxu0 %v1889_v45  ;;  %2647 = vmatpush.msra.mxu1 %v2624_v36  ;;  %v8094_v47 = vpop.f32.mrf.mxu3  ;;  %v2318_v45 = vld [vmem:[#allocation2 + $0x330] sm:$0xff] }
 0x45c   :  { %2226 = vmatmul.f32.gmra.mxu2 %v2170_v2  ;;  %v2461_v2 = vld [vmem:[#allocation2 + $0x398] sm:$0xff] }
 0x45d   :  { %2648 = vmatpush.msra.mxu1 %v2623_v24  ;;  %v2174_v24 = vld [vmem:[#allocation2 + $0x2c0] sm:$0xff] }
 0x45e   :  { %v8097_v56 = vpop.f32.mrf.mxu1  ;;  %v8099_v11 = vpop.f32.mrf.mxu0 }
 0x45f   :  { %10502 = vst [vmem:[#allocation48_spill] sm:$0xff] %v8097_v56  ;;  %2649 = vmatpush.msra.mxu1 %v2622_v43  ;;  %v2428_v3 = vpop.permute.xlu1 %2427  ;;  %v8127_v36 = vpop.f32.mrf.mxu2  ;;  %v2606_v43 = vld [vmem:[#allocation2 + $0x410] sm:$0xff]  ;;  %v2179_v56 = vld [vmem:[#allocation2 + $0x2e8] sm:$0xff] }
 0x460   :  { %v2475_v54 = vmul.f32 %v8014_v63, %v2428_v3  ;;  %v2620_v63 = vmul.f32 %v7934_v35, %v2572_v5 }
 0x462   :  { %2113 = vmatmul.f32.gmra.mxu1 %v2035_v32  ;;  %2369 = vmatmul.f32.gmra.mxu3 %v2315_v59 }
 0x463   :  { %2504 = vmatpush.msra.mxu0 %v2475_v54  ;;  %v8105_v58 = vpop.f32.mrf.mxu3 }
 0x464   :  { %2229 = vmatmul.f32.gmra.mxu2 %v2171_v33  ;;  %v2462_v33 = vld [vmem:[#allocation2 + $0x3a0] sm:$0xff] }
 0x465   :  { %2505 = vmatpush.msra.mxu0 %v2474_v60  ;;  %v2175_v60 = vld [vmem:[#allocation2 + $0x2c8] sm:$0xff] }
 0x466   :  { %2506 = vmatmul.f32.vlgmr.msra.gmra.mxu0 %v2458_v38  ;;  %v8107_v62 = vpop.f32.mrf.mxu0  ;;  %v8109_v10 = vpop.f32.mrf.mxu1  ;;  %v2607_v38 = vld [vmem:[#allocation2 + $0x418] sm:$0xff] }
 0x467   :  { %v2574_v17 = vpop.permute.xlu1 %2573  ;;  %v8135_v3 = vpop.f32.mrf.mxu2 }
 0x468   :  { %v2621_v9 = vmul.f32 %v7934_v35, %v2574_v17  ;;  %v2173_v35 = vld [vmem:[#allocation2 + $0x2b8] sm:$0xff]  ;;  %10503 = vst [vmem:[#allocation23_spill] sm:$0xff] %v8135_v3  ;;  %v2320_v17 = vld [vmem:[#allocation2 + $0x340] sm:$0xff] }
 0x46a   :  { %2372 = vmatmul.f32.gmra.mxu3 %v2316_v18  ;;  %2650 = vmatpush.msra.mxu1 %v2621_v9 }
 0x46b   :  { %v8113_v16 = vpop.f32.mrf.mxu3 }
 0x46c   :  { %2651 = vmatpush.msra.mxu1 %v2620_v63  ;;  %2232 = vmatmul.f32.gmra.mxu2 %v2172_v15  ;;  %v2176_v15 = vld [vmem:[#allocation2 + $0x2d0] sm:$0xff] }
 0x46d   :  { %2652 = vmatmul.f32.vlgmr.msra.gmra.mxu1 %v2604_v8  ;;  %v2608_v8 = vld [vmem:[#allocation2 + $0x420] sm:$0xff] }
 0x46e   :  { %2509 = vmatmul.f32.gmra.mxu0 %v2459_v6  ;;  %v8117_v7 = vpop.f32.mrf.mxu0  ;;  %v8119_v48 = vpop.f32.mrf.mxu1  ;;  %v2463_v6 = vld [vmem:[#allocation2 + $0x3a8] sm:$0xff] }
 0x46f   :  { %v8143_v9 = vpop.f32.mrf.mxu2 }
 0x470   :  { %10505 = vst [vmem:[#allocation20_spill] sm:$0xff] %v8143_v9  ;;  %v8205_v9 = vpop.permute.xlu2 %2800 }
 0x471   :  { %10531 = vst [vmem:[#allocation42_spill] sm:$0xff] %v8205_v9 }
 0x472   :  { %2375 = vmatmul.f32.gmra.mxu3 %v2317_v23 }
 0x473   :  { %v8121_v39 = vpop.f32.mrf.mxu3 }
 0x474   :  { %2235 = vmatmul.f32.gmra.mxu2 %v2173_v35 }
 0x475   :  { %2655 = vmatmul.f32.gmra.mxu1 %v2605_v31 }
 0x476   :  { %2512 = vmatmul.f32.gmra.mxu0 %v2460_v50  ;;  %v8123_v42 = vpop.f32.mrf.mxu0  ;;  %v8125_v22 = vpop.f32.mrf.mxu1  ;;  %v2321_v50 = vld [vmem:[#allocation2 + $0x348] sm:$0xff] }
 0x47a   :  { %2378 = vmatmul.f32.gmra.mxu3 %v2318_v45  ;;  %v2177_v45 = vld [vmem:[#allocation2 + $0x2d8] sm:$0xff] }
 0x47b   :  { %v8129_v19 = vpop.f32.mrf.mxu3 }
 0x47c   :  { %2238 = vmatmul.f32.gmra.mxu2 %v2174_v24  ;;  %v2464_v24 = vld [vmem:[#allocation2 + $0x3b0] sm:$0xff] }
 0x47d   :  { %2658 = vmatmul.f32.gmra.mxu1 %v2606_v43  ;;  %v8153_v43 = vpop.f32.mrf.mxu2 }
 0x47e   :  { %2515 = vmatmul.f32.gmra.mxu0 %v2461_v2  ;;  %v8131_v32 = vpop.f32.mrf.mxu0  ;;  %v8133_v59 = vpop.f32.mrf.mxu1  ;;  %v2609_v2 = vld [vmem:[#allocation2 + $0x428] sm:$0xff]  ;;  %10508 = vst [vmem:[#allocation35_spill] sm:$0xff] %v8153_v43 }
 0x482   :  { %2381 = vmatmul.f32.gmra.mxu3 %v2319_v29 }
 0x483   :  { %v8137_v54 = vpop.f32.mrf.mxu3 }
 0x484   :  { %10504 = vst [vmem:[#allocation10_spill] sm:$0xff] %v8137_v54  ;;  %2241 = vmatmul.f32.gmra.mxu2 %v2175_v60 }
 0x485   :  { %2661 = vmatmul.f32.gmra.mxu1 %v2607_v38  ;;  %v2178_v38 = vld [vmem:[#allocation2 + $0x2e0] sm:$0xff] }
 0x486   :  { %2518 = vmatmul.f32.gmra.mxu0 %v2462_v33  ;;  %v8139_v18 = vpop.f32.mrf.mxu0  ;;  %v8141_v5 = vpop.f32.mrf.mxu1  ;;  %v2322_v33 = vld [vmem:[#allocation2 + $0x350] sm:$0xff] }
 0x48a   :  { %2384 = vmatmul.f32.gmra.mxu3 %v2320_v17  ;;  %v2465_v17 = vld [vmem:[#allocation2 + $0x3b8] sm:$0xff] }
 0x48b   :  { %v8145_v63 = vpop.f32.mrf.mxu3 }
 0x48c   :  { %10506 = vst [vmem:[#allocation18_spill] sm:$0xff] %v8145_v63  ;;  %2244 = vmatmul.f32.gmra.mxu2 %v2176_v15  ;;  %v2610_v15 = vld [vmem:[#allocation2 + $0x430] sm:$0xff] }
 0x48d   :  { %2664 = vmatmul.f32.gmra.mxu1 %v2608_v8 }
 0x48e   :  { %2521 = vmatmul.f32.gmra.mxu0 %v2463_v6  ;;  %v8147_v23 = vpop.f32.mrf.mxu0  ;;  %v8149_v35 = vpop.f32.mrf.mxu1 }
 0x492   :  { %2387 = vmatmul.f32.gmra.mxu3 %v2321_v50 }
 0x493   :  { %v8151_v31 = vpop.f32.mrf.mxu3 }
 0x494   :  { %10507 = vst [vmem:[#allocation21_spill] sm:$0xff] %v8151_v31  ;;  %2247 = vmatmul.f32.gmra.mxu2 %v2177_v45  ;;  %v2323_v45 = vld [vmem:[#allocation2 + $0x358] sm:$0xff] }
 0x495   :  { %2667 = vmatmul.f32.gmra.mxu1 %v2609_v2  ;;  %v2466_v2 = vld [vmem:[#allocation2 + $0x3c0] sm:$0xff] }
 0x496   :  { %2524 = vmatmul.f32.gmra.mxu0 %v2464_v24  ;;  %v8155_v29 = vpop.f32.mrf.mxu0  ;;  %v8157_v60 = vpop.f32.mrf.mxu1 }
 0x497   :  { %v8165_v24 = vpop.f32.mrf.mxu2 }
 0x498   :  { %10511 = vst [vmem:[#allocation24_spill] sm:$0xff] %v8165_v24  ;;  %v2612_v24 = vld [vmem:[#allocation2 + $0x440] sm:$0xff] }
 0x49a   :  { %2390 = vmatmul.f32.gmra.mxu3 %v2322_v33 }
 0x49b   :  { %v8159_v6 = vpop.f32.mrf.mxu3 }
 0x49c   :  { %10509 = vst [vmem:[#allocation27_spill] sm:$0xff] %v8159_v6  ;;  %2250 = vmatmul.f32.gmra.mxu2 %v2178_v38  ;;  %v2467_v6 = vld [vmem:[#allocation2 + $0x3c8] sm:$0xff] }
 0x49d   :  { %2670 = vmatmul.f32.gmra.mxu1 %v2610_v15  ;;  %v2180_v15 = vld [vmem:[#allocation2 + $0x2f0] sm:$0xff] }
 0x49e   :  { %2527 = vmatmul.f32.gmra.mxu0 %v2465_v17  ;;  %v8161_v8 = vpop.f32.mrf.mxu0  ;;  %v8163_v50 = vpop.f32.mrf.mxu1  ;;  %v2324_v17 = vld [vmem:[#allocation2 + $0x360] sm:$0xff] }
 0x49f   :  { %10510 = vst [vmem:[#allocation11_spill] sm:$0xff] %v8161_v8  ;;  %v8173_v57 = vpop.f32.mrf.mxu2 }
 0x4a0   :  { %10515 = vst [vmem:[#allocation33_spill] sm:$0xff] %v8173_v57  ;;  %v2613_v57 = vld [vmem:[#allocation2 + $0x448] sm:$0xff] }
 0x4a2   :  { %2393 = vmatmul.f32.gmra.mxu3 %v2323_v45 }
 0x4a3   :  { %v8171_v38 = vpop.f32.mrf.mxu3 }
 0x4a4   :  { %2253 = vmatmul.f32.gmra.mxu2 %v2179_v56  ;;  %10514 = vst [vmem:[#allocation41_spill] sm:$0xff] %v8171_v38  ;;  %v2181_v38 = vld [vmem:[#allocation2 + $0x2f8] sm:$0xff] }
 0x4a5   :  { %2673 = vmatmul.f32.gmra.mxu1 %v2611_v13  ;;  %v2468_v13 = vld [vmem:[#allocation2 + $0x3d0] sm:$0xff] }
 0x4a6   :  { %2530 = vmatmul.f32.gmra.mxu0 %v2466_v2  ;;  %v8167_v33 = vpop.f32.mrf.mxu0  ;;  %v8169_v53 = vpop.f32.mrf.mxu1  ;;  %v2325_v2 = vld [vmem:[#allocation2 + $0x368] sm:$0xff] }
 0x4a7   :  { %10512 = vst [vmem:[#allocation22_spill] sm:$0xff] %v8167_v33  ;;  %v8181_v26 = vpop.f32.mrf.mxu2 }
 0x4a8   :  { %10513 = vst [vmem:[#allocation25_spill] sm:$0xff] %v8169_v53 }
 0x4a9   :  { %10519 = vst [vmem:[#allocation31_spill] sm:$0xff] %v8181_v26 }
 0x4aa   :  { %2396 = vmatmul.f32.gmra.mxu3 %v2324_v17 }
 0x4ab   :  { %v8179_v43 = vpop.f32.mrf.mxu3 }
 0x4ac   :  { %2256 = vmatmul.f32.gmra.mxu2 %v2180_v15  ;;  %10518 = vst [vmem:[#allocation26_spill] sm:$0xff] %v8179_v43  ;;  %v2326_v15 = vld [vmem:[#allocation2 + $0x370] sm:$0xff]  ;;  %v2469_v43 = vld [vmem:[#allocation2 + $0x3d8] sm:$0xff] }
 0x4ad   :  { %2676 = vmatmul.f32.gmra.mxu1 %v2612_v24  ;;  %v8187_v24 = vpop.permute.xlu0 %2810 }
 0x4ae   :  { %2533 = vmatmul.f32.gmra.mxu0 %v2467_v6  ;;  %v8175_v45 = vpop.f32.mrf.mxu0  ;;  %10522 = vst [vmem:[#allocation13_spill] sm:$0xff] %v8187_v24 }
 0x4af   :  { %10516 = vst [vmem:[#allocation12_spill] sm:$0xff] %v8175_v45  ;;  %v8177_v56 = vpop.f32.mrf.mxu1  ;;  %v8191_v31 = vpop.f32.mrf.mxu2 }
 0x4b0   :  { %10517 = vst [vmem:[#allocation30_spill] sm:$0xff] %v8177_v56 }
 0x4b1   :  { %10524 = vst [vmem:[#allocation32_spill] sm:$0xff] %v8191_v31 }
 0x4b2   :  { %2399 = vmatmul.f32.gmra.mxu3 %v2325_v2  ;;  %v2614_v2 = vld [vmem:[#allocation2 + $0x450] sm:$0xff] }
 0x4b4   :  { %2259 = vmatmul.f32.gmra.mxu2 %v2181_v38  ;;  %v8189_v45 = vpop.f32.mrf.mxu3  ;;  %v2327_v38 = vld [vmem:[#allocation2 + $0x378] sm:$0xff] }
 0x4b5   :  { %2679 = vmatmul.f32.gmra.mxu1 %v2613_v57  ;;  %10523 = vst [vmem:[#allocation36_spill] sm:$0xff] %v8189_v45 }
 0x4b6   :  { %2536 = vmatmul.f32.gmra.mxu0 %v2468_v13  ;;  %v8183_v17 = vpop.f32.mrf.mxu0  ;;  %v2470_v13 = vld [vmem:[#allocation2 + $0x3e0] sm:$0xff] }
 0x4b7   :  { %10520 = vst [vmem:[#allocation45_spill] sm:$0xff] %v8183_v17  ;;  %v8185_v6 = vpop.f32.mrf.mxu1  ;;  %v2615_v17 = vld [vmem:[#allocation2 + $0x458] sm:$0xff] }
 0x4b8   :  { %10521 = vst [vmem:[#allocation39_spill] sm:$0xff] %v8185_v6  ;;  %v8197_v6 = vpop.permute.xlu0 %2795 }
 0x4b9   :  { %10527 = vst [vmem:[#allocation44_spill] sm:$0xff] %v8197_v6 }
 0x4ba   :  { %2402 = vmatmul.f32.gmra.mxu3 %v2326_v15 }
 0x4bc   :  { %v8199_v15 = vpop.f32.mrf.mxu3 }
 0x4bd   :  { %2682 = vmatmul.f32.gmra.mxu1 %v2614_v2  ;;  %10528 = vst [vmem:[#allocation14_spill] sm:$0xff] %v8199_v15  ;;  %v2616_v2 = vld [vmem:[#allocation2 + $0x460] sm:$0xff] }
 0x4be   :  { %2539 = vmatmul.f32.gmra.mxu0 %v2469_v43  ;;  %v2471_v43 = vld [vmem:[#allocation2 + $0x3e8] sm:$0xff] }
 0x4bf   :  { %v8193_v26 = vpop.f32.mrf.mxu1  ;;  %v8195_v57 = vpop.f32.mrf.mxu0 }
 0x4c0   :  { %10525 = vst [vmem:[#allocation37_spill] sm:$0xff] %v8193_v26  ;;  %v2215_v24 = vpop.f32.mrf.mxu2 }
 0x4c1   :  { %10526 = vst [vmem:[#allocation34_spill] sm:$0xff] %v8195_v57 }
 0x4c2   :  { %2405 = vmatmul.f32.gmra.mxu3 %v2327_v38  ;;  %v8207_v38 = vpop.permute.xlu0 %2780 }
 0x4c3   :  { %10532 = vst [vmem:[#allocation40_spill] sm:$0xff] %v8207_v38  ;;  %v2473_v38 = vld [vmem:[#allocation2 + $0x3f8] sm:$0xff] }
 0x4c5   :  { %2685 = vmatmul.f32.gmra.mxu1 %v2615_v17  ;;  %v2617_v17 = vld [vmem:[#allocation2 + $0x468] sm:$0xff] }
 0x4c6   :  { %2542 = vmatmul.f32.gmra.mxu0 %v2470_v13  ;;  %v2472_v13 = vld [vmem:[#allocation2 + $0x3f0] sm:$0xff] }
 0x4c7   :  { %v8201_v45 = vpop.f32.mrf.mxu1 }
 0x4c8   :  { %10529 = vst [vmem:[#allocation43_spill] sm:$0xff] %v8201_v45  ;;  %v8203_v31 = vpop.f32.mrf.mxu0  ;;  %v2218_v57 = vpop.f32.mrf.mxu2 }
 0x4c9   :  { %10530 = vst [vmem:[#allocation38_spill] sm:$0xff] %v8203_v31  ;;  %v8213_v45 = vpop.permute.xlu1 %2805  ;;  %v8215_v31 = vpop.permute.xlu2 %2785 }
 0x4ca   :  { %10535 = vst [vmem:[#allocation28_spill] sm:$0xff] %v8213_v45  ;;  %v8217_v56 = vpop.permute.xlu0 %2765 }
 0x4cb   :  { %10536 = vst [vmem:[#allocation49_spill] sm:$0xff] %v8215_v31 }
 0x4cd   :  { %v2361_v26 = vpop.f32.mrf.mxu3  ;;  %2688 = vmatmul.f32.gmra.mxu1 %v2616_v2 }
 0x4ce   :  { %2545 = vmatmul.f32.gmra.mxu0 %v2471_v43 }
 0x4cf   :  { %v8209_v6 = vpop.f32.mrf.mxu1 }
 0x4d0   :  { %10533 = vst [vmem:[#allocation47_spill] sm:$0xff] %v8209_v6  ;;  %v8211_v15 = vpop.f32.mrf.mxu0  ;;  %v2221_v43 = vpop.f32.mrf.mxu2  ;;  %v2618_v6 = vld [vmem:[#allocation2 + $0x470] sm:$0xff] }
 0x4d1   :  { %10534 = vst [vmem:[#allocation29_spill] sm:$0xff] %v8211_v15  ;;  %v1648_v15 = vadd.f32 %v7993_v41, %v7831_v20  ;;  %v8225_v45 = vpop.permute.xlu1 %2790  ;;  %v1651_v20 = vadd.f32 %v8019_v51, %v7848_v46  ;;  %v1654_v46 = vadd.f32 %v8040_v61, %v7866_v30 }
 0x4d2   :  { %10539 = vst [vmem:[#allocation52_spill] sm:$0xff] %v8225_v45  ;;  %v8231_v63 = vpop.permute.xlu0 %2750 }
 0x4d5   :  { %v2364_v14 = vpop.f32.mrf.mxu3  ;;  %2691 = vmatmul.f32.gmra.mxu1 %v2617_v17  ;;  %v8228_v17 = vpop.permute.xlu2 %2770 }
 0x4d6   :  { %2548 = vmatmul.f32.gmra.mxu0 %v2472_v13  ;;  %v1825_v13 = vadd.f32 %v8063_v1, %v1648_v15  ;;  %10540 = vst [vmem:[#allocation53_spill] sm:$0xff] %v8228_v17  ;;  %v1826_v1 = vadd.f32 %v8077_v49, %v1651_v20  ;;  %v1827_v49 = vadd.f32 %v8084_v4, %v1654_v46 }
 0x4d7   :  { %v8219_v9 = vpop.f32.mrf.mxu1  ;;  %v1657_v4 = vadd.f32 %v8071_v21, %v7885_v52 }
 0x4d8   :  { %10537 = vst [vmem:[#allocation50_spill] sm:$0xff] %v8219_v9  ;;  %v8221_v2 = vpop.f32.mrf.mxu0  ;;  %v1971_v31 = vadd.f32 %v8099_v11, %v1825_v13  ;;  %v1972_v11 = vadd.f32 %v8107_v62, %v1826_v1 }
 0x4d9   :  { %10538 = vst [vmem:[#allocation51_spill] sm:$0xff] %v8221_v2  ;;  %v2224_v2 = vpop.f32.mrf.mxu2  ;;  %v8239_v15 = vpop.permute.xlu1 %2775 }
 0x4da   :  { %v2736_v8 = vpop.permute.xlu0 %2735 }
 0x4dd   :  { %v2367_v33 = vpop.f32.mrf.mxu3  ;;  %2694 = vmatmul.f32.gmra.mxu1 %v2618_v6  ;;  %v8242_v17 = vpop.permute.xlu2 %2755 }
 0x4de   :  { %2551 = vmatmul.f32.gmra.mxu0 %v2473_v38  ;;  %v2117_v38 = vadd.f32 %v8109_v10, %v1971_v31  ;;  %v2118_v10 = vadd.f32 %v8119_v48, %v1972_v11 }
 0x4df   :  { %v8233_v3 = vpop.f32.mrf.mxu1 }
 0x4e0   :  { %10541 = vst [vmem:[#allocation54_spill] sm:$0xff] %v8233_v3  ;;  %v2263_v41 = vadd.f32 %v2215_v24, %v2117_v38 }
 0x4e1   :  { %v2227_v54 = vpop.f32.mrf.mxu2 }
 0x4e2   :  { %v2409_v6 = vadd.f32 %v2361_v26, %v2263_v41 }
 0x4e3   :  { %v2507_v9 = vpop.f32.mrf.mxu0 }
 0x4e4   :  { %v2555_v13 = vadd.f32 %v2507_v9, %v2409_v6  ;;  %v1973_v9 = vadd.f32 %v8117_v7, %v1827_v49  ;;  %v1828_v7 = vadd.f32 %v8094_v47, %v1657_v4 }
 0x4e5   :  { %v2370_v53 = vpop.f32.mrf.mxu3  ;;  %2697 = vmatmul.f32.gmra.mxu1 %v2619_v37  ;;  %v2264_v37 = vadd.f32 %v2218_v57, %v2118_v10 }
 0x4e6   :  { %v2119_v30 = vadd.f32 %v8125_v22, %v1973_v9  ;;  %v1974_v11 = vadd.f32 %v8123_v42, %v1828_v7 }
 0x4e7   :  { %v2410_v24 = vadd.f32 %v2364_v14, %v2264_v37 }
 0x4e8   :  { %v2265_v14 = vadd.f32 %v2221_v43, %v2119_v30  ;;  %v1660_v43 = vadd.f32 %v8081_v34, %v7902_v12  ;;  %v1663_v34 = vadd.f32 %v8091_v25, %v7927_v55 }
 0x4e9   :  { %v2230_v41 = vpop.f32.mrf.mxu2 }
 0x4ea   :  { %v2653_v3 = vpop.f32.mrf.mxu1  ;;  %v1829_v46 = vadd.f32 %v8105_v58, %v1660_v43 }
 0x4eb   :  { %v2510_v45 = vpop.f32.mrf.mxu0  ;;  %v2701_v31 = vadd.f32 %v2653_v3, %v2555_v13  ;;  %v8253_v3 = vpop.permute.xlu1 %2760 }
 0x4ec   :  { %v2556_v38 = vadd.f32 %v2510_v45, %v2410_v24  ;;  %v2411_v45 = vadd.f32 %v2367_v33, %v2265_v14  ;;  %v1975_v49 = vadd.f32 %v8131_v32, %v1829_v46 }
 0x4ed   :  { %v2813_v51 = vadd.f32 %v2736_v8, %v2701_v31  ;;  %v2373_v26 = vpop.f32.mrf.mxu3  ;;  %v2741_v8 = vpop.permute.xlu2 %2740  ;;  %v2120_v31 = vadd.f32 %v8133_v59, %v1974_v11 }
 0x4ef   :  { %v8248_v62 = vmax.f32 %v2813_v51, 0.0  ;;  %v2266_v47 = vadd.f32 %v2224_v2, %v2120_v31  ;;  %v1830_v2 = vadd.f32 %v8113_v16, %v1663_v34 }
 0x4f1   :  { %2862 = vrot.lane.b32.xlu1 %v8248_v62, %s5904_s26  ;;  %v2412_v37 = vadd.f32 %v2370_v53, %v2266_v47  ;;  %v2233_v42 = vpop.f32.mrf.mxu2  ;;  %v1976_v30 = vadd.f32 %v8139_v18, %v1830_v2  ;;  %v10548_v2 = vld [vmem:[#allocation18_spill] sm:$0xff] }
 0x4f2   :  { %v2656_v20 = vpop.f32.mrf.mxu1 }
 0x4f3   :  { %v2513_v48 = vpop.f32.mrf.mxu0  ;;  %v2702_v61 = vadd.f32 %v2656_v20, %v2556_v38  ;;  %v2746_v21 = vpop.permute.xlu1 %2745  ;;  %v2122_v14 = vadd.f32 %v8149_v35, %v1976_v30 }
 0x4f4   :  { %v2557_v13 = vadd.f32 %v2513_v48, %v2411_v45  ;;  %v2121_v48 = vadd.f32 %v8141_v5, %v1975_v49  ;;  %v10543_v49 = vld [vmem:[#allocation11_spill] sm:$0xff] }
 0x4f5   :  { %v2814_v57 = vadd.f32 %v2741_v8, %v2702_v61  ;;  %v2376_v6 = vpop.f32.mrf.mxu3  ;;  %v2268_v16 = vadd.f32 %v2230_v41, %v2122_v14 }
 0x4f6   :  { %v2267_v58 = vadd.f32 %v2227_v54, %v2121_v48  ;;  %v1666_v54 = vadd.f32 %v8102_v44, %v7958_v40  ;;  %v1669_v44 = vadd.f32 %v8115_v27, %v7979_v0  ;;  %v1672_v27 = vadd.f32 %v8127_v36, %v7990_v28  ;;  %v10545_v48 = vld [vmem:[#allocation46_spill] sm:$0xff] }
 0x4f7   :  { %v8259_v1 = vmax.f32 %v2814_v57, 0.0  ;;  %v2414_v18 = vadd.f32 %v2376_v6, %v2268_v16  ;;  %v10550_v16 = vld [vmem:[#allocation30_spill] sm:$0xff] }
 0x4f8   :  { %v2413_v20 = vadd.f32 %v2373_v26, %v2267_v58  ;;  %v1831_v26 = vadd.f32 %v8121_v39, %v1666_v54  ;;  %v1832_v6 = vadd.f32 %v8129_v19, %v1669_v44  ;;  %v10547_v58 = vld [vmem:[#allocation53_spill] sm:$0xff] }
 0x4f9   :  { %2864 = vrot.lane.b32.xlu0 %v8259_v1, %s5904_s26  ;;  %v2236_v5 = vpop.f32.mrf.mxu2 }
 0x4fa   :  { %v2659_v10 = vpop.f32.mrf.mxu1  ;;  %v1977_v7 = vadd.f32 %v8147_v23, %v1831_v26  ;;  %v1978_v31 = vadd.f32 %v8155_v29, %v1832_v6 }
 0x4fb   :  { %v2516_v22 = vpop.f32.mrf.mxu0  ;;  %v2703_v52 = vadd.f32 %v2659_v10, %v2557_v13 }
 0x4fc   :  { %v2558_v24 = vadd.f32 %v2516_v22, %v2412_v37  ;;  %v2123_v13 = vadd.f32 %v8157_v60, %v1977_v7  ;;  %v2124_v43 = vadd.f32 %v8163_v50, %v1978_v31  ;;  %v10552_v7 = vld [vmem:[#allocation20_spill] sm:$0xff] }
 0x4fd   :  { %v2815_v33 = vadd.f32 %v2746_v21, %v2703_v52  ;;  %v2379_v9 = vpop.f32.mrf.mxu3 }
 0x4ff   :  { %v8268_v51 = vmax.f32 %v2815_v33, 0.0  ;;  %v10542_v33 = vld [vmem:[#allocation10_spill] sm:$0xff] }
 0x500   :  { %v1833_v46 = vadd.f32 %v10542_v33, %v1672_v27  ;;  %v10559_v33 = vld [vmem:[#allocation27_spill] sm:$0xff] }
 0x501   :  { %2866 = vrot.lane.b32.xlu2 %v8268_v51, %s5904_s26  ;;  %v2239_v40 = vpop.f32.mrf.mxu2 }
 0x502   :  { %v2662_v38 = vpop.f32.mrf.mxu1 }
 0x503   :  { %v2519_v59 = vpop.f32.mrf.mxu0  ;;  %v2704_v12 = vadd.f32 %v2662_v38, %v2558_v24  ;;  %v1979_v24 = vadd.f32 %v10543_v49, %v1833_v46  ;;  %v10544_v38 = vld [vmem:[#allocation25_spill] sm:$0xff] }
 0x504   :  { %v2559_v61 = vadd.f32 %v2519_v59, %v2413_v20  ;;  %v10560_v49 = vld [vmem:[#allocation45_spill] sm:$0xff] }
 0x505   :  { %v2816_v53 = vadd.f32 %v8231_v63, %v2704_v12  ;;  %v2382_v25 = vpop.f32.mrf.mxu3  ;;  %v2125_v28 = vadd.f32 %v10544_v38, %v1979_v24  ;;  %v10561_v38 = vld [vmem:[#allocation37_spill] sm:$0xff] }
 0x507   :  { %v8278_v32 = vmax.f32 %v2816_v53, 0.0  ;;  %v2271_v34 = vadd.f32 %v2239_v40, %v2125_v28 }
 0x509   :  { %2868 = vrot.lane.b32.xlu1 %v8278_v32, %s5904_s26  ;;  %v2242_v47 = vpop.f32.mrf.mxu2 }
 0x50a   :  { %v2665_v4 = vpop.f32.mrf.mxu1 }
 0x50b   :  { %v2522_v8 = vpop.f32.mrf.mxu0  ;;  %v2705_v55 = vadd.f32 %v2665_v4, %v2559_v61 }
 0x50c   :  { %v2560_v45 = vadd.f32 %v2522_v8, %v2414_v18  ;;  %v10551_v18 = vld [vmem:[#allocation19_spill] sm:$0xff] }
 0x50d   :  { %v2817_v63 = vadd.f32 %v8242_v17, %v2705_v55  ;;  %v2269_v17 = vadd.f32 %v2233_v42, %v2123_v13  ;;  %v2385_v41 = vpop.f32.mrf.mxu3  ;;  %v10553_v13 = vld [vmem:[#allocation21_spill] sm:$0xff] }
 0x50e   :  { %v2417_v30 = vadd.f32 %v2385_v41, %v2271_v34 }
 0x50f   :  { %v8288_v57 = vmax.f32 %v2817_v63, 0.0  ;;  %v2415_v23 = vadd.f32 %v2379_v9, %v2269_v17  ;;  %v10554_v17 = vld [vmem:[#allocation12_spill] sm:$0xff] }
 0x511   :  { %2870 = vrot.lane.b32.xlu0 %v8288_v57, %s5904_s26  ;;  %v2245_v8 = vpop.f32.mrf.mxu2 }
 0x512   :  { %v2668_v11 = vpop.f32.mrf.mxu1 }
 0x513   :  { %v2525_v35 = vpop.f32.mrf.mxu0  ;;  %v2706_v22 = vadd.f32 %v2668_v11, %v2560_v45  ;;  %v1678_v45 = vadd.f32 %v10552_v7, %v10551_v18  ;;  %v10568_v7 = vld [vmem:[#allocation15_spill] sm:$0xff] }
 0x514   :  { %v2561_v52 = vadd.f32 %v2525_v35, %v2415_v23 }
 0x515   :  { %v2818_v39 = vadd.f32 %v8253_v3, %v2706_v22  ;;  %v2270_v3 = vadd.f32 %v2236_v5, %v2124_v43  ;;  %v2388_v42 = vpop.f32.mrf.mxu3  ;;  %v10549_v5 = vld [vmem:[#allocation22_spill] sm:$0xff]  ;;  %v1835_v22 = vadd.f32 %v10553_v13, %v1678_v45  ;;  %v10569_v45 = vld [vmem:[#allocation33_spill] sm:$0xff]  ;;  %v10570_v13 = vld [vmem:[#allocation52_spill] sm:$0xff] }
 0x517   :  { %v8298_v10 = vmax.f32 %v2818_v39, 0.0  ;;  %v2416_v37 = vadd.f32 %v2382_v25, %v2270_v3  ;;  %v1981_v39 = vadd.f32 %v10554_v17, %v1835_v22  ;;  %v10571_v17 = vld [vmem:[#allocation26_spill] sm:$0xff] }
 0x519   :  { %2872 = vrot.lane.b32.xlu2 %v8298_v10, %s5904_s26  ;;  %v2248_v23 = vpop.f32.mrf.mxu2 }
 0x51a   :  { %v2671_v21 = vpop.f32.mrf.mxu1 }
 0x51b   :  { %v2528_v60 = vpop.f32.mrf.mxu0  ;;  %v2707_v0 = vadd.f32 %v2671_v21, %v2561_v52  ;;  %v10555_v52 = vld [vmem:[#allocation39_spill] sm:$0xff] }
 0x51c   :  { %v2562_v59 = vadd.f32 %v2528_v60, %v2416_v37  ;;  %v2127_v60 = vadd.f32 %v10555_v52, %v1981_v39 }
 0x51d   :  { %v2819_v19 = vadd.f32 %v8217_v56, %v2707_v0  ;;  %v10546_v56 = vld [vmem:[#allocation23_spill] sm:$0xff]  ;;  %v2391_v25 = vpop.f32.mrf.mxu3  ;;  %v10556_v0 = vld [vmem:[#allocation9_spill] sm:$0xff] }
 0x51e   :  { %v1675_v12 = vadd.f32 %v10546_v56, %v10545_v48  ;;  %v2273_v3 = vadd.f32 %v2245_v8, %v2127_v60  ;;  %v10562_v56 = vld [vmem:[#allocation16_spill] sm:$0xff] }
 0x51f   :  { %v8308_v29 = vmax.f32 %v2819_v19, 0.0  ;;  %v10558_v19 = vld [vmem:[#allocation40_spill] sm:$0xff] }
 0x520   :  { %v1834_v20 = vadd.f32 %v10548_v2, %v1675_v12  ;;  %v2419_v37 = vadd.f32 %v2391_v25, %v2273_v3  ;;  %v10563_v12 = vld [vmem:[#allocation24_spill] sm:$0xff]  ;;  %v10574_v3 = vld [vmem:[#allocation17_spill] sm:$0xff] }
 0x521   :  { %2874 = vrot.lane.b32.xlu1 %v8308_v29, %s5904_s26  ;;  %v2251_v48 = vpop.f32.mrf.mxu2  ;;  %v1684_v34 = vadd.f32 %v10563_v12, %v10562_v56  ;;  %v10579_v12 = vld [vmem:[#allocation50_spill] sm:$0xff] }
 0x522   :  { %v2674_v9 = vpop.f32.mrf.mxu1  ;;  %v1980_v4 = vadd.f32 %v10549_v5, %v1834_v20 }
 0x523   :  { %v2531_v50 = vpop.f32.mrf.mxu0  ;;  %v2708_v36 = vadd.f32 %v2674_v9, %v2562_v59 }
 0x524   :  { %v2563_v14 = vadd.f32 %v2531_v50, %v2417_v30  ;;  %v2126_v63 = vadd.f32 %v10550_v16, %v1980_v4  ;;  %v10565_v30 = vld [vmem:[#allocation41_spill] sm:$0xff] }
 0x525   :  { %v2820_v53 = vadd.f32 %v10547_v58, %v2708_v36  ;;  %v2394_v43 = vpop.f32.mrf.mxu3  ;;  %v1837_v8 = vadd.f32 %v10565_v30, %v1684_v34 }
 0x526   :  { %v2272_v35 = vadd.f32 %v2242_v47, %v2126_v63  ;;  %v10567_v63 = vld [vmem:[#allocation43_spill] sm:$0xff] }
 0x527   :  { %v8318_v61 = vmax.f32 %v2820_v53, 0.0  ;;  %v10564_v53 = vld [vmem:[#allocation49_spill] sm:$0xff] }
 0x528   :  { %v2418_v40 = vadd.f32 %v2388_v42, %v2272_v35  ;;  %v1687_v35 = vadd.f32 %v10569_v45, %v10568_v7 }
 0x529   :  { %2876 = vrot.lane.b32.xlu0 %v8318_v61, %s5904_s26 }
 0x52a   :  { %v2677_v54 = vpop.f32.mrf.mxu1  ;;  %v1838_v39 = vadd.f32 %v10571_v17, %v1687_v35  ;;  %v10585_v35 = vld [vmem:[#allocation54_spill] sm:$0xff]  ;;  %v10586_v17 = vld [vmem:[#allocation28_spill] sm:$0xff] }
 0x52b   :  { %v2534_v55 = vpop.f32.mrf.mxu0  ;;  %v2709_v26 = vadd.f32 %v2677_v54, %v2563_v14  ;;  %v10566_v14 = vld [vmem:[#allocation34_spill] sm:$0xff] }
 0x52c   :  { %v2564_v41 = vadd.f32 %v2534_v55, %v2418_v40  ;;  %v1983_v55 = vadd.f32 %v10566_v14, %v1837_v8  ;;  %v2254_v40 = vpop.f32.mrf.mxu2 }
 0x52d   :  { %v2821_v11 = vadd.f32 %v8239_v15, %v2709_v26  ;;  %v10557_v15 = vld [vmem:[#allocation35_spill] sm:$0xff]  ;;  %v2397_v20 = vpop.f32.mrf.mxu3 }
 0x52e   :  { %v1681_v27 = vadd.f32 %v10557_v15, %v10556_v0  ;;  %v2129_v26 = vadd.f32 %v10567_v63, %v1983_v55  ;;  %v10573_v0 = vld [vmem:[#allocation47_spill] sm:$0xff]  ;;  %v10583_v55 = vld [vmem:[#allocation14_spill] sm:$0xff] }
 0x52f   :  { %v8328_v44 = vmax.f32 %v2821_v11, 0.0  ;;  %v10584_v63 = vld [vmem:[#allocation51_spill] sm:$0xff] }
 0x530   :  { %v1836_v46 = vadd.f32 %v10559_v33, %v1681_v27  ;;  %v2275_v11 = vadd.f32 %v2251_v48, %v2129_v26 }
 0x531   :  { %2878 = vrot.lane.b32.xlu2 %v8328_v44, %s5904_s26 }
 0x532   :  { %v2680_v31 = vpop.f32.mrf.mxu1  ;;  %v1982_v24 = vadd.f32 %v10560_v49, %v1836_v46  ;;  %v10576_v46 = vld [vmem:[#allocation44_spill] sm:$0xff] }
 0x533   :  { %v2537_v6 = vpop.f32.mrf.mxu0  ;;  %v2710_v21 = vadd.f32 %v2680_v31, %v2564_v41  ;;  %v2421_v41 = vadd.f32 %v2397_v20, %v2275_v11  ;;  %v10572_v31 = vld [vmem:[#allocation38_spill] sm:$0xff]  ;;  %v10577_v49 = vld [vmem:[#allocation36_spill] sm:$0xff] }
 0x534   :  { %v2565_v59 = vadd.f32 %v2537_v6, %v2419_v37  ;;  %v2128_v28 = vadd.f32 %v10561_v38, %v1982_v24  ;;  %v1984_v52 = vadd.f32 %v10572_v31, %v1838_v39  ;;  %v10578_v38 = vld [vmem:[#allocation29_spill] sm:$0xff]  ;;  %v10581_v20 = vld [vmem:[#allocation32_spill] sm:$0xff] }
 0x535   :  { %v2822_v47 = vadd.f32 %v10558_v19, %v2710_v21  ;;  %v10575_v19 = vld [vmem:[#allocation31_spill] sm:$0xff] }
 0x536   :  { %v2274_v58 = vadd.f32 %v2248_v23, %v2128_v28  ;;  %v2400_v23 = vpop.f32.mrf.mxu3  ;;  %v2130_v15 = vadd.f32 %v10573_v0, %v1984_v52 }
 0x537   :  { %v8338_v42 = vmax.f32 %v2822_v47, 0.0  ;;  %v1690_v47 = vadd.f32 %v10575_v19, %v10574_v3 }
 0x538   :  { %v2420_v5 = vadd.f32 %v2394_v43, %v2274_v58  ;;  %v2276_v33 = vadd.f32 %v2254_v40, %v2130_v15 }
 0x539   :  { %2880 = vrot.lane.b32.xlu1 %v8338_v42, %s5904_s26  ;;  %v1839_v24 = vadd.f32 %v10577_v49, %v1690_v47 }
 0x53a   :  { %v2683_v9 = vpop.f32.mrf.mxu1 }
 0x53b   :  { %v2540_v50 = vpop.f32.mrf.mxu0  ;;  %v2711_v36 = vadd.f32 %v2683_v9, %v2565_v59  ;;  %v2422_v59 = vadd.f32 %v2400_v23, %v2276_v33  ;;  %v2257_v9 = vpop.f32.mrf.mxu2  ;;  %v1985_v28 = vadd.f32 %v10578_v38, %v1839_v24 }
 0x53c   :  { %v2566_v25 = vadd.f32 %v2540_v50, %v2420_v5  ;;  %v10582_v5 = vld [vmem:[#allocation42_spill] sm:$0xff] }
 0x53d   :  { %v2823_v2 = vadd.f32 %v10564_v53, %v2711_v36  ;;  %v2131_v34 = vadd.f32 %v10579_v12, %v1985_v28 }
 0x53e   :  { %v2403_v48 = vpop.f32.mrf.mxu3 }
 0x53f   :  { %v8348_v4 = vmax.f32 %v2823_v2, 0.0  ;;  %v10580_v2 = vld [vmem:[#allocation48_spill] sm:$0xff]  ;;  %v2277_v8 = vadd.f32 %v2257_v9, %v2131_v34 }
 0x540   :  { %v1693_v30 = vadd.f32 %v10581_v20, %v10580_v2 }
 0x541   :  { %2882 = vrot.lane.b32.xlu0 %v8348_v4, %s5904_s26 }
 0x542   :  { %v2686_v16 = vpop.f32.mrf.mxu1 }
 0x543   :  { %v2543_v54 = vpop.f32.mrf.mxu0  ;;  %v2712_v18 = vadd.f32 %v2686_v16, %v2566_v25  ;;  %v1840_v25 = vadd.f32 %v10583_v55, %v1693_v30  ;;  %v2260_v7 = vpop.f32.mrf.mxu2 }
 0x544   :  { %v2567_v60 = vadd.f32 %v2543_v54, %v2421_v41  ;;  %v2423_v54 = vadd.f32 %v2403_v48, %v2277_v8  ;;  %v5807_v8 = vld [vmem:[%s10413_s11] ss:$0 sm:$0xff] }
 0x545   :  { %v2824_v22 = vadd.f32 %v10570_v13, %v2712_v18  ;;  %v1986_v26 = vadd.f32 %v10584_v63, %v1840_v25 }
 0x547   :  { %v8358_v6 = vmax.f32 %v2824_v22, 0.0  ;;  %v2132_v11 = vadd.f32 %v10585_v35, %v1986_v26  ;;  %v2406_v22 = vpop.f32.mrf.mxu3 }
 0x549   :  { %2884 = vrot.lane.b32.xlu2 %v8358_v6, %s5904_s26  ;;  %v2278_v40 = vadd.f32 %v2260_v7, %v2132_v11 }
 0x54a   :  { %v2689_v43 = vpop.f32.mrf.mxu1 }
 0x54b   :  { %v2546_v21 = vpop.f32.mrf.mxu0  ;;  %v2713_v27 = vadd.f32 %v2689_v43, %v2567_v60  ;;  %v2424_v23 = vadd.f32 %v2406_v22, %v2278_v40  ;;  %v10587_v43 = vld [vmem:[#allocation13_spill] sm:$0xff] }
 0x54c   :  { %v2568_v36 = vadd.f32 %v2546_v21, %v2422_v59 }
 0x54d   :  { %v2825_v37 = vadd.f32 %v10576_v46, %v2713_v27 }
 0x54f   :  { %v8368_v50 = vmax.f32 %v2825_v37, 0.0 }
 0x551   :  { %2886 = vrot.lane.b32.xlu1 %v8368_v50, %s5904_s26 }
 0x552   :  { %v2692_v56 = vpop.f32.mrf.mxu1 }
 0x553   :  { %v2714_v58 = vadd.f32 %v2692_v56, %v2568_v36  ;;  %v2549_v53 = vpop.f32.mrf.mxu0 }
 0x554   :  { %v2569_v18 = vadd.f32 %v2549_v53, %v2423_v54 }
 0x555   :  { %v2826_v14 = vadd.f32 %v10582_v5, %v2714_v58 }
 0x557   :  { %v8378_v16 = vmax.f32 %v2826_v14, 0.0  ;;  %v2846_v14 = vld [vmem:[#allocation4 + $0x200] sm:$0xff] }
 0x559   :  { %2888 = vrot.lane.b32.xlu0 %v8378_v16, %s5904_s26 }
 0x55a   :  { %v2695_v45 = vpop.f32.mrf.mxu1 }
 0x55b   :  { %v2715_v13 = vadd.f32 %v2695_v45, %v2569_v18  ;;  %v2552_v41 = vpop.f32.mrf.mxu0  ;;  %v8454_v27 = vpop.permute.xlu2 %2866  ;;  %v2847_v45 = vld [vmem:[#allocation4 + $0x208] sm:$0xff] }
 0x55c   :  { %v2570_v52 = vadd.f32 %v2552_v41, %v2424_v23  ;;  %v2848_v41 = vld [vmem:[#allocation4 + $0x210] sm:$0xff] }
 0x55d   :  { %v2827_v39 = vadd.f32 %v10586_v17, %v2715_v13 }
 0x55f   :  { %v8385_v31 = vmax.f32 %v2827_v39, 0.0 }
 0x561   :  { %2890 = vrot.lane.b32.xlu2 %v8385_v31, %s5904_s26  ;;  %3230 = vrot.lane.b32.xlu0 %v8385_v31, %s5905_s0 }
 0x562   :  { %3376 = vrot.lane.b32.xlu1 %v8385_v31, %s5906_s21  ;;  %v2698_v60 = vpop.f32.mrf.mxu1 }
 0x563   :  { %v2716_v21 = vadd.f32 %v2698_v60, %v2570_v52  ;;  %v8474_v33 = vpop.permute.xlu1 %2862 }
 0x565   :  { %v2828_v0 = vadd.f32 %v10587_v43, %v2716_v21 }
 0x567   :  { %v8394_v15 = vmax.f32 %v2828_v0, 0.0 }
 0x569   :  { %2991 = vmatpush.msra.mxu3 %v8394_v15  ;;  %3084 = vrot.lane.b32.xlu2 %v8385_v31, %s5901_s17 }
 0x56a   :  { %3228 = vrot.lane.b32.xlu0 %v8378_v16, %s5905_s0  ;;  %2892 = vrot.lane.b32.xlu1 %v8394_v15, %s5904_s26 }
 0x56b   :  { %2992 = vmatpush.msra.mxu3 %v8385_v31  ;;  %v8470_v19 = vpop.permute.xlu0 %2864 }
 0x56d   :  { %2993 = vmatpush.msra.mxu3 %v8378_v16 }
 0x56f   :  { %2994 = vmatpush.msra.mxu3 %v8368_v50 }
 0x571   :  { %2995 = vmatpush.msra.mxu3 %v8358_v6  ;;  %3082 = vrot.lane.b32.xlu2 %v8378_v16, %s5901_s17 }
 0x572   :  { %3226 = vrot.lane.b32.xlu0 %v8368_v50, %s5905_s0  ;;  %3374 = vrot.lane.b32.xlu1 %v8378_v16, %s5906_s21 }
 0x573   :  { %2996 = vmatpush.msra.mxu3 %v8348_v4  ;;  %v8462_v3 = vpop.permute.xlu2 %2872 }
 0x574   :  { %v2915_v52 = vmul.f32 %v5807_v8, %v8462_v3 }
 0x575   :  { %2997 = vmatpush.msra.mxu3 %v8338_v42 }
 0x577   :  { %2998 = vmatpush.msra.mxu3 %v8328_v44 }
 0x579   :  { %2999 = vmatpush.msra.mxu3 %v8318_v61  ;;  %3080 = vrot.lane.b32.xlu2 %v8368_v50, %s5901_s17 }
 0x57a   :  { %3224 = vrot.lane.b32.xlu0 %v8358_v6, %s5905_s0  ;;  %3372 = vrot.lane.b32.xlu1 %v8368_v50, %s5906_s21 }
 0x57b   :  { %3000 = vmatpush.msra.mxu3 %v8308_v29  ;;  %v8484_v49 = vpop.permute.xlu1 %2868 }
 0x57c   :  { %v2913_v3 = vmul.f32 %v5807_v8, %v8484_v49 }
 0x57d   :  { %3001 = vmatpush.msra.mxu3 %v8298_v10 }
 0x57f   :  { %3002 = vmatpush.msra.mxu3 %v8288_v57 }
 0x581   :  { %3003 = vmatpush.msra.mxu3 %v8278_v32  ;;  %3078 = vrot.lane.b32.xlu2 %v8358_v6, %s5901_s17 }
 0x582   :  { %3222 = vrot.lane.b32.xlu0 %v8348_v4, %s5905_s0  ;;  %3370 = vrot.lane.b32.xlu1 %v8358_v6, %s5906_s21 }
 0x583   :  { %3004 = vmatpush.msra.mxu3 %v8268_v51  ;;  %v8482_v46 = vpop.permute.xlu0 %2870 }
 0x584   :  { %v2914_v60 = vmul.f32 %v5807_v8, %v8482_v46  ;;  %v2910_v46 = vmul.f32 %v5807_v8, %v8474_v33 }
 0x585   :  { %3005 = vmatpush.msra.mxu3 %v8259_v1 }
 0x587   :  { %3006 = vmatpush.msra.mxu3 %v8248_v62 }
 0x588   :  { %3007 = vmatmul.f32.vlgmr.msra.gmra.mxu3 %v2846_v14 }
 0x589   :  { %3076 = vrot.lane.b32.xlu2 %v8348_v4, %s5901_s17 }
 0x58a   :  { %3220 = vrot.lane.b32.xlu0 %v8338_v42, %s5905_s0  ;;  %3368 = vrot.lane.b32.xlu1 %v8348_v4, %s5906_s21 }
 0x58b   :  { %v8472_v47 = vpop.permute.xlu2 %2878 }
 0x58c   :  { %v2918_v13 = vmul.f32 %v5807_v8, %v8472_v47  ;;  %v2849_v47 = vld [vmem:[#allocation4 + $0x218] sm:$0xff] }
 0x590   :  { %3010 = vmatmul.f32.gmra.mxu3 %v2847_v45  ;;  %v2898_v45 = vld [vmem:[#allocation4 + $0x20] sm:$0xff] }
 0x591   :  { %3074 = vrot.lane.b32.xlu2 %v8338_v42, %s5901_s17 }
 0x592   :  { %3218 = vrot.lane.b32.xlu0 %v8328_v44, %s5905_s0  ;;  %3366 = vrot.lane.b32.xlu1 %v8338_v42, %s5906_s21 }
 0x593   :  { %v2875_v9 = vpop.permute.xlu1 %2874 }
 0x594   :  { %v2916_v23 = vmul.f32 %v5807_v8, %v2875_v9 }
 0x598   :  { %3013 = vmatmul.f32.gmra.mxu3 %v2848_v41  ;;  %v2899_v41 = vld [vmem:[#allocation4 + $0x28] sm:$0xff] }
 0x599   :  { %3072 = vrot.lane.b32.xlu2 %v8328_v44, %s5901_s17 }
 0x59a   :  { %3216 = vrot.lane.b32.xlu0 %v8318_v61, %s5905_s0  ;;  %3364 = vrot.lane.b32.xlu1 %v8328_v44, %s5906_s21 }
 0x59b   :  { %v2877_v24 = vpop.permute.xlu0 %2876 }
 0x59c   :  { %v2917_v39 = vmul.f32 %v5807_v8, %v2877_v24  ;;  %v2911_v24 = vmul.f32 %v5807_v8, %v8470_v19  ;;  %v2850_v19 = vld [vmem:[#allocation4 + $0x220] sm:$0xff] }
 0x5a0   :  { %3016 = vmatmul.f32.gmra.mxu3 %v2849_v47  ;;  %v2900_v47 = vld [vmem:[#allocation4 + $0x30] sm:$0xff] }
 0x5a1   :  { %3070 = vrot.lane.b32.xlu2 %v8318_v61, %s5901_s17 }
 0x5a2   :  { %3214 = vrot.lane.b32.xlu0 %v8308_v29, %s5905_s0  ;;  %3362 = vrot.lane.b32.xlu1 %v8318_v61, %s5906_s21 }
 0x5a3   :  { %v2885_v37 = vpop.permute.xlu2 %2884 }
 0x5a4   :  { %v2921_v7 = vmul.f32 %v5807_v8, %v2885_v37  ;;  %v2912_v37 = vmul.f32 %v5807_v8, %v8454_v27 }
 0x5a8   :  { %3019 = vmatmul.f32.gmra.mxu3 %v2850_v19 }
 0x5a9   :  { %3068 = vrot.lane.b32.xlu2 %v8308_v29, %s5901_s17 }
 0x5aa   :  { %3212 = vrot.lane.b32.xlu0 %v8298_v10, %s5905_s0  ;;  %3360 = vrot.lane.b32.xlu1 %v8308_v29, %s5906_s21 }
 0x5ab   :  { %v2881_v36 = vpop.permute.xlu1 %2880 }
 0x5ac   :  { %v2919_v11 = vmul.f32 %v5807_v8, %v2881_v36 }
 0x5b1   :  { %3066 = vrot.lane.b32.xlu2 %v8298_v10, %s5901_s17 }
 0x5b2   :  { %3210 = vrot.lane.b32.xlu0 %v8288_v57, %s5905_s0  ;;  %3358 = vrot.lane.b32.xlu1 %v8298_v10, %s5906_s21 }
 0x5b3   :  { %v2883_v38 = vpop.permute.xlu0 %2882 }
 0x5b4   :  { %v2920_v35 = vmul.f32 %v5807_v8, %v2883_v38  ;;  %v2895_v38 = vld [vmem:[#allocation4 + $0x8] sm:$0xff] }
 0x5b9   :  { %3064 = vrot.lane.b32.xlu2 %v8288_v57, %s5901_s17 }
 0x5ba   :  { %3208 = vrot.lane.b32.xlu0 %v8278_v32, %s5905_s0  ;;  %3356 = vrot.lane.b32.xlu1 %v8288_v57, %s5906_s21 }
 0x5bb   :  { %v2891_v59 = vpop.permute.xlu2 %2890 }
 0x5bc   :  { %v2924_v55 = vmul.f32 %v5807_v8, %v2891_v59  ;;  %v2894_v59 = vld [vmem:[#allocation4] sm:$0xff] }
 0x5c1   :  { %3062 = vrot.lane.b32.xlu2 %v8278_v32, %s5901_s17 }
 0x5c2   :  { %3206 = vrot.lane.b32.xlu0 %v8268_v51, %s5905_s0  ;;  %3354 = vrot.lane.b32.xlu1 %v8278_v32, %s5906_s21 }
 0x5c3   :  { %v8498_v28 = vpop.permute.xlu2 %3084  ;;  %v2887_v12 = vpop.permute.xlu1 %2886 }
 0x5c4   :  { %v2922_v54 = vmul.f32 %v5807_v8, %v2887_v12  ;;  %v2851_v12 = vld [vmem:[#allocation4 + $0x228] sm:$0xff] }
 0x5c5   :  { %3022 = vmatmul.f32.gmra.mxu3 %v2851_v12  ;;  %v2902_v12 = vld [vmem:[#allocation4 + $0x40] sm:$0xff] }
 0x5c9   :  { %3060 = vrot.lane.b32.xlu2 %v8268_v51, %s5901_s17 }
 0x5ca   :  { %3204 = vrot.lane.b32.xlu0 %v8259_v1, %s5905_s0  ;;  %3352 = vrot.lane.b32.xlu1 %v8268_v51, %s5906_s21 }
 0x5cb   :  { %v8506_v48 = vpop.permute.xlu2 %3082  ;;  %v2889_v56 = vpop.permute.xlu0 %2888 }
 0x5cc   :  { %v2923_v25 = vmul.f32 %v5807_v8, %v2889_v56 }
 0x5d1   :  { %3058 = vrot.lane.b32.xlu2 %v8259_v1, %s5901_s17 }
 0x5d2   :  { %3522 = vrot.lane.b32.xlu0 %v8385_v31, %s5909_s5  ;;  %3350 = vrot.lane.b32.xlu1 %v8259_v1, %s5906_s21 }
 0x5d3   :  { %v8514_v34 = vpop.permute.xlu2 %3080  ;;  %v8516_v58 = vpop.permute.xlu0 %3230 }
 0x5d4   :  { %v8518_v53 = vpop.permute.xlu1 %3376 }
 0x5d9   :  { %3056 = vrot.lane.b32.xlu2 %v8248_v62, %s5901_s17 }
 0x5da   :  { %3086 = vrot.lane.b32.xlu0 %v8394_v15, %s5901_s17  ;;  %3348 = vrot.lane.b32.xlu1 %v8248_v62, %s5906_s21 }
 0x5db   :  { %v8526_v2 = vpop.permute.xlu2 %3078 }
 0x5dc   :  { %v8528_v20 = vpop.permute.xlu0 %3228  ;;  %v2893_v30 = vpop.permute.xlu1 %2892 }
 0x5dd   :  { %v2925_v5 = vmul.f32 %v5807_v8, %v2893_v30  ;;  %v2896_v8 = vld [vmem:[#allocation4 + $0x10] sm:$0xff] }
 0x5df   :  { %2926 = vmatpush.msra.mxu2 %v2925_v5 }
 0x5e1   :  { %2927 = vmatpush.msra.mxu2 %v2924_v55  ;;  %3518 = vrot.lane.b32.xlu2 %v8368_v50, %s5909_s5  ;;  %v2852_v55 = vld [vmem:[#allocation4 + $0x230] sm:$0xff] }
 0x5e2   :  { %3232 = vrot.lane.b32.xlu0 %v8394_v15, %s5905_s0  ;;  %3202 = vrot.lane.b32.xlu1 %v8248_v62, %s5905_s0 }
 0x5e3   :  { %2928 = vmatpush.msra.mxu2 %v2923_v25  ;;  %v8539_v63 = vpop.permute.xlu2 %3076  ;;  %3025 = vmatmul.f32.gmra.mxu3 %v2852_v55 }
 0x5e4   :  { %v8541_v26 = vpop.permute.xlu0 %3226  ;;  %v8543_v18 = vpop.permute.xlu1 %3374 }
 0x5e5   :  { %2929 = vmatpush.msra.mxu2 %v2922_v54 }
 0x5e7   :  { %2930 = vmatpush.msra.mxu2 %v2921_v7  ;;  %v2853_v7 = vld [vmem:[#allocation4 + $0x238] sm:$0xff] }
 0x5e9   :  { %2931 = vmatpush.msra.mxu2 %v2920_v35  ;;  %3378 = vrot.lane.b32.xlu2 %v8394_v15, %s5906_s21 }
 0x5ea   :  { %3960 = vrot.lane.b32.xlu0 %v8385_v31, %s5910_s7  ;;  %3520 = vrot.lane.b32.xlu1 %v8378_v16, %s5909_s5 }
 0x5eb   :  { %2932 = vmatpush.msra.mxu2 %v2919_v11  ;;  %v8552_v22 = vpop.permute.xlu2 %3074  ;;  %3028 = vmatmul.f32.gmra.mxu3 %v2853_v7 }
 0x5ec   :  { %v8554_v40 = vpop.permute.xlu0 %3224  ;;  %v8556_v17 = vpop.permute.xlu1 %3372 }
 0x5ed   :  { %2933 = vmatpush.msra.mxu2 %v2918_v13  ;;  %v2854_v13 = vld [vmem:[#allocation4 + $0x240] sm:$0xff] }
 0x5ef   :  { %2934 = vmatpush.msra.mxu2 %v2917_v39 }
 0x5f1   :  { %2935 = vmatpush.msra.mxu2 %v2916_v23  ;;  %3668 = vrot.lane.b32.xlu2 %v8385_v31, %s5907_s15 }
 0x5f2   :  { %3666 = vrot.lane.b32.xlu0 %v8378_v16, %s5907_s15  ;;  %3516 = vrot.lane.b32.xlu1 %v8358_v6, %s5909_s5 }
 0x5f3   :  { %2936 = vmatpush.msra.mxu2 %v2915_v52  ;;  %v8566_v21 = vpop.permute.xlu2 %3072  ;;  %3031 = vmatmul.f32.gmra.mxu3 %v2854_v13 }
 0x5f4   :  { %v8568_v43 = vpop.permute.xlu0 %3222  ;;  %v8570_v0 = vpop.permute.xlu1 %3370 }
 0x5f5   :  { %2937 = vmatpush.msra.mxu2 %v2914_v60  ;;  %v2855_v60 = vld [vmem:[#allocation4 + $0x248] sm:$0xff] }
 0x5f7   :  { %2938 = vmatpush.msra.mxu2 %v2913_v3 }
 0x5f9   :  { %2939 = vmatpush.msra.mxu2 %v2912_v37  ;;  %3512 = vrot.lane.b32.xlu2 %v8338_v42, %s5909_s5 }
 0x5fa   :  { %3510 = vrot.lane.b32.xlu0 %v8328_v44, %s5909_s5  ;;  %3514 = vrot.lane.b32.xlu1 %v8348_v4, %s5909_s5 }
 0x5fb   :  { %2940 = vmatpush.msra.mxu2 %v2911_v24  ;;  %v8582_v49 = vpop.permute.xlu2 %3070  ;;  %3034 = vmatmul.f32.gmra.mxu3 %v2855_v60 }
 0x5fc   :  { %v8584_v27 = vpop.permute.xlu0 %3220  ;;  %v8586_v9 = vpop.permute.xlu1 %3368 }
 0x5fd   :  { %2941 = vmatpush.msra.mxu2 %v2910_v46  ;;  %v2856_v46 = vld [vmem:[#allocation4 + $0x250] sm:$0xff] }
 0x5fe   :  { %2942 = vmatmul.f32.vlgmr.msra.gmra.mxu2 %v2894_v59 }
 0x601   :  { %3956 = vrot.lane.b32.xlu2 %v8368_v50, %s5910_s7 }
 0x602   :  { %3954 = vrot.lane.b32.xlu0 %v8358_v6, %s5910_s7  ;;  %3958 = vrot.lane.b32.xlu1 %v8378_v16, %s5910_s7 }
 0x603   :  { %v8594_v33 = vpop.permute.xlu2 %3068  ;;  %3037 = vmatmul.f32.gmra.mxu3 %v2856_v46 }
 0x604   :  { %v8596_v36 = vpop.permute.xlu0 %3218  ;;  %v8598_v56 = vpop.permute.xlu1 %3366 }
 0x606   :  { %2945 = vmatmul.f32.gmra.mxu2 %v2895_v38  ;;  %v2857_v38 = vld [vmem:[#allocation4 + $0x258] sm:$0xff] }
 0x609   :  { %3812 = vrot.lane.b32.xlu2 %v8378_v16, %s5908_s22 }
 0x60a   :  { %3810 = vrot.lane.b32.xlu0 %v8368_v50, %s5908_s22  ;;  %3814 = vrot.lane.b32.xlu1 %v8385_v31, %s5908_s22  ;;  %v2897_v31 = vld [vmem:[#allocation4 + $0x18] sm:$0xff] }
 0x60b   :  { %v8606_v30 = vpop.permute.xlu2 %3066  ;;  %3040 = vmatmul.f32.gmra.mxu3 %v2857_v38 }
 0x60c   :  { %v8608_v5 = vpop.permute.xlu0 %3216  ;;  %v8610_v14 = vpop.permute.xlu1 %3364 }
 0x60e   :  { %2948 = vmatmul.f32.gmra.mxu2 %v2896_v8 }
 0x611   :  { %3662 = vrot.lane.b32.xlu2 %v8358_v6, %s5907_s15 }
 0x612   :  { %3660 = vrot.lane.b32.xlu0 %v8348_v4, %s5907_s15  ;;  %3664 = vrot.lane.b32.xlu1 %v8368_v50, %s5907_s15 }
 0x613   :  { %v8618_v16 = vpop.permute.xlu2 %3064 }
 0x614   :  { %v8620_v25 = vpop.permute.xlu0 %3214  ;;  %v8622_v54 = vpop.permute.xlu1 %3362 }
 0x616   :  { %2951 = vmatmul.f32.gmra.mxu2 %v2897_v31  ;;  %v2858_v31 = vld [vmem:[#allocation4 + $0x260] sm:$0xff] }
 0x617   :  { %3043 = vmatmul.f32.gmra.mxu3 %v2858_v31  ;;  %v2904_v31 = vld [vmem:[#allocation4 + $0x50] sm:$0xff] }
 0x619   :  { %3506 = vrot.lane.b32.xlu2 %v8308_v29, %s5909_s5 }
 0x61a   :  { %3504 = vrot.lane.b32.xlu0 %v8298_v10, %s5909_s5  ;;  %3508 = vrot.lane.b32.xlu1 %v8318_v61, %s5909_s5 }
 0x61b   :  { %v8630_v50 = vpop.permute.xlu2 %3062 }
 0x61c   :  { %v8632_v35 = vpop.permute.xlu0 %3212  ;;  %v8634_v11 = vpop.permute.xlu1 %3360 }
 0x61e   :  { %2954 = vmatmul.f32.gmra.mxu2 %v2898_v45  ;;  %v2903_v45 = vld [vmem:[#allocation4 + $0x48] sm:$0xff] }
 0x621   :  { %3950 = vrot.lane.b32.xlu2 %v8338_v42, %s5910_s7 }
 0x622   :  { %3948 = vrot.lane.b32.xlu0 %v8328_v44, %s5910_s7  ;;  %3952 = vrot.lane.b32.xlu1 %v8348_v4, %s5910_s7 }
 0x623   :  { %v8642_v39 = vpop.permute.xlu2 %3060 }
 0x624   :  { %v8644_v23 = vpop.permute.xlu0 %3210  ;;  %v8646_v52 = vpop.permute.xlu1 %3358 }
 0x626   :  { %2957 = vmatmul.f32.gmra.mxu2 %v2899_v41  ;;  %v8695_v41 = vld [vmem:[%s10413_s11 + $0x3] ss:$0 sm:$0xff] }
 0x627   :  { %v3411_v46 = vmul.f32 %v8695_v41, %v8518_v53  ;;  %v3410_v38 = vmul.f32 %v8695_v41, %v8543_v18 }
 0x629   :  { %3806 = vrot.lane.b32.xlu2 %v8348_v4, %s5908_s22 }
 0x62a   :  { %3804 = vrot.lane.b32.xlu0 %v8338_v42, %s5908_s22  ;;  %3808 = vrot.lane.b32.xlu1 %v8358_v6, %s5908_s22  ;;  %v2901_v6 = vld [vmem:[#allocation4 + $0x38] sm:$0xff] }
 0x62b   :  { %v8654_v3 = vpop.permute.xlu2 %3058 }
 0x62c   :  { %v8656_v37 = vpop.permute.xlu0 %3208  ;;  %v8658_v24 = vpop.permute.xlu1 %3356 }
 0x62e   :  { %2960 = vmatmul.f32.gmra.mxu2 %v2900_v47 }
 0x631   :  { %3656 = vrot.lane.b32.xlu2 %v8328_v44, %s5907_s15 }
 0x632   :  { %3654 = vrot.lane.b32.xlu0 %v8318_v61, %s5907_s15  ;;  %3658 = vrot.lane.b32.xlu1 %v8338_v42, %s5907_s15 }
 0x633   :  { %v8666_v4 = vpop.permute.xlu2 %3056 }
 0x634   :  { %v8668_v59 = vpop.permute.xlu0 %3206  ;;  %v8670_v19 = vpop.permute.xlu1 %3354 }
 0x636   :  { %2963 = vmatmul.f32.gmra.mxu2 %v2901_v6  ;;  %v2859_v6 = vld [vmem:[#allocation4 + $0x268] sm:$0xff] }
 0x637   :  { %3046 = vmatmul.f32.gmra.mxu3 %v2859_v6  ;;  %v3406_v6 = vmul.f32 %v8695_v41, %v8598_v56 }
 0x639   :  { %3500 = vrot.lane.b32.xlu2 %v8278_v32, %s5909_s5 }
 0x63a   :  { %3498 = vrot.lane.b32.xlu0 %v8268_v51, %s5909_s5  ;;  %3502 = vrot.lane.b32.xlu1 %v8288_v57, %s5909_s5 }
 0x63b   :  { %v8678_v42 = vpop.permute.xlu2 %3518 }
 0x63c   :  { %v8680_v8 = vpop.permute.xlu0 %3204  ;;  %v8682_v55 = vpop.permute.xlu1 %3352 }
 0x63e   :  { %2966 = vmatmul.f32.gmra.mxu2 %v2902_v12  ;;  %v3409_v12 = vmul.f32 %v8695_v41, %v8556_v17 }
 0x641   :  { %3944 = vrot.lane.b32.xlu2 %v8308_v29, %s5910_s7 }
 0x642   :  { %3942 = vrot.lane.b32.xlu0 %v8298_v10, %s5910_s7  ;;  %3946 = vrot.lane.b32.xlu1 %v8318_v61, %s5910_s7 }
 0x643   :  { %v3379_v7 = vpop.permute.xlu2 %3378 }
 0x644   :  { %v8690_v13 = vpop.permute.xlu0 %3522  ;;  %v3412_v60 = vmul.f32 %v8695_v41, %v3379_v7  ;;  %v8698_v47 = vpop.permute.xlu1 %3350 }
 0x646   :  { %2969 = vmatmul.f32.gmra.mxu2 %v2903_v45  ;;  %v8721_v45 = vld [vmem:[%s10413_s11 + $0x1] ss:$0 sm:$0xff] }
 0x647   :  { %3413 = vmatpush.msrb.mxu2 %v3412_v60  ;;  %v3119_v17 = vmul.f32 %v8721_v45, %v8498_v28  ;;  %v3407_v60 = vmul.f32 %v8695_v41, %v8586_v9  ;;  %v3117_v28 = vmul.f32 %v8721_v45, %v8514_v34  ;;  %v3405_v9 = vmul.f32 %v8695_v41, %v8610_v14  ;;  %v8751_v34 = vld [vmem:[%s10413_s11 + $0x2] ss:$0 sm:$0xff] }
 0x648   :  { %v3404_v14 = vmul.f32 %v8695_v41, %v8622_v54  ;;  %v3264_v54 = vmul.f32 %v8751_v34, %v8528_v20 }
 0x649   :  { %3414 = vmatpush.msrb.mxu2 %v3411_v46  ;;  %3800 = vrot.lane.b32.xlu2 %v8318_v61, %s5908_s22  ;;  %v3408_v61 = vmul.f32 %v8695_v41, %v8570_v0  ;;  %v3118_v0 = vmul.f32 %v8721_v45, %v8506_v48  ;;  %v2860_v46 = vld [vmem:[#allocation4 + $0x270] sm:$0xff] }
 0x64a   :  { %3798 = vrot.lane.b32.xlu0 %v8308_v29, %s5908_s22  ;;  %3802 = vrot.lane.b32.xlu1 %v8328_v44, %s5908_s22 }
 0x64b   :  { %3415 = vmatpush.msrb.mxu2 %v3410_v38  ;;  %v8712_v53 = vpop.permute.xlu2 %3668  ;;  %3049 = vmatmul.f32.gmra.mxu3 %v2860_v46  ;;  %v3262_v46 = vmul.f32 %v8751_v34, %v8554_v40  ;;  %v3110_v40 = vmul.f32 %v8721_v45, %v8606_v30  ;;  %v3109_v30 = vmul.f32 %v8721_v45, %v8618_v16 }
 0x64c   :  { %v3087_v7 = vpop.permute.xlu0 %3086  ;;  %v8714_v18 = vpop.permute.xlu1 %3348  ;;  %v3258_v16 = vmul.f32 %v8751_v34, %v8608_v5  ;;  %v3106_v5 = vmul.f32 %v8721_v45, %v8654_v3  ;;  %v2908_v3 = vld [vmem:[#allocation4 + $0x70] sm:$0xff] }
 0x64d   :  { %v3120_v44 = vmul.f32 %v8721_v45, %v3087_v7  ;;  %3416 = vmatpush.msrb.mxu2 %v3409_v12  ;;  %v2905_v12 = vld [vmem:[#allocation4 + $0x58] sm:$0xff]  ;;  %v3115_v7 = vmul.f32 %v8721_v45, %v8539_v63  ;;  %v3402_v63 = vmul.f32 %v8695_v41, %v8646_v52  ;;  %v3263_v52 = vmul.f32 %v8751_v34, %v8541_v26 }
 0x64e   :  { %2972 = vmatmul.f32.gmra.mxu2 %v2904_v31  ;;  %v3116_v31 = vmul.f32 %v8721_v45, %v8526_v2  ;;  %v3265_v2 = vmul.f32 %v8751_v34, %v8516_v58  ;;  %v3111_v26 = vmul.f32 %v8721_v45, %v8594_v33  ;;  %v3260_v33 = vmul.f32 %v8751_v34, %v8584_v27 }
 0x64f   :  { %3121 = vmatpush.msrb.mxu0 %v3120_v44  ;;  %3417 = vmatpush.msrb.mxu2 %v3408_v61  ;;  %v3403_v61 = vmul.f32 %v8695_v41, %v8634_v11  ;;  %v3114_v44 = vmul.f32 %v8721_v45, %v8552_v22  ;;  %v2861_v11 = vld [vmem:[#allocation4 + $0x278] sm:$0xff]  ;;  %v3113_v22 = vmul.f32 %v8721_v45, %v8566_v21 }
 0x650   :  { %v3112_v21 = vmul.f32 %v8721_v45, %v8582_v49  ;;  %v3399_v49 = vmul.f32 %v8695_v41, %v8682_v55  ;;  %v3259_v27 = vmul.f32 %v8751_v34, %v8596_v36  ;;  %v3257_v36 = vmul.f32 %v8751_v34, %v8620_v25 }
 0x651   :  { %3122 = vmatpush.msrb.mxu0 %v3119_v17  ;;  %3418 = vmatpush.msrb.mxu2 %v3407_v60  ;;  %v3401_v60 = vmul.f32 %v8695_v41, %v8658_v24  ;;  %v3261_v24 = vmul.f32 %v8751_v34, %v8568_v43  ;;  %v3255_v25 = vmul.f32 %v8751_v34, %v8644_v23 }
 0x652   :  { %3648 = vrot.lane.b32.xlu0 %v8288_v57, %s5907_s15  ;;  %3650 = vrot.lane.b32.xlu2 %v8298_v10, %s5907_s15  ;;  %v3252_v23 = vmul.f32 %v8751_v34, %v8680_v8  ;;  %v3090_v8 = vld [vmem:[#allocation4 + $0x88] sm:$0xff] }
 0x653   :  { %3652 = vrot.lane.b32.xlu1 %v8308_v29, %s5907_s15  ;;  %3123 = vmatpush.msrb.mxu0 %v3118_v0  ;;  %v8740_v48 = vpop.permute.xlu2 %3512  ;;  %v2906_v0 = vld [vmem:[#allocation4 + $0x60] sm:$0xff] }
 0x654   :  { %3419 = vmatpush.msrb.mxu2 %v3406_v6  ;;  %v3233_v56 = vpop.permute.xlu0 %3232  ;;  %v8744_v38 = vpop.permute.xlu1 %3202  ;;  %3052 = vmatmul.f32.gmra.mxu3 %v2861_v11  ;;  %v3400_v6 = vmul.f32 %v8695_v41, %v8670_v19 }
 0x655   :  { %v3266_v29 = vmul.f32 %v8751_v34, %v3233_v56  ;;  %3124 = vmatpush.msrb.mxu0 %v3117_v28  ;;  %v3398_v28 = vmul.f32 %v8695_v41, %v8698_v47  ;;  %v3397_v47 = vmul.f32 %v8695_v41, %v8714_v18  ;;  %v3108_v56 = vmul.f32 %v8721_v45, %v8630_v50 }
 0x656   :  { %3420 = vmatpush.msrb.mxu2 %v3405_v9  ;;  %v2907_v9 = vld [vmem:[#allocation4 + $0x68] sm:$0xff]  ;;  %v3256_v50 = vmul.f32 %v8751_v34, %v8632_v35  ;;  %v3105_v35 = vmul.f32 %v8721_v45, %v8666_v4 }
 0x657   :  { %2975 = vmatmul.f32.gmra.mxu2 %v2905_v12  ;;  %3125 = vmatpush.msrb.mxu0 %v3116_v31  ;;  %v3107_v12 = vmul.f32 %v8721_v45, %v8642_v39  ;;  %v3089_v31 = vld [vmem:[#allocation4 + $0x80] sm:$0xff]  ;;  %v2909_v45 = vld [vmem:[#allocation4 + $0x78] sm:$0xff] }
 0x658   :  { %3267 = vmatpush.msrb.mxu1 %v3266_v29  ;;  %3421 = vmatpush.msrb.mxu2 %v3404_v14  ;;  %v3254_v29 = vmul.f32 %v8751_v34, %v8656_v37 }
 0x659   :  { %3126 = vmatpush.msrb.mxu0 %v3115_v7  ;;  %v3235_v7 = vld [vmem:[#allocation4 + $0x100] sm:$0xff] }
 0x65a   :  { %3268 = vmatpush.msrb.mxu1 %v3265_v2  ;;  %3422 = vmatpush.msrb.mxu2 %v3403_v61 }
 0x65b   :  { %3962 = vrot.lane.b32.xlu0 %v8394_v15, %s5910_s7  ;;  %3494 = vrot.lane.b32.xlu2 %v8248_v62, %s5909_s5  ;;  %v8772_v58 = vpop.permute.xlu2 %3956 }
 0x65c   :  { %3496 = vrot.lane.b32.xlu1 %v8259_v1, %s5909_s5  ;;  %3127 = vmatpush.msrb.mxu0 %v3114_v44  ;;  %v8778_v20 = vpop.permute.xlu0 %3960  ;;  %v8780_v17 = vpop.permute.xlu1 %3520 }
 0x65d   :  { %3269 = vmatpush.msrb.mxu1 %v3264_v54  ;;  %3423 = vmatpush.msrb.mxu2 %v3402_v63 }
 0x65e   :  { %3128 = vmatpush.msrb.mxu0 %v3113_v22  ;;  %v3382_v22 = vld [vmem:[#allocation4 + $0x188] sm:$0xff] }
 0x65f   :  { %3270 = vmatpush.msrb.mxu1 %v3263_v52  ;;  %3424 = vmatpush.msrb.mxu2 %v3401_v60  ;;  %v3237_v52 = vld [vmem:[#allocation4 + $0x110] sm:$0xff] }
 0x660   :  { %2978 = vmatmul.f32.gmra.mxu2 %v2906_v0  ;;  %3129 = vmatpush.msrb.mxu0 %v3112_v21  ;;  %v4093_v0 = vld [vmem:[%s10408_s6 + $0x78] sm:$0xff] }
 0x661   :  { %3271 = vmatpush.msrb.mxu1 %v3262_v46  ;;  %3425 = vmatpush.msrb.mxu2 %v3400_v6 }
 0x662   :  { %3130 = vmatpush.msrb.mxu0 %v3111_v26  ;;  %v3383_v26 = vld [vmem:[#allocation4 + $0x190] sm:$0xff] }
 0x663   :  { %3272 = vmatpush.msrb.mxu1 %v3261_v24  ;;  %3426 = vmatpush.msrb.mxu2 %v3399_v49  ;;  %v8800_v19 = vpop.permute.xlu2 %3812  ;;  %v3238_v24 = vld [vmem:[#allocation4 + $0x118] sm:$0xff] }
 0x664   :  { %3816 = vrot.lane.b32.xlu0 %v8394_v15, %s5908_s22  ;;  %3938 = vrot.lane.b32.xlu2 %v8278_v32, %s5910_s7  ;;  %v8810_v43 = vpop.permute.xlu0 %3666  ;;  %v8812_v55 = vpop.permute.xlu1 %3516 }
 0x665   :  { %3940 = vrot.lane.b32.xlu1 %v8288_v57, %s5910_s7  ;;  %3131 = vmatpush.msrb.mxu0 %v3110_v40  ;;  %v4090_v40 = vld [vmem:[%s10408_s6 + $0x60] sm:$0xff] }
 0x666   :  { %3273 = vmatpush.msrb.mxu1 %v3260_v33  ;;  %3427 = vmatpush.msrb.mxu2 %v3398_v28  ;;  %v4092_v33 = vld [vmem:[%s10408_s6 + $0x70] sm:$0xff] }
 0x667   :  { %3132 = vmatpush.msrb.mxu0 %v3109_v30 }
 0x668   :  { %3274 = vmatpush.msrb.mxu1 %v3259_v27  ;;  %3428 = vmatpush.msrb.mxu2 %v3397_v47  ;;  %v3094_v27 = vld [vmem:[#allocation4 + $0xa8] sm:$0xff]  ;;  %v3384_v47 = vld [vmem:[#allocation4 + $0x198] sm:$0xff] }
 0x669   :  { %2981 = vmatmul.f32.gmra.mxu2 %v2907_v9  ;;  %3133 = vmatpush.msrb.mxu0 %v3108_v56  ;;  %v3239_v9 = vld [vmem:[#allocation4 + $0x120] sm:$0xff] }
 0x66a   :  { %3275 = vmatpush.msrb.mxu1 %v3258_v16  ;;  %v4087_v16 = vld [vmem:[%s10408_s6 + $0x48] sm:$0xff] }
 0x66b   :  { %3134 = vmatpush.msrb.mxu0 %v3107_v12  ;;  %v8830_v41 = vpop.permute.xlu2 %3662  ;;  %v4091_v12 = vld [vmem:[%s10408_s6 + $0x68] sm:$0xff] }
 0x66c   :  { %3276 = vmatpush.msrb.mxu1 %v3257_v36  ;;  %3646 = vrot.lane.b32.xlu0 %v8278_v32, %s5907_s15  ;;  %v8838_v39 = vpop.permute.xlu0 %3510  ;;  %v8840_v18 = vpop.permute.xlu1 %3514 }
 0x66d   :  { %3524 = vrot.lane.b32.xlu2 %v8394_v15, %s5909_s5  ;;  %3796 = vrot.lane.b32.xlu1 %v8298_v10, %s5908_s22  ;;  %v3253_v10 = vmul.f32 %v8751_v34, %v8668_v59  ;;  %v3251_v59 = vmul.f32 %v8751_v34, %v8744_v38  ;;  %v3381_v38 = vld [vmem:[#allocation4 + $0x180] sm:$0xff]  ;;  %v3236_v34 = vld [vmem:[#allocation4 + $0x108] sm:$0xff] }
 0x66e   :  { %3135 = vmatpush.msrb.mxu0 %v3106_v5  ;;  %3277 = vmatpush.msrb.mxu1 %v3256_v50 }
 0x670   :  { %3136 = vmatpush.msrb.mxu0 %v3105_v35  ;;  %3278 = vmatpush.msrb.mxu1 %v3255_v25  ;;  %v3095_v25 = vld [vmem:[#allocation4 + $0xb0] sm:$0xff]  ;;  %v3385_v35 = vld [vmem:[#allocation4 + $0x1a0] sm:$0xff] }
 0x671   :  { %2984 = vmatmul.f32.gmra.mxu2 %v2908_v3  ;;  %3137 = vmatmul.f32.vlgmr.msrb.gmra.mxu0 %v3089_v31  ;;  %v3240_v3 = vld [vmem:[#allocation4 + $0x128] sm:$0xff] }
 0x672   :  { %3279 = vmatpush.msrb.mxu1 %v3254_v29  ;;  %v4084_v29 = vld [vmem:[%s10408_s6 + $0x30] sm:$0xff] }
 0x673   :  { %v8854_v14 = vpop.permute.xlu2 %3506 }
 0x674   :  { %3280 = vmatpush.msrb.mxu1 %v3253_v10  ;;  %3644 = vrot.lane.b32.xlu0 %v8268_v51, %s5907_s15  ;;  %v8860_v4 = vpop.permute.xlu0 %3954  ;;  %v8862_v37 = vpop.permute.xlu1 %3958  ;;  %v4088_v10 = vld [vmem:[%s10408_s6 + $0x50] sm:$0xff] }
 0x675   :  { %3670 = vrot.lane.b32.xlu2 %v8394_v15, %s5907_s15  ;;  %3794 = vrot.lane.b32.xlu1 %v8288_v57, %s5908_s22  ;;  %v3091_v57 = vld [vmem:[#allocation4 + $0x90] sm:$0xff] }
 0x676   :  { %3281 = vmatpush.msrb.mxu1 %v3252_v23  ;;  %v4086_v23 = vld [vmem:[%s10408_s6 + $0x40] sm:$0xff] }
 0x678   :  { %3282 = vmatpush.msrb.mxu1 %v3251_v59 }
 0x679   :  { %2987 = vmatmul.f32.gmra.mxu2 %v2909_v45  ;;  %3140 = vmatmul.f32.gmra.mxu0 %v3090_v8 }
 0x67a   :  { %3283 = vmatmul.f32.vlgmr.msrb.gmra.mxu1 %v3235_v7  ;;  %v3096_v7 = vld [vmem:[#allocation4 + $0xb8] sm:$0xff] }
 0x67b   :  { %v8870_v2 = vpop.permute.xlu2 %3950 }
 0x67c   :  { %3642 = vrot.lane.b32.xlu0 %v8259_v1, %s5907_s15  ;;  %v8874_v15 = vpop.permute.xlu0 %3810  ;;  %v8876_v61 = vpop.permute.xlu1 %3814 }
 0x67d   :  { %3936 = vrot.lane.b32.xlu2 %v8268_v51, %s5910_s7  ;;  %3792 = vrot.lane.b32.xlu1 %v8278_v32, %s5908_s22  ;;  %v3092_v32 = vld [vmem:[#allocation4 + $0x98] sm:$0xff] }
 0x681   :  { %3143 = vmatmul.f32.gmra.mxu0 %v3091_v57  ;;  %3429 = vmatmul.f32.vlgmr.msrb.gmra.mxu2 %v3381_v38  ;;  %v8882_v44 = vpop.f32.mrf.mxu2  ;;  %v3386_v57 = vld [vmem:[#allocation4 + $0x1a8] sm:$0xff]  ;;  %v3241_v38 = vld [vmem:[#allocation4 + $0x130] sm:$0xff] }
 0x682   :  { %3286 = vmatmul.f32.gmra.mxu1 %v3236_v34 }
 0x683   :  { %v8884_v54 = vpop.permute.xlu2 %3806 }
 0x684   :  { %3640 = vrot.lane.b32.xlu0 %v8248_v62, %s5907_s15  ;;  %v8888_v63 = vpop.permute.xlu0 %3660  ;;  %v8890_v11 = vpop.permute.xlu1 %3664 }
 0x685   :  { %3934 = vrot.lane.b32.xlu2 %v8259_v1, %s5910_s7  ;;  %3790 = vrot.lane.b32.xlu1 %v8268_v51, %s5908_s22  ;;  %v3093_v51 = vld [vmem:[#allocation4 + $0xa0] sm:$0xff] }
 0x689   :  { %3146 = vmatmul.f32.gmra.mxu0 %v3092_v32  ;;  %3432 = vmatmul.f32.gmra.mxu2 %v3382_v22  ;;  %v8896_v60 = vpop.f32.mrf.mxu2  ;;  %v4081_v32 = vld [vmem:[%s10408_s6 + $0x18] sm:$0xff] }
 0x68a   :  { %3289 = vmatmul.f32.gmra.mxu1 %v3237_v52  ;;  %v4085_v22 = vld [vmem:[%s10408_s6 + $0x38] sm:$0xff]  ;;  %v4083_v52 = vld [vmem:[%s10408_s6 + $0x28] sm:$0xff] }
 0x68b   :  { %v8901_v21 = vpop.permute.xlu2 %3656 }
 0x68c   :  { %4171 = vperm.xlu0 %5785, %v4093_v0   ;;  %v8903_v46 = vpop.permute.xlu0 %3504  ;;  %v8905_v6 = vpop.permute.xlu1 %3508 }
 0x68d   :  { %3932 = vrot.lane.b32.xlu2 %v8248_v62, %s5910_s7  ;;  %3788 = vrot.lane.b32.xlu1 %v8259_v1, %s5908_s22 }
 0x691   :  { %3149 = vmatmul.f32.gmra.mxu0 %v3093_v51  ;;  %3435 = vmatmul.f32.gmra.mxu2 %v3383_v26  ;;  %v8911_v49 = vpop.f32.mrf.mxu2 }
 0x692   :  { %3292 = vmatmul.f32.gmra.mxu1 %v3238_v24  ;;  %v3097_v24 = vld [vmem:[#allocation4 + $0xc0] sm:$0xff] }
 0x693   :  { %v8919_v28 = vpop.permute.xlu2 %3500 }
 0x694   :  { %4156 = vperm.xlu0 %5785, %v4090_v40   ;;  %v8921_v1 = vpop.permute.xlu0 %3948  ;;  %v8923_v30 = vpop.permute.xlu1 %3952  ;;  %v3387_v40 = vld [vmem:[#allocation4 + $0x1b0] sm:$0xff] }
 0x695   :  { %3786 = vrot.lane.b32.xlu2 %v8248_v62, %s5908_s22  ;;  %4166 = vperm.xlu1 %5786, %v4092_v33   ;;  %v4089_v62 = vld [vmem:[%s10408_s6 + $0x58] sm:$0xff] }
 0x696   :  { %v3242_v33 = vld [vmem:[#allocation4 + $0x138] sm:$0xff] }
 0x699   :  { %3152 = vmatmul.f32.gmra.mxu0 %v3094_v27  ;;  %3438 = vmatmul.f32.gmra.mxu2 %v3384_v47  ;;  %v8927_v56 = vpop.f32.mrf.mxu2  ;;  %v4078_v47 = vld [vmem:[%s10408_s6] sm:$0xff] }
 0x69a   :  { %3295 = vmatmul.f32.gmra.mxu1 %v3239_v9  ;;  %v4082_v9 = vld [vmem:[%s10408_s6 + $0x20] sm:$0xff] }
 0x69b   :  { %v8938_v36 = vpop.permute.xlu2 %3944 }
 0x69c   :  { %4141 = vperm.xlu0 %5785, %v4087_v16   ;;  %v8940_v50 = vpop.permute.xlu0 %3804  ;;  %v8942_v5 = vpop.permute.xlu1 %3808  ;;  %v4080_v16 = vld [vmem:[%s10408_s6 + $0x10] sm:$0xff] }
 0x69d   :  { %4161 = vperm.xlu2 %5784, %v4091_v12   ;;  %4151 = vperm.xlu1 %5786, %v4089_v62  }
 0x6a1   :  { %3155 = vmatmul.f32.gmra.mxu0 %v3095_v25  ;;  %3441 = vmatmul.f32.gmra.mxu2 %v3385_v35  ;;  %v8944_v31 = vpop.f32.mrf.mxu2  ;;  %v3098_v35 = vld [vmem:[#allocation4 + $0xc8] sm:$0xff] }
 0x6a2   :  { %3298 = vmatmul.f32.gmra.mxu1 %v3240_v3  ;;  %v3388_v3 = vld [vmem:[#allocation4 + $0x1b8] sm:$0xff] }
 0x6a3   :  { %v8955_v59 = vpop.permute.xlu2 %3800 }
 0x6a4   :  { %4126 = vperm.xlu0 %5785, %v4084_v29   ;;  %v8957_v45 = vpop.permute.xlu0 %3654  ;;  %v8959_v8 = vpop.permute.xlu1 %3658  ;;  %v3243_v29 = vld [vmem:[#allocation4 + $0x140] sm:$0xff] }
 0x6a5   :  { %4146 = vperm.xlu2 %5784, %v4088_v10   ;;  %4136 = vperm.xlu1 %5786, %v4086_v23   ;;  %v4079_v23 = vld [vmem:[%s10408_s6 + $0x8] sm:$0xff] }
 0x6a9   :  { %3158 = vmatmul.f32.gmra.mxu0 %v3096_v7  ;;  %3444 = vmatmul.f32.gmra.mxu2 %v3386_v57  ;;  %v8961_v34 = vpop.f32.mrf.mxu2 }
 0x6aa   :  { %3301 = vmatmul.f32.gmra.mxu1 %v3241_v38 }
 0x6ac   :  { %4111 = vperm.xlu0 %5785, %v4081_v32   ;;  %v8972_v0 = vpop.permute.xlu0 %3498  ;;  %v8974_v51 = vpop.permute.xlu2 %3650  ;;  %v3099_v32 = vld [vmem:[#allocation4 + $0xd0] sm:$0xff] }
 0x6ad   :  { %4131 = vperm.xlu2 %5784, %v4085_v22   ;;  %4121 = vperm.xlu1 %5786, %v4083_v52   ;;  %v8976_v26 = vpop.permute.xlu1 %3502  ;;  %v3389_v22 = vld [vmem:[#allocation4 + $0x1c0] sm:$0xff]  ;;  %v3244_v52 = vld [vmem:[#allocation4 + $0x148] sm:$0xff] }
 0x6b1   :  { %3161 = vmatmul.f32.gmra.mxu0 %v3097_v24  ;;  %3447 = vmatmul.f32.gmra.mxu2 %v3387_v40  ;;  %v8978_v27 = vpop.f32.mrf.mxu2 }
 0x6b2   :  { %3304 = vmatmul.f32.gmra.mxu1 %v3242_v33 }
 0x6b4   :  { %4096 = vperm.xlu0 %5785, %v4078_v47   ;;  %v8989_v12 = vpop.permute.xlu0 %3942  ;;  %v3100_v47 = vld [vmem:[#allocation4 + $0xd8] sm:$0xff] }
 0x6b5   :  { %4116 = vperm.xlu2 %5784, %v4082_v9   ;;  %4106 = vperm.xlu1 %5786, %v4080_v16   ;;  %v8991_v62 = vpop.permute.xlu2 %3494  ;;  %v8993_v25 = vpop.permute.xlu1 %3946  ;;  %v3390_v9 = vld [vmem:[#allocation4 + $0x1c8] sm:$0xff] }
 0x6b9   :  { %3164 = vmatmul.f32.gmra.mxu0 %v3098_v35  ;;  %3450 = vmatmul.f32.gmra.mxu2 %v3388_v3  ;;  %v8995_v10 = vpop.f32.mrf.mxu2  ;;  %v3245_v35 = vld [vmem:[#allocation4 + $0x150] sm:$0xff]  ;;  %v9015_v3 = vld [vmem:[%s10413_s11 + $0x5] ss:$0 sm:$0xff] }
 0x6ba   :  { %10588 = vst [vmem:[#allocation10_spill] sm:$0xff] %v8995_v10  ;;  %3307 = vmatmul.f32.gmra.mxu1 %v3243_v29  ;;  %v3553_v10 = vmul.f32 %v9015_v3, %v8840_v18 }
 0x6bc   :  { %v9000_v7 = vpop.permute.xlu0 %3798 }
 0x6bd   :  { %4101 = vperm.xlu2 %5784, %v4079_v23   ;;  %v9002_v57 = vpop.permute.xlu1 %3802 }
 0x6be   :  { %v9004_v38 = vpop.permute.xlu2 %3938 }
 0x6c1   :  { %3167 = vmatmul.f32.gmra.mxu0 %v3099_v32  ;;  %3453 = vmatmul.f32.gmra.mxu2 %v3389_v22  ;;  %v9006_v24 = vpop.f32.mrf.mxu2  ;;  %v3557_v32 = vmul.f32 %v9015_v3, %v8690_v13  ;;  %v3556_v22 = vmul.f32 %v9015_v3, %v8780_v17  ;;  %v3101_v13 = vld [vmem:[#allocation4 + $0xe0] sm:$0xff]  ;;  %v3554_v17 = vmul.f32 %v9015_v3, %v8812_v55 }
 0x6c2   :  { %10589 = vst [vmem:[#allocation11_spill] sm:$0xff] %v9006_v24  ;;  %3310 = vmatmul.f32.gmra.mxu1 %v3244_v52  ;;  %v3555_v24 = vmul.f32 %v9015_v3, %v8678_v42  ;;  %v9039_v42 = vld [vmem:[%s10413_s11 + $0x6] ss:$0 sm:$0xff] }
 0x6c3   :  { %v3703_v55 = vmul.f32 %v9039_v42, %v8712_v53  ;;  %v3702_v18 = vmul.f32 %v9039_v42, %v8810_v43  ;;  %v3551_v53 = vmul.f32 %v9015_v3, %v8838_v39  ;;  %v9069_v43 = vld [vmem:[%s10413_s11 + $0x7] ss:$0 sm:$0xff]  ;;  %v3700_v39 = vmul.f32 %v9039_v42, %v8830_v41 }
 0x6c4   :  { %v9008_v40 = vpop.permute.xlu0 %3648  ;;  %v3849_v41 = vmul.f32 %v9069_v43, %v8876_v61  ;;  %v3848_v61 = vmul.f32 %v9069_v43, %v8800_v19 }
 0x6c5   :  { %v9010_v33 = vpop.permute.xlu1 %3652 }
 0x6c7   :  { %v3525_v16 = vpop.permute.xlu2 %3524 }
 0x6c8   :  { %v3558_v29 = vmul.f32 %v9015_v3, %v3525_v16 }
 0x6c9   :  { %3170 = vmatmul.f32.gmra.mxu0 %v3100_v47  ;;  %3456 = vmatmul.f32.gmra.mxu2 %v3390_v9  ;;  %v9018_v23 = vpop.f32.mrf.mxu2  ;;  %v9029_v47 = vld [vmem:[%s10413_s11 + $0x8] ss:$0 sm:$0xff] }
 0x6ca   :  { %10590 = vst [vmem:[#allocation25_spill] sm:$0xff] %v9018_v23  ;;  %3313 = vmatmul.f32.gmra.mxu1 %v3245_v35  ;;  %3559 = vmatpush.msrb.mxu3 %v3558_v29  ;;  %v3391_v35 = vld [vmem:[#allocation4 + $0x1d0] sm:$0xff]  ;;  %v3246_v23 = vld [vmem:[#allocation4 + $0x158] sm:$0xff]  ;;  %v3989_v19 = vmul.f32 %v9029_v47, %v8921_v1 }
 0x6cc   :  { %3560 = vmatpush.msrb.mxu3 %v3557_v32 }
 0x6cd   :  { %v3963_v52 = vpop.permute.xlu0 %3962 }
 0x6ce   :  { %3561 = vmatpush.msrb.mxu3 %v3556_v22  ;;  %v3996_v9 = vmul.f32 %v9029_v47, %v3963_v52  ;;  %v9032_v16 = vpop.permute.xlu1 %3496  ;;  %v3995_v22 = vmul.f32 %v9029_v47, %v8778_v20  ;;  %v3552_v20 = vmul.f32 %v9015_v3, %v8740_v48 }
 0x6cf   :  { %v3671_v29 = vpop.permute.xlu2 %3670 }
 0x6d0   :  { %v3704_v32 = vmul.f32 %v9039_v42, %v3671_v29  ;;  %3562 = vmatpush.msrb.mxu3 %v3555_v24  ;;  %3997 = vmatpush.msra.mxu2 %v3996_v9  ;;  %v3994_v29 = vmul.f32 %v9029_v47, %v8862_v37  ;;  %v9052_v24 = vpop.f32.mrf.mxu3  ;;  %v3993_v9 = vmul.f32 %v9029_v47, %v8772_v58  ;;  %v3247_v58 = vld [vmem:[#allocation4 + $0x160] sm:$0xff] }
 0x6d1   :  { %3173 = vmatmul.f32.gmra.mxu0 %v3101_v13  ;;  %3459 = vmatmul.f32.gmra.mxu2 %v3391_v35  ;;  %v9044_v52 = vpop.f32.mrf.mxu2  ;;  %v3701_v13 = vmul.f32 %v9039_v42, %v8890_v11  ;;  %v3550_v11 = vmul.f32 %v9015_v3, %v8905_v6  ;;  %v3991_v6 = vmul.f32 %v9029_v47, %v8923_v30 }
 0x6d2   :  { %10591 = vst [vmem:[#allocation46_spill] sm:$0xff] %v9044_v52  ;;  %3316 = vmatmul.f32.gmra.mxu1 %v3246_v23  ;;  %3563 = vmatpush.msrb.mxu3 %v3554_v17  ;;  %v3392_v23 = vld [vmem:[#allocation4 + $0x1d8] sm:$0xff]  ;;  %v3992_v17 = vmul.f32 %v9029_v47, %v8860_v4  ;;  %v3990_v30 = vmul.f32 %v9029_v47, %v8870_v2  ;;  %v3103_v2 = vld [vmem:[#allocation4 + $0xf0] sm:$0xff] }
 0x6d3   :  { %3705 = vmatpush.msra.mxu0 %v3704_v32  ;;  %3998 = vmatpush.msra.mxu2 %v3995_v22  ;;  %v3549_v22 = vmul.f32 %v9015_v3, %v8854_v14  ;;  %v3548_v14 = vmul.f32 %v9015_v3, %v8903_v46  ;;  %v3547_v46 = vmul.f32 %v9015_v3, %v8976_v26 }
 0x6d4   :  { %3564 = vmatpush.msrb.mxu3 %v3553_v10  ;;  %v3102_v10 = vld [vmem:[#allocation4 + $0xe8] sm:$0xff]  ;;  %v3546_v26 = vmul.f32 %v9015_v3, %v8919_v28  ;;  %v3845_v28 = vmul.f32 %v9069_v43, %v8884_v54  ;;  %v3844_v54 = vmul.f32 %v9069_v43, %v8940_v50  ;;  %v3693_v50 = vmul.f32 %v9039_v42, %v9008_v40 }
 0x6d5   :  { %3706 = vmatpush.msra.mxu0 %v3703_v55  ;;  %3999 = vmatpush.msra.mxu2 %v3994_v29  ;;  %v3699_v55 = vmul.f32 %v9039_v42, %v8888_v63  ;;  %v3698_v63 = vmul.f32 %v9039_v42, %v8959_v8  ;;  %v3842_v40 = vmul.f32 %v9069_v43, %v8955_v59 }
 0x6d6   :  { %3565 = vmatpush.msrb.mxu3 %v3552_v20  ;;  %v3817_v37 = vpop.permute.xlu0 %3816 }
 0x6d7   :  { %3707 = vmatpush.msra.mxu0 %v3702_v18  ;;  %v9064_v48 = vpop.permute.xlu1 %3940  ;;  %4000 = vmatpush.msra.mxu2 %v3993_v9  ;;  %v3850_v35 = vmul.f32 %v9069_v43, %v3817_v37  ;;  %v9088_v29 = vpop.permute.xlu2 %3936  ;;  %v3697_v9 = vmul.f32 %v9039_v42, %v8901_v21  ;;  %v3847_v18 = vmul.f32 %v9069_v43, %v8874_v15  ;;  %v3393_v21 = vld [vmem:[#allocation4 + $0x1e0] sm:$0xff] }
 0x6d8   :  { %3566 = vmatpush.msrb.mxu3 %v3551_v53  ;;  %v9090_v4 = vpop.f32.mrf.mxu3  ;;  %v3248_v53 = vld [vmem:[#allocation4 + $0x168] sm:$0xff]  ;;  %v3846_v37 = vmul.f32 %v9069_v43, %v8942_v5  ;;  %v3696_v15 = vmul.f32 %v9039_v42, %v8957_v45  ;;  %v3695_v5 = vmul.f32 %v9039_v42, %v9010_v33  ;;  %v3987_v45 = vmul.f32 %v9029_v47, %v8938_v36 }
 0x6d9   :  { %3708 = vmatpush.msra.mxu0 %v3701_v13  ;;  %3462 = vmatmul.f32.gmra.mxu2 %v3392_v23  ;;  %v3545_v23 = vmul.f32 %v9015_v3, %v8972_v0  ;;  %v3988_v13 = vmul.f32 %v9029_v47, %v8993_v25  ;;  %v3694_v33 = vmul.f32 %v9039_v42, %v8974_v51  ;;  %v3104_v51 = vld [vmem:[#allocation4 + $0xf8] sm:$0xff] }
 0x6da   :  { %3176 = vmatmul.f32.gmra.mxu0 %v3102_v10  ;;  %3319 = vmatmul.f32.gmra.mxu1 %v3247_v58  ;;  %v9078_v32 = vpop.f32.mrf.mxu2  ;;  %v3544_v10 = vmul.f32 %v9015_v3, %v9032_v16  ;;  %v3986_v36 = vmul.f32 %v9029_v47, %v8989_v12  ;;  %v3543_v16 = vmul.f32 %v9015_v3, %v8991_v62  ;;  %v3249_v12 = vld [vmem:[#allocation4 + $0x170] sm:$0xff]  ;;  %v3527_v62 = vld [vmem:[#allocation4 + $0x280] sm:$0xff] }
 0x6db   :  { %10592 = vst [vmem:[#allocation23_spill] sm:$0xff] %v9078_v32  ;;  %3567 = vmatpush.msrb.mxu3 %v3550_v11  ;;  %3709 = vmatpush.msra.mxu0 %v3700_v39  ;;  %v3843_v39 = vmul.f32 %v9069_v43, %v9002_v57  ;;  %v3985_v11 = vmul.f32 %v9029_v47, %v9064_v48 }
 0x6dc   :  { %3851 = vmatpush.msra.mxu1 %v3850_v35  ;;  %4001 = vmatpush.msra.mxu2 %v3992_v17  ;;  %v3394_v17 = vld [vmem:[#allocation4 + $0x1e8] sm:$0xff] }
 0x6dd   :  { %3568 = vmatpush.msrb.mxu3 %v3549_v22  ;;  %3710 = vmatpush.msra.mxu0 %v3699_v55  ;;  %v3984_v22 = vmul.f32 %v9029_v47, %v9004_v38 }
 0x6de   :  { %3852 = vmatpush.msra.mxu1 %v3849_v41  ;;  %4002 = vmatpush.msra.mxu2 %v3991_v6  ;;  %v3647_v20 = vpop.permute.xlu0 %3646  ;;  %v3841_v6 = vmul.f32 %v9069_v43, %v9000_v7 }
 0x6df   :  { %3569 = vmatpush.msrb.mxu3 %v3548_v14  ;;  %3711 = vmatpush.msra.mxu0 %v3698_v63  ;;  %v9104_v8 = vpop.permute.xlu1 %3796  ;;  %v3935_v0 = vpop.permute.xlu2 %3934  ;;  %v3692_v3 = vmul.f32 %v9039_v42, %v3647_v20  ;;  %v3983_v14 = vmul.f32 %v9029_v47, %v9088_v29 }
 0x6e0   :  { %3853 = vmatpush.msra.mxu1 %v3848_v61  ;;  %4003 = vmatpush.msra.mxu2 %v3990_v30  ;;  %v9130_v58 = vpop.f32.mrf.mxu3  ;;  %v3982_v30 = vmul.f32 %v9029_v47, %v3935_v0  ;;  %v3840_v20 = vmul.f32 %v9069_v43, %v9104_v8 }
 0x6e1   :  { %3570 = vmatpush.msrb.mxu3 %v3547_v46  ;;  %3712 = vmatpush.msra.mxu0 %v3697_v9  ;;  %v3250_v46 = vld [vmem:[#allocation4 + $0x178] sm:$0xff] }
 0x6e2   :  { %3854 = vmatpush.msra.mxu1 %v3847_v18  ;;  %4004 = vmatpush.msra.mxu2 %v3989_v19  ;;  %v3395_v18 = vld [vmem:[#allocation4 + $0x1f0] sm:$0xff]  ;;  %v3528_v19 = vld [vmem:[#allocation4 + $0x288] sm:$0xff] }
 0x6e3   :  { %3179 = vmatmul.f32.gmra.mxu0 %v3103_v2  ;;  %3322 = vmatmul.f32.gmra.mxu1 %v3248_v53  ;;  %v9116_v1 = vpop.f32.mrf.mxu2 }
 0x6e4   :  { %10593 = vst [vmem:[#allocation53_spill] sm:$0xff] %v9116_v1  ;;  %3465 = vmatmul.f32.gmra.mxu2 %v3393_v21  ;;  %3571 = vmatpush.msrb.mxu3 %v3546_v26  ;;  %v3673_v26 = vld [vmem:[#allocation4 + $0x300] sm:$0xff]  ;;  %v3829_v1 = vld [vmem:[#allocation4 + $0x3d0] sm:$0xff] }
 0x6e5   :  { %3713 = vmatpush.msra.mxu0 %v3696_v15  ;;  %3855 = vmatpush.msra.mxu1 %v3846_v37 }
 0x6e6   :  { %4005 = vmatpush.msra.mxu2 %v3988_v13  ;;  %3572 = vmatpush.msrb.mxu3 %v3545_v23  ;;  %v3645_v25 = vpop.permute.xlu0 %3644  ;;  %v3396_v13 = vld [vmem:[#allocation4 + $0x1f8] sm:$0xff] }
 0x6e7   :  { %3714 = vmatpush.msra.mxu0 %v3695_v5  ;;  %3856 = vmatpush.msra.mxu1 %v3845_v28  ;;  %v3795_v35 = vpop.permute.xlu1 %3794  ;;  %v3691_v48 = vmul.f32 %v9039_v42, %v3645_v25  ;;  %v3933_v63 = vpop.permute.xlu2 %3932  ;;  %v3529_v28 = vld [vmem:[#allocation4 + $0x290] sm:$0xff] }
 0x6e8   :  { %4006 = vmatpush.msra.mxu2 %v3987_v45  ;;  %3573 = vmatpush.msrb.mxu3 %v3544_v10  ;;  %v9161_v61 = vpop.f32.mrf.mxu3  ;;  %v3981_v7 = vmul.f32 %v9029_v47, %v3933_v63  ;;  %v3839_v29 = vmul.f32 %v9069_v43, %v3795_v35  ;;  %v3965_v35 = vld [vmem:[#allocation4 + $0x400] sm:$0xff] }
 0x6e9   :  { %3715 = vmatpush.msra.mxu0 %v3694_v33  ;;  %3857 = vmatpush.msra.mxu1 %v3844_v54 }
 0x6ea   :  { %4007 = vmatpush.msra.mxu2 %v3986_v36  ;;  %3574 = vmatpush.msrb.mxu3 %v3543_v16  ;;  %v3819_v36 = vld [vmem:[#allocation4 + $0x380] sm:$0xff]  ;;  %v3530_v16 = vld [vmem:[#allocation4 + $0x298] sm:$0xff] }
 0x6eb   :  { %3716 = vmatpush.msra.mxu0 %v3693_v50  ;;  %3858 = vmatpush.msra.mxu1 %v3843_v39 }
 0x6ec   :  { %4008 = vmatpush.msra.mxu2 %v3985_v11  ;;  %3182 = vmatmul.f32.gmra.mxu0 %v3104_v51  ;;  %v9147_v57 = vpop.f32.mrf.mxu2 }
 0x6ed   :  { %10594 = vst [vmem:[#allocation18_spill] sm:$0xff] %v9147_v57  ;;  %3325 = vmatmul.f32.gmra.mxu1 %v3249_v12  ;;  %3468 = vmatmul.f32.gmra.mxu2 %v3394_v17  ;;  %v3675_v12 = vld [vmem:[#allocation4 + $0x310] sm:$0xff]  ;;  %v3966_v17 = vld [vmem:[#allocation4 + $0x408] sm:$0xff]  ;;  %v3684_v57 = vld [vmem:[#allocation4 + $0x358] sm:$0xff] }
 0x6ee   :  { %3575 = vmatmul.f32.vlgmr.msrb.gmra.mxu3 %v3527_v62  ;;  %3717 = vmatpush.msra.mxu0 %v3692_v3  ;;  %v9154_v55 = vpop.f32.mrf.mxu0  ;;  %v3643_v41 = vpop.permute.xlu0 %3642  ;;  %v3531_v62 = vld [vmem:[#allocation4 + $0x2a0] sm:$0xff] }
 0x6ef   :  { %3859 = vmatpush.msra.mxu1 %v3842_v40  ;;  %4009 = vmatpush.msra.mxu2 %v3984_v22  ;;  %v3690_v59 = vmul.f32 %v9039_v42, %v3643_v41  ;;  %v3793_v38 = vpop.permute.xlu1 %3792  ;;  %v3787_v0 = vpop.permute.xlu2 %3786  ;;  %v3676_v41 = vld [vmem:[#allocation4 + $0x318] sm:$0xff] }
 0x6f0   :  { %3718 = vmatpush.msra.mxu0 %v3691_v48  ;;  %v3838_v9 = vmul.f32 %v9069_v43, %v3793_v38  ;;  %v9177_v23 = vpop.f32.mrf.mxu3  ;;  %v3835_v33 = vmul.f32 %v9069_v43, %v3787_v0 }
 0x6f1   :  { %3860 = vmatpush.msra.mxu1 %v3841_v6  ;;  %4010 = vmatpush.msra.mxu2 %v3983_v14  ;;  %v3967_v6 = vld [vmem:[#allocation4 + $0x410] sm:$0xff] }
 0x6f2   :  { %3719 = vmatpush.msra.mxu0 %v3690_v59  ;;  %v3821_v14 = vld [vmem:[#allocation4 + $0x390] sm:$0xff]  ;;  %v3532_v59 = vld [vmem:[#allocation4 + $0x2a8] sm:$0xff] }
 0x6f3   :  { %3861 = vmatpush.msra.mxu1 %v3840_v20  ;;  %4011 = vmatpush.msra.mxu2 %v3982_v30  ;;  %v3677_v20 = vld [vmem:[#allocation4 + $0x320] sm:$0xff] }
 0x6f4   :  { %v9169_v2 = vpop.f32.mrf.mxu2 }
 0x6f5   :  { %10595 = vst [vmem:[#allocation22_spill] sm:$0xff] %v9169_v2  ;;  %3862 = vmatpush.msra.mxu1 %v3839_v29  ;;  %4012 = vmatpush.msra.mxu2 %v3981_v7  ;;  %v3968_v29 = vld [vmem:[#allocation4 + $0x418] sm:$0xff]  ;;  %v3539_v2 = vld [vmem:[#allocation4 + $0x2e0] sm:$0xff] }
 0x6f6   :  { %3328 = vmatmul.f32.gmra.mxu1 %v3250_v46  ;;  %3471 = vmatmul.f32.gmra.mxu2 %v3395_v18  ;;  %v9171_v8 = vpop.f32.mrf.mxu0  ;;  %v3641_v53 = vpop.permute.xlu0 %3640  ;;  %v3533_v46 = vld [vmem:[#allocation4 + $0x2b0] sm:$0xff] }
 0x6f7   :  { %3578 = vmatmul.f32.gmra.mxu3 %v3528_v19  ;;  %3863 = vmatpush.msra.mxu1 %v3838_v9  ;;  %v9173_v47 = vpop.f32.mrf.mxu1  ;;  %v3689_v21 = vmul.f32 %v9039_v42, %v3641_v53  ;;  %v3791_v37 = vpop.permute.xlu1 %3790  ;;  %v3674_v42 = vld [vmem:[#allocation4 + $0x308] sm:$0xff]  ;;  %v3822_v9 = vld [vmem:[#allocation4 + $0x398] sm:$0xff] }
 0x6f8   :  { %v3837_v15 = vmul.f32 %v9069_v43, %v3791_v37  ;;  %v9189_v50 = vpop.f32.mrf.mxu3  ;;  %v3969_v37 = vld [vmem:[#allocation4 + $0x420] sm:$0xff] }
 0x6f9   :  { %3720 = vmatpush.msra.mxu0 %v3689_v21  ;;  %v3678_v21 = vld [vmem:[#allocation4 + $0x328] sm:$0xff] }
 0x6fa   :  { %3721 = vmatmul.f32.vlgmr.msra.gmra.mxu0 %v3673_v26  ;;  %3864 = vmatpush.msra.mxu1 %v3837_v15  ;;  %v3823_v15 = vld [vmem:[#allocation4 + $0x3a0] sm:$0xff] }
 0x6fc   :  { %v9179_v5 = vpop.f32.mrf.mxu2 }
 0x6fd   :  { %10596 = vst [vmem:[#allocation30_spill] sm:$0xff] %v9179_v5  ;;  %v3828_v5 = vld [vmem:[#allocation4 + $0x3c8] sm:$0xff] }
 0x6fe   :  { %3474 = vmatmul.f32.gmra.mxu2 %v3396_v13  ;;  %v9181_v45 = vpop.f32.mrf.mxu0  ;;  %v3534_v13 = vld [vmem:[#allocation4 + $0x2b8] sm:$0xff] }
 0x6ff   :  { %3581 = vmatmul.f32.gmra.mxu3 %v3529_v28  ;;  %v9183_v10 = vpop.f32.mrf.mxu1  ;;  %v3789_v25 = vpop.permute.xlu1 %3788 }
 0x700   :  { %v3836_v54 = vmul.f32 %v9069_v43, %v3789_v25  ;;  %v3820_v43 = vld [vmem:[#allocation4 + $0x388] sm:$0xff]  ;;  %v9199_v22 = vpop.f32.mrf.mxu3  ;;  %v3679_v25 = vld [vmem:[#allocation4 + $0x330] sm:$0xff] }
 0x702   :  { %3724 = vmatmul.f32.gmra.mxu0 %v3674_v42  ;;  %3865 = vmatpush.msra.mxu1 %v3836_v54  ;;  %v3970_v54 = vld [vmem:[#allocation4 + $0x428] sm:$0xff] }
 0x704   :  { %v9187_v39 = vpop.f32.mrf.mxu2  ;;  %3866 = vmatpush.msra.mxu1 %v3835_v33  ;;  %v3824_v33 = vld [vmem:[#allocation4 + $0x3a8] sm:$0xff] }
 0x705   :  { %3867 = vmatmul.f32.vlgmr.msra.gmra.mxu1 %v3819_v36 }
 0x706   :  { %4013 = vmatmul.f32.vlgmr.msra.gmra.mxu2 %v3965_v35  ;;  %v9191_v51 = vpop.f32.mrf.mxu0  ;;  %v3535_v35 = vld [vmem:[#allocation4 + $0x2c0] sm:$0xff] }
 0x707   :  { %3584 = vmatmul.f32.gmra.mxu3 %v3530_v16  ;;  %v9193_v11 = vpop.f32.mrf.mxu1 }
 0x708   :  { %v9209_v7 = vpop.f32.mrf.mxu3 }
 0x70a   :  { %3727 = vmatmul.f32.gmra.mxu0 %v3675_v12 }
 0x70c   :  { %v9195_v3 = vpop.f32.mrf.mxu2 }
 0x70d   :  { %3870 = vmatmul.f32.gmra.mxu1 %v3820_v43  ;;  %v3680_v43 = vld [vmem:[#allocation4 + $0x338] sm:$0xff] }
 0x70e   :  { %4016 = vmatmul.f32.gmra.mxu2 %v3966_v17  ;;  %v9197_v40 = vpop.f32.mrf.mxu0 }
 0x70f   :  { %3587 = vmatmul.f32.gmra.mxu3 %v3531_v62  ;;  %v9201_v48 = vpop.f32.mrf.mxu1  ;;  %v3971_v62 = vld [vmem:[#allocation4 + $0x430] sm:$0xff] }
 0x710   :  { %v9217_v26 = vpop.f32.mrf.mxu3 }
 0x712   :  { %3730 = vmatmul.f32.gmra.mxu0 %v3676_v41  ;;  %v3825_v41 = vld [vmem:[#allocation4 + $0x3b0] sm:$0xff] }
 0x714   :  { %v9203_v38 = vpop.f32.mrf.mxu2 }
 0x715   :  { %3873 = vmatmul.f32.gmra.mxu1 %v3821_v14 }
 0x716   :  { %4019 = vmatmul.f32.gmra.mxu2 %v3967_v6  ;;  %v9205_v63 = vpop.f32.mrf.mxu0  ;;  %v3536_v6 = vld [vmem:[#allocation4 + $0x2c8] sm:$0xff] }
 0x717   :  { %3590 = vmatmul.f32.gmra.mxu3 %v3532_v59  ;;  %v9207_v30 = vpop.f32.mrf.mxu1 }
 0x718   :  { %v9227_v16 = vpop.f32.mrf.mxu3 }
 0x71a   :  { %3733 = vmatmul.f32.gmra.mxu0 %v3677_v20 }
 0x71c   :  { %v9211_v18 = vpop.f32.mrf.mxu2 }
 0x71d   :  { %3876 = vmatmul.f32.gmra.mxu1 %v3822_v9  ;;  %v3681_v9 = vld [vmem:[#allocation4 + $0x340] sm:$0xff] }
 0x71e   :  { %4022 = vmatmul.f32.gmra.mxu2 %v3968_v29  ;;  %v9213_v19 = vpop.f32.mrf.mxu0 }
 0x71f   :  { %3593 = vmatmul.f32.gmra.mxu3 %v3533_v46  ;;  %v9215_v53 = vpop.f32.mrf.mxu1  ;;  %v3972_v46 = vld [vmem:[#allocation4 + $0x438] sm:$0xff] }
 0x720   :  { %v9237_v20 = vpop.f32.mrf.mxu3 }
 0x721   :  { %10597 = vst [vmem:[#allocation19_spill] sm:$0xff] %v9237_v20 }
 0x722   :  { %3736 = vmatmul.f32.gmra.mxu0 %v3678_v21  ;;  %v3826_v21 = vld [vmem:[#allocation4 + $0x3b8] sm:$0xff] }
 0x724   :  { %v9219_v28 = vpop.f32.mrf.mxu2 }
 0x725   :  { %3879 = vmatmul.f32.gmra.mxu1 %v3823_v15 }
 0x726   :  { %4025 = vmatmul.f32.gmra.mxu2 %v3969_v37  ;;  %v9221_v42 = vpop.f32.mrf.mxu0  ;;  %v3537_v37 = vld [vmem:[#allocation4 + $0x2d0] sm:$0xff] }
 0x727   :  { %3596 = vmatmul.f32.gmra.mxu3 %v3534_v13  ;;  %v9223_v0 = vpop.f32.mrf.mxu1 }
 0x72a   :  { %3739 = vmatmul.f32.gmra.mxu0 %v3679_v25 }
 0x72c   :  { %v9225_v36 = vpop.f32.mrf.mxu2 }
 0x72d   :  { %3882 = vmatmul.f32.gmra.mxu1 %v3824_v33  ;;  %v9247_v33 = vpop.f32.mrf.mxu3 }
 0x72e   :  { %4028 = vmatmul.f32.gmra.mxu2 %v3970_v54  ;;  %v9229_v12 = vpop.f32.mrf.mxu0  ;;  %v3682_v54 = vld [vmem:[#allocation4 + $0x348] sm:$0xff]  ;;  %10599 = vst [vmem:[#allocation21_spill] sm:$0xff] %v9247_v33  ;;  %v3685_v33 = vld [vmem:[#allocation4 + $0x360] sm:$0xff] }
 0x72f   :  { %3599 = vmatmul.f32.gmra.mxu3 %v3535_v35  ;;  %v9231_v17 = vpop.f32.mrf.mxu1  ;;  %v3973_v35 = vld [vmem:[#allocation4 + $0x440] sm:$0xff] }
 0x732   :  { %3742 = vmatmul.f32.gmra.mxu0 %v3680_v43  ;;  %v3827_v43 = vld [vmem:[#allocation4 + $0x3c0] sm:$0xff] }
 0x734   :  { %v9233_v14 = vpop.f32.mrf.mxu2 }
 0x735   :  { %3885 = vmatmul.f32.gmra.mxu1 %v3825_v41 }
 0x736   :  { %4031 = vmatmul.f32.gmra.mxu2 %v3971_v62  ;;  %v9235_v59 = vpop.f32.mrf.mxu0  ;;  %v3538_v62 = vld [vmem:[#allocation4 + $0x2d8] sm:$0xff] }
 0x737   :  { %3602 = vmatmul.f32.gmra.mxu3 %v3536_v6  ;;  %v9239_v29 = vpop.f32.mrf.mxu1 }
 0x73a   :  { %3745 = vmatmul.f32.gmra.mxu0 %v3681_v9  ;;  %v3683_v9 = vld [vmem:[#allocation4 + $0x350] sm:$0xff] }
 0x73c   :  { %v9241_v15 = vpop.f32.mrf.mxu2 }
 0x73d   :  { %3888 = vmatmul.f32.gmra.mxu1 %v3826_v21  ;;  %v9255_v21 = vpop.f32.mrf.mxu3 }
 0x73e   :  { %4034 = vmatmul.f32.gmra.mxu2 %v3972_v46  ;;  %v9243_v13 = vpop.f32.mrf.mxu0  ;;  %10602 = vst [vmem:[#allocation9_spill] sm:$0xff] %v9255_v21 }
 0x73f   :  { %10598 = vst [vmem:[#allocation20_spill] sm:$0xff] %v9243_v13  ;;  %3605 = vmatmul.f32.gmra.mxu3 %v3537_v37  ;;  %v9245_v25 = vpop.f32.mrf.mxu1  ;;  %v3974_v37 = vld [vmem:[#allocation4 + $0x448] sm:$0xff] }
 0x742   :  { %3748 = vmatmul.f32.gmra.mxu0 %v3682_v54 }
 0x744   :  { %v9249_v41 = vpop.f32.mrf.mxu2 }
 0x745   :  { %3891 = vmatmul.f32.gmra.mxu1 %v3827_v43  ;;  %v9265_v21 = vpop.f32.mrf.mxu3 }
 0x746   :  { %4037 = vmatmul.f32.gmra.mxu2 %v3973_v35  ;;  %v9251_v6 = vpop.f32.mrf.mxu0  ;;  %10606 = vst [vmem:[#allocation45_spill] sm:$0xff] %v9265_v21 }
 0x747   :  { %3608 = vmatmul.f32.gmra.mxu3 %v3538_v62  ;;  %10600 = vst [vmem:[#allocation12_spill] sm:$0xff] %v9251_v6  ;;  %v9253_v46 = vpop.f32.mrf.mxu1  ;;  %v3975_v62 = vld [vmem:[#allocation4 + $0x450] sm:$0xff]  ;;  %v3540_v6 = vld [vmem:[#allocation4 + $0x2e8] sm:$0xff] }
 0x748   :  { %10601 = vst [vmem:[#allocation39_spill] sm:$0xff] %v9253_v46 }
 0x74a   :  { %3751 = vmatmul.f32.gmra.mxu0 %v3683_v9 }
 0x74c   :  { %v9257_v54 = vpop.f32.mrf.mxu2 }
 0x74d   :  { %3894 = vmatmul.f32.gmra.mxu1 %v3828_v5  ;;  %v3976_v5 = vld [vmem:[#allocation4 + $0x458] sm:$0xff] }
 0x74e   :  { %4040 = vmatmul.f32.gmra.mxu2 %v3974_v37  ;;  %v9259_v35 = vpop.f32.mrf.mxu0  ;;  %v9267_v37 = vpop.permute.xlu0 %4171 }
 0x74f   :  { %3611 = vmatmul.f32.gmra.mxu3 %v3539_v2  ;;  %10603 = vst [vmem:[#allocation35_spill] sm:$0xff] %v9259_v35  ;;  %v9261_v43 = vpop.f32.mrf.mxu1  ;;  %v3541_v35 = vld [vmem:[#allocation4 + $0x2f0] sm:$0xff] }
 0x750   :  { %10604 = vst [vmem:[#allocation40_spill] sm:$0xff] %v9261_v43 }
 0x751   :  { %10607 = vst [vmem:[#allocation37_spill] sm:$0xff] %v9267_v37  ;;  %v3542_v37 = vld [vmem:[#allocation4 + $0x2f8] sm:$0xff] }
 0x752   :  { %3754 = vmatmul.f32.gmra.mxu0 %v3684_v57  ;;  %v3830_v57 = vld [vmem:[#allocation4 + $0x3d8] sm:$0xff] }
 0x754   :  { %v9263_v9 = vpop.f32.mrf.mxu2 }
 0x755   :  { %10605 = vst [vmem:[#allocation27_spill] sm:$0xff] %v9263_v9  ;;  %3897 = vmatmul.f32.gmra.mxu1 %v3829_v1  ;;  %v9275_v9 = vpop.f32.mrf.mxu3  ;;  %v3686_v1 = vld [vmem:[#allocation4 + $0x368] sm:$0xff] }
 0x756   :  { %4043 = vmatmul.f32.gmra.mxu2 %v3975_v62  ;;  %10611 = vst [vmem:[#allocation41_spill] sm:$0xff] %v9275_v9  ;;  %v3977_v62 = vld [vmem:[#allocation4 + $0x460] sm:$0xff] }
 0x757   :  { %3614 = vmatmul.f32.gmra.mxu3 %v3540_v6  ;;  %v9269_v2 = vpop.f32.mrf.mxu0  ;;  %v9271_v43 = vpop.f32.mrf.mxu1 }
 0x758   :  { %10608 = vst [vmem:[#allocation16_spill] sm:$0xff] %v9269_v2  ;;  %v9277_v6 = vpop.permute.xlu0 %4156 }
 0x759   :  { %10609 = vst [vmem:[#allocation24_spill] sm:$0xff] %v9271_v43 }
 0x75a   :  { %3757 = vmatmul.f32.gmra.mxu0 %v3685_v33  ;;  %10612 = vst [vmem:[#allocation34_spill] sm:$0xff] %v9277_v6  ;;  %v3831_v33 = vld [vmem:[#allocation4 + $0x3e0] sm:$0xff]  ;;  %v3832_v6 = vld [vmem:[#allocation4 + $0x3e8] sm:$0xff] }
 0x75c   :  { %v9273_v32 = vpop.f32.mrf.mxu2 }
 0x75d   :  { %10610 = vst [vmem:[#allocation49_spill] sm:$0xff] %v9273_v32  ;;  %3900 = vmatmul.f32.gmra.mxu1 %v3830_v57  ;;  %v9285_v57 = vpop.f32.mrf.mxu3 }
 0x75e   :  { %4046 = vmatmul.f32.gmra.mxu2 %v3976_v5  ;;  %v3687_v5 = vld [vmem:[#allocation4 + $0x370] sm:$0xff]  ;;  %10616 = vst [vmem:[#allocation52_spill] sm:$0xff] %v9285_v57 }
 0x75f   :  { %3617 = vmatmul.f32.gmra.mxu3 %v3541_v35  ;;  %v9287_v35 = vpop.permute.xlu2 %4161  ;;  %v3833_v57 = vld [vmem:[#allocation4 + $0x3f0] sm:$0xff] }
 0x760   :  { %v9279_v2 = vpop.f32.mrf.mxu0  ;;  %v9281_v21 = vpop.f32.mrf.mxu1  ;;  %10617 = vst [vmem:[#allocation26_spill] sm:$0xff] %v9287_v35 }
 0x761   :  { %10613 = vst [vmem:[#allocation43_spill] sm:$0xff] %v9279_v2  ;;  %v9289_v9 = vpop.permute.xlu0 %4141 }
 0x762   :  { %3760 = vmatmul.f32.gmra.mxu0 %v3686_v1  ;;  %10614 = vst [vmem:[#allocation15_spill] sm:$0xff] %v9281_v21  ;;  %v3978_v1 = vld [vmem:[#allocation4 + $0x468] sm:$0xff] }
 0x763   :  { %10618 = vst [vmem:[#allocation38_spill] sm:$0xff] %v9289_v9  ;;  %v3834_v9 = vld [vmem:[#allocation4 + $0x3f8] sm:$0xff] }
 0x765   :  { %3903 = vmatmul.f32.gmra.mxu1 %v3831_v33 }
 0x766   :  { %4049 = vmatmul.f32.gmra.mxu2 %v3977_v62  ;;  %v3688_v62 = vld [vmem:[#allocation4 + $0x378] sm:$0xff] }
 0x767   :  { %3620 = vmatmul.f32.gmra.mxu3 %v3542_v37  ;;  %v9283_v43 = vpop.f32.mrf.mxu2  ;;  %v9299_v35 = vpop.permute.xlu2 %4146 }
 0x768   :  { %10615 = vst [vmem:[#allocation33_spill] sm:$0xff] %v9283_v43  ;;  %v9297_v43 = vpop.permute.xlu1 %4166 }
 0x769   :  { %v9291_v2 = vpop.f32.mrf.mxu0  ;;  %10622 = vst [vmem:[#allocation44_spill] sm:$0xff] %v9297_v43  ;;  %v9301_v32 = vpop.permute.xlu0 %4126 }
 0x76a   :  { %3763 = vmatmul.f32.gmra.mxu0 %v3687_v5  ;;  %10619 = vst [vmem:[#allocation47_spill] sm:$0xff] %v9291_v2  ;;  %v9295_v37 = vpop.f32.mrf.mxu1  ;;  %v3979_v5 = vld [vmem:[#allocation4 + $0x470] sm:$0xff]  ;;  %v3009_v2 = vadd.f32 %v9052_v24, %v8882_v44  ;;  %v3012_v24 = vadd.f32 %v9090_v4, %v8896_v60  ;;  %v3015_v60 = vadd.f32 %v9130_v58, %v8911_v49 }
 0x76b   :  { %10621 = vst [vmem:[#allocation31_spill] sm:$0xff] %v9295_v37 }
 0x76c   :  { %10623 = vst [vmem:[#allocation36_spill] sm:$0xff] %v9299_v35  ;;  %v3186_v43 = vadd.f32 %v9154_v55, %v3009_v2 }
 0x76d   :  { %3906 = vmatmul.f32.gmra.mxu1 %v3832_v6 }
 0x76e   :  { %4052 = vmatmul.f32.gmra.mxu2 %v3978_v1 }
 0x770   :  { %v9293_v33 = vpop.f32.mrf.mxu2  ;;  %v9310_v46 = vpop.permute.xlu1 %4151 }
 0x771   :  { %10620 = vst [vmem:[#allocation17_spill] sm:$0xff] %v9293_v33  ;;  %v3576_v21 = vpop.f32.mrf.mxu3  ;;  %v9316_v13 = vpop.permute.xlu0 %4111 }
 0x772   :  { %3766 = vmatmul.f32.gmra.mxu0 %v3688_v62  ;;  %v3980_v62 = vld [vmem:[#allocation4 + $0x478] sm:$0xff]  ;;  %10626 = vst [vmem:[#allocation48_spill] sm:$0xff] %v9310_v46  ;;  %v3187_v46 = vadd.f32 %v9171_v8, %v3012_v24 }
 0x773   :  { %v9307_v37 = vpop.f32.mrf.mxu1 }
 0x774   :  { %10625 = vst [vmem:[#allocation50_spill] sm:$0xff] %v9307_v37 }
 0x775   :  { %3909 = vmatmul.f32.gmra.mxu1 %v3833_v57  ;;  %v9313_v57 = vpop.permute.xlu2 %4131 }
 0x776   :  { %4055 = vmatmul.f32.gmra.mxu2 %v3979_v5  ;;  %v3332_v5 = vadd.f32 %v9173_v47, %v3186_v43  ;;  %v3333_v43 = vadd.f32 %v9183_v10, %v3187_v46 }
 0x777   :  { %v3722_v6 = vpop.f32.mrf.mxu0 }
 0x779   :  { %v9303_v1 = vpop.f32.mrf.mxu2  ;;  %v4097_v52 = vpop.permute.xlu0 %4096 }
 0x77a   :  { %10624 = vst [vmem:[#allocation29_spill] sm:$0xff] %v9303_v1  ;;  %v3579_v33 = vpop.f32.mrf.mxu3  ;;  %v3478_v1 = vadd.f32 %v9187_v39, %v3332_v5  ;;  %v3479_v39 = vadd.f32 %v9195_v3, %v3333_v43 }
 0x77c   :  { %v3624_v37 = vadd.f32 %v3576_v21, %v3478_v1  ;;  %v3625_v4 = vadd.f32 %v3579_v33, %v3479_v39  ;;  %v3018_v33 = vadd.f32 %v9161_v61, %v8927_v56  ;;  %v3021_v61 = vadd.f32 %v9177_v23, %v8944_v31 }
 0x77d   :  { %3912 = vmatmul.f32.gmra.mxu1 %v3834_v9  ;;  %v9327_v5 = vpop.permute.xlu2 %4116  ;;  %v3024_v23 = vadd.f32 %v9189_v50, %v8961_v34  ;;  %v3027_v50 = vadd.f32 %v9199_v22, %v8978_v27  ;;  %v10628_v22 = vld [vmem:[#allocation10_spill] sm:$0xff] }
 0x77e   :  { %4058 = vmatmul.f32.gmra.mxu2 %v3980_v62  ;;  %v3770_v47 = vadd.f32 %v3722_v6, %v3624_v37  ;;  %v9324_v62 = vpop.permute.xlu1 %4136  ;;  %v3188_v37 = vadd.f32 %v9181_v45, %v3015_v60  ;;  %v3189_v43 = vadd.f32 %v9191_v51, %v3018_v33 }
 0x77f   :  { %v3725_v35 = vpop.f32.mrf.mxu0 }
 0x780   :  { %v3771_v10 = vadd.f32 %v3725_v35, %v3625_v4  ;;  %v3334_v6 = vadd.f32 %v9193_v11, %v3188_v37 }
 0x781   :  { %v9318_v44 = vpop.f32.mrf.mxu2 }
 0x782   :  { %10627 = vst [vmem:[#allocation32_spill] sm:$0xff] %v9318_v44  ;;  %v3582_v55 = vpop.f32.mrf.mxu3  ;;  %v3868_v2 = vpop.f32.mrf.mxu1 }
 0x783   :  { %v3916_v9 = vadd.f32 %v3868_v2, %v3770_v47  ;;  %v3480_v47 = vadd.f32 %v9203_v38, %v3334_v6  ;;  %v3335_v38 = vadd.f32 %v9201_v48, %v3189_v43  ;;  %v3190_v48 = vadd.f32 %v9197_v40, %v3021_v61 }
 0x785   :  { %v3626_v45 = vadd.f32 %v3582_v55, %v3480_v47 }
 0x786   :  { %v9338_v49 = vpop.permute.xlu1 %4121 }
 0x787   :  { %v3728_v20 = vpop.f32.mrf.mxu0 }
 0x789   :  { %v4014_v44 = vpop.f32.mrf.mxu2 }
 0x78a   :  { %v3585_v21 = vpop.f32.mrf.mxu3  ;;  %v4062_v1 = vadd.f32 %v4014_v44, %v3916_v9  ;;  %v3871_v8 = vpop.f32.mrf.mxu1  ;;  %v3772_v9 = vadd.f32 %v3728_v20, %v3626_v45 }
 0x78b   :  { %v3917_v3 = vadd.f32 %v3871_v8, %v3771_v10  ;;  %v4102_v44 = vpop.permute.xlu2 %4101  ;;  %v3481_v8 = vadd.f32 %v9211_v18, %v3335_v38 }
 0x78c   :  { %v4174_v46 = vadd.f32 %v4097_v52, %v4062_v1 }
 0x78d   :  { %v3627_v55 = vadd.f32 %v3585_v21, %v3481_v8 }
 0x78e   :  { %v9333_v24 = vmax.f32 %v4174_v46, 0.0  ;;  %v4107_v20 = vpop.permute.xlu1 %4106 }
 0x78f   :  { %v3731_v2 = vpop.f32.mrf.mxu0 }
 0x790   :  { %4223 = vrot.lane.b32.xlu1 %v9333_v24, %s5904_s26  ;;  %v3773_v46 = vadd.f32 %v3731_v2, %v3627_v55 }
 0x791   :  { %v4017_v58 = vpop.f32.mrf.mxu2 }
 0x792   :  { %v3588_v35 = vpop.f32.mrf.mxu3  ;;  %v4063_v52 = vadd.f32 %v4017_v58, %v3917_v3  ;;  %v3874_v11 = vpop.f32.mrf.mxu1  ;;  %v3336_v3 = vadd.f32 %v9207_v30, %v3190_v48 }
 0x793   :  { %v3918_v4 = vadd.f32 %v3874_v11, %v3772_v9 }
 0x794   :  { %v4175_v39 = vadd.f32 %v4102_v44, %v4063_v52  ;;  %v3482_v33 = vadd.f32 %v9219_v28, %v3336_v3  ;;  %v3191_v52 = vadd.f32 %v9205_v63, %v3024_v23 }
 0x796   :  { %v9344_v60 = vmax.f32 %v4175_v39, 0.0  ;;  %v3628_v21 = vadd.f32 %v3588_v35, %v3482_v33  ;;  %v3337_v11 = vadd.f32 %v9215_v53, %v3191_v52 }
 0x797   :  { %v3734_v1 = vpop.f32.mrf.mxu0 }
 0x798   :  { %4225 = vrot.lane.b32.xlu0 %v9344_v60, %s5904_s26  ;;  %v3774_v30 = vadd.f32 %v3734_v1, %v3628_v21  ;;  %v3483_v39 = vadd.f32 %v9225_v36, %v3337_v11 }
 0x799   :  { %v4020_v56 = vpop.f32.mrf.mxu2 }
 0x79a   :  { %v3591_v37 = vpop.f32.mrf.mxu3  ;;  %v4064_v51 = vadd.f32 %v4020_v56, %v3918_v4  ;;  %v3877_v10 = vpop.f32.mrf.mxu1 }
 0x79b   :  { %v3919_v18 = vadd.f32 %v3877_v10, %v3773_v46  ;;  %v3629_v35 = vadd.f32 %v3591_v37, %v3483_v39  ;;  %v3030_v37 = vadd.f32 %v9209_v7, %v10628_v22 }
 0x79c   :  { %v4176_v6 = vadd.f32 %v4107_v20, %v4064_v51 }
 0x79e   :  { %v9353_v47 = vmax.f32 %v4176_v6, 0.0 }
 0x79f   :  { %v3737_v58 = vpop.f32.mrf.mxu0 }
 0x7a0   :  { %4227 = vrot.lane.b32.xlu2 %v9353_v47, %s5904_s26  ;;  %v3775_v53 = vadd.f32 %v3737_v58, %v3629_v35  ;;  %v10629_v58 = vld [vmem:[#allocation11_spill] sm:$0xff] }
 0x7a1   :  { %v4023_v31 = vpop.f32.mrf.mxu2  ;;  %v3033_v33 = vadd.f32 %v9217_v26, %v10629_v58  ;;  %v10639_v58 = vld [vmem:[#allocation38_spill] sm:$0xff] }
 0x7a2   :  { %v3594_v45 = vpop.f32.mrf.mxu3  ;;  %v4065_v40 = vadd.f32 %v4023_v31, %v3919_v18  ;;  %v3880_v2 = vpop.f32.mrf.mxu1 }
 0x7a3   :  { %v3920_v28 = vadd.f32 %v3880_v2, %v3774_v30 }
 0x7a4   :  { %v4177_v44 = vadd.f32 %v9316_v13, %v4065_v40  ;;  %v3192_v13 = vadd.f32 %v9213_v19, %v3027_v50 }
 0x7a6   :  { %v9363_v43 = vmax.f32 %v4177_v44, 0.0  ;;  %v3338_v8 = vadd.f32 %v9223_v0, %v3192_v13  ;;  %v10630_v44 = vld [vmem:[#allocation25_spill] sm:$0xff]  ;;  %v10632_v13 = vld [vmem:[#allocation19_spill] sm:$0xff] }
 0x7a7   :  { %v3740_v9 = vpop.f32.mrf.mxu0  ;;  %v3036_v11 = vadd.f32 %v9227_v16, %v10630_v44 }
 0x7a8   :  { %4229 = vrot.lane.b32.xlu1 %v9363_v43, %s5904_s26  ;;  %v3484_v55 = vadd.f32 %v9233_v14, %v3338_v8 }
 0x7a9   :  { %v4026_v34 = vpop.f32.mrf.mxu2 }
 0x7aa   :  { %v3597_v63 = vpop.f32.mrf.mxu3  ;;  %v4066_v38 = vadd.f32 %v4026_v34, %v3920_v28  ;;  %v3883_v4 = vpop.f32.mrf.mxu1  ;;  %v3630_v51 = vadd.f32 %v3594_v45, %v3484_v55  ;;  %v10634_v55 = vld [vmem:[#allocation39_spill] sm:$0xff] }
 0x7ab   :  { %v3921_v36 = vadd.f32 %v3883_v4, %v3775_v53  ;;  %v10631_v4 = vld [vmem:[#allocation46_spill] sm:$0xff] }
 0x7ac   :  { %v4178_v1 = vadd.f32 %v9327_v5, %v4066_v38  ;;  %v3193_v5 = vadd.f32 %v9221_v42, %v3030_v37  ;;  %v3776_v0 = vadd.f32 %v3740_v9, %v3630_v51  ;;  %v3039_v53 = vadd.f32 %v10632_v13, %v10631_v4  ;;  %v10635_v51 = vld [vmem:[#allocation27_spill] sm:$0xff]  ;;  %v10648_v13 = vld [vmem:[#allocation18_spill] sm:$0xff] }
 0x7ae   :  { %v9373_v56 = vmax.f32 %v4178_v1, 0.0  ;;  %v3339_v46 = vadd.f32 %v9231_v17, %v3193_v5  ;;  %v10636_v5 = vld [vmem:[#allocation23_spill] sm:$0xff] }
 0x7af   :  { %v3743_v61 = vpop.f32.mrf.mxu0 }
 0x7b0   :  { %4231 = vrot.lane.b32.xlu0 %v9373_v56, %s5904_s26  ;;  %v3485_v18 = vadd.f32 %v9241_v15, %v3339_v46 }
 0x7b1   :  { %v4029_v27 = vpop.f32.mrf.mxu2 }
 0x7b2   :  { %v3600_v19 = vpop.f32.mrf.mxu3  ;;  %v4067_v20 = vadd.f32 %v4029_v27, %v3921_v36  ;;  %v3886_v10 = vpop.f32.mrf.mxu1  ;;  %v3631_v31 = vadd.f32 %v3597_v63, %v3485_v18 }
 0x7b3   :  { %v3922_v14 = vadd.f32 %v3886_v10, %v3776_v0  ;;  %v10637_v0 = vld [vmem:[#allocation21_spill] sm:$0xff] }
 0x7b4   :  { %v4179_v48 = vadd.f32 %v9338_v49, %v4067_v20  ;;  %v3194_v49 = vadd.f32 %v9229_v12, %v3033_v33  ;;  %v3777_v17 = vadd.f32 %v3743_v61, %v3631_v31  ;;  %v10640_v31 = vld [vmem:[#allocation40_spill] sm:$0xff] }
 0x7b6   :  { %v9383_v6 = vmax.f32 %v4179_v48, 0.0  ;;  %v3340_v40 = vadd.f32 %v9239_v29, %v3194_v49  ;;  %v3042_v48 = vadd.f32 %v10637_v0, %v10636_v5  ;;  %v10641_v49 = vld [vmem:[#allocation49_spill] sm:$0xff] }
 0x7b7   :  { %v3746_v3 = vpop.f32.mrf.mxu0  ;;  %v10653_v5 = vld [vmem:[#allocation17_spill] sm:$0xff] }
 0x7b8   :  { %4233 = vrot.lane.b32.xlu2 %v9383_v6, %s5904_s26  ;;  %v3486_v30 = vadd.f32 %v9249_v41, %v3340_v40 }
 0x7b9   :  { %v4032_v7 = vpop.f32.mrf.mxu2 }
 0x7ba   :  { %v4068_v42 = vadd.f32 %v4032_v7, %v3922_v14  ;;  %v3603_v23 = vpop.f32.mrf.mxu3  ;;  %v3889_v21 = vpop.f32.mrf.mxu1  ;;  %v3632_v28 = vadd.f32 %v3600_v19, %v3486_v30 }
 0x7bb   :  { %v3923_v15 = vadd.f32 %v3889_v21, %v3777_v17 }
 0x7bc   :  { %v4180_v45 = vadd.f32 %v9301_v32, %v4068_v42  ;;  %v3195_v32 = vadd.f32 %v9235_v59, %v3036_v11  ;;  %v3778_v39 = vadd.f32 %v3746_v3, %v3632_v28 }
 0x7be   :  { %v9393_v2 = vmax.f32 %v4180_v45, 0.0  ;;  %v3341_v50 = vadd.f32 %v9245_v25, %v3195_v32 }
 0x7bf   :  { %v3749_v52 = vpop.f32.mrf.mxu0 }
 0x7c0   :  { %4235 = vrot.lane.b32.xlu1 %v9393_v2, %s5904_s26  ;;  %v3487_v38 = vadd.f32 %v9257_v54, %v3341_v50 }
 0x7c1   :  { %v4035_v26 = vpop.f32.mrf.mxu2 }
 0x7c2   :  { %v4069_v12 = vadd.f32 %v4035_v26, %v3923_v15  ;;  %v3892_v9 = vpop.f32.mrf.mxu1  ;;  %v3606_v34 = vpop.f32.mrf.mxu3  ;;  %v3633_v59 = vadd.f32 %v3603_v23, %v3487_v38  ;;  %v10642_v15 = vld [vmem:[#allocation53_spill] sm:$0xff] }
 0x7c3   :  { %v3924_v41 = vadd.f32 %v3892_v9, %v3778_v39  ;;  %v10645_v39 = vld [vmem:[#allocation36_spill] sm:$0xff]  ;;  %v10647_v38 = vld [vmem:[#allocation33_spill] sm:$0xff] }
 0x7c4   :  { %v4181_v29 = vadd.f32 %v9313_v57, %v4069_v12  ;;  %v10633_v57 = vld [vmem:[#allocation20_spill] sm:$0xff]  ;;  %v3779_v61 = vadd.f32 %v3749_v52, %v3633_v59  ;;  %v10643_v52 = vld [vmem:[#allocation9_spill] sm:$0xff]  ;;  %v10644_v12 = vld [vmem:[#allocation35_spill] sm:$0xff] }
 0x7c5   :  { %v3196_v36 = vadd.f32 %v10633_v57, %v3039_v53  ;;  %v3045_v30 = vadd.f32 %v10643_v52, %v10642_v15  ;;  %v10649_v53 = vld [vmem:[#allocation45_spill] sm:$0xff] }
 0x7c6   :  { %v9403_v35 = vmax.f32 %v4181_v29, 0.0  ;;  %v3048_v59 = vadd.f32 %v10649_v53, %v10648_v13 }
 0x7c7   :  { %v3752_v63 = vpop.f32.mrf.mxu0  ;;  %v3342_v27 = vadd.f32 %v10634_v55, %v3196_v36  ;;  %v3198_v9 = vadd.f32 %v10644_v12, %v3045_v30  ;;  %v10659_v30 = vld [vmem:[#allocation29_spill] sm:$0xff] }
 0x7c8   :  { %4237 = vrot.lane.b32.xlu0 %v9403_v35, %s5904_s26 }
 0x7c9   :  { %v4038_v16 = vpop.f32.mrf.mxu2  ;;  %v3488_v19 = vadd.f32 %v10635_v51, %v3342_v27  ;;  %v10651_v27 = vld [vmem:[#allocation48_spill] sm:$0xff]  ;;  %v10652_v51 = vld [vmem:[#allocation15_spill] sm:$0xff] }
 0x7ca   :  { %v4070_v1 = vadd.f32 %v4038_v16, %v3924_v41  ;;  %v3895_v8 = vpop.f32.mrf.mxu1  ;;  %v3609_v37 = vpop.f32.mrf.mxu3 }
 0x7cb   :  { %v3925_v54 = vadd.f32 %v3895_v8, %v3779_v61  ;;  %v3634_v46 = vadd.f32 %v3606_v34, %v3488_v19  ;;  %v10646_v34 = vld [vmem:[#allocation24_spill] sm:$0xff] }
 0x7cc   :  { %v4182_v25 = vadd.f32 %v9324_v62, %v4070_v1  ;;  %v10638_v62 = vld [vmem:[#allocation12_spill] sm:$0xff]  ;;  %v3344_v50 = vadd.f32 %v10646_v34, %v3198_v9 }
 0x7cd   :  { %v3197_v18 = vadd.f32 %v10638_v62, %v3042_v48  ;;  %v3780_v7 = vadd.f32 %v3752_v63, %v3634_v46  ;;  %v10650_v61 = vld [vmem:[#allocation16_spill] sm:$0xff]  ;;  %v10654_v46 = vld [vmem:[#allocation22_spill] sm:$0xff] }
 0x7ce   :  { %v9413_v22 = vmax.f32 %v4182_v25, 0.0  ;;  %v3490_v16 = vadd.f32 %v10647_v38, %v3344_v50  ;;  %v3199_v25 = vadd.f32 %v10650_v61, %v3048_v59 }
 0x7cf   :  { %v3755_v10 = vpop.f32.mrf.mxu0  ;;  %v3343_v42 = vadd.f32 %v10640_v31, %v3197_v18 }
 0x7d0   :  { %4239 = vrot.lane.b32.xlu2 %v9413_v22, %s5904_s26  ;;  %v3345_v19 = vadd.f32 %v10652_v51, %v3199_v25 }
 0x7d1   :  { %v4041_v20 = vpop.f32.mrf.mxu2  ;;  %v3489_v17 = vadd.f32 %v10641_v49, %v3343_v42  ;;  %v10657_v42 = vld [vmem:[#allocation34_spill] sm:$0xff] }
 0x7d2   :  { %v4071_v14 = vadd.f32 %v4041_v20, %v3925_v54  ;;  %v3898_v3 = vpop.f32.mrf.mxu1  ;;  %v3612_v45 = vpop.f32.mrf.mxu3  ;;  %v3491_v0 = vadd.f32 %v10653_v5, %v3345_v19 }
 0x7d3   :  { %v3926_v21 = vadd.f32 %v3898_v3, %v3780_v7  ;;  %v3635_v26 = vadd.f32 %v3609_v37, %v3489_v17  ;;  %v3636_v1 = vadd.f32 %v3612_v45, %v3490_v16  ;;  %v10658_v17 = vld [vmem:[#allocation31_spill] sm:$0xff]  ;;  %v10664_v16 = vld [vmem:[#allocation50_spill] sm:$0xff] }
 0x7d4   :  { %v4183_v33 = vadd.f32 %v10639_v58, %v4071_v14  ;;  %v10655_v14 = vld [vmem:[#allocation41_spill] sm:$0xff]  ;;  %v10656_v58 = vld [vmem:[#allocation43_spill] sm:$0xff] }
 0x7d5   :  { %v3781_v32 = vadd.f32 %v3755_v10, %v3635_v26  ;;  %v3051_v3 = vadd.f32 %v10655_v14, %v10654_v46 }
 0x7d6   :  { %v9423_v23 = vmax.f32 %v4183_v33, 0.0 }
 0x7d7   :  { %v3758_v11 = vpop.f32.mrf.mxu0  ;;  %v3200_v33 = vadd.f32 %v10656_v58, %v3051_v3 }
 0x7d8   :  { %4241 = vrot.lane.b32.xlu1 %v9423_v23, %s5904_s26  ;;  %v3782_v55 = vadd.f32 %v3758_v11, %v3636_v1  ;;  %v10660_v11 = vld [vmem:[#allocation30_spill] sm:$0xff]  ;;  %v10665_v1 = vld [vmem:[#allocation32_spill] sm:$0xff] }
 0x7d9   :  { %v4044_v40 = vpop.f32.mrf.mxu2  ;;  %v3346_v45 = vadd.f32 %v10658_v17, %v3200_v33 }
 0x7da   :  { %v4072_v44 = vadd.f32 %v4044_v40, %v3926_v21  ;;  %v3901_v28 = vpop.f32.mrf.mxu1  ;;  %v3615_v57 = vpop.f32.mrf.mxu3 }
 0x7db   :  { %v3927_v63 = vadd.f32 %v3901_v28, %v3781_v32  ;;  %v3637_v62 = vadd.f32 %v3615_v57, %v3491_v0  ;;  %v3492_v26 = vadd.f32 %v10659_v30, %v3346_v45  ;;  %v10661_v28 = vld [vmem:[#allocation52_spill] sm:$0xff]  ;;  %v10667_v0 = vld [vmem:[#allocation37_spill] sm:$0xff] }
 0x7dc   :  { %v4184_v29 = vadd.f32 %v10645_v39, %v4072_v44  ;;  %v3054_v12 = vadd.f32 %v10661_v28, %v10660_v11 }
 0x7de   :  { %v9433_v41 = vmax.f32 %v4184_v29, 0.0  ;;  %v10662_v29 = vld [vmem:[#allocation47_spill] sm:$0xff] }
 0x7df   :  { %v3761_v37 = vpop.f32.mrf.mxu0  ;;  %v3201_v34 = vadd.f32 %v10662_v29, %v3054_v12  ;;  %v5815_v29 = vld [vmem:[%s10413_s11] ss:$0 sm:$0xff] }
 0x7e0   :  { %4243 = vrot.lane.b32.xlu0 %v9433_v41, %s5904_s26  ;;  %v3783_v31 = vadd.f32 %v3761_v37, %v3637_v62 }
 0x7e1   :  { %v4047_v4 = vpop.f32.mrf.mxu2 }
 0x7e2   :  { %v4073_v8 = vadd.f32 %v4047_v4, %v3927_v63  ;;  %v3904_v36 = vpop.f32.mrf.mxu1  ;;  %v3618_v49 = vpop.f32.mrf.mxu3  ;;  %v10663_v63 = vld [vmem:[#allocation26_spill] sm:$0xff]  ;;  %v3347_v4 = vadd.f32 %v10664_v16, %v3201_v34 }
 0x7e3   :  { %v3928_v10 = vadd.f32 %v3904_v36, %v3782_v55  ;;  %v3638_v9 = vadd.f32 %v3618_v49, %v3492_v26 }
 0x7e4   :  { %v4185_v54 = vadd.f32 %v10651_v27, %v4073_v8  ;;  %v3493_v8 = vadd.f32 %v10665_v1, %v3347_v4  ;;  %v4207_v1 = vld [vmem:[#allocation6 + $0x200] sm:$0xff] }
 0x7e6   :  { %v9443_v20 = vmax.f32 %v4185_v54, 0.0  ;;  %v10666_v54 = vld [vmem:[#allocation44_spill] sm:$0xff] }
 0x7e7   :  { %v3764_v52 = vpop.f32.mrf.mxu0 }
 0x7e8   :  { %4245 = vrot.lane.b32.xlu2 %v9443_v20, %s5904_s26  ;;  %v3784_v50 = vadd.f32 %v3764_v52, %v3638_v9 }
 0x7e9   :  { %v4050_v48 = vpop.f32.mrf.mxu2 }
 0x7ea   :  { %v4074_v18 = vadd.f32 %v4050_v48, %v3928_v10  ;;  %v3907_v7 = vpop.f32.mrf.mxu1  ;;  %v3621_v59 = vpop.f32.mrf.mxu3 }
 0x7eb   :  { %v3929_v15 = vadd.f32 %v3907_v7, %v3783_v31  ;;  %v3639_v61 = vadd.f32 %v3621_v59, %v3493_v8 }
 0x7ec   :  { %v4186_v21 = vadd.f32 %v10657_v42, %v4074_v18 }
 0x7ee   :  { %v9453_v40 = vmax.f32 %v4186_v21, 0.0 }
 0x7ef   :  { %v3767_v57 = vpop.f32.mrf.mxu0 }
 0x7f0   :  { %4587 = vrot.lane.b32.xlu0 %v9453_v40, %s5905_s0  ;;  %4247 = vrot.lane.b32.xlu1 %v9453_v40, %s5904_s26  ;;  %v3785_v27 = vadd.f32 %v3767_v57, %v3639_v61 }
 0x7f1   :  { %v4053_v44 = vpop.f32.mrf.mxu2 }
 0x7f2   :  { %v4075_v32 = vadd.f32 %v4053_v44, %v3929_v15  ;;  %v3910_v39 = vpop.f32.mrf.mxu1 }
 0x7f3   :  { %v3930_v53 = vadd.f32 %v3910_v39, %v3784_v50 }
 0x7f4   :  { %v4187_v38 = vadd.f32 %v10663_v63, %v4075_v32 }
 0x7f6   :  { %v9465_v13 = vmax.f32 %v4187_v38, 0.0 }
 0x7f8   :  { %4249 = vrot.lane.b32.xlu0 %v9465_v13, %s5904_s26 }
 0x7f9   :  { %v4056_v36 = vpop.f32.mrf.mxu2 }
 0x7fa   :  { %v4076_v25 = vadd.f32 %v4056_v36, %v3930_v53  ;;  %v3913_v55 = vpop.f32.mrf.mxu1  ;;  %v9540_v14 = vpop.permute.xlu2 %4227 }
 0x7fb   :  { %v3931_v19 = vadd.f32 %v3913_v55, %v3785_v27 }
 0x7fc   :  { %v4188_v37 = vadd.f32 %v10666_v54, %v4076_v25  ;;  %v4208_v54 = vld [vmem:[#allocation6 + $0x208] sm:$0xff] }
 0x7fe   :  { %v9471_v51 = vmax.f32 %v4188_v37, 0.0 }
 0x800   :  { %4251 = vrot.lane.b32.xlu2 %v9471_v51, %s5904_s26  ;;  %4589 = vrot.lane.b32.xlu0 %v9465_v13, %s5905_s0 }
 0x801   :  { %4737 = vrot.lane.b32.xlu1 %v9471_v51, %s5906_s21  ;;  %v4059_v10 = vpop.f32.mrf.mxu2 }
 0x802   :  { %v4077_v5 = vadd.f32 %v4059_v10, %v3931_v19  ;;  %v9562_v58 = vpop.permute.xlu1 %4223 }
 0x804   :  { %v4189_v48 = vadd.f32 %v10667_v0, %v4077_v5 }
 0x806   :  { %v9480_v46 = vmax.f32 %v4189_v48, 0.0 }
 0x808   :  { %4352 = vmatpush.msrb.mxu0 %v9480_v46  ;;  %4445 = vrot.lane.b32.xlu2 %v9471_v51, %s5901_s17 }
 0x809   :  { %4591 = vrot.lane.b32.xlu0 %v9471_v51, %s5905_s0  ;;  %4253 = vrot.lane.b32.xlu1 %v9480_v46, %s5904_s26 }
 0x80a   :  { %4353 = vmatpush.msrb.mxu0 %v9471_v51  ;;  %v9548_v3 = vpop.permute.xlu0 %4225 }
 0x80c   :  { %4354 = vmatpush.msrb.mxu0 %v9465_v13 }
 0x80e   :  { %4355 = vmatpush.msrb.mxu0 %v9453_v40 }
 0x810   :  { %4356 = vmatpush.msrb.mxu0 %v9443_v20  ;;  %4443 = vrot.lane.b32.xlu2 %v9465_v13, %s5901_s17 }
 0x811   :  { %4585 = vrot.lane.b32.xlu0 %v9443_v20, %s5905_s0  ;;  %4735 = vrot.lane.b32.xlu1 %v9465_v13, %s5906_s21 }
 0x812   :  { %4357 = vmatpush.msrb.mxu0 %v9433_v41  ;;  %v9550_v62 = vpop.permute.xlu2 %4233 }
 0x814   :  { %4358 = vmatpush.msrb.mxu0 %v9423_v23 }
 0x816   :  { %4359 = vmatpush.msrb.mxu0 %v9413_v22 }
 0x818   :  { %4360 = vmatpush.msrb.mxu0 %v9403_v35  ;;  %4441 = vrot.lane.b32.xlu2 %v9453_v40, %s5901_s17 }
 0x819   :  { %4583 = vrot.lane.b32.xlu0 %v9433_v41, %s5905_s0  ;;  %4733 = vrot.lane.b32.xlu1 %v9453_v40, %s5906_s21 }
 0x81a   :  { %4361 = vmatpush.msrb.mxu0 %v9393_v2  ;;  %v9572_v42 = vpop.permute.xlu1 %4229 }
 0x81b   :  { %v4274_v48 = vmul.f32 %v5815_v29, %v9572_v42  ;;  %v4255_v42 = vld [vmem:[#allocation6] sm:$0xff] }
 0x81c   :  { %4362 = vmatpush.msrb.mxu0 %v9383_v6 }
 0x81e   :  { %4363 = vmatpush.msrb.mxu0 %v9373_v56 }
 0x820   :  { %4364 = vmatpush.msrb.mxu0 %v9363_v43  ;;  %4439 = vrot.lane.b32.xlu2 %v9443_v20, %s5901_s17 }
 0x821   :  { %4581 = vrot.lane.b32.xlu0 %v9423_v23, %s5905_s0  ;;  %4731 = vrot.lane.b32.xlu1 %v9443_v20, %s5906_s21 }
 0x822   :  { %4365 = vmatpush.msrb.mxu0 %v9353_v47  ;;  %v9558_v18 = vpop.permute.xlu0 %4231 }
 0x823   :  { %v4275_v19 = vmul.f32 %v5815_v29, %v9558_v18  ;;  %v4271_v18 = vmul.f32 %v5815_v29, %v9562_v58  ;;  %v4256_v58 = vld [vmem:[#allocation6 + $0x8] sm:$0xff] }
 0x824   :  { %4366 = vmatpush.msrb.mxu0 %v9344_v60 }
 0x826   :  { %4367 = vmatpush.msrb.mxu0 %v9333_v24 }
 0x827   :  { %4368 = vmatmul.f32.vlgmr.msrb.gmra.mxu0 %v4207_v1  ;;  %v4259_v1 = vld [vmem:[#allocation6 + $0x20] sm:$0xff] }
 0x828   :  { %4437 = vrot.lane.b32.xlu2 %v9433_v41, %s5901_s17 }
 0x829   :  { %4579 = vrot.lane.b32.xlu0 %v9413_v22, %s5905_s0  ;;  %4729 = vrot.lane.b32.xlu1 %v9433_v41, %s5906_s21 }
 0x82a   :  { %v9560_v7 = vpop.permute.xlu2 %4239 }
 0x82b   :  { %v4279_v36 = vmul.f32 %v5815_v29, %v9560_v7  ;;  %v4273_v7 = vmul.f32 %v5815_v29, %v9540_v14 }
 0x82f   :  { %4371 = vmatmul.f32.gmra.mxu0 %v4208_v54 }
 0x830   :  { %4435 = vrot.lane.b32.xlu2 %v9423_v23, %s5901_s17 }
 0x831   :  { %4577 = vrot.lane.b32.xlu0 %v9403_v35, %s5905_s0  ;;  %4727 = vrot.lane.b32.xlu1 %v9423_v23, %s5906_s21 }
 0x832   :  { %v4236_v17 = vpop.permute.xlu1 %4235 }
 0x833   :  { %v4277_v37 = vmul.f32 %v5815_v29, %v4236_v17 }
 0x838   :  { %4433 = vrot.lane.b32.xlu2 %v9413_v22, %s5901_s17 }
 0x839   :  { %4575 = vrot.lane.b32.xlu0 %v9393_v2, %s5905_s0  ;;  %4725 = vrot.lane.b32.xlu1 %v9413_v22, %s5906_s21 }
 0x83a   :  { %v9570_v33 = vpop.permute.xlu0 %4237 }
 0x83b   :  { %v4278_v27 = vmul.f32 %v5815_v29, %v9570_v33  ;;  %v4272_v33 = vmul.f32 %v5815_v29, %v9548_v3  ;;  %v4210_v3 = vld [vmem:[#allocation6 + $0x218] sm:$0xff] }
 0x840   :  { %4431 = vrot.lane.b32.xlu2 %v9403_v35, %s5901_s17 }
 0x841   :  { %4573 = vrot.lane.b32.xlu0 %v9383_v6, %s5905_s0  ;;  %4723 = vrot.lane.b32.xlu1 %v9403_v35, %s5906_s21 }
 0x842   :  { %v4246_v31 = vpop.permute.xlu2 %4245 }
 0x843   :  { %v4282_v59 = vmul.f32 %v5815_v29, %v4246_v31 }
 0x848   :  { %4429 = vrot.lane.b32.xlu2 %v9393_v2, %s5901_s17 }
 0x849   :  { %4571 = vrot.lane.b32.xlu0 %v9373_v56, %s5905_s0  ;;  %4721 = vrot.lane.b32.xlu1 %v9393_v2, %s5906_s21 }
 0x84a   :  { %v4242_v52 = vpop.permute.xlu1 %4241 }
 0x84b   :  { %v4280_v57 = vmul.f32 %v5815_v29, %v4242_v52  ;;  %v4211_v52 = vld [vmem:[#allocation6 + $0x220] sm:$0xff] }
 0x850   :  { %4427 = vrot.lane.b32.xlu2 %v9383_v6, %s5901_s17 }
 0x851   :  { %4569 = vrot.lane.b32.xlu0 %v9363_v43, %s5905_s0  ;;  %4719 = vrot.lane.b32.xlu1 %v9383_v6, %s5906_s21 }
 0x852   :  { %v4244_v21 = vpop.permute.xlu0 %4243 }
 0x853   :  { %v4281_v8 = vmul.f32 %v5815_v29, %v4244_v21 }
 0x858   :  { %4425 = vrot.lane.b32.xlu2 %v9373_v56, %s5901_s17 }
 0x859   :  { %4567 = vrot.lane.b32.xlu0 %v9353_v47, %s5905_s0  ;;  %4717 = vrot.lane.b32.xlu1 %v9373_v56, %s5906_s21 }
 0x85a   :  { %v4252_v49 = vpop.permute.xlu2 %4251 }
 0x85b   :  { %v4285_v50 = vmul.f32 %v5815_v29, %v4252_v49 }
 0x860   :  { %4423 = vrot.lane.b32.xlu2 %v9363_v43, %s5901_s17 }
 0x861   :  { %4565 = vrot.lane.b32.xlu0 %v9344_v60, %s5905_s0  ;;  %4715 = vrot.lane.b32.xlu1 %v9363_v43, %s5906_s21 }
 0x862   :  { %v9586_v45 = vpop.permute.xlu2 %4445  ;;  %v9588_v15 = vpop.permute.xlu0 %4587 }
 0x863   :  { %v4248_v44 = vpop.permute.xlu1 %4247 }
 0x864   :  { %v4283_v38 = vmul.f32 %v5815_v29, %v4248_v44  ;;  %v4257_v44 = vld [vmem:[#allocation6 + $0x10] sm:$0xff] }
 0x868   :  { %4421 = vrot.lane.b32.xlu2 %v9353_v47, %s5901_s17 }
 0x869   :  { %4563 = vrot.lane.b32.xlu0 %v9333_v24, %s5905_s0  ;;  %4713 = vrot.lane.b32.xlu1 %v9353_v47, %s5906_s21 }
 0x86a   :  { %v9596_v30 = vpop.permute.xlu2 %4443  ;;  %v4250_v26 = vpop.permute.xlu0 %4249 }
 0x86b   :  { %v4284_v63 = vmul.f32 %v5815_v29, %v4250_v26 }
 0x870   :  { %4419 = vrot.lane.b32.xlu2 %v9344_v60, %s5901_s17 }
 0x871   :  { %4709 = vrot.lane.b32.xlu0 %v9333_v24, %s5906_s21  ;;  %4711 = vrot.lane.b32.xlu1 %v9344_v60, %s5906_s21 }
 0x872   :  { %v9604_v11 = vpop.permute.xlu2 %4441  ;;  %v9606_v28 = vpop.permute.xlu0 %4589 }
 0x873   :  { %v9608_v12 = vpop.permute.xlu1 %4737 }
 0x878   :  { %5173 = vrot.lane.b32.xlu2 %v9465_v13, %s5908_s22 }
 0x879   :  { %4883 = vrot.lane.b32.xlu0 %v9471_v51, %s5909_s5  ;;  %4417 = vrot.lane.b32.xlu1 %v9333_v24, %s5901_s17 }
 0x87a   :  { %v9616_v9 = vpop.permute.xlu2 %4439 }
 0x87b   :  { %v9618_v32 = vpop.permute.xlu0 %4591  ;;  %v4254_v39 = vpop.permute.xlu1 %4253 }
 0x87c   :  { %v4286_v34 = vmul.f32 %v5815_v29, %v4254_v39 }
 0x87e   :  { %4287 = vmatpush.msra.mxu3 %v4286_v34  ;;  %v4212_v34 = vld [vmem:[#allocation6 + $0x228] sm:$0xff] }
 0x880   :  { %4288 = vmatpush.msra.mxu3 %v4285_v50  ;;  %4593 = vrot.lane.b32.xlu2 %v9480_v46, %s5905_s0  ;;  %v4258_v50 = vld [vmem:[#allocation6 + $0x18] sm:$0xff] }
 0x881   :  { %5321 = vrot.lane.b32.xlu0 %v9471_v51, %s5910_s7  ;;  %5175 = vrot.lane.b32.xlu1 %v9471_v51, %s5908_s22 }
 0x882   :  { %4289 = vmatpush.msra.mxu3 %v4284_v63  ;;  %v9629_v16 = vpop.permute.xlu2 %4437 }
 0x883   :  { %v9631_v4 = vpop.permute.xlu0 %4585  ;;  %v9633_v53 = vpop.permute.xlu1 %4735 }
 0x884   :  { %4290 = vmatpush.msra.mxu3 %v4283_v38 }
 0x886   :  { %4291 = vmatpush.msra.mxu3 %v4282_v59  ;;  %v4213_v59 = vld [vmem:[#allocation6 + $0x230] sm:$0xff] }
 0x888   :  { %4292 = vmatpush.msra.mxu3 %v4281_v8  ;;  %5029 = vrot.lane.b32.xlu2 %v9471_v51, %s5907_s15  ;;  %v4276_v51 = vmul.f32 %v5815_v29, %v9550_v62  ;;  %v4209_v62 = vld [vmem:[#allocation6 + $0x210] sm:$0xff] }
 0x889   :  { %5171 = vrot.lane.b32.xlu0 %v9453_v40, %s5908_s22  ;;  %4739 = vrot.lane.b32.xlu1 %v9480_v46, %s5906_s21 }
 0x88a   :  { %4293 = vmatpush.msra.mxu3 %v4280_v57  ;;  %v9642_v61 = vpop.permute.xlu2 %4435  ;;  %4374 = vmatmul.f32.gmra.mxu0 %v4209_v62 }
 0x88b   :  { %v9644_v25 = vpop.permute.xlu0 %4583  ;;  %v9646_v55 = vpop.permute.xlu1 %4733 }
 0x88c   :  { %4294 = vmatpush.msra.mxu3 %v4279_v36  ;;  %v4214_v36 = vld [vmem:[#allocation6 + $0x238] sm:$0xff] }
 0x88e   :  { %4295 = vmatpush.msra.mxu3 %v4278_v27  ;;  %v4260_v27 = vld [vmem:[#allocation6 + $0x28] sm:$0xff] }
 0x890   :  { %4296 = vmatpush.msra.mxu3 %v4277_v37  ;;  %4447 = vrot.lane.b32.xlu2 %v9480_v46, %s5901_s17 }
 0x891   :  { %5027 = vrot.lane.b32.xlu0 %v9465_v13, %s5907_s15  ;;  %4881 = vrot.lane.b32.xlu1 %v9465_v13, %s5909_s5 }
 0x892   :  { %4297 = vmatpush.msra.mxu3 %v4276_v51  ;;  %v9657_v10 = vpop.permute.xlu2 %4433  ;;  %4377 = vmatmul.f32.gmra.mxu0 %v4210_v3  ;;  %v4215_v51 = vld [vmem:[#allocation6 + $0x240] sm:$0xff] }
 0x893   :  { %v9659_v5 = vpop.permute.xlu0 %4581  ;;  %v9661_v0 = vpop.permute.xlu1 %4731 }
 0x894   :  { %4298 = vmatpush.msra.mxu3 %v4275_v19 }
 0x896   :  { %4299 = vmatpush.msra.mxu3 %v4274_v48  ;;  %v4261_v48 = vld [vmem:[#allocation6 + $0x30] sm:$0xff] }
 0x898   :  { %4300 = vmatpush.msra.mxu3 %v4273_v7  ;;  %4879 = vrot.lane.b32.xlu2 %v9453_v40, %s5909_s5 }
 0x899   :  { %4877 = vrot.lane.b32.xlu0 %v9443_v20, %s5909_s5  ;;  %5319 = vrot.lane.b32.xlu1 %v9465_v13, %s5910_s7 }
 0x89a   :  { %4301 = vmatpush.msra.mxu3 %v4272_v33  ;;  %v9673_v31 = vpop.permute.xlu2 %4431  ;;  %4380 = vmatmul.f32.gmra.mxu0 %v4211_v52  ;;  %v4216_v33 = vld [vmem:[#allocation6 + $0x248] sm:$0xff]  ;;  %v4263_v52 = vld [vmem:[#allocation6 + $0x40] sm:$0xff] }
 0x89b   :  { %v9675_v14 = vpop.permute.xlu0 %4579  ;;  %v9677_v21 = vpop.permute.xlu1 %4729 }
 0x89c   :  { %4302 = vmatpush.msra.mxu3 %v4271_v18  ;;  %v4262_v18 = vld [vmem:[#allocation6 + $0x38] sm:$0xff] }
 0x89d   :  { %4303 = vmatmul.f32.vlgmr.msra.gmra.mxu3 %v4255_v42 }
 0x8a0   :  { %5317 = vrot.lane.b32.xlu2 %v9453_v40, %s5910_s7 }
 0x8a1   :  { %5315 = vrot.lane.b32.xlu0 %v9443_v20, %s5910_s7  ;;  %5169 = vrot.lane.b32.xlu1 %v9443_v20, %s5908_s22 }
 0x8a2   :  { %v9685_v13 = vpop.permute.xlu2 %4429  ;;  %4383 = vmatmul.f32.gmra.mxu0 %v4212_v34 }
 0x8a3   :  { %v9687_v49 = vpop.permute.xlu0 %4577  ;;  %v9689_v17 = vpop.permute.xlu1 %4727 }
 0x8a5   :  { %4306 = vmatmul.f32.gmra.mxu3 %v4256_v58  ;;  %v4217_v58 = vld [vmem:[#allocation6 + $0x250] sm:$0xff] }
 0x8a8   :  { %5167 = vrot.lane.b32.xlu2 %v9433_v41, %s5908_s22 }
 0x8a9   :  { %5165 = vrot.lane.b32.xlu0 %v9423_v23, %s5908_s22  ;;  %5025 = vrot.lane.b32.xlu1 %v9453_v40, %s5907_s15 }
 0x8aa   :  { %v9697_v26 = vpop.permute.xlu2 %4427  ;;  %4386 = vmatmul.f32.gmra.mxu0 %v4213_v59 }
 0x8ab   :  { %v9699_v39 = vpop.permute.xlu0 %4575  ;;  %v9701_v29 = vpop.permute.xlu1 %4725 }
 0x8ad   :  { %4309 = vmatmul.f32.gmra.mxu3 %v4257_v44  ;;  %v9772_v44 = vld [vmem:[%s10413_s11 + $0x2] ss:$0 sm:$0xff] }
 0x8b0   :  { %5023 = vrot.lane.b32.xlu2 %v9443_v20, %s5907_s15 }
 0x8b1   :  { %5021 = vrot.lane.b32.xlu0 %v9433_v41, %s5907_s15  ;;  %4875 = vrot.lane.b32.xlu1 %v9433_v41, %s5909_s5 }
 0x8b2   :  { %v9709_v40 = vpop.permute.xlu2 %4425  ;;  %4389 = vmatmul.f32.gmra.mxu0 %v4214_v36  ;;  %v4218_v36 = vld [vmem:[#allocation6 + $0x258] sm:$0xff] }
 0x8b3   :  { %v9711_v63 = vpop.permute.xlu0 %4573  ;;  %v9713_v38 = vpop.permute.xlu1 %4723 }
 0x8b5   :  { %4312 = vmatmul.f32.gmra.mxu3 %v4258_v50 }
 0x8b8   :  { %4873 = vrot.lane.b32.xlu2 %v9423_v23, %s5909_s5 }
 0x8b9   :  { %4871 = vrot.lane.b32.xlu0 %v9413_v22, %s5909_s5  ;;  %5313 = vrot.lane.b32.xlu1 %v9433_v41, %s5910_s7 }
 0x8ba   :  { %v9721_v20 = vpop.permute.xlu2 %4423  ;;  %4392 = vmatmul.f32.gmra.mxu0 %v4215_v51  ;;  %v4264_v51 = vld [vmem:[#allocation6 + $0x48] sm:$0xff] }
 0x8bb   :  { %v9723_v8 = vpop.permute.xlu0 %4571  ;;  %v9725_v57 = vpop.permute.xlu1 %4721 }
 0x8bd   :  { %4315 = vmatmul.f32.gmra.mxu3 %v4259_v1  ;;  %v4626_v1 = vmul.f32 %v9772_v44, %v9618_v32  ;;  %v4624_v32 = vmul.f32 %v9772_v44, %v9588_v15  ;;  %v4621_v15 = vmul.f32 %v9772_v44, %v9659_v5  ;;  %v9814_v5 = vld [vmem:[%s10413_s11 + $0x1] ss:$0 sm:$0xff] }
 0x8c0   :  { %5311 = vrot.lane.b32.xlu2 %v9423_v23, %s5910_s7 }
 0x8c1   :  { %5309 = vrot.lane.b32.xlu0 %v9413_v22, %s5910_s7  ;;  %5163 = vrot.lane.b32.xlu1 %v9413_v22, %s5908_s22 }
 0x8c2   :  { %v9733_v41 = vpop.permute.xlu2 %4421  ;;  %4395 = vmatmul.f32.gmra.mxu0 %v4216_v33 }
 0x8c3   :  { %v9735_v54 = vpop.permute.xlu0 %4569  ;;  %v9737_v37 = vpop.permute.xlu1 %4719 }
 0x8c5   :  { %4318 = vmatmul.f32.gmra.mxu3 %v4260_v27 }
 0x8c8   :  { %5161 = vrot.lane.b32.xlu2 %v9403_v35, %s5908_s22 }
 0x8c9   :  { %5159 = vrot.lane.b32.xlu0 %v9393_v2, %s5908_s22  ;;  %5019 = vrot.lane.b32.xlu1 %v9423_v23, %s5907_s15 }
 0x8ca   :  { %v9745_v19 = vpop.permute.xlu2 %4419  ;;  %4398 = vmatmul.f32.gmra.mxu0 %v4217_v58  ;;  %v4622_v58 = vmul.f32 %v9772_v44, %v9644_v25 }
 0x8cb   :  { %v9747_v62 = vpop.permute.xlu0 %4567  ;;  %v9749_v7 = vpop.permute.xlu1 %4717 }
 0x8cd   :  { %4321 = vmatmul.f32.gmra.mxu3 %v4261_v48 }
 0x8d0   :  { %5017 = vrot.lane.b32.xlu2 %v9413_v22, %s5907_s15 }
 0x8d1   :  { %5015 = vrot.lane.b32.xlu0 %v9403_v35, %s5907_s15  ;;  %4869 = vrot.lane.b32.xlu1 %v9403_v35, %s5909_s5 }
 0x8d2   :  { %v9757_v23 = vpop.permute.xlu2 %5173  ;;  %4401 = vmatmul.f32.gmra.mxu0 %v4218_v36  ;;  %v4220_v36 = vld [vmem:[#allocation6 + $0x268] sm:$0xff] }
 0x8d3   :  { %v9759_v42 = vpop.permute.xlu0 %4565  ;;  %v9761_v3 = vpop.permute.xlu1 %4715 }
 0x8d5   :  { %4324 = vmatmul.f32.gmra.mxu3 %v4262_v18  ;;  %v4219_v18 = vld [vmem:[#allocation6 + $0x260] sm:$0xff] }
 0x8d8   :  { %4867 = vrot.lane.b32.xlu2 %v9393_v2, %s5909_s5 }
 0x8d9   :  { %4865 = vrot.lane.b32.xlu0 %v9383_v6, %s5909_s5  ;;  %5307 = vrot.lane.b32.xlu1 %v9403_v35, %s5910_s7  ;;  %v4625_v35 = vmul.f32 %v9772_v44, %v9606_v28  ;;  %v4623_v28 = vmul.f32 %v9772_v44, %v9631_v4  ;;  %v4620_v4 = vmul.f32 %v9772_v44, %v9675_v14 }
 0x8da   :  { %v4594_v22 = vpop.permute.xlu2 %4593  ;;  %4404 = vmatmul.f32.gmra.mxu0 %v4219_v18  ;;  %v4480_v14 = vmul.f32 %v9814_v5, %v9586_v45  ;;  %v4478_v45 = vmul.f32 %v9814_v5, %v9604_v11  ;;  %v4615_v18 = vmul.f32 %v9772_v44, %v9735_v54  ;;  %v4221_v11 = vld [vmem:[#allocation6 + $0x270] sm:$0xff] }
 0x8db   :  { %v4627_v34 = vmul.f32 %v9772_v44, %v4594_v22  ;;  %v9775_v50 = vpop.permute.xlu0 %4563  ;;  %v9777_v59 = vpop.permute.xlu1 %4713  ;;  %v4265_v22 = vld [vmem:[#allocation6 + $0x50] sm:$0xff] }
 0x8dd   :  { %4327 = vmatmul.f32.gmra.mxu3 %v4263_v52  ;;  %4628 = vmatpush.msrb.mxu2 %v4627_v34 }
 0x8df   :  { %4629 = vmatpush.msrb.mxu2 %v4626_v1 }
 0x8e0   :  { %5305 = vrot.lane.b32.xlu2 %v9393_v2, %s5910_s7 }
 0x8e1   :  { %5303 = vrot.lane.b32.xlu0 %v9383_v6, %s5910_s7  ;;  %5157 = vrot.lane.b32.xlu1 %v9383_v6, %s5908_s22 }
 0x8e2   :  { %4630 = vmatpush.msrb.mxu2 %v4625_v35  ;;  %v9791_v27 = vpop.permute.xlu2 %5029  ;;  %v4618_v35 = vmul.f32 %v9772_v44, %v9699_v39  ;;  %4407 = vmatmul.f32.gmra.mxu0 %v4220_v36  ;;  %v4266_v39 = vld [vmem:[#allocation6 + $0x58] sm:$0xff] }
 0x8e3   :  { %v9793_v48 = vpop.permute.xlu0 %4709  ;;  %v9795_v33 = vpop.permute.xlu1 %4711 }
 0x8e4   :  { %4631 = vmatpush.msrb.mxu2 %v4624_v32  ;;  %v4479_v32 = vmul.f32 %v9814_v5, %v9596_v30 }
 0x8e5   :  { %4330 = vmatmul.f32.gmra.mxu3 %v4264_v51  ;;  %v4617_v51 = vmul.f32 %v9772_v44, %v9711_v63 }
 0x8e6   :  { %4632 = vmatpush.msrb.mxu2 %v4623_v28  ;;  %v4477_v28 = vmul.f32 %v9814_v5, %v9616_v9  ;;  %v4613_v9 = vmul.f32 %v9772_v44, %v9759_v42 }
 0x8e8   :  { %4633 = vmatpush.msrb.mxu2 %v4622_v58  ;;  %5155 = vrot.lane.b32.xlu2 %v9373_v56, %s5908_s22  ;;  %v4614_v58 = vmul.f32 %v9772_v44, %v9747_v62  ;;  %v4612_v62 = vmul.f32 %v9772_v44, %v9775_v50  ;;  %v4472_v50 = vmul.f32 %v9814_v5, %v9685_v13 }
 0x8e9   :  { %5153 = vrot.lane.b32.xlu0 %v9363_v43, %s5908_s22  ;;  %5013 = vrot.lane.b32.xlu1 %v9393_v2, %s5907_s15  ;;  %v4619_v2 = vmul.f32 %v9772_v44, %v9687_v49  ;;  %v4616_v49 = vmul.f32 %v9772_v44, %v9723_v8  ;;  %v4476_v8 = vmul.f32 %v9814_v5, %v9629_v16 }
 0x8ea   :  { %4634 = vmatpush.msrb.mxu2 %v4621_v15  ;;  %v4448_v25 = vpop.permute.xlu2 %4447  ;;  %4410 = vmatmul.f32.gmra.mxu0 %v4221_v11  ;;  %v4475_v15 = vmul.f32 %v9814_v5, %v9642_v61  ;;  %v4474_v16 = vmul.f32 %v9814_v5, %v9657_v10  ;;  %v4267_v61 = vld [vmem:[#allocation6 + $0x60] sm:$0xff] }
 0x8eb   :  { %v4481_v52 = vmul.f32 %v9814_v5, %v4448_v25  ;;  %v9817_v34 = vpop.permute.xlu0 %4883  ;;  %v9819_v1 = vpop.permute.xlu1 %4417  ;;  %v4473_v25 = vmul.f32 %v9814_v5, %v9673_v31  ;;  %v9878_v10 = vld [vmem:[%s10413_s11 + $0x3] ss:$0 sm:$0xff]  ;;  %v4471_v31 = vmul.f32 %v9814_v5, %v9697_v26 }
 0x8ec   :  { %4635 = vmatpush.msrb.mxu2 %v4620_v4  ;;  %v4772_v44 = vmul.f32 %v9878_v10, %v9608_v12  ;;  %v4470_v12 = vmul.f32 %v9814_v5, %v9709_v40  ;;  %v9899_v26 = vpop.f32.mrf.mxu0  ;;  %v4469_v40 = vmul.f32 %v9814_v5, %v9721_v20  ;;  %v4767_v20 = vmul.f32 %v9878_v10, %v9689_v17 }
 0x8ed   :  { %4333 = vmatmul.f32.gmra.mxu3 %v4265_v22  ;;  %4482 = vmatpush.msrb.mxu1 %v4481_v52  ;;  %v4596_v22 = vld [vmem:[#allocation6 + $0x100] sm:$0xff]  ;;  %v4222_v52 = vld [vmem:[#allocation6 + $0x278] sm:$0xff]  ;;  %v4466_v17 = vmul.f32 %v9814_v5, %v9819_v1 }
 0x8ee   :  { %4636 = vmatpush.msrb.mxu2 %v4619_v2  ;;  %v4771_v2 = vmul.f32 %v9878_v10, %v9633_v53  ;;  %v4770_v53 = vmul.f32 %v9878_v10, %v9646_v55  ;;  %v4768_v55 = vmul.f32 %v9878_v10, %v9677_v21  ;;  %v4766_v21 = vmul.f32 %v9878_v10, %v9701_v29 }
 0x8ef   :  { %4483 = vmatpush.msrb.mxu1 %v4480_v14  ;;  %v4764_v29 = vmul.f32 %v9878_v10, %v9725_v57  ;;  %v4762_v57 = vmul.f32 %v9878_v10, %v9749_v7  ;;  %v4759_v7 = vmul.f32 %v9878_v10, %v9795_v33  ;;  %v4452_v33 = vld [vmem:[#allocation6 + $0x90] sm:$0xff] }
 0x8f0   :  { %4637 = vmatpush.msrb.mxu2 %v4618_v35  ;;  %5011 = vrot.lane.b32.xlu2 %v9383_v6, %s5907_s15  ;;  %v4268_v35 = vld [vmem:[#allocation6 + $0x68] sm:$0xff] }
 0x8f1   :  { %5009 = vrot.lane.b32.xlu0 %v9373_v56, %s5907_s15  ;;  %4863 = vrot.lane.b32.xlu1 %v9373_v56, %s5909_s5 }
 0x8f2   :  { %4484 = vmatpush.msrb.mxu1 %v4479_v32  ;;  %4638 = vmatpush.msrb.mxu2 %v4617_v51  ;;  %v9841_v30 = vpop.permute.xlu2 %4879  ;;  %v4597_v32 = vld [vmem:[#allocation6 + $0x108] sm:$0xff]  ;;  %v4769_v51 = vmul.f32 %v9878_v10, %v9661_v0 }
 0x8f3   :  { %v9843_v63 = vpop.permute.xlu0 %5321  ;;  %v9845_v6 = vpop.permute.xlu1 %5175  ;;  %4413 = vmatmul.f32.gmra.mxu0 %v4222_v52 }
 0x8f4   :  { %4485 = vmatpush.msrb.mxu1 %v4478_v45  ;;  %4639 = vmatpush.msrb.mxu2 %v4616_v49  ;;  %v4468_v45 = vmul.f32 %v9814_v5, %v9733_v41  ;;  %v4467_v49 = vmul.f32 %v9814_v5, %v9745_v19  ;;  %v9935_v11 = vpop.f32.mrf.mxu0  ;;  %v4763_v5 = vmul.f32 %v9878_v10, %v9737_v37  ;;  %v4270_v37 = vld [vmem:[#allocation6 + $0x78] sm:$0xff] }
 0x8f5   :  { %4336 = vmatmul.f32.gmra.mxu3 %v4266_v39  ;;  %v4269_v39 = vld [vmem:[#allocation6 + $0x70] sm:$0xff] }
 0x8f6   :  { %4486 = vmatpush.msrb.mxu1 %v4477_v28  ;;  %4640 = vmatpush.msrb.mxu2 %v4615_v18  ;;  %v4450_v28 = vld [vmem:[#allocation6 + $0x80] sm:$0xff]  ;;  %v4598_v18 = vld [vmem:[#allocation6 + $0x110] sm:$0xff] }
 0x8f8   :  { %4487 = vmatpush.msrb.mxu1 %v4476_v8  ;;  %4641 = vmatpush.msrb.mxu2 %v4614_v58  ;;  %v4765_v8 = vmul.f32 %v9878_v10, %v9713_v38 }
 0x8f9   :  { %4861 = vrot.lane.b32.xlu2 %v9363_v43, %s5909_s5  ;;  %4885 = vrot.lane.b32.xlu0 %v9480_v46, %s5909_s5 }
 0x8fa   :  { %5301 = vrot.lane.b32.xlu1 %v9373_v56, %s5910_s7  ;;  %4488 = vmatpush.msrb.mxu1 %v4475_v15  ;;  %v9867_v54 = vpop.permute.xlu2 %5317  ;;  %v4451_v15 = vld [vmem:[#allocation6 + $0x88] sm:$0xff] }
 0x8fb   :  { %4642 = vmatpush.msrb.mxu2 %v4613_v9  ;;  %v9871_v42 = vpop.permute.xlu0 %5171  ;;  %v4740_v4 = vpop.permute.xlu1 %4739  ;;  %v4599_v9 = vld [vmem:[#allocation6 + $0x118] sm:$0xff] }
 0x8fc   :  { %v4773_v56 = vmul.f32 %v9878_v10, %v4740_v4  ;;  %4489 = vmatpush.msrb.mxu1 %v4474_v16  ;;  %v4760_v16 = vmul.f32 %v9878_v10, %v9777_v59  ;;  %v4758_v59 = vmul.f32 %v9878_v10, %v9793_v48  ;;  %v4742_v4 = vld [vmem:[#allocation6 + $0x180] sm:$0xff] }
 0x8fd   :  { %4643 = vmatpush.msrb.mxu2 %v4612_v62  ;;  %4339 = vmatmul.f32.gmra.mxu3 %v4267_v61 }
 0x8fe   :  { %4490 = vmatpush.msrb.mxu1 %v4473_v25  ;;  %4774 = vmatpush.msrb.mxu3 %v4773_v56  ;;  %v4600_v25 = vld [vmem:[#allocation6 + $0x120] sm:$0xff]  ;;  %v5454_v56 = vld [vmem:[%s10410_s8 + $0x78] sm:$0xff] }
 0x8ff   :  { %4644 = vmatmul.f32.vlgmr.msrb.gmra.mxu2 %v4596_v22 }
 0x900   :  { %4491 = vmatpush.msrb.mxu1 %v4472_v50  ;;  %4775 = vmatpush.msrb.mxu3 %v4772_v44  ;;  %v4453_v50 = vld [vmem:[#allocation6 + $0x98] sm:$0xff] }
 0x901   :  { %5299 = vrot.lane.b32.xlu2 %v9363_v43, %s5910_s7  ;;  %4859 = vrot.lane.b32.xlu0 %v9353_v47, %s5909_s5 }
 0x902   :  { %5151 = vrot.lane.b32.xlu1 %v9353_v47, %s5908_s22  ;;  %4492 = vmatpush.msrb.mxu1 %v4471_v31  ;;  %v9897_v13 = vpop.permute.xlu2 %5167  ;;  %v4743_v31 = vld [vmem:[#allocation6 + $0x188] sm:$0xff] }
 0x903   :  { %4776 = vmatpush.msrb.mxu3 %v4771_v2  ;;  %v9903_v14 = vpop.permute.xlu0 %5027  ;;  %v9905_v36 = vpop.permute.xlu1 %4881  ;;  %v4601_v2 = vld [vmem:[#allocation6 + $0x128] sm:$0xff] }
 0x904   :  { %4493 = vmatpush.msrb.mxu1 %v4470_v12  ;;  %v5451_v12 = vld [vmem:[%s10410_s8 + $0x60] sm:$0xff] }
 0x905   :  { %4777 = vmatpush.msrb.mxu3 %v4770_v53 }
 0x906   :  { %4342 = vmatmul.f32.gmra.mxu3 %v4268_v35  ;;  %4494 = vmatpush.msrb.mxu1 %v4469_v40 }
 0x907   :  { %4778 = vmatpush.msrb.mxu3 %v4769_v51  ;;  %4647 = vmatmul.f32.gmra.mxu2 %v4597_v32  ;;  %v4454_v32 = vld [vmem:[#allocation6 + $0xa0] sm:$0xff]  ;;  %v4744_v51 = vld [vmem:[#allocation6 + $0x190] sm:$0xff] }
 0x908   :  { %4495 = vmatpush.msrb.mxu1 %v4468_v45  ;;  %v4602_v45 = vld [vmem:[#allocation6 + $0x130] sm:$0xff] }
 0x909   :  { %4779 = vmatpush.msrb.mxu3 %v4768_v55  ;;  %5177 = vrot.lane.b32.xlu2 %v9480_v46, %s5908_s22  ;;  %v5448_v55 = vld [vmem:[%s10410_s8 + $0x48] sm:$0xff] }
 0x90a   :  { %5297 = vrot.lane.b32.xlu0 %v9353_v47, %s5910_s7  ;;  %5031 = vrot.lane.b32.xlu1 %v9480_v46, %s5907_s15  ;;  %v9925_v0 = vpop.permute.xlu2 %5023 }
 0x90b   :  { %4496 = vmatpush.msrb.mxu1 %v4467_v49  ;;  %4780 = vmatpush.msrb.mxu3 %v4767_v20  ;;  %v9931_v41 = vpop.permute.xlu0 %4877  ;;  %v9933_v19 = vpop.permute.xlu1 %5319  ;;  %v5453_v20 = vld [vmem:[%s10410_s8 + $0x70] sm:$0xff] }
 0x90d   :  { %4497 = vmatpush.msrb.mxu1 %v4466_v17  ;;  %4781 = vmatpush.msrb.mxu3 %v4766_v21 }
 0x90e   :  { %4345 = vmatmul.f32.gmra.mxu3 %v4269_v39  ;;  %4498 = vmatmul.f32.vlgmr.msrb.gmra.mxu1 %v4450_v28  ;;  %v4455_v28 = vld [vmem:[#allocation6 + $0xa8] sm:$0xff] }
 0x90f   :  { %4782 = vmatpush.msrb.mxu3 %v4765_v8  ;;  %4650 = vmatmul.f32.gmra.mxu2 %v4598_v18  ;;  %v4745_v18 = vld [vmem:[#allocation6 + $0x198] sm:$0xff] }
 0x910   :  { %v4603_v8 = vld [vmem:[#allocation6 + $0x138] sm:$0xff] }
 0x911   :  { %4783 = vmatpush.msrb.mxu3 %v4764_v29  ;;  %5323 = vrot.lane.b32.xlu2 %v9480_v46, %s5910_s7  ;;  %v4761_v46 = vmul.f32 %v9878_v10, %v9761_v3 }
 0x912   :  { %5147 = vrot.lane.b32.xlu0 %v9333_v24, %s5908_s22  ;;  %5007 = vrot.lane.b32.xlu1 %v9363_v43, %s5907_s15  ;;  %v9949_v38 = vpop.permute.xlu2 %4873  ;;  %v9959_v43 = vpop.f32.mrf.mxu0 }
 0x913   :  { %4784 = vmatpush.msrb.mxu3 %v4763_v5  ;;  %v9953_v1 = vpop.permute.xlu0 %5315  ;;  %v9955_v58 = vpop.permute.xlu1 %5169  ;;  %10668 = vst [vmem:[#allocation42_spill] sm:$0xff] %v9959_v43  ;;  %v5452_v5 = vld [vmem:[%s10410_s8 + $0x68] sm:$0xff] }
 0x915   :  { %4785 = vmatpush.msrb.mxu3 %v4762_v57  ;;  %v5450_v57 = vld [vmem:[%s10410_s8 + $0x58] sm:$0xff] }
 0x916   :  { %4348 = vmatmul.f32.gmra.mxu3 %v4270_v37  ;;  %4501 = vmatmul.f32.gmra.mxu1 %v4451_v15 }
 0x917   :  { %4786 = vmatpush.msrb.mxu3 %v4761_v46  ;;  %4653 = vmatmul.f32.gmra.mxu2 %v4599_v9 }
 0x919   :  { %4787 = vmatpush.msrb.mxu3 %v4760_v16  ;;  %5149 = vrot.lane.b32.xlu2 %v9344_v60, %s5908_s22  ;;  %v4456_v16 = vld [vmem:[#allocation6 + $0xb0] sm:$0xff] }
 0x91a   :  { %5003 = vrot.lane.b32.xlu0 %v9344_v60, %s5907_s15  ;;  %4857 = vrot.lane.b32.xlu1 %v9344_v60, %s5909_s5  ;;  %v9971_v3 = vpop.permute.xlu2 %5311  ;;  %v9984_v52 = vpop.f32.mrf.mxu0 }
 0x91b   :  { %4788 = vmatpush.msrb.mxu3 %v4759_v7  ;;  %v9975_v61 = vpop.permute.xlu0 %5165  ;;  %v9977_v62 = vpop.permute.xlu1 %5025  ;;  %10669 = vst [vmem:[#allocation14_spill] sm:$0xff] %v9984_v52  ;;  %v4746_v7 = vld [vmem:[#allocation6 + $0x1a0] sm:$0xff]  ;;  %v4609_v52 = vld [vmem:[#allocation6 + $0x168] sm:$0xff] }
 0x91d   :  { %4789 = vmatpush.msrb.mxu3 %v4758_v59  ;;  %v4604_v59 = vld [vmem:[#allocation6 + $0x140] sm:$0xff] }
 0x91e   :  { %4504 = vmatmul.f32.gmra.mxu1 %v4452_v33  ;;  %4790 = vmatmul.f32.vlgmr.msrb.gmra.mxu3 %v4742_v4  ;;  %v5449_v33 = vld [vmem:[%s10410_s8 + $0x50] sm:$0xff] }
 0x91f   :  { %4656 = vmatmul.f32.gmra.mxu2 %v4600_v25  ;;  %v5442_v25 = vld [vmem:[%s10410_s8 + $0x18] sm:$0xff] }
 0x920   :  { %v9982_v22 = vpop.f32.mrf.mxu3 }
 0x921   :  { %5005 = vrot.lane.b32.xlu2 %v9353_v47, %s5907_s15 }
 0x922   :  { %5532 = vperm.xlu0 %5785, %v5454_v56   ;;  %5295 = vrot.lane.b32.xlu1 %v9344_v60, %s5910_s7  ;;  %v9990_v48 = vpop.permute.xlu2 %5161  ;;  %v10007_v53 = vpop.f32.mrf.mxu0  ;;  %v5447_v56 = vld [vmem:[%s10410_s8 + $0x40] sm:$0xff] }
 0x923   :  { %v9992_v10 = vpop.permute.xlu0 %5021  ;;  %v9994_v44 = vpop.permute.xlu1 %4875  ;;  %10670 = vst [vmem:[#allocation51_spill] sm:$0xff] %v10007_v53 }
 0x926   :  { %4507 = vmatmul.f32.gmra.mxu1 %v4453_v50  ;;  %4793 = vmatmul.f32.gmra.mxu3 %v4743_v31 }
 0x927   :  { %4659 = vmatmul.f32.gmra.mxu2 %v4601_v2 }
 0x928   :  { %v9999_v47 = vpop.f32.mrf.mxu3 }
 0x929   :  { %4855 = vrot.lane.b32.xlu2 %v9333_v24, %s5909_s5 }
 0x92a   :  { %5517 = vperm.xlu0 %5785, %v5451_v12   ;;  %5293 = vrot.lane.b32.xlu1 %v9333_v24, %s5910_s7  ;;  %v10005_v60 = vpop.permute.xlu2 %5017  ;;  %v10029_v29 = vpop.f32.mrf.mxu0 }
 0x92b   :  { %v10009_v35 = vpop.permute.xlu0 %4871  ;;  %v10011_v40 = vpop.permute.xlu1 %5313  ;;  %10672 = vst [vmem:[#allocation28_spill] sm:$0xff] %v10029_v29 }
 0x92e   :  { %4510 = vmatmul.f32.gmra.mxu1 %v4454_v32  ;;  %4796 = vmatmul.f32.gmra.mxu3 %v4744_v51  ;;  %v4457_v32 = vld [vmem:[#allocation6 + $0xb8] sm:$0xff]  ;;  %v4747_v51 = vld [vmem:[#allocation6 + $0x1a8] sm:$0xff] }
 0x92f   :  { %4662 = vmatmul.f32.gmra.mxu2 %v4602_v45  ;;  %v4605_v45 = vld [vmem:[#allocation6 + $0x148] sm:$0xff] }
 0x930   :  { %v10019_v49 = vpop.f32.mrf.mxu3 }
 0x931   :  { %10671 = vst [vmem:[#allocation54_spill] sm:$0xff] %v10019_v49  ;;  %5001 = vrot.lane.b32.xlu2 %v9333_v24, %s5907_s15  ;;  %v5445_v24 = vld [vmem:[%s10410_s8 + $0x30] sm:$0xff] }
 0x932   :  { %5502 = vperm.xlu0 %5785, %v5448_v55   ;;  %5527 = vperm.xlu1 %5786, %v5453_v20   ;;  %v10023_v21 = vpop.permute.xlu2 %4867  ;;  %v10051_v4 = vpop.f32.mrf.mxu0  ;;  %v5446_v55 = vld [vmem:[%s10410_s8 + $0x38] sm:$0xff]  ;;  %v5439_v20 = vld [vmem:[%s10410_s8] sm:$0xff]  ;;  %v4752_v49 = vld [vmem:[#allocation6 + $0x1d0] sm:$0xff] }
 0x933   :  { %v10025_v17 = vpop.permute.xlu0 %5309  ;;  %v10027_v39 = vpop.permute.xlu1 %5163  ;;  %10674 = vst [vmem:[#allocation10_spill] sm:$0xff] %v10051_v4  ;;  %v4608_v4 = vld [vmem:[#allocation6 + $0x160] sm:$0xff] }
 0x936   :  { %4513 = vmatmul.f32.gmra.mxu1 %v4455_v28  ;;  %4799 = vmatmul.f32.gmra.mxu3 %v4745_v18  ;;  %v5444_v28 = vld [vmem:[%s10410_s8 + $0x28] sm:$0xff] }
 0x937   :  { %4665 = vmatmul.f32.gmra.mxu2 %v4603_v8 }
 0x938   :  { %v10040_v37 = vpop.f32.mrf.mxu3 }
 0x939   :  { %10673 = vst [vmem:[#allocation13_spill] sm:$0xff] %v10040_v37  ;;  %5522 = vperm.xlu2 %5784, %v5452_v5  }
 0x93a   :  { %5487 = vperm.xlu0 %5785, %v5445_v24   ;;  %5512 = vperm.xlu1 %5786, %v5450_v57   ;;  %v10042_v15 = vpop.permute.xlu2 %5305  ;;  %v10078_v8 = vpop.f32.mrf.mxu0 }
 0x93b   :  { %v10044_v9 = vpop.permute.xlu0 %5159  ;;  %v10046_v46 = vpop.permute.xlu1 %5019  ;;  %10677 = vst [vmem:[#allocation46_spill] sm:$0xff] %v10078_v8 }
 0x93e   :  { %4516 = vmatmul.f32.gmra.mxu1 %v4456_v16  ;;  %4802 = vmatmul.f32.gmra.mxu3 %v4746_v7  ;;  %v4458_v16 = vld [vmem:[#allocation6 + $0xc0] sm:$0xff]  ;;  %v4748_v7 = vld [vmem:[#allocation6 + $0x1b0] sm:$0xff] }
 0x93f   :  { %4668 = vmatmul.f32.gmra.mxu2 %v4604_v59  ;;  %v4606_v59 = vld [vmem:[#allocation6 + $0x150] sm:$0xff] }
 0x940   :  { %v10059_v50 = vpop.f32.mrf.mxu3 }
 0x941   :  { %10675 = vst [vmem:[#allocation11_spill] sm:$0xff] %v10059_v50  ;;  %5507 = vperm.xlu2 %5784, %v5449_v33   ;;  %v5443_v33 = vld [vmem:[%s10410_s8 + $0x20] sm:$0xff] }
 0x942   :  { %5472 = vperm.xlu0 %5785, %v5442_v25   ;;  %5497 = vperm.xlu1 %5786, %v5447_v56   ;;  %v10061_v31 = vpop.permute.xlu2 %5155  ;;  %v5441_v25 = vld [vmem:[%s10410_s8 + $0x10] sm:$0xff] }
 0x943   :  { %v10063_v2 = vpop.permute.xlu0 %5015  ;;  %v10065_v12 = vpop.permute.xlu1 %4869 }
 0x946   :  { %4519 = vmatmul.f32.gmra.mxu1 %v4457_v32  ;;  %4805 = vmatmul.f32.gmra.mxu3 %v4747_v51  ;;  %v10094_v32 = vpop.f32.mrf.mxu0 }
 0x947   :  { %4671 = vmatmul.f32.gmra.mxu2 %v4605_v45  ;;  %10679 = vst [vmem:[#allocation20_spill] sm:$0xff] %v10094_v32  ;;  %v4460_v32 = vld [vmem:[#allocation6 + $0xd0] sm:$0xff] }
 0x948   :  { %v10076_v18 = vpop.f32.mrf.mxu3 }
 0x949   :  { %10676 = vst [vmem:[#allocation25_spill] sm:$0xff] %v10076_v18  ;;  %5492 = vperm.xlu2 %5784, %v5446_v55   ;;  %v4459_v55 = vld [vmem:[#allocation6 + $0xc8] sm:$0xff] }
 0x94a   :  { %5457 = vperm.xlu0 %5785, %v5439_v20   ;;  %5482 = vperm.xlu1 %5786, %v5444_v28   ;;  %v10080_v5 = vpop.permute.xlu2 %5011  ;;  %v4749_v20 = vld [vmem:[#allocation6 + $0x1b8] sm:$0xff] }
 0x94b   :  { %v10082_v24 = vpop.permute.xlu0 %4865  ;;  %v10084_v57 = vpop.permute.xlu1 %5307 }
 0x94e   :  { %4522 = vmatmul.f32.gmra.mxu1 %v4458_v16  ;;  %4808 = vmatmul.f32.gmra.mxu3 %v4748_v7  ;;  %v4607_v16 = vld [vmem:[#allocation6 + $0x158] sm:$0xff]  ;;  %v5440_v7 = vld [vmem:[%s10410_s8 + $0x8] sm:$0xff] }
 0x94f   :  { %4674 = vmatmul.f32.gmra.mxu2 %v4606_v59  ;;  %v5568_v59 = vld [vmem:[%s10412_s10] sm:$0xff] }
 0x950   :  { %v10092_v56 = vpop.f32.mrf.mxu3 }
 0x951   :  { %10678 = vst [vmem:[#allocation19_spill] sm:$0xff] %v10092_v56  ;;  %5477 = vperm.xlu2 %5784, %v5443_v33   ;;  %v4396_v56 = vpop.f32.mrf.mxu0 }
 0x952   :  { %5467 = vperm.xlu1 %5786, %v5441_v25  }
 0x953   :  { %v10096_v51 = vpop.permute.xlu2 %4861  ;;  %v10098_v45 = vpop.permute.xlu0 %5303 }
 0x954   :  { %v10100_v28 = vpop.permute.xlu1 %5157 }
 0x956   :  { %4525 = vmatmul.f32.gmra.mxu1 %v4459_v55  ;;  %4811 = vmatmul.f32.gmra.mxu3 %v4749_v20  ;;  %v4750_v55 = vld [vmem:[#allocation6 + $0x1c0] sm:$0xff] }
 0x957   :  { %4677 = vmatmul.f32.gmra.mxu2 %v4607_v16 }
 0x958   :  { %v10108_v33 = vpop.f32.mrf.mxu3 }
 0x959   :  { %10680 = vst [vmem:[#allocation39_spill] sm:$0xff] %v10108_v33  ;;  %5462 = vperm.xlu2 %5784, %v5440_v7   ;;  %v4461_v7 = vld [vmem:[#allocation6 + $0xd8] sm:$0xff]  ;;  %v10123_v33 = vld [vmem:[%s10413_s11 + $0x7] ss:$0 sm:$0xff] }
 0x95a   :  { %5571 = vperm.xlu1 %5786, %v5568_v59   ;;  %v4751_v59 = vld [vmem:[#allocation6 + $0x1c8] sm:$0xff] }
 0x95b   :  { %v10110_v25 = vpop.permute.xlu2 %5299  ;;  %v10112_v8 = vpop.permute.xlu0 %5153 }
 0x95c   :  { %v10114_v20 = vpop.permute.xlu1 %5013 }
 0x95e   :  { %4528 = vmatmul.f32.gmra.mxu1 %v4460_v32  ;;  %4814 = vmatmul.f32.gmra.mxu3 %v4750_v55  ;;  %v4399_v32 = vpop.f32.mrf.mxu0 }
 0x95f   :  { %4680 = vmatmul.f32.gmra.mxu2 %v4608_v4  ;;  %v5210_v4 = vmul.f32 %v10123_v33, %v9845_v6  ;;  %v10139_v6 = vld [vmem:[%s10413_s11 + $0x8] ss:$0 sm:$0xff] }
 0x960   :  { %v10116_v29 = vpop.f32.mrf.mxu3 }
 0x961   :  { %10681 = vst [vmem:[#allocation27_spill] sm:$0xff] %v10116_v29  ;;  %v5209_v29 = vmul.f32 %v10123_v33, %v9757_v23  ;;  %v10145_v23 = vld [vmem:[%s10413_s11 + $0x5] ss:$0 sm:$0xff] }
 0x963   :  { %v5178_v16 = vpop.permute.xlu2 %5177  ;;  %v10118_v18 = vpop.permute.xlu0 %5009 }
 0x964   :  { %v5211_v53 = vmul.f32 %v10123_v33, %v5178_v16  ;;  %v10126_v50 = vpop.permute.xlu1 %4863  ;;  %v5208_v16 = vmul.f32 %v10123_v33, %v9871_v42 }
 0x966   :  { %4531 = vmatmul.f32.gmra.mxu1 %v4461_v7  ;;  %4817 = vmatmul.f32.gmra.mxu3 %v4751_v59  ;;  %v4462_v59 = vld [vmem:[#allocation6 + $0xe0] sm:$0xff] }
 0x967   :  { %5212 = vmatpush.msra.mxu2 %v5211_v53 }
 0x968   :  { %v4331_v55 = vpop.f32.mrf.mxu3  ;;  %4683 = vmatmul.f32.gmra.mxu2 %v4609_v52 }
 0x969   :  { %5213 = vmatpush.msra.mxu2 %v5210_v4  ;;  %v10132_v37 = vadd.f32 %v4396_v56, %v4331_v55  ;;  %v4610_v56 = vld [vmem:[#allocation6 + $0x170] sm:$0xff]  ;;  %v4918_v4 = vmul.f32 %v10145_v23, %v9817_v34  ;;  %v5356_v55 = vmul.f32 %v10139_v6, %v9843_v63  ;;  %v4916_v63 = vmul.f32 %v10145_v23, %v9841_v30 }
 0x96a   :  { %v5353_v30 = vmul.f32 %v10139_v6, %v9953_v1 }
 0x96b   :  { %5214 = vmatpush.msra.mxu2 %v5209_v29  ;;  %v5324_v43 = vpop.permute.xlu2 %5323  ;;  %v4886_v7 = vpop.permute.xlu0 %4885  ;;  %v5207_v29 = vmul.f32 %v10123_v33, %v9955_v58  ;;  %v4917_v58 = vmul.f32 %v10145_v23, %v9905_v36 }
 0x96c   :  { %v5357_v52 = vmul.f32 %v10139_v6, %v5324_v43  ;;  %v4919_v53 = vmul.f32 %v10145_v23, %v4886_v7  ;;  %v10148_v42 = vpop.permute.xlu1 %5301  ;;  %v5206_v43 = vmul.f32 %v10123_v33, %v9897_v13  ;;  %v5355_v13 = vmul.f32 %v10139_v6, %v9933_v19 }
 0x96d   :  { %5215 = vmatpush.msra.mxu2 %v5208_v16  ;;  %v4402_v16 = vpop.f32.mrf.mxu0  ;;  %v4915_v19 = vmul.f32 %v10145_v23, %v9931_v41  ;;  %v5202_v41 = vmul.f32 %v10123_v33, %v10044_v9  ;;  %v4912_v9 = vmul.f32 %v10145_v23, %v10009_v35 }
 0x96e   :  { %4534 = vmatmul.f32.gmra.mxu1 %v4462_v59  ;;  %4820 = vmatmul.f32.gmra.mxu3 %v4752_v49  ;;  %v5205_v49 = vmul.f32 %v10123_v33, %v9975_v61  ;;  %v5204_v59 = vmul.f32 %v10123_v33, %v10027_v39  ;;  %v4463_v61 = vld [vmem:[#allocation6 + $0xe8] sm:$0xff]  ;;  %v5203_v39 = vmul.f32 %v10123_v33, %v9990_v48 }
 0x96f   :  { %4920 = vmatpush.msra.mxu0 %v4919_v53  ;;  %5216 = vmatpush.msra.mxu2 %v5207_v29  ;;  %v4753_v53 = vld [vmem:[#allocation6 + $0x1d8] sm:$0xff]  ;;  %v4913_v48 = vmul.f32 %v10145_v23, %v9949_v38  ;;  %v5350_v38 = vmul.f32 %v10139_v6, %v10025_v17  ;;  %v4911_v17 = vmul.f32 %v10145_v23, %v10065_v12 }
 0x970   :  { %5358 = vmatpush.msra.mxu3 %v5357_v52  ;;  %v4334_v7 = vpop.f32.mrf.mxu3  ;;  %4686 = vmatmul.f32.gmra.mxu2 %v4610_v56  ;;  %v4611_v29 = vld [vmem:[#allocation6 + $0x178] sm:$0xff]  ;;  %v5352_v56 = vmul.f32 %v10139_v6, %v10011_v40  ;;  %v5201_v40 = vmul.f32 %v10123_v33, %v10100_v28  ;;  %v10203_v28 = vld [vmem:[%s10413_s11 + $0x6] ss:$0 sm:$0xff]  ;;  %v5348_v12 = vmul.f32 %v10139_v6, %v10042_v15 }
 0x971   :  { %4921 = vmatpush.msra.mxu0 %v4918_v4  ;;  %5217 = vmatpush.msra.mxu2 %v5206_v43  ;;  %v10162_v34 = vadd.f32 %v4399_v32, %v4334_v7  ;;  %v5354_v32 = vmul.f32 %v10139_v6, %v9867_v54  ;;  %v4914_v54 = vmul.f32 %v10145_v23, %v9994_v44 }
 0x972   :  { %5359 = vmatpush.msra.mxu3 %v5356_v55  ;;  %v5351_v44 = vmul.f32 %v10139_v6, %v9971_v3  ;;  %v5200_v7 = vmul.f32 %v10123_v33, %v10061_v31  ;;  %v5349_v31 = vmul.f32 %v10139_v6, %v10084_v57  ;;  %v5347_v15 = vmul.f32 %v10139_v6, %v10098_v45 }
 0x973   :  { %4922 = vmatpush.msra.mxu0 %v4917_v58  ;;  %5218 = vmatpush.msra.mxu2 %v5205_v49  ;;  %v10170_v36 = vpop.permute.xlu0 %4859  ;;  %v5150_v4 = vpop.permute.xlu2 %5149  ;;  %v4464_v49 = vld [vmem:[#allocation6 + $0xf0] sm:$0xff] }
 0x974   :  { %5360 = vmatpush.msra.mxu3 %v5355_v13  ;;  %v5152_v52 = vpop.permute.xlu1 %5151  ;;  %v5199_v13 = vmul.f32 %v10123_v33, %v10112_v8  ;;  %v5063_v8 = vmul.f32 %v10203_v28, %v9903_v14  ;;  %v4908_v14 = vmul.f32 %v10145_v23, %v10126_v50  ;;  %v5061_v50 = vmul.f32 %v10203_v28, %v9925_v0 }
 0x975   :  { %4923 = vmatpush.msra.mxu0 %v4916_v63  ;;  %5219 = vmatpush.msra.mxu2 %v5204_v59  ;;  %v4405_v55 = vpop.f32.mrf.mxu0  ;;  %v5064_v63 = vmul.f32 %v10203_v28, %v9791_v27  ;;  %v4910_v59 = vmul.f32 %v10145_v23, %v10023_v21  ;;  %v4909_v27 = vmul.f32 %v10145_v23, %v10082_v24 }
 0x976   :  { %5361 = vmatpush.msra.mxu3 %v5354_v32  ;;  %4537 = vmatmul.f32.gmra.mxu1 %v4463_v61  ;;  %v5198_v32 = vmul.f32 %v10123_v33, %v5152_v52  ;;  %v5197_v52 = vmul.f32 %v10123_v33, %v5150_v4  ;;  %v5060_v4 = vmul.f32 %v10203_v28, %v9992_v10 }
 0x977   :  { %4823 = vmatmul.f32.gmra.mxu3 %v4753_v53  ;;  %4924 = vmatpush.msra.mxu0 %v4915_v19  ;;  %v5062_v19 = vmul.f32 %v10203_v28, %v9977_v62  ;;  %v4907_v62 = vmul.f32 %v10145_v23, %v10096_v51 }
 0x978   :  { %5220 = vmatpush.msra.mxu2 %v5203_v39  ;;  %5362 = vmatpush.msra.mxu3 %v5353_v30  ;;  %v4337_v1 = vpop.f32.mrf.mxu3  ;;  %v4465_v39 = vld [vmem:[#allocation6 + $0xf8] sm:$0xff] }
 0x979   :  { %4925 = vmatpush.msra.mxu0 %v4914_v54  ;;  %v10188_v43 = vadd.f32 %v4402_v16, %v4337_v1  ;;  %4689 = vmatmul.f32.gmra.mxu2 %v4611_v29  ;;  %v4754_v16 = vld [vmem:[#allocation6 + $0x1e0] sm:$0xff]  ;;  %v5346_v29 = vmul.f32 %v10139_v6, %v10148_v42  ;;  %v4755_v54 = vld [vmem:[#allocation6 + $0x1e8] sm:$0xff]  ;;  %v4906_v42 = vmul.f32 %v10145_v23, %v10170_v36 }
 0x97a   :  { %5221 = vmatpush.msra.mxu2 %v5202_v41  ;;  %5363 = vmatpush.msra.mxu3 %v5352_v56  ;;  %v5345_v41 = vmul.f32 %v10139_v6, %v10110_v25  ;;  %v5059_v25 = vmul.f32 %v10203_v28, %v10046_v46  ;;  %v4888_v46 = vld [vmem:[#allocation6 + $0x280] sm:$0xff] }
 0x97b   :  { %4926 = vmatpush.msra.mxu0 %v4913_v48  ;;  %v10225_v53 = vpop.permute.xlu2 %5005 }
 0x97c   :  { %5222 = vmatpush.msra.mxu2 %v5201_v40  ;;  %5364 = vmatpush.msra.mxu3 %v5351_v44  ;;  %v5298_v58 = vpop.permute.xlu0 %5297  ;;  %v5032_v3 = vpop.permute.xlu1 %5031  ;;  %v5058_v40 = vmul.f32 %v10203_v28, %v10005_v60 }
 0x97d   :  { %v5065_v35 = vmul.f32 %v10203_v28, %v5032_v3  ;;  %4927 = vmatpush.msra.mxu0 %v4912_v9  ;;  %v4408_v56 = vpop.f32.mrf.mxu0  ;;  %v5344_v1 = vmul.f32 %v10139_v6, %v5298_v58  ;;  %v5181_v3 = vld [vmem:[#allocation6 + $0x388] sm:$0xff] }
 0x97e   :  { %5223 = vmatpush.msra.mxu2 %v5200_v7  ;;  %5365 = vmatpush.msra.mxu3 %v5350_v38  ;;  %v5057_v38 = vmul.f32 %v10203_v28, %v10063_v2  ;;  %v5055_v2 = vmul.f32 %v10203_v28, %v10080_v5  ;;  %v5182_v5 = vld [vmem:[#allocation6 + $0x390] sm:$0xff] }
 0x97f   :  { %4540 = vmatmul.f32.gmra.mxu1 %v4464_v49  ;;  %4826 = vmatmul.f32.gmra.mxu3 %v4754_v16  ;;  %v5056_v49 = vmul.f32 %v10203_v28, %v10114_v20 }
 0x980   :  { %4928 = vmatpush.msra.mxu0 %v4911_v17  ;;  %5066 = vmatpush.msra.mxu1 %v5065_v35  ;;  %v4340_v61 = vpop.f32.mrf.mxu3 }
 0x981   :  { %5224 = vmatpush.msra.mxu2 %v5199_v13  ;;  %5366 = vmatpush.msra.mxu3 %v5349_v31  ;;  %v10219_v57 = vadd.f32 %v4405_v55, %v4340_v61  ;;  %v4756_v55 = vld [vmem:[#allocation6 + $0x1f0] sm:$0xff]  ;;  %v5054_v31 = vmul.f32 %v10203_v28, %v10118_v18  ;;  %v4757_v13 = vld [vmem:[#allocation6 + $0x1f8] sm:$0xff]  ;;  %v4370_v18 = vadd.f32 %v9899_v26, %v9982_v22 }
 0x982   :  { %4929 = vmatpush.msra.mxu0 %v4910_v59  ;;  %5067 = vmatpush.msra.mxu1 %v5064_v63  ;;  %v10227_v21 = vpop.f32.mrf.mxu2  ;;  %v4889_v59 = vld [vmem:[#allocation6 + $0x288] sm:$0xff]  ;;  %v4890_v26 = vld [vmem:[#allocation6 + $0x290] sm:$0xff] }
 0x983   :  { %5225 = vmatpush.msra.mxu2 %v5198_v32  ;;  %5367 = vmatpush.msra.mxu3 %v5348_v12  ;;  %v4856_v44 = vpop.permute.xlu2 %4855  ;;  %v5052_v12 = vmul.f32 %v10203_v28, %v10225_v53 }
 0x984   :  { %4930 = vmatpush.msra.mxu0 %v4909_v27  ;;  %5068 = vmatpush.msra.mxu1 %v5063_v8  ;;  %v5148_v24 = vpop.permute.xlu0 %5147  ;;  %v10236_v30 = vpop.permute.xlu1 %5007  ;;  %v4904_v7 = vmul.f32 %v10145_v23, %v4856_v44 }
 0x985   :  { %5226 = vmatpush.msra.mxu2 %v5197_v52  ;;  %5368 = vmatpush.msra.mxu3 %v5347_v15  ;;  %v5196_v45 = vmul.f32 %v10123_v33, %v5148_v24  ;;  %v5180_v33 = vld [vmem:[#allocation6 + $0x380] sm:$0xff]  ;;  %v4411_v58 = vpop.f32.mrf.mxu0  ;;  %v5053_v63 = vmul.f32 %v10203_v28, %v10236_v30 }
 0x986   :  { %4931 = vmatpush.msra.mxu0 %v4908_v14  ;;  %5069 = vmatpush.msra.mxu1 %v5062_v19  ;;  %v5034_v30 = vld [vmem:[#allocation6 + $0x300] sm:$0xff] }
 0x987   :  { %5369 = vmatpush.msra.mxu3 %v5346_v29  ;;  %4543 = vmatmul.f32.gmra.mxu1 %v4465_v39  ;;  %v5326_v39 = vld [vmem:[#allocation6 + $0x400] sm:$0xff]  ;;  %v5183_v29 = vld [vmem:[#allocation6 + $0x398] sm:$0xff] }
 0x988   :  { %4829 = vmatmul.f32.gmra.mxu3 %v4755_v54  ;;  %4932 = vmatpush.msra.mxu0 %v4907_v62  ;;  %v4373_v54 = vadd.f32 %v9935_v11, %v9999_v47 }
 0x989   :  { %5070 = vmatpush.msra.mxu1 %v5061_v50  ;;  %5227 = vmatpush.msra.mxu2 %v5196_v45  ;;  %v4343_v51 = vpop.f32.mrf.mxu3  ;;  %v5035_v50 = vld [vmem:[#allocation6 + $0x308] sm:$0xff] }
 0x98a   :  { %5370 = vmatpush.msra.mxu3 %v5345_v41  ;;  %4933 = vmatpush.msra.mxu0 %v4906_v42  ;;  %v10252_v0 = vadd.f32 %v4408_v56, %v4343_v51  ;;  %v10254_v48 = vpop.f32.mrf.mxu2  ;;  %v5327_v41 = vld [vmem:[#allocation6 + $0x408] sm:$0xff]  ;;  %v4891_v42 = vld [vmem:[#allocation6 + $0x298] sm:$0xff] }
 0x98b   :  { %5071 = vmatpush.msra.mxu1 %v5060_v4  ;;  %v4499_v36 = vpop.f32.mrf.mxu1  ;;  %5228 = vmatmul.f32.vlgmr.msra.gmra.mxu2 %v5180_v33  ;;  %v5002_v8 = vpop.permute.xlu2 %5001  ;;  %v10682_v51 = vld [vmem:[#allocation54_spill] sm:$0xff] }
 0x98c   :  { %5371 = vmatpush.msra.mxu3 %v5344_v1  ;;  %v4858_v10 = vpop.permute.xlu1 %4857  ;;  %v5004_v61 = vpop.permute.xlu0 %5003  ;;  %v4547_v19 = vadd.f32 %v4499_v36, %v4370_v18  ;;  %v5050_v24 = vmul.f32 %v10203_v28, %v5002_v8  ;;  %v10683_v1 = vld [vmem:[#allocation42_spill] sm:$0xff] }
 0x98d   :  { %5072 = vmatpush.msra.mxu1 %v5059_v25  ;;  %v4905_v9 = vmul.f32 %v10145_v23, %v4858_v10  ;;  %v5051_v15 = vmul.f32 %v10203_v28, %v5004_v61  ;;  %v4376_v25 = vadd.f32 %v10683_v1, %v10682_v51  ;;  %v5036_v10 = vld [vmem:[#allocation6 + $0x310] sm:$0xff]  ;;  %v10693_v51 = vld [vmem:[#allocation20_spill] sm:$0xff] }
 0x98e   :  { %v4693_v22 = vadd.f32 %v10227_v21, %v4547_v19  ;;  %v5184_v21 = vld [vmem:[#allocation6 + $0x3a0] sm:$0xff]  ;;  %v4894_v19 = vld [vmem:[#allocation6 + $0x2b0] sm:$0xff] }
 0x98f   :  { %5073 = vmatpush.msra.mxu1 %v5058_v40  ;;  %4934 = vmatpush.msra.mxu0 %v4905_v9  ;;  %v5328_v40 = vld [vmem:[#allocation6 + $0x410] sm:$0xff]  ;;  %v4892_v9 = vld [vmem:[#allocation6 + $0x2a0] sm:$0xff] }
 0x990   :  { %4832 = vmatmul.f32.gmra.mxu3 %v4756_v55 }
 0x991   :  { %5074 = vmatpush.msra.mxu1 %v5057_v38  ;;  %v4346_v60 = vpop.f32.mrf.mxu3  ;;  %4935 = vmatpush.msra.mxu0 %v4904_v7  ;;  %v10684_v7 = vld [vmem:[#allocation13_spill] sm:$0xff] }
 0x992   :  { %4936 = vmatmul.f32.vlgmr.msra.gmra.mxu0 %v4888_v46  ;;  %v10266_v16 = vadd.f32 %v4411_v58, %v4346_v60  ;;  %v10268_v35 = vpop.f32.mrf.mxu2  ;;  %v10685_v46 = vld [vmem:[#allocation14_spill] sm:$0xff] }
 0x993   :  { %5075 = vmatpush.msra.mxu1 %v5056_v49  ;;  %v4502_v23 = vpop.f32.mrf.mxu1  ;;  %5231 = vmatmul.f32.gmra.mxu2 %v5181_v3  ;;  %v4379_v58 = vadd.f32 %v10685_v46, %v10684_v7  ;;  %v5189_v7 = vld [vmem:[#allocation6 + $0x3c8] sm:$0xff] }
 0x994   :  { %v5296_v17 = vpop.permute.xlu1 %5295 }
 0x995   :  { %5076 = vmatpush.msra.mxu1 %v5055_v2  ;;  %v5343_v20 = vmul.f32 %v10139_v6, %v5296_v17  ;;  %v5329_v17 = vld [vmem:[#allocation6 + $0x418] sm:$0xff] }
 0x997   :  { %5077 = vmatpush.msra.mxu1 %v5054_v31  ;;  %5372 = vmatpush.msra.mxu3 %v5343_v20  ;;  %v4893_v31 = vld [vmem:[#allocation6 + $0x2a8] sm:$0xff] }
 0x998   :  { %4835 = vmatmul.f32.gmra.mxu3 %v4757_v13 }
 0x999   :  { %5078 = vmatpush.msra.mxu1 %v5053_v63  ;;  %v10279_v32 = vpop.f32.mrf.mxu3  ;;  %v10686_v63 = vld [vmem:[#allocation11_spill] sm:$0xff] }
 0x99a   :  { %4939 = vmatmul.f32.gmra.mxu0 %v4889_v59  ;;  %v4654_v27 = vpop.f32.mrf.mxu2  ;;  %v10687_v59 = vld [vmem:[#allocation51_spill] sm:$0xff] }
 0x99b   :  { %5079 = vmatpush.msra.mxu1 %v5052_v12  ;;  %v4505_v52 = vpop.f32.mrf.mxu1  ;;  %5234 = vmatmul.f32.gmra.mxu2 %v5182_v5  ;;  %v4382_v61 = vadd.f32 %v10687_v59, %v10686_v63  ;;  %v5333_v63 = vld [vmem:[#allocation6 + $0x438] sm:$0xff] }
 0x99c   :  { %v5294_v14 = vpop.permute.xlu1 %5293  ;;  %v4549_v44 = vadd.f32 %v4505_v52, %v4376_v25  ;;  %v5330_v52 = vld [vmem:[#allocation6 + $0x420] sm:$0xff] }
 0x99d   :  { %5080 = vmatpush.msra.mxu1 %v5051_v15  ;;  %v5342_v53 = vmul.f32 %v10139_v6, %v5294_v14  ;;  %v4548_v6 = vadd.f32 %v4502_v23, %v4373_v54  ;;  %v5037_v23 = vld [vmem:[#allocation6 + $0x318] sm:$0xff]  ;;  %v5038_v15 = vld [vmem:[#allocation6 + $0x320] sm:$0xff]  ;;  %v5039_v54 = vld [vmem:[#allocation6 + $0x328] sm:$0xff] }
 0x99e   :  { %v4695_v55 = vadd.f32 %v10268_v35, %v4549_v44  ;;  %v5186_v35 = vld [vmem:[#allocation6 + $0x3b0] sm:$0xff] }
 0x99f   :  { %5081 = vmatpush.msra.mxu1 %v5050_v24  ;;  %5373 = vmatpush.msra.mxu3 %v5342_v53  ;;  %v4694_v33 = vadd.f32 %v10254_v48, %v4548_v6  ;;  %v5185_v48 = vld [vmem:[#allocation6 + $0x3a8] sm:$0xff]  ;;  %v10688_v53 = vld [vmem:[#allocation25_spill] sm:$0xff]  ;;  %v4895_v6 = vld [vmem:[#allocation6 + $0x2b8] sm:$0xff] }
 0x9a0   :  { %5082 = vmatmul.f32.vlgmr.msra.gmra.mxu1 %v5034_v30  ;;  %5374 = vmatmul.f32.vlgmr.msra.gmra.mxu3 %v5326_v39  ;;  %v10689_v30 = vld [vmem:[#allocation28_spill] sm:$0xff] }
 0x9a1   :  { %v4791_v45 = vpop.f32.mrf.mxu3  ;;  %v4385_v39 = vadd.f32 %v10689_v30, %v10688_v53  ;;  %v4898_v53 = vld [vmem:[#allocation6 + $0x2d0] sm:$0xff]  ;;  %v5191_v30 = vld [vmem:[#allocation6 + $0x3d8] sm:$0xff] }
 0x9a2   :  { %v10289_v56 = vadd.f32 %v4791_v45, %v4693_v22  ;;  %4942 = vmatmul.f32.gmra.mxu0 %v4890_v26  ;;  %v4657_v28 = vpop.f32.mrf.mxu2 }
 0x9a3   :  { %v4508_v62 = vpop.f32.mrf.mxu1  ;;  %5237 = vmatmul.f32.gmra.mxu2 %v5183_v29 }
 0x9a4   :  { %v4550_v2 = vadd.f32 %v4508_v62, %v4379_v58  ;;  %v5331_v62 = vld [vmem:[#allocation6 + $0x428] sm:$0xff]  ;;  %v10694_v58 = vld [vmem:[#allocation39_spill] sm:$0xff] }
 0x9a6   :  { %v4696_v20 = vadd.f32 %v4654_v27, %v4550_v2  ;;  %v5187_v27 = vld [vmem:[#allocation6 + $0x3b8] sm:$0xff] }
 0x9a8   :  { %5085 = vmatmul.f32.gmra.mxu1 %v5035_v50  ;;  %5377 = vmatmul.f32.gmra.mxu3 %v5327_v41 }
 0x9a9   :  { %v4794_v4 = vpop.f32.mrf.mxu3 }
 0x9aa   :  { %v10294_v11 = vadd.f32 %v4794_v4, %v4694_v33  ;;  %4945 = vmatmul.f32.gmra.mxu0 %v4891_v42  ;;  %v4660_v47 = vpop.f32.mrf.mxu2  ;;  %v10690_v42 = vld [vmem:[#allocation19_spill] sm:$0xff]  ;;  %v10691_v33 = vld [vmem:[#allocation10_spill] sm:$0xff] }
 0x9ab   :  { %v4511_v36 = vpop.f32.mrf.mxu1  ;;  %5240 = vmatmul.f32.gmra.mxu2 %v5184_v21  ;;  %v4388_v21 = vadd.f32 %v10691_v33, %v10690_v42  ;;  %v10692_v4 = vld [vmem:[#allocation27_spill] sm:$0xff] }
 0x9ac   :  { %v4551_v8 = vadd.f32 %v4511_v36, %v4382_v61  ;;  %v4394_v1 = vadd.f32 %v10693_v51, %v10692_v4  ;;  %v5336_v4 = vld [vmem:[#allocation6 + $0x450] sm:$0xff] }
 0x9ae   :  { %v4697_v14 = vadd.f32 %v4657_v28, %v4551_v8  ;;  %v5188_v28 = vld [vmem:[#allocation6 + $0x3c0] sm:$0xff] }
 0x9b0   :  { %5088 = vmatmul.f32.gmra.mxu1 %v5036_v10  ;;  %5380 = vmatmul.f32.gmra.mxu3 %v5328_v40 }
 0x9b1   :  { %v4797_v38 = vpop.f32.mrf.mxu3 }
 0x9b2   :  { %v10299_v3 = vadd.f32 %v4797_v38, %v4695_v55  ;;  %4948 = vmatmul.f32.gmra.mxu0 %v4892_v9  ;;  %v4663_v49 = vpop.f32.mrf.mxu2  ;;  %v5040_v9 = vld [vmem:[#allocation6 + $0x330] sm:$0xff] }
 0x9b3   :  { %v4514_v60 = vpop.f32.mrf.mxu1  ;;  %5243 = vmatmul.f32.gmra.mxu2 %v5185_v48  ;;  %v4896_v48 = vld [vmem:[#allocation6 + $0x2c0] sm:$0xff] }
 0x9b4   :  { %v4552_v45 = vadd.f32 %v4514_v60, %v4385_v39  ;;  %v10695_v60 = vld [vmem:[#allocation46_spill] sm:$0xff] }
 0x9b5   :  { %v4391_v2 = vadd.f32 %v10695_v60, %v10694_v58 }
 0x9b6   :  { %v4698_v50 = vadd.f32 %v4660_v47, %v4552_v45  ;;  %v5332_v47 = vld [vmem:[#allocation6 + $0x430] sm:$0xff]  ;;  %v5043_v45 = vld [vmem:[#allocation6 + $0x348] sm:$0xff] }
 0x9b8   :  { %5091 = vmatmul.f32.gmra.mxu1 %v5037_v23  ;;  %5383 = vmatmul.f32.gmra.mxu3 %v5329_v17 }
 0x9b9   :  { %v4800_v13 = vpop.f32.mrf.mxu3 }
 0x9ba   :  { %v10303_v5 = vadd.f32 %v4800_v13, %v4696_v20  ;;  %4951 = vmatmul.f32.gmra.mxu0 %v4893_v31  ;;  %v4666_v12 = vpop.f32.mrf.mxu2  ;;  %v5041_v13 = vld [vmem:[#allocation6 + $0x338] sm:$0xff] }
 0x9bb   :  { %v4517_v18 = vpop.f32.mrf.mxu1  ;;  %5246 = vmatmul.f32.gmra.mxu2 %v5186_v35 }
 0x9bc   :  { %v4553_v10 = vadd.f32 %v4517_v18, %v4388_v21  ;;  %v5190_v18 = vld [vmem:[#allocation6 + $0x3d0] sm:$0xff] }
 0x9bd   :  { %v5044_v21 = vld [vmem:[#allocation6 + $0x350] sm:$0xff] }
 0x9be   :  { %v4699_v38 = vadd.f32 %v4663_v49, %v4553_v10  ;;  %v4897_v49 = vld [vmem:[#allocation6 + $0x2c8] sm:$0xff] }
 0x9c0   :  { %5094 = vmatmul.f32.gmra.mxu1 %v5038_v15  ;;  %5386 = vmatmul.f32.gmra.mxu3 %v5330_v52 }
 0x9c1   :  { %v4803_v24 = vpop.f32.mrf.mxu3 }
 0x9c2   :  { %v10307_v26 = vadd.f32 %v4803_v24, %v4697_v14  ;;  %4954 = vmatmul.f32.gmra.mxu0 %v4894_v19  ;;  %v4669_v22 = vpop.f32.mrf.mxu2  ;;  %v5334_v24 = vld [vmem:[#allocation6 + $0x440] sm:$0xff] }
 0x9c3   :  { %v4520_v29 = vpop.f32.mrf.mxu1  ;;  %5249 = vmatmul.f32.gmra.mxu2 %v5187_v27  ;;  %v5042_v27 = vld [vmem:[#allocation6 + $0x340] sm:$0xff] }
 0x9c4   :  { %v4554_v20 = vadd.f32 %v4520_v29, %v4391_v2 }
 0x9c6   :  { %v4700_v61 = vadd.f32 %v4666_v12, %v4554_v20 }
 0x9c8   :  { %5097 = vmatmul.f32.gmra.mxu1 %v5039_v54  ;;  %5389 = vmatmul.f32.gmra.mxu3 %v5331_v62  ;;  %v5335_v54 = vld [vmem:[#allocation6 + $0x448] sm:$0xff] }
 0x9c9   :  { %v4806_v41 = vpop.f32.mrf.mxu3 }
 0x9ca   :  { %v10313_v25 = vadd.f32 %v4806_v41, %v4698_v50  ;;  %4957 = vmatmul.f32.gmra.mxu0 %v4895_v6  ;;  %v4672_v36 = vpop.f32.mrf.mxu2  ;;  %v4899_v6 = vld [vmem:[#allocation6 + $0x2d8] sm:$0xff]  ;;  %v5192_v50 = vld [vmem:[#allocation6 + $0x3e0] sm:$0xff] }
 0x9cb   :  { %v4523_v44 = vpop.f32.mrf.mxu1  ;;  %5252 = vmatmul.f32.gmra.mxu2 %v5188_v28 }
 0x9cc   :  { %v4555_v40 = vadd.f32 %v4523_v44, %v4394_v1 }
 0x9ce   :  { %v4701_v55 = vadd.f32 %v4669_v22, %v4555_v40 }
 0x9d0   :  { %5100 = vmatmul.f32.gmra.mxu1 %v5040_v9  ;;  %5392 = vmatmul.f32.gmra.mxu3 %v5332_v47  ;;  %v5045_v47 = vld [vmem:[#allocation6 + $0x358] sm:$0xff] }
 0x9d1   :  { %v4809_v46 = vpop.f32.mrf.mxu3 }
 0x9d2   :  { %v10317_v23 = vadd.f32 %v4809_v46, %v4699_v38  ;;  %4960 = vmatmul.f32.gmra.mxu0 %v4896_v48  ;;  %v4675_v17 = vpop.f32.mrf.mxu2  ;;  %v5194_v38 = vld [vmem:[#allocation6 + $0x3f0] sm:$0xff] }
 0x9d3   :  { %v4526_v31 = vpop.f32.mrf.mxu1  ;;  %5255 = vmatmul.f32.gmra.mxu2 %v5189_v7 }
 0x9d4   :  { %v4556_v35 = vadd.f32 %v4526_v31, %v10132_v37  ;;  %v5338_v31 = vld [vmem:[#allocation6 + $0x460] sm:$0xff] }
 0x9d6   :  { %v4702_v59 = vadd.f32 %v4672_v36, %v4556_v35  ;;  %v5193_v36 = vld [vmem:[#allocation6 + $0x3e8] sm:$0xff]  ;;  %v4414_v35 = vpop.f32.mrf.mxu0 }
 0x9d8   :  { %5103 = vmatmul.f32.gmra.mxu1 %v5041_v13  ;;  %5395 = vmatmul.f32.gmra.mxu3 %v5333_v63  ;;  %v5195_v13 = vld [vmem:[#allocation6 + $0x3f8] sm:$0xff] }
 0x9d9   :  { %v4812_v8 = vpop.f32.mrf.mxu3 }
 0x9da   :  { %v10320_v15 = vadd.f32 %v4812_v8, %v4700_v61  ;;  %4963 = vmatmul.f32.gmra.mxu0 %v4897_v49  ;;  %v4678_v14 = vpop.f32.mrf.mxu2 }
 0x9db   :  { %v4529_v52 = vpop.f32.mrf.mxu1  ;;  %5258 = vmatmul.f32.gmra.mxu2 %v5190_v18 }
 0x9dc   :  { %v4557_v19 = vadd.f32 %v4529_v52, %v10162_v34  ;;  %v5047_v52 = vld [vmem:[#allocation6 + $0x368] sm:$0xff] }
 0x9de   :  { %v4703_v37 = vadd.f32 %v4675_v17, %v4557_v19  ;;  %v5046_v17 = vld [vmem:[#allocation6 + $0x360] sm:$0xff] }
 0x9e0   :  { %5106 = vmatmul.f32.gmra.mxu1 %v5042_v27  ;;  %5398 = vmatmul.f32.gmra.mxu3 %v5334_v24 }
 0x9e1   :  { %v4815_v12 = vpop.f32.mrf.mxu3 }
 0x9e2   :  { %v10323_v39 = vadd.f32 %v4815_v12, %v4701_v55  ;;  %4966 = vmatmul.f32.gmra.mxu0 %v4898_v53  ;;  %v4681_v34 = vpop.f32.mrf.mxu2  ;;  %v5337_v55 = vld [vmem:[#allocation6 + $0x458] sm:$0xff]  ;;  %v5340_v53 = vld [vmem:[#allocation6 + $0x470] sm:$0xff] }
 0x9e3   :  { %v4532_v22 = vpop.f32.mrf.mxu1  ;;  %5261 = vmatmul.f32.gmra.mxu2 %v5191_v30 }
 0x9e4   :  { %v4558_v29 = vadd.f32 %v4532_v22, %v10188_v43  ;;  %v4900_v43 = vld [vmem:[#allocation6 + $0x2e0] sm:$0xff] }
 0x9e6   :  { %v4704_v62 = vadd.f32 %v4678_v14, %v4558_v29  ;;  %v4903_v14 = vld [vmem:[#allocation6 + $0x2f8] sm:$0xff] }
 0x9e8   :  { %5109 = vmatmul.f32.gmra.mxu1 %v5043_v45  ;;  %5401 = vmatmul.f32.gmra.mxu3 %v5335_v54  ;;  %v5049_v45 = vld [vmem:[#allocation6 + $0x378] sm:$0xff] }
 0x9e9   :  { %v4818_v28 = vpop.f32.mrf.mxu3  ;;  %v5341_v54 = vld [vmem:[#allocation6 + $0x478] sm:$0xff] }
 0x9ea   :  { %v10326_v41 = vadd.f32 %v4818_v28, %v4702_v59  ;;  %4969 = vmatmul.f32.gmra.mxu0 %v4899_v6  ;;  %v4415_v59 = vadd.f32 %v4414_v35, %v10279_v32 }
 0x9eb   :  { %v4535_v42 = vpop.f32.mrf.mxu1  ;;  %5264 = vmatmul.f32.gmra.mxu2 %v5192_v50  ;;  %v4684_v1 = vpop.f32.mrf.mxu2 }
 0x9ec   :  { %v4559_v33 = vadd.f32 %v4535_v42, %v10219_v57  ;;  %v4901_v57 = vld [vmem:[#allocation6 + $0x2e8] sm:$0xff] }
 0x9ee   :  { %v4705_v51 = vadd.f32 %v4681_v34, %v4559_v33 }
 0x9f0   :  { %5112 = vmatmul.f32.gmra.mxu1 %v5044_v21  ;;  %5404 = vmatmul.f32.gmra.mxu3 %v5336_v4 }
 0x9f1   :  { %v4821_v44 = vpop.f32.mrf.mxu3 }
 0x9f2   :  { %v10329_v10 = vadd.f32 %v4821_v44, %v4703_v37  ;;  %4972 = vmatmul.f32.gmra.mxu0 %v4900_v43  ;;  %v5048_v37 = vld [vmem:[#allocation6 + $0x370] sm:$0xff] }
 0x9f3   :  { %v4538_v40 = vpop.f32.mrf.mxu1  ;;  %5267 = vmatmul.f32.gmra.mxu2 %v5193_v36  ;;  %v4687_v46 = vpop.f32.mrf.mxu2 }
 0x9f4   :  { %v4560_v9 = vadd.f32 %v4538_v40, %v10252_v0  ;;  %v4902_v0 = vld [vmem:[#allocation6 + $0x2f0] sm:$0xff] }
 0x9f6   :  { %v4706_v48 = vadd.f32 %v4684_v1, %v4560_v9 }
 0x9f8   :  { %5115 = vmatmul.f32.gmra.mxu1 %v5045_v47  ;;  %5407 = vmatmul.f32.gmra.mxu3 %v5337_v55 }
 0x9fa   :  { %v4824_v7 = vpop.f32.mrf.mxu3  ;;  %4975 = vmatmul.f32.gmra.mxu0 %v4901_v57 }
 0x9fb   :  { %v10332_v58 = vadd.f32 %v4824_v7, %v4704_v62  ;;  %5270 = vmatmul.f32.gmra.mxu2 %v5194_v38 }
 0x9fc   :  { %v4541_v60 = vpop.f32.mrf.mxu1  ;;  %v4690_v18 = vpop.f32.mrf.mxu2 }
 0x9fd   :  { %v4561_v2 = vadd.f32 %v4541_v60, %v10266_v16  ;;  %v5339_v16 = vld [vmem:[#allocation6 + $0x468] sm:$0xff] }
 0x9ff   :  { %v4707_v20 = vadd.f32 %v4687_v46, %v4561_v2 }
 0xa00   :  { %5118 = vmatmul.f32.gmra.mxu1 %v5046_v17  ;;  %5410 = vmatmul.f32.gmra.mxu3 %v5338_v31 }
 0xa02   :  { %v4827_v63 = vpop.f32.mrf.mxu3  ;;  %4978 = vmatmul.f32.gmra.mxu0 %v4902_v0 }
 0xa03   :  { %v10336_v49 = vadd.f32 %v4827_v63, %v4705_v51  ;;  %5273 = vmatmul.f32.gmra.mxu2 %v5195_v13 }
 0xa04   :  { %v4544_v61 = vpop.f32.mrf.mxu1 }
 0xa05   :  { %v4562_v8 = vadd.f32 %v4544_v61, %v4415_v59 }
 0xa07   :  { %v4708_v19 = vadd.f32 %v4690_v18, %v4562_v8 }
 0xa08   :  { %5121 = vmatmul.f32.gmra.mxu1 %v5047_v52  ;;  %5413 = vmatmul.f32.gmra.mxu3 %v5339_v16 }
 0xa0a   :  { %4981 = vmatmul.f32.gmra.mxu0 %v4903_v14 }
 0xa0b   :  { %v4830_v27 = vpop.f32.mrf.mxu3 }
 0xa0c   :  { %v10338_v24 = vadd.f32 %v4830_v27, %v4706_v48 }
 0xa0e   :  { %v5229_v30 = vpop.f32.mrf.mxu2 }
 0xa0f   :  { %v4937_v32 = vpop.f32.mrf.mxu0 }
 0xa10   :  { %5124 = vmatmul.f32.gmra.mxu1 %v5048_v37  ;;  %v4985_v12 = vadd.f32 %v4937_v32, %v10289_v56  ;;  %5416 = vmatmul.f32.gmra.mxu3 %v5340_v53 }
 0xa13   :  { %v4833_v22 = vpop.f32.mrf.mxu3 }
 0xa14   :  { %v10341_v29 = vadd.f32 %v4833_v22, %v4707_v20 }
 0xa16   :  { %v5232_v62 = vpop.f32.mrf.mxu2 }
 0xa17   :  { %v4940_v34 = vpop.f32.mrf.mxu0 }
 0xa18   :  { %5127 = vmatmul.f32.gmra.mxu1 %v5049_v45  ;;  %v4986_v6 = vadd.f32 %v4940_v34, %v10294_v11  ;;  %5419 = vmatmul.f32.gmra.mxu3 %v5341_v54 }
 0xa1b   :  { %v4836_v50 = vpop.f32.mrf.mxu3 }
 0xa1c   :  { %v10344_v28 = vadd.f32 %v4836_v50, %v4708_v19 }
 0xa1d   :  { %v5083_v42 = vpop.f32.mrf.mxu1 }
 0xa1e   :  { %v5131_v33 = vadd.f32 %v5083_v42, %v4985_v12  ;;  %v5235_v21 = vpop.f32.mrf.mxu2 }
 0xa1f   :  { %v4943_v4 = vpop.f32.mrf.mxu0 }
 0xa20   :  { %v5277_v56 = vadd.f32 %v5229_v30, %v5131_v33  ;;  %v4987_v51 = vadd.f32 %v4943_v4, %v10299_v3 }
 0xa23   :  { %v5375_v43 = vpop.f32.mrf.mxu3 }
 0xa24   :  { %v10347_v1 = vadd.f32 %v5375_v43, %v5277_v56 }
 0xa25   :  { %v5086_v36 = vpop.f32.mrf.mxu1 }
 0xa26   :  { %v5132_v44 = vadd.f32 %v5086_v36, %v4986_v6  ;;  %v5238_v40 = vpop.f32.mrf.mxu2 }
 0xa27   :  { %v4946_v9 = vpop.f32.mrf.mxu0 }
 0xa28   :  { %v5278_v47 = vadd.f32 %v5232_v62, %v5132_v44  ;;  %v4988_v11 = vadd.f32 %v4946_v9, %v10303_v5 }
 0xa2b   :  { %v5378_v55 = vpop.f32.mrf.mxu3 }
 0xa2c   :  { %v10350_v48 = vadd.f32 %v5378_v55, %v5278_v47 }
 0xa2d   :  { %v5089_v57 = vpop.f32.mrf.mxu1 }
 0xa2e   :  { %v5133_v38 = vadd.f32 %v5089_v57, %v4987_v51  ;;  %v5241_v7 = vpop.f32.mrf.mxu2 }
 0xa2f   :  { %v4949_v46 = vpop.f32.mrf.mxu0 }
 0xa30   :  { %v5279_v60 = vadd.f32 %v5235_v21, %v5133_v38  ;;  %v4989_v3 = vadd.f32 %v4949_v46, %v10307_v26 }
 0xa33   :  { %v5381_v2 = vpop.f32.mrf.mxu3 }
 0xa34   :  { %v10353_v17 = vadd.f32 %v5381_v2, %v5279_v60 }
 0xa35   :  { %v5092_v31 = vpop.f32.mrf.mxu1 }
 0xa36   :  { %v5134_v20 = vadd.f32 %v5092_v31, %v4988_v11  ;;  %v5244_v0 = vpop.f32.mrf.mxu2 }
 0xa37   :  { %v4952_v35 = vpop.f32.mrf.mxu0 }
 0xa38   :  { %v5280_v13 = vadd.f32 %v5238_v40, %v5134_v20  ;;  %v4990_v5 = vadd.f32 %v4952_v35, %v10313_v25 }
 0xa3b   :  { %v5384_v63 = vpop.f32.mrf.mxu3 }
 0xa3c   :  { %v10356_v59 = vadd.f32 %v5384_v63, %v5280_v13 }
 0xa3d   :  { %v5095_v61 = vpop.f32.mrf.mxu1 }
 0xa3e   :  { %v5135_v18 = vadd.f32 %v5095_v61, %v4989_v3  ;;  %v5247_v8 = vpop.f32.mrf.mxu2  ;;  %v5533_v61 = vpop.permute.xlu0 %5532 }
 0xa3f   :  { %v4955_v52 = vpop.f32.mrf.mxu0 }
 0xa40   :  { %v5281_v16 = vadd.f32 %v5241_v7, %v5135_v18  ;;  %v4991_v26 = vadd.f32 %v4955_v52, %v10317_v23  ;;  %v5528_v52 = vpop.permute.xlu1 %5527 }
 0xa43   :  { %v5387_v19 = vpop.f32.mrf.mxu3 }
 0xa44   :  { %v10359_v14 = vadd.f32 %v5387_v19, %v5281_v16  ;;  %v5523_v19 = vpop.permute.xlu2 %5522 }
 0xa45   :  { %v5098_v27 = vpop.f32.mrf.mxu1 }
 0xa46   :  { %v5136_v37 = vadd.f32 %v5098_v27, %v4990_v5  ;;  %v5250_v30 = vpop.f32.mrf.mxu2  ;;  %v5518_v27 = vpop.permute.xlu0 %5517 }
 0xa47   :  { %v4958_v53 = vpop.f32.mrf.mxu0 }
 0xa48   :  { %v5282_v32 = vadd.f32 %v5244_v0, %v5136_v37  ;;  %v4992_v25 = vadd.f32 %v4958_v53, %v10320_v15 }
 0xa4b   :  { %v5390_v12 = vpop.f32.mrf.mxu3 }
 0xa4c   :  { %v10362_v22 = vadd.f32 %v5390_v12, %v5282_v32 }
 0xa4d   :  { %v5101_v45 = vpop.f32.mrf.mxu1 }
 0xa4e   :  { %v5137_v54 = vadd.f32 %v5101_v45, %v4991_v26  ;;  %v5253_v23 = vpop.f32.mrf.mxu2 }
 0xa4f   :  { %v4961_v62 = vpop.f32.mrf.mxu0 }
 0xa50   :  { %v5283_v34 = vadd.f32 %v5247_v8, %v5137_v54  ;;  %v4993_v6 = vadd.f32 %v4961_v62, %v10323_v39 }
 0xa53   :  { %v5393_v50 = vpop.f32.mrf.mxu3 }
 0xa54   :  { %v10365_v42 = vadd.f32 %v5393_v50, %v5283_v34 }
 0xa55   :  { %v5104_v33 = vpop.f32.mrf.mxu1 }
 0xa56   :  { %v5138_v21 = vadd.f32 %v5104_v33, %v4992_v25  ;;  %v10367_v43 = vpop.f32.mrf.mxu2 }
 0xa57   :  { %v4964_v4 = vpop.f32.mrf.mxu0 }
 0xa58   :  { %v5284_v56 = vadd.f32 %v5250_v30, %v5138_v21 }
 0xa5b   :  { %v5396_v51 = vpop.f32.mrf.mxu3 }
 0xa5c   :  { %v10369_v15 = vadd.f32 %v5396_v51, %v5284_v56  ;;  %v5508_v56 = vpop.permute.xlu2 %5507 }
 0xa5d   :  { %v5107_v36 = vpop.f32.mrf.mxu1 }
 0xa5e   :  { %v5139_v44 = vadd.f32 %v5107_v36, %v4993_v6  ;;  %v5259_v55 = vpop.f32.mrf.mxu2  ;;  %v5513_v6 = vpop.permute.xlu1 %5512 }
 0xa5f   :  { %v4967_v40 = vpop.f32.mrf.mxu0 }
 0xa60   :  { %v5285_v9 = vadd.f32 %v5253_v23, %v5139_v44 }
 0xa63   :  { %v5399_v47 = vpop.f32.mrf.mxu3 }
 0xa64   :  { %v10371_v11 = vadd.f32 %v5399_v47, %v5285_v9  ;;  %v4994_v9 = vadd.f32 %v4964_v4, %v10326_v41  ;;  %v5493_v4 = vpop.permute.xlu2 %5492 }
 0xa65   :  { %v5110_v39 = vpop.f32.mrf.mxu1 }
 0xa66   :  { %v5262_v46 = vpop.f32.mrf.mxu2 }
 0xa67   :  { %v4970_v57 = vpop.f32.mrf.mxu0 }
 0xa68   :  { %v4996_v50 = vadd.f32 %v4970_v57, %v10332_v58 }
 0xa6b   :  { %v10373_v38 = vpop.f32.mrf.mxu3 }
 0xa6d   :  { %v5113_v7 = vpop.f32.mrf.mxu1 }
 0xa6e   :  { %v5265_v31 = vpop.f32.mrf.mxu2 }
 0xa6f   :  { %v4973_v60 = vpop.f32.mrf.mxu0 }
 0xa70   :  { %v4997_v54 = vadd.f32 %v4973_v60, %v10336_v49 }
 0xa73   :  { %v5405_v3 = vpop.f32.mrf.mxu3 }
 0xa75   :  { %v5116_v2 = vpop.f32.mrf.mxu1 }
 0xa76   :  { %v5268_v5 = vpop.f32.mrf.mxu2  ;;  %v5142_v51 = vadd.f32 %v5116_v2, %v4996_v50  ;;  %v5498_v2 = vpop.permute.xlu1 %5497 }
 0xa77   :  { %v4976_v0 = vpop.f32.mrf.mxu0 }
 0xa78   :  { %v4998_v32 = vadd.f32 %v4976_v0, %v10338_v24 }
 0xa7b   :  { %v5408_v20 = vpop.f32.mrf.mxu3 }
 0xa7d   :  { %v5119_v35 = vpop.f32.mrf.mxu1 }
 0xa7e   :  { %v5271_v26 = vpop.f32.mrf.mxu2  ;;  %v5143_v33 = vadd.f32 %v5119_v35, %v4997_v54 }
 0xa7f   :  { %v4979_v18 = vpop.f32.mrf.mxu0 }
 0xa80   :  { %v4999_v53 = vadd.f32 %v4979_v18, %v10341_v29  ;;  %v4995_v29 = vadd.f32 %v4967_v40, %v10329_v10  ;;  %v5289_v60 = vadd.f32 %v5265_v31, %v5143_v33  ;;  %v5140_v18 = vadd.f32 %v5110_v39, %v4994_v9 }
 0xa82   :  { %v5141_v49 = vadd.f32 %v5113_v7, %v4995_v29 }
 0xa83   :  { %v5411_v13 = vpop.f32.mrf.mxu3 }
 0xa84   :  { %v5435_v58 = vadd.f32 %v5411_v13, %v5289_v60 }
 0xa85   :  { %v5122_v63 = vpop.f32.mrf.mxu1 }
 0xa86   :  { %v5144_v62 = vadd.f32 %v5122_v63, %v4998_v32  ;;  %v5274_v23 = vpop.f32.mrf.mxu2 }
 0xa87   :  { %v4982_v37 = vpop.f32.mrf.mxu0 }
 0xa88   :  { %v5000_v25 = vadd.f32 %v4982_v37, %v10344_v28  ;;  %v5290_v36 = vadd.f32 %v5268_v5, %v5144_v62  ;;  %v5503_v28 = vpop.permute.xlu0 %5502  ;;  %v5286_v5 = vadd.f32 %v10367_v43, %v5140_v18 }
 0xa8a   :  { %v5432_v7 = vadd.f32 %v10373_v38, %v5286_v5  ;;  %v5478_v38 = vpop.permute.xlu2 %5477 }
 0xa8b   :  { %v5414_v8 = vpop.f32.mrf.mxu3  ;;  %v5539_v54 = vadd.f32 %v5478_v38, %v10359_v14 }
 0xa8c   :  { %v5436_v0 = vadd.f32 %v5414_v8, %v5290_v36  ;;  %v5543_v8 = vadd.f32 %v5498_v2, %v10371_v11 }
 0xa8d   :  { %v5125_v16 = vpop.f32.mrf.mxu1 }
 0xa8e   :  { %v5145_v12 = vadd.f32 %v5125_v16, %v4999_v53  ;;  %v5288_v16 = vadd.f32 %v5262_v46, %v5142_v51  ;;  %v5548_v10 = vadd.f32 %v5523_v19, %v5436_v0  ;;  %v5559_v32 = vmax.f32 %v5543_v8, 0.0 }
 0xa90   :  { %v5291_v21 = vadd.f32 %v5271_v26, %v5145_v12  ;;  %v5287_v26 = vadd.f32 %v5259_v55, %v5141_v49  ;;  %v5434_v37 = vadd.f32 %v5408_v20, %v5288_v16  ;;  %v5564_v39 = vmax.f32 %v5548_v10, 0.0  ;;  %v5488_v46 = vpop.permute.xlu0 %5487 }
 0xa91   :  { %v5544_v55 = vadd.f32 %v5503_v28, %v5432_v7 }
 0xa92   :  { %v5433_v53 = vadd.f32 %v5405_v3, %v5287_v26  ;;  %v5546_v31 = vadd.f32 %v5513_v6, %v5434_v37  ;;  %v5483_v3 = vpop.permute.xlu1 %5482 }
 0xa93   :  { %v5417_v30 = vpop.f32.mrf.mxu3  ;;  %v5560_v19 = vmax.f32 %v5544_v55, 0.0  ;;  %v5540_v12 = vadd.f32 %v5483_v3, %v10362_v22 }
 0xa94   :  { %v5437_v24 = vadd.f32 %v5417_v30, %v5291_v21  ;;  %v5547_v30 = vadd.f32 %v5518_v27, %v5435_v58  ;;  %v5545_v13 = vadd.f32 %v5508_v56, %v5433_v53  ;;  %v5562_v20 = vmax.f32 %v5546_v31, 0.0 }
 0xa95   :  { %v5128_v45 = vpop.f32.mrf.mxu1  ;;  %v5541_v27 = vadd.f32 %v5488_v46, %v10365_v42  ;;  %v5463_v42 = vpop.permute.xlu2 %5462 }
 0xa96   :  { %v5146_v34 = vadd.f32 %v5128_v45, %v5000_v25  ;;  %v5549_v57 = vadd.f32 %v5528_v52, %v5437_v24  ;;  %v5561_v43 = vmax.f32 %v5545_v13, 0.0  ;;  %v5542_v52 = vadd.f32 %v5493_v4, %v10369_v15 }
 0xa97   :  { %v5557_v11 = vmax.f32 %v5541_v27, 0.0  ;;  %v5536_v50 = vadd.f32 %v5463_v42, %v10350_v48 }
 0xa98   :  { %v5292_v44 = vadd.f32 %v5274_v23, %v5146_v34  ;;  %v5565_v41 = vmax.f32 %v5549_v57, 0.0  ;;  %v5473_v25 = vpop.permute.xlu0 %5472  ;;  %v5558_v45 = vmax.f32 %v5542_v52, 0.0  ;;  %v5556_v34 = vmax.f32 %v5540_v12, 0.0 }
 0xa99   :  { %v5538_v62 = vadd.f32 %v5473_v25, %v10356_v59  ;;  %v5555_v23 = vmax.f32 %v5539_v54, 0.0  ;;  %v5552_v56 = vmax.f32 %v5536_v50, 0.0 }
 0xa9a   :  { %v5468_v15 = vpop.permute.xlu1 %5467 }
 0xa9b   :  { %v5420_v47 = vpop.f32.mrf.mxu3  ;;  %v5537_v6 = vadd.f32 %v5468_v15, %v10353_v17  ;;  %v5554_v33 = vmax.f32 %v5538_v62, 0.0  ;;  %v5567_v17 = vld [vmem:[%s10411_s9] sm:$0xff] }
 0xa9c   :  { %v5438_v63 = vadd.f32 %v5420_v47, %v5292_v44 }
 0xa9d   :  { %v5553_v14 = vmax.f32 %v5537_v6, 0.0 }
 0xa9e   :  { %v5550_v35 = vadd.f32 %v5533_v61, %v5438_v63  ;;  %v5563_v61 = vmax.f32 %v5547_v30, 0.0 }
 0xaa0   :  { %v5566_v40 = vmax.f32 %v5550_v35, 0.0  ;;  %v5458_v22 = vpop.permute.xlu0 %5457  ;;  %v5613_v35 = vld [vmem:[%s10414_s12] sm:$0x3] }
 0xaa1   :  { %v5535_v21 = vadd.f32 %v5458_v22, %v10347_v1 }
 0xaa2   :  { %5574 = vmatpush.msrb.mxu0 %v5566_v40  ;;  %v5572_v29 = vpop.permute.xlu1 %5571 }
 0xaa3   :  { %v5551_v59 = vmax.f32 %v5535_v21, 0.0 }
 0xaa4   :  { %5575 = vmatpush.msrb.mxu0 %v5565_v41 }
 0xaa6   :  { %5576 = vmatpush.msrb.mxu0 %v5564_v39 }
 0xaa8   :  { %5577 = vmatpush.msrb.mxu0 %v5563_v61 }
 0xaaa   :  { %5578 = vmatpush.msrb.mxu0 %v5562_v20 }
 0xaac   :  { %5579 = vmatpush.msrb.mxu0 %v5561_v43 }
 0xaae   :  { %5580 = vmatpush.msrb.mxu0 %v5560_v19 }
 0xab0   :  { %5581 = vmatpush.msrb.mxu0 %v5559_v32 }
 0xab2   :  { %5582 = vmatpush.msrb.mxu0 %v5558_v45 }
 0xab4   :  { %5583 = vmatpush.msrb.mxu0 %v5557_v11 }
 0xab6   :  { %5584 = vmatpush.msrb.mxu0 %v5556_v34 }
 0xab8   :  { %5585 = vmatpush.msrb.mxu0 %v5555_v23 }
 0xaba   :  { %5586 = vmatpush.msrb.mxu0 %v5554_v33 }
 0xabc   :  { %5587 = vmatpush.msrb.mxu0 %v5553_v14 }
 0xabe   :  { %5588 = vmatpush.msrb.mxu0 %v5552_v56 }
 0xac0   :  { %5589 = vmatpush.msrb.mxu0 %v5551_v59 }
 0xac1   :  { %5590 = vmatmul.f32.vlgmr.msrb.gmra.mxu0 %v5567_v17 }
 0xb3e   :  { %v5591_v51 = vpop.f32.mrf.mxu0 }
 0xb3f   :  { %v5592_v48 = vadd.f32 %v5591_v51, %v5572_v29 }
 0xb41   :  { %v5594_v36 = vsub.f32 0.0, %v5592_v48  ;;  %v5615_v58 = vrot.slane %v5592_v48, 1 }
 0xb43   :  { %v5595_v24 = vmul.f32 1.442695, %v5594_v36  ;;  %v5617_v37 = vadd.f32 %v5615_v58, %v5613_v35 }
 0xb45   :  { %5795 = vpow2.f32 %v5595_v24 }
 0xb4b   :  { %v5796_v44 = vpop.eup %5795 }
 0xb4c   :  { %v5597_v1 = vadd.f32 1.0, %v5796_v44 }
 0xb4e   :  { %5797 = vrcp.f32 %v5597_v1  ;;  %v5609_v49 = vand.u32 2147483648, %v5597_v1  ;;  %v5607_v0 = vand.u32 2147483647, %v5597_v1  ;;  %vm5603_vm1 = vweird.f32 %v5597_v1 }
 0xb50   :  { %v5610_v18 = vor.u32 1.1754944e-38, %v5609_v49  ;;  %vm5608_vm3 = vcmp.eq.f32.partialorder %v5607_v0, 8.507059e+37 }
 0xb54   :  { %v5798_v28 = vpop.eup %5797 }
 0xb55   :  { %v5599_v9 = vmul.f32 %v5798_v28, %v5597_v1  ;;  %vm5604_vm0 = vweird.f32 %v5798_v28 }
 0xb56   :  { %vm5605_vm2 = vmor %vm5603_vm1, %vm5604_vm0 }
 0xb57   :  { %v5600_v47 = vsub.f32 1.0, %v5599_v9 }
 0xb59   :  { %v5601_v60 = vmul.f32 %v5798_v28, %v5600_v47 }
 0xb5b   :  { %v5602_v63 = vadd.f32 %v5798_v28, %v5601_v60 }
 0xb5d   :  { %v5606_v16 = vsel %vm5605_vm2, %v5798_v28, %v5602_v63 }
 0xb5e   :  { %v5611_v57 = vsel %vm5608_vm3, %v5610_v18, %v5606_v16 }
 0xb5f   :  { %v5618_v26 = vmul.f32 0.5, %v5611_v57 }
 0xb61   :  { %v5620_v10 = vrot.slane %v5618_v26, 3 }
 0xb63   :  { %v5622_v40 = vsub.f32 %v5617_v37, %v5620_v10  ;;  %v5623_v2 = vadd.f32 %v5620_v10, %v5617_v37 }
 0xb65   :  { %v5625_v5 = vrot.slane %v5622_v40, 7  ;;  %v5628_v53 = vrot.slane %v5623_v2, 5 }
 0xb67   :  { %v5631_v30 = vsel %vm5630_vm4, %v5592_v48, %v5625_v5 }
 0xb68   :  { %v5633_v41 = vsel %vm5632_vm5, %v5631_v30, %v5628_v53 }
 0xb69   :  { %v5635_v4 = vsel %vm5634_vm6, %v5633_v41, 0.0 }
 0xb6a   :  { %5636 = vst [vmem:[%s10415_s13] sm:$0xff] %v5635_v4 }
 0xb6b   :  { %5641 = vsyncpa [#allocation3], 1 }
 0xb6c   :  { %5642 = vsyncpa [#allocation5], 1 }

</bundles_post_ra>
